<compile_context>
chip_gen: v6e
topology: v6e:2x2x1
jax: 0.10.0
libtpu: 0.0.40
codegen_flags: <defaults>
</compile_context>

<pallas_src>
import jax
import jax.numpy as jnp
from jax import lax
from jax.experimental import pallas as pl
from jax.experimental.pallas import tpu as pltpu

KERNEL_SIZE = 7
PAD = 3  # ReplicationPad2d(3) for kernel_size=7


def _spatial_attention_kernel(x_ref, w_ref, o_ref):
    # x_ref: (TB, C, H, W) VMEM   w_ref: (2*7*7,) SMEM   o_ref: (TB, H, W) VMEM
    x = x_ref[...].astype(jnp.float32)            # (TB, C, H, W)
    TB, C, H, W = x.shape

    # Channel reduction (dim=1 in NCHW): running-sum (scaled once by 1/C) + max.
    avg_map = jnp.sum(x, axis=1) * (1.0 / C)      # (TB, H, W)
    max_map = jnp.max(x, axis=1)                  # (TB, H, W)

    # Replication ("edge") pad by PAD on H and W via pure copies / concat.
    def rep_pad(m):
        top, bot = m[:, :1, :], m[:, -1:, :]
        m = jnp.concatenate([top] * PAD + [m] + [bot] * PAD, axis=1)     # (TB, H+6, W)
        left, right = m[:, :, :1], m[:, :, -1:]
        m = jnp.concatenate([left] * PAD + [m] + [right] * PAD, axis=2)  # (TB, H+6, W+6)
        return m

    padded = (rep_pad(avg_map), rep_pad(max_map))  # channel 0 = avg, 1 = max

    # 7x7 conv, 2 -> 1 channels, no bias.  dx (lane) shifts hoisted out of the
    # inner loop; weights are scalar loads from SMEM; 4 independent
    # accumulators give the scheduler ILP across the 4 VALU slots.
    accs = [jnp.zeros((TB, H, W), dtype=jnp.float32) for _ in range(4)]
    for c in range(2):
        pc = padded[c]
        for dx in range(KERNEL_SIZE):
            col = pc[:, :, dx:dx + W]                            # lane slice, 14 total
            for dy in range(KERNEL_SIZE):
                wv = w_ref[c * KERNEL_SIZE * KERNEL_SIZE + dy * KERNEL_SIZE + dx]
                k = (2 * c + dy) % 4
                accs[k] = accs[k] + wv * col[:, dy:dy + H, :]    # cheap sublane slice

    acc = (accs[0] + accs[1]) + (accs[2] + accs[3])
    o_ref[...] = jax.nn.sigmoid(acc).astype(o_ref.dtype)


def spatial_attention(x, weight):
    """x: (N, C, H, W); weight: (1, 2, 7, 7) PyTorch-layout conv weight (no bias)."""
    N, C, H, W = x.shape
    assert weight.shape == (1, 2, KERNEL_SIZE, KERNEL_SIZE)
    w_flat = weight.reshape(-1).astype(jnp.float32)   # (98,) -> SMEM scalar taps

    # Largest batch tile dividing N whose double-buffered input block stays
    # inside a conservative VMEM budget (safe on v5e/v6e/v7x scoped defaults).
    # Note: for very large C (e.g. C*H*W*4 >> budget) a C-reduction grid axis
    # with running sum/max scratch would be the next step (esp. v7x's 64 MiB).
    per_image_bytes = C * H * W * x.dtype.itemsize
    budget_bytes = 8 * 1024 * 1024            # per input buffer (x2 for double-buffer)
    tb_cap = max(1, budget_bytes // max(per_image_bytes, 1))
    TB = 1
    for d in range(1, N + 1):
        if N % d == 0 and d <= tb_cap:
            TB = d

    return pl.pallas_call(
        _spatial_attention_kernel,
        out_shape=jax.ShapeDtypeStruct((N, 1, H, W), x.dtype),
        grid_spec=pltpu.PrefetchScalarGridSpec(
            num_scalar_prefetch=0,
            grid=(N // TB,),
            in_specs=[
                pl.BlockSpec((TB, C, H, W), lambda n: (n, 0, 0, 0)),
                pl.BlockSpec(memory_space=pltpu.MemorySpace.SMEM),
            ],
            # Channel dim squeezed out of the kernel's view of the output.
            out_specs=pl.BlockSpec((TB, None, H, W), lambda n: (n, 0, 0, 0)),
        ),
        compiler_params=pltpu.CompilerParams(
            dimension_semantics=("parallel",),   # batch axis splits across TCs on v7x
        ),
    )(x, w_flat)


def _reference(x, weight):
    # Pure-JAX reference: mean/max over channels, edge pad, 7x7 conv, sigmoid.
    avg = jnp.mean(x, axis=1, keepdims=True)
    mx = jnp.max(x, axis=1, keepdims=True)
    cat = jnp.concatenate([avg, mx], axis=1)                  # (N, 2, H, W)
    padded = jnp.pad(cat, ((0, 0), (0, 0), (PAD, PAD), (PAD, PAD)), mode="edge")
    out = lax.conv_general_dilated(
        padded, weight, window_strides=(1, 1), padding="VALID",
        dimension_numbers=("NCHW", "OIHW", "NCHW"))
    return jax.nn.sigmoid(out)


if __name__ == "__main__":
    key = jax.random.PRNGKey(0)
    k_x, k_w = jax.random.split(key)

    N, C, H, W = 2, 4, 16, 16
    x = jax.random.normal(k_x, (N, C, H, W), dtype=jnp.float32)

    # Deterministic conv weight, shape (out=1, in=2, 7, 7), no bias
    # (matches nn.Conv2d(2, 1, 7, bias=False); kaiming-uniform-ish scale).
    fan_in = 2 * KERNEL_SIZE * KERNEL_SIZE
    bound = (1.0 / fan_in) ** 0.5
    weight = jax.random.uniform(
        k_w, (1, 2, KERNEL_SIZE, KERNEL_SIZE),
        minval=-bound, maxval=bound, dtype=jnp.float32)

    out = spatial_attention(x, weight)
    out = jax.block_until_ready(out)

    ref = jax.block_until_ready(_reference(x, weight))
    assert out.shape == (N, 1, H, W)
    assert jnp.allclose(out, ref, atol=1e-5, rtol=1e-5), "mismatch vs reference"

    print("KERNEL_OK")
</pallas_src>

<mosaic_0001>
module attributes {stable_mosaic.version = 11 : i64} {
  func.func @_spatial_attention_kernel(%arg0: i32, %arg1: memref<2x4x16x16xf32, #tpu.memory_space<vmem>>, %arg2: memref<98xf32, #tpu.memory_space<smem>>, %arg3: memref<2x1x16x16xf32, #tpu.memory_space<vmem>>) attributes {dimension_semantics = [#tpu.dimension_semantics<parallel>], iteration_bounds = array<i64: 1>, scalar_prefetch = 0 : i64, scratch_operands = 0 : i64, tpu.core_type = #tpu.core_type<tc>, window_params = [{transform_indices = @transform_0, window_bounds = array<i64: 2, 4, 16, 16>}, {transform_indices = @transform_1, window_bounds = array<i64: 98>}, {transform_indices = @transform_2, window_bounds = array<i64: 2, 1, 16, 16>}]} {
    %c0 = arith.constant 0 : index
    %c0_0 = arith.constant 0 : index
    %c0_1 = arith.constant 0 : index
    %c0_2 = arith.constant 0 : index
    %0 = vector.load %arg1[%c0, %c0_0, %c0_1, %c0_2] : memref<2x4x16x16xf32, #tpu.memory_space<vmem>>, vector<2x4x16x16xf32>
    %cst = arith.constant dense<0.000000e+00> : vector<2x16x16xf32>
    %1 = vector.multi_reduction <add>, %0, %cst [1] : vector<2x4x16x16xf32> to vector<2x16x16xf32>
    %cst_3 = arith.constant 2.500000e-01 : f32
    %2 = vector.broadcast %cst_3 : f32 to vector<2x16x16xf32>
    %3 = arith.mulf %1, %2 : vector<2x16x16xf32>
    %cst_4 = arith.constant dense<0xFF800000> : vector<2x16x16xf32>
    %4 = vector.multi_reduction <maximumf>, %0, %cst_4 [1] : vector<2x4x16x16xf32> to vector<2x16x16xf32>
    %5 = vector.extract_strided_slice %3 {offsets = [0, 0, 0], sizes = [2, 1, 16], strides = [1, 1, 1]} : vector<2x16x16xf32> to vector<2x1x16xf32>
    %6 = vector.extract_strided_slice %3 {offsets = [0, 15, 0], sizes = [2, 1, 16], strides = [1, 1, 1]} : vector<2x16x16xf32> to vector<2x1x16xf32>
    %7 = tpu.concatenate %5, %5, %5, %3, %6, %6, %6 in 1 : vector<2x1x16xf32>, vector<2x1x16xf32>, vector<2x1x16xf32>, vector<2x16x16xf32>, vector<2x1x16xf32>, vector<2x1x16xf32>, vector<2x1x16xf32> -> vector<2x22x16xf32>
    %8 = vector.extract_strided_slice %7 {offsets = [0, 0, 0], sizes = [2, 22, 1], strides = [1, 1, 1]} : vector<2x22x16xf32> to vector<2x22x1xf32>
    %9 = vector.extract_strided_slice %7 {offsets = [0, 0, 15], sizes = [2, 22, 1], strides = [1, 1, 1]} : vector<2x22x16xf32> to vector<2x22x1xf32>
    %10 = tpu.concatenate %8, %8, %8, %7, %9, %9, %9 in 2 : vector<2x22x1xf32>, vector<2x22x1xf32>, vector<2x22x1xf32>, vector<2x22x16xf32>, vector<2x22x1xf32>, vector<2x22x1xf32>, vector<2x22x1xf32> -> vector<2x22x22xf32>
    %11 = vector.extract_strided_slice %4 {offsets = [0, 0, 0], sizes = [2, 1, 16], strides = [1, 1, 1]} : vector<2x16x16xf32> to vector<2x1x16xf32>
    %12 = vector.extract_strided_slice %4 {offsets = [0, 15, 0], sizes = [2, 1, 16], strides = [1, 1, 1]} : vector<2x16x16xf32> to vector<2x1x16xf32>
    %13 = tpu.concatenate %11, %11, %11, %4, %12, %12, %12 in 1 : vector<2x1x16xf32>, vector<2x1x16xf32>, vector<2x1x16xf32>, vector<2x16x16xf32>, vector<2x1x16xf32>, vector<2x1x16xf32>, vector<2x1x16xf32> -> vector<2x22x16xf32>
    %14 = vector.extract_strided_slice %13 {offsets = [0, 0, 0], sizes = [2, 22, 1], strides = [1, 1, 1]} : vector<2x22x16xf32> to vector<2x22x1xf32>
    %15 = vector.extract_strided_slice %13 {offsets = [0, 0, 15], sizes = [2, 22, 1], strides = [1, 1, 1]} : vector<2x22x16xf32> to vector<2x22x1xf32>
    %16 = tpu.concatenate %14, %14, %14, %13, %15, %15, %15 in 2 : vector<2x22x1xf32>, vector<2x22x1xf32>, vector<2x22x1xf32>, vector<2x22x16xf32>, vector<2x22x1xf32>, vector<2x22x1xf32>, vector<2x22x1xf32> -> vector<2x22x22xf32>
    %cst_5 = arith.constant 0.000000e+00 : f32
    %17 = vector.broadcast %cst_5 : f32 to vector<2x16x16xf32>
    %cst_6 = arith.constant 0.000000e+00 : f32
    %18 = vector.broadcast %cst_6 : f32 to vector<2x16x16xf32>
    %cst_7 = arith.constant 0.000000e+00 : f32
    %19 = vector.broadcast %cst_7 : f32 to vector<2x16x16xf32>
    %cst_8 = arith.constant 0.000000e+00 : f32
    %20 = vector.broadcast %cst_8 : f32 to vector<2x16x16xf32>
    %21 = vector.extract_strided_slice %10 {offsets = [0, 0, 0], sizes = [2, 22, 16], strides = [1, 1, 1]} : vector<2x22x22xf32> to vector<2x22x16xf32>
    %c0_9 = arith.constant 0 : index
    %22 = memref.load %arg2[%c0_9] : memref<98xf32, #tpu.memory_space<smem>>
    %23 = vector.extract_strided_slice %21 {offsets = [0, 0, 0], sizes = [2, 16, 16], strides = [1, 1, 1]} : vector<2x22x16xf32> to vector<2x16x16xf32>
    %24 = vector.broadcast %22 : f32 to vector<2x16x16xf32>
    %25 = arith.mulf %24, %23 : vector<2x16x16xf32>
    %26 = arith.addf %17, %25 : vector<2x16x16xf32>
    %c7 = arith.constant 7 : index
    %27 = memref.load %arg2[%c7] : memref<98xf32, #tpu.memory_space<smem>>
    %28 = vector.extract_strided_slice %21 {offsets = [0, 1, 0], sizes = [2, 16, 16], strides = [1, 1, 1]} : vector<2x22x16xf32> to vector<2x16x16xf32>
    %29 = vector.broadcast %27 : f32 to vector<2x16x16xf32>
    %30 = arith.mulf %29, %28 : vector<2x16x16xf32>
    %31 = arith.addf %18, %30 : vector<2x16x16xf32>
    %c14 = arith.constant 14 : index
    %32 = memref.load %arg2[%c14] : memref<98xf32, #tpu.memory_space<smem>>
    %33 = vector.extract_strided_slice %21 {offsets = [0, 2, 0], sizes = [2, 16, 16], strides = [1, 1, 1]} : vector<2x22x16xf32> to vector<2x16x16xf32>
    %34 = vector.broadcast %32 : f32 to vector<2x16x16xf32>
    %35 = arith.mulf %34, %33 : vector<2x16x16xf32>
    %36 = arith.addf %19, %35 : vector<2x16x16xf32>
    %c21 = arith.constant 21 : index
    %37 = memref.load %arg2[%c21] : memref<98xf32, #tpu.memory_space<smem>>
    %38 = vector.extract_strided_slice %21 {offsets = [0, 3, 0], sizes = [2, 16, 16], strides = [1, 1, 1]} : vector<2x22x16xf32> to vector<2x16x16xf32>
    %39 = vector.broadcast %37 : f32 to vector<2x16x16xf32>
    %40 = arith.mulf %39, %38 : vector<2x16x16xf32>
    %41 = arith.addf %20, %40 : vector<2x16x16xf32>
    %c28 = arith.constant 28 : index
    %42 = memref.load %arg2[%c28] : memref<98xf32, #tpu.memory_space<smem>>
    %43 = vector.extract_strided_slice %21 {offsets = [0, 4, 0], sizes = [2, 16, 16], strides = [1, 1, 1]} : vector<2x22x16xf32> to vector<2x16x16xf32>
    %44 = vector.broadcast %42 : f32 to vector<2x16x16xf32>
    %45 = arith.mulf %44, %43 : vector<2x16x16xf32>
    %46 = arith.addf %26, %45 : vector<2x16x16xf32>
    %c35 = arith.constant 35 : index
    %47 = memref.load %arg2[%c35] : memref<98xf32, #tpu.memory_space<smem>>
    %48 = vector.extract_strided_slice %21 {offsets = [0, 5, 0], sizes = [2, 16, 16], strides = [1, 1, 1]} : vector<2x22x16xf32> to vector<2x16x16xf32>
    %49 = vector.broadcast %47 : f32 to vector<2x16x16xf32>
    %50 = arith.mulf %49, %48 : vector<2x16x16xf32>
    %51 = arith.addf %31, %50 : vector<2x16x16xf32>
    %c42 = arith.constant 42 : index
    %52 = memref.load %arg2[%c42] : memref<98xf32, #tpu.memory_space<smem>>
    %53 = vector.extract_strided_slice %21 {offsets = [0, 6, 0], sizes = [2, 16, 16], strides = [1, 1, 1]} : vector<2x22x16xf32> to vector<2x16x16xf32>
    %54 = vector.broadcast %52 : f32 to vector<2x16x16xf32>
    %55 = arith.mulf %54, %53 : vector<2x16x16xf32>
    %56 = arith.addf %36, %55 : vector<2x16x16xf32>
    %57 = vector.extract_strided_slice %10 {offsets = [0, 0, 1], sizes = [2, 22, 16], strides = [1, 1, 1]} : vector<2x22x22xf32> to vector<2x22x16xf32>
    %c1 = arith.constant 1 : index
    %58 = memref.load %arg2[%c1] : memref<98xf32, #tpu.memory_space<smem>>
    %59 = vector.extract_strided_slice %57 {offsets = [0, 0, 0], sizes = [2, 16, 16], strides = [1, 1, 1]} : vector<2x22x16xf32> to vector<2x16x16xf32>
    %60 = vector.broadcast %58 : f32 to vector<2x16x16xf32>
    %61 = arith.mulf %60, %59 : vector<2x16x16xf32>
    %62 = arith.addf %46, %61 : vector<2x16x16xf32>
    %c8 = arith.constant 8 : index
    %63 = memref.load %arg2[%c8] : memref<98xf32, #tpu.memory_space<smem>>
    %64 = vector.extract_strided_slice %57 {offsets = [0, 1, 0], sizes = [2, 16, 16], strides = [1, 1, 1]} : vector<2x22x16xf32> to vector<2x16x16xf32>
    %65 = vector.broadcast %63 : f32 to vector<2x16x16xf32>
    %66 = arith.mulf %65, %64 : vector<2x16x16xf32>
    %67 = arith.addf %51, %66 : vector<2x16x16xf32>
    %c15 = arith.constant 15 : index
    %68 = memref.load %arg2[%c15] : memref<98xf32, #tpu.memory_space<smem>>
    %69 = vector.extract_strided_slice %57 {offsets = [0, 2, 0], sizes = [2, 16, 16], strides = [1, 1, 1]} : vector<2x22x16xf32> to vector<2x16x16xf32>
    %70 = vector.broadcast %68 : f32 to vector<2x16x16xf32>
    %71 = arith.mulf %70, %69 : vector<2x16x16xf32>
    %72 = arith.addf %56, %71 : vector<2x16x16xf32>
    %c22 = arith.constant 22 : index
    %73 = memref.load %arg2[%c22] : memref<98xf32, #tpu.memory_space<smem>>
    %74 = vector.extract_strided_slice %57 {offsets = [0, 3, 0], sizes = [2, 16, 16], strides = [1, 1, 1]} : vector<2x22x16xf32> to vector<2x16x16xf32>
    %75 = vector.broadcast %73 : f32 to vector<2x16x16xf32>
    %76 = arith.mulf %75, %74 : vector<2x16x16xf32>
    %77 = arith.addf %41, %76 : vector<2x16x16xf32>
    %c29 = arith.constant 29 : index
    %78 = memref.load %arg2[%c29] : memref<98xf32, #tpu.memory_space<smem>>
    %79 = vector.extract_strided_slice %57 {offsets = [0, 4, 0], sizes = [2, 16, 16], strides = [1, 1, 1]} : vector<2x22x16xf32> to vector<2x16x16xf32>
    %80 = vector.broadcast %78 : f32 to vector<2x16x16xf32>
    %81 = arith.mulf %80, %79 : vector<2x16x16xf32>
    %82 = arith.addf %62, %81 : vector<2x16x16xf32>
    %c36 = arith.constant 36 : index
    %83 = memref.load %arg2[%c36] : memref<98xf32, #tpu.memory_space<smem>>
    %84 = vector.extract_strided_slice %57 {offsets = [0, 5, 0], sizes = [2, 16, 16], strides = [1, 1, 1]} : vector<2x22x16xf32> to vector<2x16x16xf32>
    %85 = vector.broadcast %83 : f32 to vector<2x16x16xf32>
    %86 = arith.mulf %85, %84 : vector<2x16x16xf32>
    %87 = arith.addf %67, %86 : vector<2x16x16xf32>
    %c43 = arith.constant 43 : index
    %88 = memref.load %arg2[%c43] : memref<98xf32, #tpu.memory_space<smem>>
    %89 = vector.extract_strided_slice %57 {offsets = [0, 6, 0], sizes = [2, 16, 16], strides = [1, 1, 1]} : vector<2x22x16xf32> to vector<2x16x16xf32>
    %90 = vector.broadcast %88 : f32 to vector<2x16x16xf32>
    %91 = arith.mulf %90, %89 : vector<2x16x16xf32>
    %92 = arith.addf %72, %91 : vector<2x16x16xf32>
    %93 = vector.extract_strided_slice %10 {offsets = [0, 0, 2], sizes = [2, 22, 16], strides = [1, 1, 1]} : vector<2x22x22xf32> to vector<2x22x16xf32>
    %c2 = arith.constant 2 : index
    %94 = memref.load %arg2[%c2] : memref<98xf32, #tpu.memory_space<smem>>
    %95 = vector.extract_strided_slice %93 {offsets = [0, 0, 0], sizes = [2, 16, 16], strides = [1, 1, 1]} : vector<2x22x16xf32> to vector<2x16x16xf32>
    %96 = vector.broadcast %94 : f32 to vector<2x16x16xf32>
    %97 = arith.mulf %96, %95 : vector<2x16x16xf32>
    %98 = arith.addf %82, %97 : vector<2x16x16xf32>
    %c9 = arith.constant 9 : index
    %99 = memref.load %arg2[%c9] : memref<98xf32, #tpu.memory_space<smem>>
    %100 = vector.extract_strided_slice %93 {offsets = [0, 1, 0], sizes = [2, 16, 16], strides = [1, 1, 1]} : vector<2x22x16xf32> to vector<2x16x16xf32>
    %101 = vector.broadcast %99 : f32 to vector<2x16x16xf32>
    %102 = arith.mulf %101, %100 : vector<2x16x16xf32>
    %103 = arith.addf %87, %102 : vector<2x16x16xf32>
    %c16 = arith.constant 16 : index
    %104 = memref.load %arg2[%c16] : memref<98xf32, #tpu.memory_space<smem>>
    %105 = vector.extract_strided_slice %93 {offsets = [0, 2, 0], sizes = [2, 16, 16], strides = [1, 1, 1]} : vector<2x22x16xf32> to vector<2x16x16xf32>
    %106 = vector.broadcast %104 : f32 to vector<2x16x16xf32>
    %107 = arith.mulf %106, %105 : vector<2x16x16xf32>
    %108 = arith.addf %92, %107 : vector<2x16x16xf32>
    %c23 = arith.constant 23 : index
    %109 = memref.load %arg2[%c23] : memref<98xf32, #tpu.memory_space<smem>>
    %110 = vector.extract_strided_slice %93 {offsets = [0, 3, 0], sizes = [2, 16, 16], strides = [1, 1, 1]} : vector<2x22x16xf32> to vector<2x16x16xf32>
    %111 = vector.broadcast %109 : f32 to vector<2x16x16xf32>
    %112 = arith.mulf %111, %110 : vector<2x16x16xf32>
    %113 = arith.addf %77, %112 : vector<2x16x16xf32>
    %c30 = arith.constant 30 : index
    %114 = memref.load %arg2[%c30] : memref<98xf32, #tpu.memory_space<smem>>
    %115 = vector.extract_strided_slice %93 {offsets = [0, 4, 0], sizes = [2, 16, 16], strides = [1, 1, 1]} : vector<2x22x16xf32> to vector<2x16x16xf32>
    %116 = vector.broadcast %114 : f32 to vector<2x16x16xf32>
    %117 = arith.mulf %116, %115 : vector<2x16x16xf32>
    %118 = arith.addf %98, %117 : vector<2x16x16xf32>
    %c37 = arith.constant 37 : index
    %119 = memref.load %arg2[%c37] : memref<98xf32, #tpu.memory_space<smem>>
    %120 = vector.extract_strided_slice %93 {offsets = [0, 5, 0], sizes = [2, 16, 16], strides = [1, 1, 1]} : vector<2x22x16xf32> to vector<2x16x16xf32>
    %121 = vector.broadcast %119 : f32 to vector<2x16x16xf32>
    %122 = arith.mulf %121, %120 : vector<2x16x16xf32>
    %123 = arith.addf %103, %122 : vector<2x16x16xf32>
    %c44 = arith.constant 44 : index
    %124 = memref.load %arg2[%c44] : memref<98xf32, #tpu.memory_space<smem>>
    %125 = vector.extract_strided_slice %93 {offsets = [0, 6, 0], sizes = [2, 16, 16], strides = [1, 1, 1]} : vector<2x22x16xf32> to vector<2x16x16xf32>
    %126 = vector.broadcast %124 : f32 to vector<2x16x16xf32>
    %127 = arith.mulf %126, %125 : vector<2x16x16xf32>
    %128 = arith.addf %108, %127 : vector<2x16x16xf32>
    %129 = vector.extract_strided_slice %10 {offsets = [0, 0, 3], sizes = [2, 22, 16], strides = [1, 1, 1]} : vector<2x22x22xf32> to vector<2x22x16xf32>
    %c3 = arith.constant 3 : index
    %130 = memref.load %arg2[%c3] : memref<98xf32, #tpu.memory_space<smem>>
    %131 = vector.extract_strided_slice %129 {offsets = [0, 0, 0], sizes = [2, 16, 16], strides = [1, 1, 1]} : vector<2x22x16xf32> to vector<2x16x16xf32>
    %132 = vector.broadcast %130 : f32 to vector<2x16x16xf32>
    %133 = arith.mulf %132, %131 : vector<2x16x16xf32>
    %134 = arith.addf %118, %133 : vector<2x16x16xf32>
    %c10 = arith.constant 10 : index
    %135 = memref.load %arg2[%c10] : memref<98xf32, #tpu.memory_space<smem>>
    %136 = vector.extract_strided_slice %129 {offsets = [0, 1, 0], sizes = [2, 16, 16], strides = [1, 1, 1]} : vector<2x22x16xf32> to vector<2x16x16xf32>
    %137 = vector.broadcast %135 : f32 to vector<2x16x16xf32>
    %138 = arith.mulf %137, %136 : vector<2x16x16xf32>
    %139 = arith.addf %123, %138 : vector<2x16x16xf32>
    %c17 = arith.constant 17 : index
    %140 = memref.load %arg2[%c17] : memref<98xf32, #tpu.memory_space<smem>>
    %141 = vector.extract_strided_slice %129 {offsets = [0, 2, 0], sizes = [2, 16, 16], strides = [1, 1, 1]} : vector<2x22x16xf32> to vector<2x16x16xf32>
    %142 = vector.broadcast %140 : f32 to vector<2x16x16xf32>
    %143 = arith.mulf %142, %141 : vector<2x16x16xf32>
    %144 = arith.addf %128, %143 : vector<2x16x16xf32>
    %c24 = arith.constant 24 : index
    %145 = memref.load %arg2[%c24] : memref<98xf32, #tpu.memory_space<smem>>
    %146 = vector.extract_strided_slice %129 {offsets = [0, 3, 0], sizes = [2, 16, 16], strides = [1, 1, 1]} : vector<2x22x16xf32> to vector<2x16x16xf32>
    %147 = vector.broadcast %145 : f32 to vector<2x16x16xf32>
    %148 = arith.mulf %147, %146 : vector<2x16x16xf32>
    %149 = arith.addf %113, %148 : vector<2x16x16xf32>
    %c31 = arith.constant 31 : index
    %150 = memref.load %arg2[%c31] : memref<98xf32, #tpu.memory_space<smem>>
    %151 = vector.extract_strided_slice %129 {offsets = [0, 4, 0], sizes = [2, 16, 16], strides = [1, 1, 1]} : vector<2x22x16xf32> to vector<2x16x16xf32>
    %152 = vector.broadcast %150 : f32 to vector<2x16x16xf32>
    %153 = arith.mulf %152, %151 : vector<2x16x16xf32>
    %154 = arith.addf %134, %153 : vector<2x16x16xf32>
    %c38 = arith.constant 38 : index
    %155 = memref.load %arg2[%c38] : memref<98xf32, #tpu.memory_space<smem>>
    %156 = vector.extract_strided_slice %129 {offsets = [0, 5, 0], sizes = [2, 16, 16], strides = [1, 1, 1]} : vector<2x22x16xf32> to vector<2x16x16xf32>
    %157 = vector.broadcast %155 : f32 to vector<2x16x16xf32>
    %158 = arith.mulf %157, %156 : vector<2x16x16xf32>
    %159 = arith.addf %139, %158 : vector<2x16x16xf32>
    %c45 = arith.constant 45 : index
    %160 = memref.load %arg2[%c45] : memref<98xf32, #tpu.memory_space<smem>>
    %161 = vector.extract_strided_slice %129 {offsets = [0, 6, 0], sizes = [2, 16, 16], strides = [1, 1, 1]} : vector<2x22x16xf32> to vector<2x16x16xf32>
    %162 = vector.broadcast %160 : f32 to vector<2x16x16xf32>
    %163 = arith.mulf %162, %161 : vector<2x16x16xf32>
    %164 = arith.addf %144, %163 : vector<2x16x16xf32>
    %165 = vector.extract_strided_slice %10 {offsets = [0, 0, 4], sizes = [2, 22, 16], strides = [1, 1, 1]} : vector<2x22x22xf32> to vector<2x22x16xf32>
    %c4 = arith.constant 4 : index
    %166 = memref.load %arg2[%c4] : memref<98xf32, #tpu.memory_space<smem>>
    %167 = vector.extract_strided_slice %165 {offsets = [0, 0, 0], sizes = [2, 16, 16], strides = [1, 1, 1]} : vector<2x22x16xf32> to vector<2x16x16xf32>
    %168 = vector.broadcast %166 : f32 to vector<2x16x16xf32>
    %169 = arith.mulf %168, %167 : vector<2x16x16xf32>
    %170 = arith.addf %154, %169 : vector<2x16x16xf32>
    %c11 = arith.constant 11 : index
    %171 = memref.load %arg2[%c11] : memref<98xf32, #tpu.memory_space<smem>>
    %172 = vector.extract_strided_slice %165 {offsets = [0, 1, 0], sizes = [2, 16, 16], strides = [1, 1, 1]} : vector<2x22x16xf32> to vector<2x16x16xf32>
    %173 = vector.broadcast %171 : f32 to vector<2x16x16xf32>
    %174 = arith.mulf %173, %172 : vector<2x16x16xf32>
    %175 = arith.addf %159, %174 : vector<2x16x16xf32>
    %c18 = arith.constant 18 : index
    %176 = memref.load %arg2[%c18] : memref<98xf32, #tpu.memory_space<smem>>
    %177 = vector.extract_strided_slice %165 {offsets = [0, 2, 0], sizes = [2, 16, 16], strides = [1, 1, 1]} : vector<2x22x16xf32> to vector<2x16x16xf32>
    %178 = vector.broadcast %176 : f32 to vector<2x16x16xf32>
    %179 = arith.mulf %178, %177 : vector<2x16x16xf32>
    %180 = arith.addf %164, %179 : vector<2x16x16xf32>
    %c25 = arith.constant 25 : index
    %181 = memref.load %arg2[%c25] : memref<98xf32, #tpu.memory_space<smem>>
    %182 = vector.extract_strided_slice %165 {offsets = [0, 3, 0], sizes = [2, 16, 16], strides = [1, 1, 1]} : vector<2x22x16xf32> to vector<2x16x16xf32>
    %183 = vector.broadcast %181 : f32 to vector<2x16x16xf32>
    %184 = arith.mulf %183, %182 : vector<2x16x16xf32>
    %185 = arith.addf %149, %184 : vector<2x16x16xf32>
    %c32 = arith.constant 32 : index
    %186 = memref.load %arg2[%c32] : memref<98xf32, #tpu.memory_space<smem>>
    %187 = vector.extract_strided_slice %165 {offsets = [0, 4, 0], sizes = [2, 16, 16], strides = [1, 1, 1]} : vector<2x22x16xf32> to vector<2x16x16xf32>
    %188 = vector.broadcast %186 : f32 to vector<2x16x16xf32>
    %189 = arith.mulf %188, %187 : vector<2x16x16xf32>
    %190 = arith.addf %170, %189 : vector<2x16x16xf32>
    %c39 = arith.constant 39 : index
    %191 = memref.load %arg2[%c39] : memref<98xf32, #tpu.memory_space<smem>>
    %192 = vector.extract_strided_slice %165 {offsets = [0, 5, 0], sizes = [2, 16, 16], strides = [1, 1, 1]} : vector<2x22x16xf32> to vector<2x16x16xf32>
    %193 = vector.broadcast %191 : f32 to vector<2x16x16xf32>
    %194 = arith.mulf %193, %192 : vector<2x16x16xf32>
    %195 = arith.addf %175, %194 : vector<2x16x16xf32>
    %c46 = arith.constant 46 : index
    %196 = memref.load %arg2[%c46] : memref<98xf32, #tpu.memory_space<smem>>
    %197 = vector.extract_strided_slice %165 {offsets = [0, 6, 0], sizes = [2, 16, 16], strides = [1, 1, 1]} : vector<2x22x16xf32> to vector<2x16x16xf32>
    %198 = vector.broadcast %196 : f32 to vector<2x16x16xf32>
    %199 = arith.mulf %198, %197 : vector<2x16x16xf32>
    %200 = arith.addf %180, %199 : vector<2x16x16xf32>
    %201 = vector.extract_strided_slice %10 {offsets = [0, 0, 5], sizes = [2, 22, 16], strides = [1, 1, 1]} : vector<2x22x22xf32> to vector<2x22x16xf32>
    %c5 = arith.constant 5 : index
    %202 = memref.load %arg2[%c5] : memref<98xf32, #tpu.memory_space<smem>>
    %203 = vector.extract_strided_slice %201 {offsets = [0, 0, 0], sizes = [2, 16, 16], strides = [1, 1, 1]} : vector<2x22x16xf32> to vector<2x16x16xf32>
    %204 = vector.broadcast %202 : f32 to vector<2x16x16xf32>
    %205 = arith.mulf %204, %203 : vector<2x16x16xf32>
    %206 = arith.addf %190, %205 : vector<2x16x16xf32>
    %c12 = arith.constant 12 : index
    %207 = memref.load %arg2[%c12] : memref<98xf32, #tpu.memory_space<smem>>
    %208 = vector.extract_strided_slice %201 {offsets = [0, 1, 0], sizes = [2, 16, 16], strides = [1, 1, 1]} : vector<2x22x16xf32> to vector<2x16x16xf32>
    %209 = vector.broadcast %207 : f32 to vector<2x16x16xf32>
    %210 = arith.mulf %209, %208 : vector<2x16x16xf32>
    %211 = arith.addf %195, %210 : vector<2x16x16xf32>
    %c19 = arith.constant 19 : index
    %212 = memref.load %arg2[%c19] : memref<98xf32, #tpu.memory_space<smem>>
    %213 = vector.extract_strided_slice %201 {offsets = [0, 2, 0], sizes = [2, 16, 16], strides = [1, 1, 1]} : vector<2x22x16xf32> to vector<2x16x16xf32>
    %214 = vector.broadcast %212 : f32 to vector<2x16x16xf32>
    %215 = arith.mulf %214, %213 : vector<2x16x16xf32>
    %216 = arith.addf %200, %215 : vector<2x16x16xf32>
    %c26 = arith.constant 26 : index
    %217 = memref.load %arg2[%c26] : memref<98xf32, #tpu.memory_space<smem>>
    %218 = vector.extract_strided_slice %201 {offsets = [0, 3, 0], sizes = [2, 16, 16], strides = [1, 1, 1]} : vector<2x22x16xf32> to vector<2x16x16xf32>
    %219 = vector.broadcast %217 : f32 to vector<2x16x16xf32>
    %220 = arith.mulf %219, %218 : vector<2x16x16xf32>
    %221 = arith.addf %185, %220 : vector<2x16x16xf32>
    %c33 = arith.constant 33 : index
    %222 = memref.load %arg2[%c33] : memref<98xf32, #tpu.memory_space<smem>>
    %223 = vector.extract_strided_slice %201 {offsets = [0, 4, 0], sizes = [2, 16, 16], strides = [1, 1, 1]} : vector<2x22x16xf32> to vector<2x16x16xf32>
    %224 = vector.broadcast %222 : f32 to vector<2x16x16xf32>
    %225 = arith.mulf %224, %223 : vector<2x16x16xf32>
    %226 = arith.addf %206, %225 : vector<2x16x16xf32>
    %c40 = arith.constant 40 : index
    %227 = memref.load %arg2[%c40] : memref<98xf32, #tpu.memory_space<smem>>
    %228 = vector.extract_strided_slice %201 {offsets = [0, 5, 0], sizes = [2, 16, 16], strides = [1, 1, 1]} : vector<2x22x16xf32> to vector<2x16x16xf32>
    %229 = vector.broadcast %227 : f32 to vector<2x16x16xf32>
    %230 = arith.mulf %229, %228 : vector<2x16x16xf32>
    %231 = arith.addf %211, %230 : vector<2x16x16xf32>
    %c47 = arith.constant 47 : index
    %232 = memref.load %arg2[%c47] : memref<98xf32, #tpu.memory_space<smem>>
    %233 = vector.extract_strided_slice %201 {offsets = [0, 6, 0], sizes = [2, 16, 16], strides = [1, 1, 1]} : vector<2x22x16xf32> to vector<2x16x16xf32>
    %234 = vector.broadcast %232 : f32 to vector<2x16x16xf32>
    %235 = arith.mulf %234, %233 : vector<2x16x16xf32>
    %236 = arith.addf %216, %235 : vector<2x16x16xf32>
    %237 = vector.extract_strided_slice %10 {offsets = [0, 0, 6], sizes = [2, 22, 16], strides = [1, 1, 1]} : vector<2x22x22xf32> to vector<2x22x16xf32>
    %c6 = arith.constant 6 : index
    %238 = memref.load %arg2[%c6] : memref<98xf32, #tpu.memory_space<smem>>
    %239 = vector.extract_strided_slice %237 {offsets = [0, 0, 0], sizes = [2, 16, 16], strides = [1, 1, 1]} : vector<2x22x16xf32> to vector<2x16x16xf32>
    %240 = vector.broadcast %238 : f32 to vector<2x16x16xf32>
    %241 = arith.mulf %240, %239 : vector<2x16x16xf32>
    %242 = arith.addf %226, %241 : vector<2x16x16xf32>
    %c13 = arith.constant 13 : index
    %243 = memref.load %arg2[%c13] : memref<98xf32, #tpu.memory_space<smem>>
    %244 = vector.extract_strided_slice %237 {offsets = [0, 1, 0], sizes = [2, 16, 16], strides = [1, 1, 1]} : vector<2x22x16xf32> to vector<2x16x16xf32>
    %245 = vector.broadcast %243 : f32 to vector<2x16x16xf32>
    %246 = arith.mulf %245, %244 : vector<2x16x16xf32>
    %247 = arith.addf %231, %246 : vector<2x16x16xf32>
    %c20 = arith.constant 20 : index
    %248 = memref.load %arg2[%c20] : memref<98xf32, #tpu.memory_space<smem>>
    %249 = vector.extract_strided_slice %237 {offsets = [0, 2, 0], sizes = [2, 16, 16], strides = [1, 1, 1]} : vector<2x22x16xf32> to vector<2x16x16xf32>
    %250 = vector.broadcast %248 : f32 to vector<2x16x16xf32>
    %251 = arith.mulf %250, %249 : vector<2x16x16xf32>
    %252 = arith.addf %236, %251 : vector<2x16x16xf32>
    %c27 = arith.constant 27 : index
    %253 = memref.load %arg2[%c27] : memref<98xf32, #tpu.memory_space<smem>>
    %254 = vector.extract_strided_slice %237 {offsets = [0, 3, 0], sizes = [2, 16, 16], strides = [1, 1, 1]} : vector<2x22x16xf32> to vector<2x16x16xf32>
    %255 = vector.broadcast %253 : f32 to vector<2x16x16xf32>
    %256 = arith.mulf %255, %254 : vector<2x16x16xf32>
    %257 = arith.addf %221, %256 : vector<2x16x16xf32>
    %c34 = arith.constant 34 : index
    %258 = memref.load %arg2[%c34] : memref<98xf32, #tpu.memory_space<smem>>
    %259 = vector.extract_strided_slice %237 {offsets = [0, 4, 0], sizes = [2, 16, 16], strides = [1, 1, 1]} : vector<2x22x16xf32> to vector<2x16x16xf32>
    %260 = vector.broadcast %258 : f32 to vector<2x16x16xf32>
    %261 = arith.mulf %260, %259 : vector<2x16x16xf32>
    %262 = arith.addf %242, %261 : vector<2x16x16xf32>
    %c41 = arith.constant 41 : index
    %263 = memref.load %arg2[%c41] : memref<98xf32, #tpu.memory_space<smem>>
    %264 = vector.extract_strided_slice %237 {offsets = [0, 5, 0], sizes = [2, 16, 16], strides = [1, 1, 1]} : vector<2x22x16xf32> to vector<2x16x16xf32>
    %265 = vector.broadcast %263 : f32 to vector<2x16x16xf32>
    %266 = arith.mulf %265, %264 : vector<2x16x16xf32>
    %267 = arith.addf %247, %266 : vector<2x16x16xf32>
    %c48 = arith.constant 48 : index
    %268 = memref.load %arg2[%c48] : memref<98xf32, #tpu.memory_space<smem>>
    %269 = vector.extract_strided_slice %237 {offsets = [0, 6, 0], sizes = [2, 16, 16], strides = [1, 1, 1]} : vector<2x22x16xf32> to vector<2x16x16xf32>
    %270 = vector.broadcast %268 : f32 to vector<2x16x16xf32>
    %271 = arith.mulf %270, %269 : vector<2x16x16xf32>
    %272 = arith.addf %252, %271 : vector<2x16x16xf32>
    %273 = vector.extract_strided_slice %16 {offsets = [0, 0, 0], sizes = [2, 22, 16], strides = [1, 1, 1]} : vector<2x22x22xf32> to vector<2x22x16xf32>
    %c49 = arith.constant 49 : index
    %274 = memref.load %arg2[%c49] : memref<98xf32, #tpu.memory_space<smem>>
    %275 = vector.extract_strided_slice %273 {offsets = [0, 0, 0], sizes = [2, 16, 16], strides = [1, 1, 1]} : vector<2x22x16xf32> to vector<2x16x16xf32>
    %276 = vector.broadcast %274 : f32 to vector<2x16x16xf32>
    %277 = arith.mulf %276, %275 : vector<2x16x16xf32>
    %278 = arith.addf %272, %277 : vector<2x16x16xf32>
    %c56 = arith.constant 56 : index
    %279 = memref.load %arg2[%c56] : memref<98xf32, #tpu.memory_space<smem>>
    %280 = vector.extract_strided_slice %273 {offsets = [0, 1, 0], sizes = [2, 16, 16], strides = [1, 1, 1]} : vector<2x22x16xf32> to vector<2x16x16xf32>
    %281 = vector.broadcast %279 : f32 to vector<2x16x16xf32>
    %282 = arith.mulf %281, %280 : vector<2x16x16xf32>
    %283 = arith.addf %257, %282 : vector<2x16x16xf32>
    %c63 = arith.constant 63 : index
    %284 = memref.load %arg2[%c63] : memref<98xf32, #tpu.memory_space<smem>>
    %285 = vector.extract_strided_slice %273 {offsets = [0, 2, 0], sizes = [2, 16, 16], strides = [1, 1, 1]} : vector<2x22x16xf32> to vector<2x16x16xf32>
    %286 = vector.broadcast %284 : f32 to vector<2x16x16xf32>
    %287 = arith.mulf %286, %285 : vector<2x16x16xf32>
    %288 = arith.addf %262, %287 : vector<2x16x16xf32>
    %c70 = arith.constant 70 : index
    %289 = memref.load %arg2[%c70] : memref<98xf32, #tpu.memory_space<smem>>
    %290 = vector.extract_strided_slice %273 {offsets = [0, 3, 0], sizes = [2, 16, 16], strides = [1, 1, 1]} : vector<2x22x16xf32> to vector<2x16x16xf32>
    %291 = vector.broadcast %289 : f32 to vector<2x16x16xf32>
    %292 = arith.mulf %291, %290 : vector<2x16x16xf32>
    %293 = arith.addf %267, %292 : vector<2x16x16xf32>
    %c77 = arith.constant 77 : index
    %294 = memref.load %arg2[%c77] : memref<98xf32, #tpu.memory_space<smem>>
    %295 = vector.extract_strided_slice %273 {offsets = [0, 4, 0], sizes = [2, 16, 16], strides = [1, 1, 1]} : vector<2x22x16xf32> to vector<2x16x16xf32>
    %296 = vector.broadcast %294 : f32 to vector<2x16x16xf32>
    %297 = arith.mulf %296, %295 : vector<2x16x16xf32>
    %298 = arith.addf %278, %297 : vector<2x16x16xf32>
    %c84 = arith.constant 84 : index
    %299 = memref.load %arg2[%c84] : memref<98xf32, #tpu.memory_space<smem>>
    %300 = vector.extract_strided_slice %273 {offsets = [0, 5, 0], sizes = [2, 16, 16], strides = [1, 1, 1]} : vector<2x22x16xf32> to vector<2x16x16xf32>
    %301 = vector.broadcast %299 : f32 to vector<2x16x16xf32>
    %302 = arith.mulf %301, %300 : vector<2x16x16xf32>
    %303 = arith.addf %283, %302 : vector<2x16x16xf32>
    %c91 = arith.constant 91 : index
    %304 = memref.load %arg2[%c91] : memref<98xf32, #tpu.memory_space<smem>>
    %305 = vector.extract_strided_slice %273 {offsets = [0, 6, 0], sizes = [2, 16, 16], strides = [1, 1, 1]} : vector<2x22x16xf32> to vector<2x16x16xf32>
    %306 = vector.broadcast %304 : f32 to vector<2x16x16xf32>
    %307 = arith.mulf %306, %305 : vector<2x16x16xf32>
    %308 = arith.addf %288, %307 : vector<2x16x16xf32>
    %309 = vector.extract_strided_slice %16 {offsets = [0, 0, 1], sizes = [2, 22, 16], strides = [1, 1, 1]} : vector<2x22x22xf32> to vector<2x22x16xf32>
    %c50 = arith.constant 50 : index
    %310 = memref.load %arg2[%c50] : memref<98xf32, #tpu.memory_space<smem>>
    %311 = vector.extract_strided_slice %309 {offsets = [0, 0, 0], sizes = [2, 16, 16], strides = [1, 1, 1]} : vector<2x22x16xf32> to vector<2x16x16xf32>
    %312 = vector.broadcast %310 : f32 to vector<2x16x16xf32>
    %313 = arith.mulf %312, %311 : vector<2x16x16xf32>
    %314 = arith.addf %298, %313 : vector<2x16x16xf32>
    %c57 = arith.constant 57 : index
    %315 = memref.load %arg2[%c57] : memref<98xf32, #tpu.memory_space<smem>>
    %316 = vector.extract_strided_slice %309 {offsets = [0, 1, 0], sizes = [2, 16, 16], strides = [1, 1, 1]} : vector<2x22x16xf32> to vector<2x16x16xf32>
    %317 = vector.broadcast %315 : f32 to vector<2x16x16xf32>
    %318 = arith.mulf %317, %316 : vector<2x16x16xf32>
    %319 = arith.addf %303, %318 : vector<2x16x16xf32>
    %c64 = arith.constant 64 : index
    %320 = memref.load %arg2[%c64] : memref<98xf32, #tpu.memory_space<smem>>
    %321 = vector.extract_strided_slice %309 {offsets = [0, 2, 0], sizes = [2, 16, 16], strides = [1, 1, 1]} : vector<2x22x16xf32> to vector<2x16x16xf32>
    %322 = vector.broadcast %320 : f32 to vector<2x16x16xf32>
    %323 = arith.mulf %322, %321 : vector<2x16x16xf32>
    %324 = arith.addf %308, %323 : vector<2x16x16xf32>
    %c71 = arith.constant 71 : index
    %325 = memref.load %arg2[%c71] : memref<98xf32, #tpu.memory_space<smem>>
    %326 = vector.extract_strided_slice %309 {offsets = [0, 3, 0], sizes = [2, 16, 16], strides = [1, 1, 1]} : vector<2x22x16xf32> to vector<2x16x16xf32>
    %327 = vector.broadcast %325 : f32 to vector<2x16x16xf32>
    %328 = arith.mulf %327, %326 : vector<2x16x16xf32>
    %329 = arith.addf %293, %328 : vector<2x16x16xf32>
    %c78 = arith.constant 78 : index
    %330 = memref.load %arg2[%c78] : memref<98xf32, #tpu.memory_space<smem>>
    %331 = vector.extract_strided_slice %309 {offsets = [0, 4, 0], sizes = [2, 16, 16], strides = [1, 1, 1]} : vector<2x22x16xf32> to vector<2x16x16xf32>
    %332 = vector.broadcast %330 : f32 to vector<2x16x16xf32>
    %333 = arith.mulf %332, %331 : vector<2x16x16xf32>
    %334 = arith.addf %314, %333 : vector<2x16x16xf32>
    %c85 = arith.constant 85 : index
    %335 = memref.load %arg2[%c85] : memref<98xf32, #tpu.memory_space<smem>>
    %336 = vector.extract_strided_slice %309 {offsets = [0, 5, 0], sizes = [2, 16, 16], strides = [1, 1, 1]} : vector<2x22x16xf32> to vector<2x16x16xf32>
    %337 = vector.broadcast %335 : f32 to vector<2x16x16xf32>
    %338 = arith.mulf %337, %336 : vector<2x16x16xf32>
    %339 = arith.addf %319, %338 : vector<2x16x16xf32>
    %c92 = arith.constant 92 : index
    %340 = memref.load %arg2[%c92] : memref<98xf32, #tpu.memory_space<smem>>
    %341 = vector.extract_strided_slice %309 {offsets = [0, 6, 0], sizes = [2, 16, 16], strides = [1, 1, 1]} : vector<2x22x16xf32> to vector<2x16x16xf32>
    %342 = vector.broadcast %340 : f32 to vector<2x16x16xf32>
    %343 = arith.mulf %342, %341 : vector<2x16x16xf32>
    %344 = arith.addf %324, %343 : vector<2x16x16xf32>
    %345 = vector.extract_strided_slice %16 {offsets = [0, 0, 2], sizes = [2, 22, 16], strides = [1, 1, 1]} : vector<2x22x22xf32> to vector<2x22x16xf32>
    %c51 = arith.constant 51 : index
    %346 = memref.load %arg2[%c51] : memref<98xf32, #tpu.memory_space<smem>>
    %347 = vector.extract_strided_slice %345 {offsets = [0, 0, 0], sizes = [2, 16, 16], strides = [1, 1, 1]} : vector<2x22x16xf32> to vector<2x16x16xf32>
    %348 = vector.broadcast %346 : f32 to vector<2x16x16xf32>
    %349 = arith.mulf %348, %347 : vector<2x16x16xf32>
    %350 = arith.addf %334, %349 : vector<2x16x16xf32>
    %c58 = arith.constant 58 : index
    %351 = memref.load %arg2[%c58] : memref<98xf32, #tpu.memory_space<smem>>
    %352 = vector.extract_strided_slice %345 {offsets = [0, 1, 0], sizes = [2, 16, 16], strides = [1, 1, 1]} : vector<2x22x16xf32> to vector<2x16x16xf32>
    %353 = vector.broadcast %351 : f32 to vector<2x16x16xf32>
    %354 = arith.mulf %353, %352 : vector<2x16x16xf32>
    %355 = arith.addf %339, %354 : vector<2x16x16xf32>
    %c65 = arith.constant 65 : index
    %356 = memref.load %arg2[%c65] : memref<98xf32, #tpu.memory_space<smem>>
    %357 = vector.extract_strided_slice %345 {offsets = [0, 2, 0], sizes = [2, 16, 16], strides = [1, 1, 1]} : vector<2x22x16xf32> to vector<2x16x16xf32>
    %358 = vector.broadcast %356 : f32 to vector<2x16x16xf32>
    %359 = arith.mulf %358, %357 : vector<2x16x16xf32>
    %360 = arith.addf %344, %359 : vector<2x16x16xf32>
    %c72 = arith.constant 72 : index
    %361 = memref.load %arg2[%c72] : memref<98xf32, #tpu.memory_space<smem>>
    %362 = vector.extract_strided_slice %345 {offsets = [0, 3, 0], sizes = [2, 16, 16], strides = [1, 1, 1]} : vector<2x22x16xf32> to vector<2x16x16xf32>
    %363 = vector.broadcast %361 : f32 to vector<2x16x16xf32>
    %364 = arith.mulf %363, %362 : vector<2x16x16xf32>
    %365 = arith.addf %329, %364 : vector<2x16x16xf32>
    %c79 = arith.constant 79 : index
    %366 = memref.load %arg2[%c79] : memref<98xf32, #tpu.memory_space<smem>>
    %367 = vector.extract_strided_slice %345 {offsets = [0, 4, 0], sizes = [2, 16, 16], strides = [1, 1, 1]} : vector<2x22x16xf32> to vector<2x16x16xf32>
    %368 = vector.broadcast %366 : f32 to vector<2x16x16xf32>
    %369 = arith.mulf %368, %367 : vector<2x16x16xf32>
    %370 = arith.addf %350, %369 : vector<2x16x16xf32>
    %c86 = arith.constant 86 : index
    %371 = memref.load %arg2[%c86] : memref<98xf32, #tpu.memory_space<smem>>
    %372 = vector.extract_strided_slice %345 {offsets = [0, 5, 0], sizes = [2, 16, 16], strides = [1, 1, 1]} : vector<2x22x16xf32> to vector<2x16x16xf32>
    %373 = vector.broadcast %371 : f32 to vector<2x16x16xf32>
    %374 = arith.mulf %373, %372 : vector<2x16x16xf32>
    %375 = arith.addf %355, %374 : vector<2x16x16xf32>
    %c93 = arith.constant 93 : index
    %376 = memref.load %arg2[%c93] : memref<98xf32, #tpu.memory_space<smem>>
    %377 = vector.extract_strided_slice %345 {offsets = [0, 6, 0], sizes = [2, 16, 16], strides = [1, 1, 1]} : vector<2x22x16xf32> to vector<2x16x16xf32>
    %378 = vector.broadcast %376 : f32 to vector<2x16x16xf32>
    %379 = arith.mulf %378, %377 : vector<2x16x16xf32>
    %380 = arith.addf %360, %379 : vector<2x16x16xf32>
    %381 = vector.extract_strided_slice %16 {offsets = [0, 0, 3], sizes = [2, 22, 16], strides = [1, 1, 1]} : vector<2x22x22xf32> to vector<2x22x16xf32>
    %c52 = arith.constant 52 : index
    %382 = memref.load %arg2[%c52] : memref<98xf32, #tpu.memory_space<smem>>
    %383 = vector.extract_strided_slice %381 {offsets = [0, 0, 0], sizes = [2, 16, 16], strides = [1, 1, 1]} : vector<2x22x16xf32> to vector<2x16x16xf32>
    %384 = vector.broadcast %382 : f32 to vector<2x16x16xf32>
    %385 = arith.mulf %384, %383 : vector<2x16x16xf32>
    %386 = arith.addf %370, %385 : vector<2x16x16xf32>
    %c59 = arith.constant 59 : index
    %387 = memref.load %arg2[%c59] : memref<98xf32, #tpu.memory_space<smem>>
    %388 = vector.extract_strided_slice %381 {offsets = [0, 1, 0], sizes = [2, 16, 16], strides = [1, 1, 1]} : vector<2x22x16xf32> to vector<2x16x16xf32>
    %389 = vector.broadcast %387 : f32 to vector<2x16x16xf32>
    %390 = arith.mulf %389, %388 : vector<2x16x16xf32>
    %391 = arith.addf %375, %390 : vector<2x16x16xf32>
    %c66 = arith.constant 66 : index
    %392 = memref.load %arg2[%c66] : memref<98xf32, #tpu.memory_space<smem>>
    %393 = vector.extract_strided_slice %381 {offsets = [0, 2, 0], sizes = [2, 16, 16], strides = [1, 1, 1]} : vector<2x22x16xf32> to vector<2x16x16xf32>
    %394 = vector.broadcast %392 : f32 to vector<2x16x16xf32>
    %395 = arith.mulf %394, %393 : vector<2x16x16xf32>
    %396 = arith.addf %380, %395 : vector<2x16x16xf32>
    %c73 = arith.constant 73 : index
    %397 = memref.load %arg2[%c73] : memref<98xf32, #tpu.memory_space<smem>>
    %398 = vector.extract_strided_slice %381 {offsets = [0, 3, 0], sizes = [2, 16, 16], strides = [1, 1, 1]} : vector<2x22x16xf32> to vector<2x16x16xf32>
    %399 = vector.broadcast %397 : f32 to vector<2x16x16xf32>
    %400 = arith.mulf %399, %398 : vector<2x16x16xf32>
    %401 = arith.addf %365, %400 : vector<2x16x16xf32>
    %c80 = arith.constant 80 : index
    %402 = memref.load %arg2[%c80] : memref<98xf32, #tpu.memory_space<smem>>
    %403 = vector.extract_strided_slice %381 {offsets = [0, 4, 0], sizes = [2, 16, 16], strides = [1, 1, 1]} : vector<2x22x16xf32> to vector<2x16x16xf32>
    %404 = vector.broadcast %402 : f32 to vector<2x16x16xf32>
    %405 = arith.mulf %404, %403 : vector<2x16x16xf32>
    %406 = arith.addf %386, %405 : vector<2x16x16xf32>
    %c87 = arith.constant 87 : index
    %407 = memref.load %arg2[%c87] : memref<98xf32, #tpu.memory_space<smem>>
    %408 = vector.extract_strided_slice %381 {offsets = [0, 5, 0], sizes = [2, 16, 16], strides = [1, 1, 1]} : vector<2x22x16xf32> to vector<2x16x16xf32>
    %409 = vector.broadcast %407 : f32 to vector<2x16x16xf32>
    %410 = arith.mulf %409, %408 : vector<2x16x16xf32>
    %411 = arith.addf %391, %410 : vector<2x16x16xf32>
    %c94 = arith.constant 94 : index
    %412 = memref.load %arg2[%c94] : memref<98xf32, #tpu.memory_space<smem>>
    %413 = vector.extract_strided_slice %381 {offsets = [0, 6, 0], sizes = [2, 16, 16], strides = [1, 1, 1]} : vector<2x22x16xf32> to vector<2x16x16xf32>
    %414 = vector.broadcast %412 : f32 to vector<2x16x16xf32>
    %415 = arith.mulf %414, %413 : vector<2x16x16xf32>
    %416 = arith.addf %396, %415 : vector<2x16x16xf32>
    %417 = vector.extract_strided_slice %16 {offsets = [0, 0, 4], sizes = [2, 22, 16], strides = [1, 1, 1]} : vector<2x22x22xf32> to vector<2x22x16xf32>
    %c53 = arith.constant 53 : index
    %418 = memref.load %arg2[%c53] : memref<98xf32, #tpu.memory_space<smem>>
    %419 = vector.extract_strided_slice %417 {offsets = [0, 0, 0], sizes = [2, 16, 16], strides = [1, 1, 1]} : vector<2x22x16xf32> to vector<2x16x16xf32>
    %420 = vector.broadcast %418 : f32 to vector<2x16x16xf32>
    %421 = arith.mulf %420, %419 : vector<2x16x16xf32>
    %422 = arith.addf %406, %421 : vector<2x16x16xf32>
    %c60 = arith.constant 60 : index
    %423 = memref.load %arg2[%c60] : memref<98xf32, #tpu.memory_space<smem>>
    %424 = vector.extract_strided_slice %417 {offsets = [0, 1, 0], sizes = [2, 16, 16], strides = [1, 1, 1]} : vector<2x22x16xf32> to vector<2x16x16xf32>
    %425 = vector.broadcast %423 : f32 to vector<2x16x16xf32>
    %426 = arith.mulf %425, %424 : vector<2x16x16xf32>
    %427 = arith.addf %411, %426 : vector<2x16x16xf32>
    %c67 = arith.constant 67 : index
    %428 = memref.load %arg2[%c67] : memref<98xf32, #tpu.memory_space<smem>>
    %429 = vector.extract_strided_slice %417 {offsets = [0, 2, 0], sizes = [2, 16, 16], strides = [1, 1, 1]} : vector<2x22x16xf32> to vector<2x16x16xf32>
    %430 = vector.broadcast %428 : f32 to vector<2x16x16xf32>
    %431 = arith.mulf %430, %429 : vector<2x16x16xf32>
    %432 = arith.addf %416, %431 : vector<2x16x16xf32>
    %c74 = arith.constant 74 : index
    %433 = memref.load %arg2[%c74] : memref<98xf32, #tpu.memory_space<smem>>
    %434 = vector.extract_strided_slice %417 {offsets = [0, 3, 0], sizes = [2, 16, 16], strides = [1, 1, 1]} : vector<2x22x16xf32> to vector<2x16x16xf32>
    %435 = vector.broadcast %433 : f32 to vector<2x16x16xf32>
    %436 = arith.mulf %435, %434 : vector<2x16x16xf32>
    %437 = arith.addf %401, %436 : vector<2x16x16xf32>
    %c81 = arith.constant 81 : index
    %438 = memref.load %arg2[%c81] : memref<98xf32, #tpu.memory_space<smem>>
    %439 = vector.extract_strided_slice %417 {offsets = [0, 4, 0], sizes = [2, 16, 16], strides = [1, 1, 1]} : vector<2x22x16xf32> to vector<2x16x16xf32>
    %440 = vector.broadcast %438 : f32 to vector<2x16x16xf32>
    %441 = arith.mulf %440, %439 : vector<2x16x16xf32>
    %442 = arith.addf %422, %441 : vector<2x16x16xf32>
    %c88 = arith.constant 88 : index
    %443 = memref.load %arg2[%c88] : memref<98xf32, #tpu.memory_space<smem>>
    %444 = vector.extract_strided_slice %417 {offsets = [0, 5, 0], sizes = [2, 16, 16], strides = [1, 1, 1]} : vector<2x22x16xf32> to vector<2x16x16xf32>
    %445 = vector.broadcast %443 : f32 to vector<2x16x16xf32>
    %446 = arith.mulf %445, %444 : vector<2x16x16xf32>
    %447 = arith.addf %427, %446 : vector<2x16x16xf32>
    %c95 = arith.constant 95 : index
    %448 = memref.load %arg2[%c95] : memref<98xf32, #tpu.memory_space<smem>>
    %449 = vector.extract_strided_slice %417 {offsets = [0, 6, 0], sizes = [2, 16, 16], strides = [1, 1, 1]} : vector<2x22x16xf32> to vector<2x16x16xf32>
    %450 = vector.broadcast %448 : f32 to vector<2x16x16xf32>
    %451 = arith.mulf %450, %449 : vector<2x16x16xf32>
    %452 = arith.addf %432, %451 : vector<2x16x16xf32>
    %453 = vector.extract_strided_slice %16 {offsets = [0, 0, 5], sizes = [2, 22, 16], strides = [1, 1, 1]} : vector<2x22x22xf32> to vector<2x22x16xf32>
    %c54 = arith.constant 54 : index
    %454 = memref.load %arg2[%c54] : memref<98xf32, #tpu.memory_space<smem>>
    %455 = vector.extract_strided_slice %453 {offsets = [0, 0, 0], sizes = [2, 16, 16], strides = [1, 1, 1]} : vector<2x22x16xf32> to vector<2x16x16xf32>
    %456 = vector.broadcast %454 : f32 to vector<2x16x16xf32>
    %457 = arith.mulf %456, %455 : vector<2x16x16xf32>
    %458 = arith.addf %442, %457 : vector<2x16x16xf32>
    %c61 = arith.constant 61 : index
    %459 = memref.load %arg2[%c61] : memref<98xf32, #tpu.memory_space<smem>>
    %460 = vector.extract_strided_slice %453 {offsets = [0, 1, 0], sizes = [2, 16, 16], strides = [1, 1, 1]} : vector<2x22x16xf32> to vector<2x16x16xf32>
    %461 = vector.broadcast %459 : f32 to vector<2x16x16xf32>
    %462 = arith.mulf %461, %460 : vector<2x16x16xf32>
    %463 = arith.addf %447, %462 : vector<2x16x16xf32>
    %c68 = arith.constant 68 : index
    %464 = memref.load %arg2[%c68] : memref<98xf32, #tpu.memory_space<smem>>
    %465 = vector.extract_strided_slice %453 {offsets = [0, 2, 0], sizes = [2, 16, 16], strides = [1, 1, 1]} : vector<2x22x16xf32> to vector<2x16x16xf32>
    %466 = vector.broadcast %464 : f32 to vector<2x16x16xf32>
    %467 = arith.mulf %466, %465 : vector<2x16x16xf32>
    %468 = arith.addf %452, %467 : vector<2x16x16xf32>
    %c75 = arith.constant 75 : index
    %469 = memref.load %arg2[%c75] : memref<98xf32, #tpu.memory_space<smem>>
    %470 = vector.extract_strided_slice %453 {offsets = [0, 3, 0], sizes = [2, 16, 16], strides = [1, 1, 1]} : vector<2x22x16xf32> to vector<2x16x16xf32>
    %471 = vector.broadcast %469 : f32 to vector<2x16x16xf32>
    %472 = arith.mulf %471, %470 : vector<2x16x16xf32>
    %473 = arith.addf %437, %472 : vector<2x16x16xf32>
    %c82 = arith.constant 82 : index
    %474 = memref.load %arg2[%c82] : memref<98xf32, #tpu.memory_space<smem>>
    %475 = vector.extract_strided_slice %453 {offsets = [0, 4, 0], sizes = [2, 16, 16], strides = [1, 1, 1]} : vector<2x22x16xf32> to vector<2x16x16xf32>
    %476 = vector.broadcast %474 : f32 to vector<2x16x16xf32>
    %477 = arith.mulf %476, %475 : vector<2x16x16xf32>
    %478 = arith.addf %458, %477 : vector<2x16x16xf32>
    %c89 = arith.constant 89 : index
    %479 = memref.load %arg2[%c89] : memref<98xf32, #tpu.memory_space<smem>>
    %480 = vector.extract_strided_slice %453 {offsets = [0, 5, 0], sizes = [2, 16, 16], strides = [1, 1, 1]} : vector<2x22x16xf32> to vector<2x16x16xf32>
    %481 = vector.broadcast %479 : f32 to vector<2x16x16xf32>
    %482 = arith.mulf %481, %480 : vector<2x16x16xf32>
    %483 = arith.addf %463, %482 : vector<2x16x16xf32>
    %c96 = arith.constant 96 : index
    %484 = memref.load %arg2[%c96] : memref<98xf32, #tpu.memory_space<smem>>
    %485 = vector.extract_strided_slice %453 {offsets = [0, 6, 0], sizes = [2, 16, 16], strides = [1, 1, 1]} : vector<2x22x16xf32> to vector<2x16x16xf32>
    %486 = vector.broadcast %484 : f32 to vector<2x16x16xf32>
    %487 = arith.mulf %486, %485 : vector<2x16x16xf32>
    %488 = arith.addf %468, %487 : vector<2x16x16xf32>
    %489 = vector.extract_strided_slice %16 {offsets = [0, 0, 6], sizes = [2, 22, 16], strides = [1, 1, 1]} : vector<2x22x22xf32> to vector<2x22x16xf32>
    %c55 = arith.constant 55 : index
    %490 = memref.load %arg2[%c55] : memref<98xf32, #tpu.memory_space<smem>>
    %491 = vector.extract_strided_slice %489 {offsets = [0, 0, 0], sizes = [2, 16, 16], strides = [1, 1, 1]} : vector<2x22x16xf32> to vector<2x16x16xf32>
    %492 = vector.broadcast %490 : f32 to vector<2x16x16xf32>
    %493 = arith.mulf %492, %491 : vector<2x16x16xf32>
    %494 = arith.addf %478, %493 : vector<2x16x16xf32>
    %c62 = arith.constant 62 : index
    %495 = memref.load %arg2[%c62] : memref<98xf32, #tpu.memory_space<smem>>
    %496 = vector.extract_strided_slice %489 {offsets = [0, 1, 0], sizes = [2, 16, 16], strides = [1, 1, 1]} : vector<2x22x16xf32> to vector<2x16x16xf32>
    %497 = vector.broadcast %495 : f32 to vector<2x16x16xf32>
    %498 = arith.mulf %497, %496 : vector<2x16x16xf32>
    %499 = arith.addf %483, %498 : vector<2x16x16xf32>
    %c69 = arith.constant 69 : index
    %500 = memref.load %arg2[%c69] : memref<98xf32, #tpu.memory_space<smem>>
    %501 = vector.extract_strided_slice %489 {offsets = [0, 2, 0], sizes = [2, 16, 16], strides = [1, 1, 1]} : vector<2x22x16xf32> to vector<2x16x16xf32>
    %502 = vector.broadcast %500 : f32 to vector<2x16x16xf32>
    %503 = arith.mulf %502, %501 : vector<2x16x16xf32>
    %504 = arith.addf %488, %503 : vector<2x16x16xf32>
    %c76 = arith.constant 76 : index
    %505 = memref.load %arg2[%c76] : memref<98xf32, #tpu.memory_space<smem>>
    %506 = vector.extract_strided_slice %489 {offsets = [0, 3, 0], sizes = [2, 16, 16], strides = [1, 1, 1]} : vector<2x22x16xf32> to vector<2x16x16xf32>
    %507 = vector.broadcast %505 : f32 to vector<2x16x16xf32>
    %508 = arith.mulf %507, %506 : vector<2x16x16xf32>
    %509 = arith.addf %473, %508 : vector<2x16x16xf32>
    %c83 = arith.constant 83 : index
    %510 = memref.load %arg2[%c83] : memref<98xf32, #tpu.memory_space<smem>>
    %511 = vector.extract_strided_slice %489 {offsets = [0, 4, 0], sizes = [2, 16, 16], strides = [1, 1, 1]} : vector<2x22x16xf32> to vector<2x16x16xf32>
    %512 = vector.broadcast %510 : f32 to vector<2x16x16xf32>
    %513 = arith.mulf %512, %511 : vector<2x16x16xf32>
    %514 = arith.addf %494, %513 : vector<2x16x16xf32>
    %c90 = arith.constant 90 : index
    %515 = memref.load %arg2[%c90] : memref<98xf32, #tpu.memory_space<smem>>
    %516 = vector.extract_strided_slice %489 {offsets = [0, 5, 0], sizes = [2, 16, 16], strides = [1, 1, 1]} : vector<2x22x16xf32> to vector<2x16x16xf32>
    %517 = vector.broadcast %515 : f32 to vector<2x16x16xf32>
    %518 = arith.mulf %517, %516 : vector<2x16x16xf32>
    %519 = arith.addf %499, %518 : vector<2x16x16xf32>
    %c97 = arith.constant 97 : index
    %520 = memref.load %arg2[%c97] : memref<98xf32, #tpu.memory_space<smem>>
    %521 = vector.extract_strided_slice %489 {offsets = [0, 6, 0], sizes = [2, 16, 16], strides = [1, 1, 1]} : vector<2x22x16xf32> to vector<2x16x16xf32>
    %522 = vector.broadcast %520 : f32 to vector<2x16x16xf32>
    %523 = arith.mulf %522, %521 : vector<2x16x16xf32>
    %524 = arith.addf %504, %523 : vector<2x16x16xf32>
    %525 = arith.addf %524, %509 : vector<2x16x16xf32>
    %526 = arith.addf %514, %519 : vector<2x16x16xf32>
    %527 = arith.addf %525, %526 : vector<2x16x16xf32>
    %528 = arith.negf %527 : vector<2x16x16xf32>
    %529 = math.exp %528 : vector<2x16x16xf32>
    %cst_10 = arith.constant 1.000000e+00 : f32
    %530 = vector.broadcast %cst_10 : f32 to vector<2x16x16xf32>
    %531 = arith.addf %530, %529 : vector<2x16x16xf32>
    %532 = arith.divf %530, %531 : vector<2x16x16xf32>
    %c0_11 = arith.constant 0 : index
    %c0_12 = arith.constant 0 : index
    %c0_13 = arith.constant 0 : index
    %c0_14 = arith.constant 0 : index
    %533 = vector.load %arg3[%c0_11, %c0_12, %c0_13, %c0_14] : memref<2x1x16x16xf32, #tpu.memory_space<vmem>>, vector<2x1x16x16xf32>
    %534 = vector.shape_cast %533 : vector<2x1x16x16xf32> to vector<2x16x16xf32>
    %535 = vector.shape_cast %532 : vector<2x16x16xf32> to vector<2x1x16x16xf32>
    tpu.vector_store %arg3[%c0_11, %c0_12, %c0_13, %c0_14], %535 {strides = array<i32>} : memref<2x1x16x16xf32, #tpu.memory_space<vmem>>, vector<2x1x16x16xf32>,
    return
  }
  func.func @transform_0(%arg0: i32) -> (i32, i32, i32, i32) {
    %c0_i32 = arith.constant 0 : i32
    %c0_i32_0 = arith.constant 0 : i32
    %c0_i32_1 = arith.constant 0 : i32
    %c0_i32_2 = arith.constant 0 : i32
    return %arg0, %c0_i32, %c0_i32_0, %c0_i32_1 : i32, i32, i32, i32
  }
  func.func @transform_1(%arg0: i32) -> i32 {
    %c0_i32 = arith.constant 0 : i32
    %c0_i32_0 = arith.constant 0 : i32
    return %c0_i32 : i32
  }
  func.func @transform_2(%arg0: i32) -> (i32, i32, i32, i32) {
    %c0_i32 = arith.constant 0 : i32
    %c0_i32_0 = arith.constant 0 : i32
    %c0_i32_1 = arith.constant 0 : i32
    %c0_i32_2 = arith.constant 0 : i32
    return %arg0, %c0_i32, %c0_i32_0, %c0_i32_1 : i32, i32, i32, i32
  }
}

</mosaic_0001>

<bundles_post_ra>
// kernel: tpu_custom_call.1
= control target key start
LH: loop header
LB: loop body
LE: loop exit
PB: predicated region body
PF: predicated region fallthrough
CT: control target
= control target key end

     0   :  { %7 = vsyncpa [#allocation3], 0  ;;  %s8829_s0 = inlined_call_operand.hbm [shape: f32[2,4,16,16], index: 0, kind: input, shape index: {}]   ;;  %s8830_s1 = inlined_call_operand.vmem [shape: f32[98], index: 1, kind: input, shape index: {}]   ;;  %s8831_s2 = inlined_call_operand.hbm [shape: f32[2,1,16,16], index: 2, kind: output, shape index: {}]  }
   0x1   :  { %8 = vsyncpa [#allocation5], 0 }
   0x2   :  { %9 = vsyncpa [#allocation4], 0  ;;  %s4755_s9 = smov [#allocation2]   ;;  %s28_s13 = sshll.u32 %s8830_s1, 4  ;;  %s29_s13 = int_to_ptr.vmem [resolvable:$true] %s28_s13 }
   0x3   :  { %s15_s10 = sshll.u32 %s4755_s9, 4  ;;  %s16_s10 = int_to_ptr.vmem [resolvable:$true] %s15_s10 }
   0x4   :  { %s4705_s14 = scalar_lea.vmem %s16_s10, 2048  ;;  %p4710_p1 = scmp.lt.s32.totalorder %s16_s10, %s16_s10 }
   0x5   :  { %p4706_p0 = scmp.ne.s32.totalorder %s16_s10, %s4705_s14  ;;  %p4711_p2 = scmp.lt.s32.totalorder %s4705_s14, %s4705_s14 }
   0x7   :  { %p4712_p3 = por %p4711_p2, %p4710_p1 }
   0x9   :  { %p4713_p4 = pnand %p4712_p3, %p4706_p0 }
   0xb   :  { %4716 = shalt.err (!%p4713_p4)
}
   0xc   :  { %s4756_s15 = smov 128   ;;  %s4757_s16 = smov 8  }
   0xd   :  { %21 = dma.hbm_to_vmem [thread:$0]  %s8829_s0, 2048, %s16_s10, [#allocation3], %s4756_s15, %s4756_s15, %s4757_s16  }
   0xe   :  { %s4717_s19 = scalar_lea.vmem %s29_s13, 16  ;;  %p4722_p6 = scmp.lt.s32.totalorder %s29_s13, %s29_s13 }
   0xf   :  { %p4718_p5 = scmp.ne.s32.totalorder %s29_s13, %s4717_s19  ;;  %p4723_p7 = scmp.lt.s32.totalorder %s4717_s19, %s4717_s19 }
  0x11   :  { %p4724_p8 = por %p4723_p7, %p4722_p6 }
  0x13   :  { %p4725_p9 = pnand %p4724_p8, %p4718_p5 }
  0x15   :  { %4728 = shalt.err (!%p4725_p9)
}
  0x16   :  { %s4758_s1 = smov [#allocation6]  }
  0x17   :  { %31 = dma.vmem_to_smem %s29_s13, 16, %s4758_s1, [#allocation5]  }
  0x18   :  { %4749 = dma.done.wait [#allocation3], 2048  }
  0x19   :  { %4750 = vsyncadd [#allocation3], 4294965248 }
  0x1a   :  { %4751 = dma.done.wait [#allocation5], 16  }
  0x1b   :  { %4752 = vsyncadd [#allocation5], 4294967280 }
  0x1c   :  { %38 = sfence }
  0x1d   :  { %v39_v0 = vld [vmem:[#allocation2] sm:$0xff]  ;;  %v4796_v1 = vld [vmem:[#allocation2 + $0x8] sm:$0xff]  ;;  %v41_v2 = vld [vmem:[#allocation2 + $0x10] sm:$0xff]  ;;  %vm55_vm0 = vcmask 130048   ;;  %vm128_vm1 = vcmask 1042432   ;;  %vm163_vm2 = vcmask 1043456  }
  0x1e   :  { %v4798_v3 = vld [vmem:[#allocation2 + $0x18] sm:$0xff]  ;;  %v43_v4 = vld [vmem:[#allocation2 + $0x20] sm:$0xff]  ;;  %v4800_v5 = vld [vmem:[#allocation2 + $0x28] sm:$0xff]  ;;  %v56_v6 = vsel %vm55_vm0, %v39_v0, 0.0  ;;  %v57_v7 = vsel %vm55_vm0, %v41_v2, 0.0  ;;  %v63_v8 = vsel %vm55_vm0, %v4796_v1, 0.0 }
  0x1f   :  { %v4806_v9 = vld [vmem:[#allocation2 + $0x30] sm:$0xff]  ;;  %v4808_v10 = vld [vmem:[#allocation2 + $0x38] sm:$0xff]  ;;  %v58_v11 = vadd.f32 %v57_v7, %v56_v6  ;;  %v59_v12 = vsel %vm55_vm0, %v43_v4, 0.0  ;;  %v64_v13 = vsel %vm55_vm0, %v4798_v3, 0.0  ;;  %v66_v14 = vsel %vm55_vm0, %v4800_v5, 0.0  ;;  %v4819_v18 = vld [vmem:[#allocation2 + $0x40] sm:$0xff] }
  0x20   :  { %v61_v15 = vsel %vm55_vm0, %v4806_v9, 0.0  ;;  %v65_v16 = vadd.f32 %v64_v13, %v63_v8  ;;  %v68_v17 = vsel %vm55_vm0, %v4808_v10, 0.0  ;;  %v4821_v19 = vld [vmem:[#allocation2 + $0x48] sm:$0xff]  ;;  %v4823_v20 = vld [vmem:[#allocation2 + $0x50] sm:$0xff]  ;;  %vm166_vm3 = vcmask 1044480   ;;  %v4825_v22 = vld [vmem:[#allocation2 + $0x58] sm:$0xff] }
  0x21   :  { %v60_v21 = vadd.f32 %v59_v12, %v58_v11  ;;  %v4827_v23 = vld [vmem:[#allocation2 + $0x60] sm:$0xff]  ;;  %v4829_v24 = vld [vmem:[#allocation2 + $0x68] sm:$0xff]  ;;  %v70_v25 = vsel %vm55_vm0, %v4819_v18, 0.0  ;;  %v71_v26 = vsel %vm55_vm0, %v4823_v20, 0.0  ;;  %v4835_v28 = vld [vmem:[#allocation2 + $0x70] sm:$0xff]  ;;  %v77_v32 = vsel %vm55_vm0, %v4821_v19, 0.0 }
  0x22   :  { %v67_v27 = vadd.f32 %v66_v14, %v65_v16  ;;  %v4837_v29 = vld [vmem:[#allocation2 + $0x78] sm:$0xff]  ;;  %v72_v30 = vadd.f32 %v71_v26, %v70_v25  ;;  %v73_v31 = vsel %vm55_vm0, %v4827_v23, 0.0  ;;  %v75_v34 = vsel %vm55_vm0, %v4835_v28, 0.0  ;;  %s4759_s0 = smov 2   ;;  %s4760_s20 = smov 1  }
  0x23   :  { %v62_v33 = vadd.f32 %v61_v15, %v60_v21  ;;  %v78_v35 = vsel %vm55_vm0, %v4825_v22, 0.0  ;;  %v80_v36 = vsel %vm55_vm0, %v4829_v24, 0.0  ;;  %v82_v40 = vsel %vm55_vm0, %v4837_v29, 0.0  ;;  %s4761_s21 = smov 3   ;;  %s4762_s22 = smov 4  }
  0x24   :  { %v69_v37 = vadd.f32 %v68_v17, %v67_v27  ;;  %v74_v38 = vadd.f32 %v73_v31, %v72_v30  ;;  %v79_v39 = vadd.f32 %v78_v35, %v77_v32  ;;  %vm153_vm4 = vcmask 1040384   ;;  %s4763_s23 = smov 5   ;;  %s4764_s24 = smov 6  }
  0x25   :  { %v84_v41 = vmul.f32 0.25, %v62_v33  ;;  %vm156_vm5 = vcmask 1041408   ;;  %v88_v42 = vsel %vm55_vm0, %v39_v0, -inf  ;;  %v89_v46 = vsel %vm55_vm0, %v41_v2, -inf  ;;  %s4569_s25 = sld [smem:[#allocation6 + $0x1]]  ;;  %s4765_s27 = smov 127  }
  0x26   :  { %v85_v43 = vmul.f32 0.25, %v69_v37  ;;  %v76_v44 = vadd.f32 %v75_v34, %v74_v38  ;;  %v81_v45 = vadd.f32 %v80_v36, %v79_v39  ;;  %v90_v50 = vmax.f32 %v88_v42, %v89_v46  ;;  %s4570_s26 = sld [smem:[#allocation6 + $0x8]]  ;;  %s4766_s7 = smov 126  }
  0x27   :  { %v129_v47 = vrot.slane %v84_v41, 5  ;;  %v118_v48 = vrot.slane %v84_v41, 7  ;;  %v122_v49 = vrot.slane %v84_v41, 6  ;;  %v91_v58 = vsel %vm55_vm0, %v43_v4, -inf  ;;  %s4571_s28 = sld [smem:[#allocation6 + $0xf]]  ;;  %s4767_s17 = smov 125  }
  0x28   :  { %v130_v51 = vrot.slane %v85_v43, 5  ;;  %v141_v52 = vrot.slane %v85_v43, 4  ;;  %v145_v53 = vrot.slane %v85_v43, 3  ;;  %v149_v54 = vrot.slane %v85_v43, 2  ;;  %s4572_s29 = sld [smem:[#allocation6 + $0x16]] }
  0x29   :  { %v83_v55 = vadd.f32 %v82_v40, %v81_v45  ;;  %v86_v56 = vmul.f32 0.25, %v76_v44  ;;  %v154_v57 = vsel %vm153_vm4, %v84_v41, %v118_v48  ;;  %v92_v62 = vmax.f32 %v90_v50, %v91_v58  ;;  %s4573_s30 = sld [smem:[#allocation6 + $0x1d]] }
  0x2a   :  { %v4856_v59 = vsel %vm128_vm1, %v129_v47, %v130_v51  ;;  %v161_v60 = vsel %vm128_vm1, %v130_v51, %v141_v52  ;;  %v157_v61 = vsel %vm156_vm5, %v154_v57, %v122_v49  ;;  %v93_v11 = vsel %vm55_vm0, %v4806_v9, -inf  ;;  %s4574_s3 = sld [smem:[#allocation6 + $0x24]] }
  0x2b   :  { %193 = vrot.lane.b32.xlu1 %v4856_v59, %s4759_s0  ;;  %175 = vrot.lane.b32.xlu0 %v4856_v59, %s4760_s20  ;;  %v164_v63 = vsel %vm163_vm2, %v161_v60, %v145_v53  ;;  %v87_v0 = vmul.f32 0.25, %v83_v55  ;;  %v132_v2 = vrot.slane %v86_v56, 5  ;;  %v119_v4 = vrot.slane %v86_v56, 7  ;;  %s4575_s4 = sld [smem:[#allocation6 + $0x2b]] }
  0x2c   :  { %v4866_v6 = vsel %vm166_vm3, %v164_v63, %v149_v54  ;;  %v123_v7 = vrot.slane %v86_v56, 6  ;;  %v4869_v8 = vsel %vm128_vm1, %v157_v61, %v129_v47  ;;  %v94_v21 = vmax.f32 %v92_v62, %v93_v11  ;;  %s4576_s5 = sld [smem:[#allocation6 + $0x2]] }
  0x2d   :  { %v133_v12 = vrot.slane %v87_v0, 5  ;;  %v155_v13 = vsel %vm153_vm4, %v86_v56, %v119_v4  ;;  %v142_v14 = vrot.slane %v87_v0, 4  ;;  %v146_v15 = vrot.slane %v87_v0, 3  ;;  %s4577_s6 = sld [smem:[#allocation6 + $0x9]] }
  0x2e   :  { %v158_v16 = vsel %vm156_vm5, %v155_v13, %v123_v7  ;;  %v150_v17 = vrot.slane %v87_v0, 2  ;;  %v95_v25 = vsel %vm55_vm0, %v4796_v1, -inf  ;;  %v96_v30 = vsel %vm55_vm0, %v4798_v3, -inf  ;;  %s4578_s8 = sld [smem:[#allocation6 + $0x10]] }
  0x2f   :  { %177 = vrot.lane.b32.xlu1 %v4866_v6, %s4760_s20  ;;  %v4880_v26 = vsel %vm128_vm1, %v132_v2, %v133_v12  ;;  %v4883_v9 = vsel %vm128_vm1, %v158_v16, %v132_v2  ;;  %v162_v27 = vsel %vm128_vm1, %v133_v12, %v142_v14  ;;  %v97_v1 = vmax.f32 %v95_v25, %v96_v30  ;;  %s4579_s9 = sld [smem:[#allocation6 + $0x17]] }
  0x30   :  { %181 = vrot.lane.b32.xlu0 %v4880_v26, %s4760_s20  ;;  %v165_v31 = vsel %vm163_vm2, %v162_v27, %v146_v15  ;;  %v98_v32 = vsel %vm55_vm0, %v4800_v5, -inf  ;;  %v100_v33 = vsel %vm55_vm0, %v4808_v10, -inf  ;;  %v335_v35 = vrot.slane %v94_v21, 5  ;;  %s4580_s10 = sld [smem:[#allocation6 + $0x1e]] }
  0x31   :  { %v4896_v34 = vsel %vm166_vm3, %v165_v31, %v150_v17  ;;  %v325_v36 = vrot.slane %v94_v21, 7  ;;  %v329_v37 = vrot.slane %v94_v21, 6  ;;  %v99_v38 = vmax.f32 %v97_v1, %v98_v32  ;;  %s4581_s11 = sld [smem:[#allocation6 + $0x25]] }
  0x32   :  { %v102_v3 = vsel %vm55_vm0, %v4819_v18, -inf  ;;  %v103_v39 = vsel %vm55_vm0, %v4823_v20, -inf  ;;  %v105_v40 = vsel %vm55_vm0, %v4827_v23, -inf  ;;  %v107_v41 = vsel %vm55_vm0, %v4835_v28, -inf  ;;  %s4582_s12 = sld [smem:[#allocation6 + $0x2c]] }
  0x33   :  { %179 = vrot.lane.b32.xlu1 %v4883_v9, %s4760_s20  ;;  %v359_v5 = vsel %vm153_vm4, %v94_v21, %v325_v36  ;;  %v104_v10 = vmax.f32 %v102_v3, %v103_v39  ;;  %v109_v42 = vsel %vm55_vm0, %v4821_v19, -inf  ;;  %v101_v18 = vmax.f32 %v99_v38, %v100_v33  ;;  %s4583_s13 = sld [smem:[#allocation6 + $0x3]] }
  0x34   :  { %173 = vrot.lane.b32.xlu0 %v4869_v8, %s4760_s20  ;;  %v361_v20 = vsel %vm156_vm5, %v359_v5, %v329_v37  ;;  %v110_v23 = vsel %vm55_vm0, %v4825_v22, -inf  ;;  %v112_v43 = vsel %vm55_vm0, %v4829_v24, -inf  ;;  %v114_v22 = vsel %vm55_vm0, %v4837_v29, -inf  ;;  %s4584_s14 = sld [smem:[#allocation6 + $0xa]] }
  0x35   :  { %v4919_v44 = vsel %vm128_vm1, %v361_v20, %v335_v35  ;;  %v106_v45 = vmax.f32 %v104_v10, %v105_v40  ;;  %v111_v28 = vmax.f32 %v109_v42, %v110_v23  ;;  %v336_v46 = vrot.slane %v101_v18, 5  ;;  %s4585_s18 = sld [smem:[#allocation6 + $0x11]] }
  0x36   :  { %v347_v47 = vrot.slane %v101_v18, 4  ;;  %v351_v19 = vrot.slane %v101_v18, 3  ;;  %v355_v48 = vrot.slane %v101_v18, 2  ;;  %vm281_vm6 = vcmask 7168   ;;  %s4586_s19 = sld [smem:[#allocation6 + $0x18]] }
  0x37   :  { %183 = vrot.lane.b32.xlu1 %v4896_v34, %s4760_s20  ;;  %v108_v49 = vmax.f32 %v106_v45, %v107_v41  ;;  %v113_v50 = vmax.f32 %v111_v28, %v112_v43  ;;  %v4928_v24 = vsel %vm128_vm1, %v335_v35, %v336_v46  ;;  %vm288_vm7 = vcmask 15360   ;;  %s4587_s1 = sld [smem:[#allocation6 + $0x1f]] }
  0x38   :  { %191 = vrot.lane.b32.xlu0 %v4869_v8, %s4759_s0  ;;  %v365_v51 = vsel %vm128_vm1, %v336_v46, %v347_v47  ;;  %vm295_vm8 = vcmask 23552   ;;  %vm302_vm9 = vcmask 154624   ;;  %vm309_vm10 = vcmask 162816  }
  0x39   :  { %v326_v52 = vrot.slane %v108_v49, 7  ;;  %v330_v53 = vrot.slane %v108_v49, 6  ;;  %v338_v54 = vrot.slane %v108_v49, 5  ;;  %v367_v55 = vsel %vm163_vm2, %v365_v51, %v351_v19 }
  0x3a   :  { %v4933_v56 = vsel %vm166_vm3, %v367_v55, %v355_v48  ;;  %v115_v57 = vmax.f32 %v113_v50, %v114_v22  ;;  %vm316_vm11 = vcmask 171008   ;;  %v676_v50 = vstv %s4569_s25  ;;  %s4593_s25 = sld [smem:[#allocation6 + $0x19]] }
  0x3b   :  { %197 = vrot.lane.b32.xlu1 %v4883_v9, %s4759_s0  ;;  %v360_v29 = vsel %vm153_vm4, %v108_v49, %v326_v52  ;;  %vm2409_vm12 = vcmask 1045504   ;;  %vm4446_vm13 = vcmask 1046528  }
  0x3c   :  { %195 = vrot.lane.b32.xlu0 %v4866_v6, %s4759_s0  ;;  %v362_v58 = vsel %vm156_vm5, %v360_v29, %v330_v53  ;;  %v339_v60 = vrot.slane %v115_v57, 5  ;;  %v348_v61 = vrot.slane %v115_v57, 4  ;;  %v352_v62 = vrot.slane %v115_v57, 3 }
  0x3d   :  { %v4942_v63 = vsel %vm128_vm1, %v362_v58, %v338_v54  ;;  %v356_v0 = vrot.slane %v115_v57, 2 }
  0x3e   :  { %v366_v2 = vsel %vm128_vm1, %v339_v60, %v348_v61  ;;  %v4946_v4 = vsel %vm128_vm1, %v338_v54, %v339_v60 }
  0x3f   :  { %201 = vrot.lane.b32.xlu1 %v4896_v34, %s4759_s0  ;;  %v368_v7 = vsel %vm163_vm2, %v366_v2, %v352_v62 }
  0x40   :  { %199 = vrot.lane.b32.xlu0 %v4880_v26, %s4759_s0  ;;  %v4954_v11 = vsel %vm166_vm3, %v368_v7, %v356_v0 }
  0x43   :  { %211 = vrot.lane.b32.xlu1 %v4856_v59, %s4761_s21 }
  0x44   :  { %209 = vrot.lane.b32.xlu0 %v4869_v8, %s4761_s21 }
  0x47   :  { %215 = vrot.lane.b32.xlu1 %v4883_v9, %s4761_s21 }
  0x48   :  { %213 = vrot.lane.b32.xlu0 %v4866_v6, %s4761_s21 }
  0x4b   :  { %219 = vrot.lane.b32.xlu1 %v4896_v34, %s4761_s21 }
  0x4c   :  { %217 = vrot.lane.b32.xlu0 %v4880_v26, %s4761_s21 }
  0x4f   :  { %229 = vrot.lane.b32.xlu1 %v4856_v59, %s4762_s22 }
  0x50   :  { %227 = vrot.lane.b32.xlu0 %v4869_v8, %s4762_s22 }
  0x53   :  { %233 = vrot.lane.b32.xlu1 %v4883_v9, %s4762_s22 }
  0x54   :  { %231 = vrot.lane.b32.xlu0 %v4866_v6, %s4762_s22 }
  0x57   :  { %237 = vrot.lane.b32.xlu1 %v4896_v34, %s4762_s22 }
  0x58   :  { %235 = vrot.lane.b32.xlu0 %v4880_v26, %s4762_s22 }
  0x5b   :  { %247 = vrot.lane.b32.xlu1 %v4856_v59, %s4763_s23 }
  0x5c   :  { %245 = vrot.lane.b32.xlu0 %v4869_v8, %s4763_s23 }
  0x5f   :  { %251 = vrot.lane.b32.xlu1 %v4883_v9, %s4763_s23 }
  0x60   :  { %249 = vrot.lane.b32.xlu0 %v4866_v6, %s4763_s23 }
  0x63   :  { %255 = vrot.lane.b32.xlu1 %v4896_v34, %s4763_s23 }
  0x64   :  { %253 = vrot.lane.b32.xlu0 %v4880_v26, %s4763_s23 }
  0x67   :  { %265 = vrot.lane.b32.xlu1 %v4856_v59, %s4764_s24 }
  0x68   :  { %263 = vrot.lane.b32.xlu0 %v4869_v8, %s4764_s24 }
  0x6b   :  { %269 = vrot.lane.b32.xlu1 %v4883_v9, %s4764_s24 }
  0x6c   :  { %267 = vrot.lane.b32.xlu0 %v4866_v6, %s4764_s24 }
  0x6f   :  { %273 = vrot.lane.b32.xlu1 %v4896_v34, %s4764_s24 }
  0x70   :  { %271 = vrot.lane.b32.xlu0 %v4880_v26, %s4764_s24 }
  0x73   :  { %377 = vrot.lane.b32.xlu1 %v4928_v24, %s4760_s20 }
  0x74   :  { %375 = vrot.lane.b32.xlu0 %v4919_v44, %s4760_s20 }
  0x77   :  { %381 = vrot.lane.b32.xlu1 %v4942_v63, %s4760_s20 }
  0x78   :  { %379 = vrot.lane.b32.xlu0 %v4933_v56, %s4760_s20 }
  0x7b   :  { %385 = vrot.lane.b32.xlu1 %v4954_v11, %s4760_s20 }
  0x7c   :  { %383 = vrot.lane.b32.xlu0 %v4946_v4, %s4760_s20  ;;  %s4589_s20 = sld [smem:[#allocation6 + $0x2d]] }
  0x7f   :  { %395 = vrot.lane.b32.xlu1 %v4928_v24, %s4759_s0 }
  0x80   :  { %393 = vrot.lane.b32.xlu0 %v4919_v44, %s4759_s0 }
  0x83   :  { %399 = vrot.lane.b32.xlu1 %v4942_v63, %s4759_s0 }
  0x84   :  { %397 = vrot.lane.b32.xlu0 %v4933_v56, %s4759_s0 }
  0x87   :  { %403 = vrot.lane.b32.xlu1 %v4954_v11, %s4759_s0 }
  0x88   :  { %401 = vrot.lane.b32.xlu0 %v4946_v4, %s4759_s0  ;;  %s4588_s0 = sld [smem:[#allocation6 + $0x26]] }
  0x8b   :  { %413 = vrot.lane.b32.xlu1 %v4928_v24, %s4761_s21 }
  0x8c   :  { %411 = vrot.lane.b32.xlu0 %v4919_v44, %s4761_s21 }
  0x8f   :  { %417 = vrot.lane.b32.xlu1 %v4942_v63, %s4761_s21 }
  0x90   :  { %415 = vrot.lane.b32.xlu0 %v4933_v56, %s4761_s21 }
  0x93   :  { %421 = vrot.lane.b32.xlu1 %v4954_v11, %s4761_s21 }
  0x94   :  { %419 = vrot.lane.b32.xlu0 %v4946_v4, %s4761_s21  ;;  %s4590_s21 = sld [smem:[#allocation6 + $0x4]] }
  0x97   :  { %431 = vrot.lane.b32.xlu1 %v4928_v24, %s4762_s22 }
  0x98   :  { %429 = vrot.lane.b32.xlu0 %v4919_v44, %s4762_s22 }
  0x9b   :  { %435 = vrot.lane.b32.xlu1 %v4942_v63, %s4762_s22 }
  0x9c   :  { %433 = vrot.lane.b32.xlu0 %v4933_v56, %s4762_s22 }
  0x9d   :  { %v194_v12 = vpop.permute.xlu1 %193  ;;  %v176_v13 = vpop.permute.xlu0 %175 }
  0x9e   :  { %v283_v43 = vsel %vm281_vm6, %v4856_v59, %v176_v13 }
  0x9f   :  { %439 = vrot.lane.b32.xlu1 %v4954_v11, %s4762_s22  ;;  %v290_v46 = vsel %vm288_vm7, %v283_v43, %v194_v12 }
  0xa0   :  { %437 = vrot.lane.b32.xlu0 %v4946_v4, %s4762_s22  ;;  %s4591_s22 = sld [smem:[#allocation6 + $0xb]] }
  0xa1   :  { %v5052_v14 = vpop.permute.xlu1 %177 }
  0xa2   :  { %v5054_v15 = vpop.permute.xlu0 %181 }
  0xa3   :  { %449 = vrot.lane.b32.xlu1 %v4928_v24, %s4763_s23  ;;  %v286_v2 = vsel %vm281_vm6, %v4880_v26, %v5054_v15  ;;  %v702_v15 = vstv %s4570_s26  ;;  %s4594_s26 = sld [smem:[#allocation6 + $0x20]] }
  0xa4   :  { %447 = vrot.lane.b32.xlu0 %v4919_v44, %s4763_s23 }
  0xa5   :  { %v180_v16 = vpop.permute.xlu1 %179 }
  0xa6   :  { %v174_v17 = vpop.permute.xlu0 %173  ;;  %v285_v22 = vsel %vm281_vm6, %v4883_v9, %v180_v16 }
  0xa7   :  { %453 = vrot.lane.b32.xlu1 %v4942_v63, %s4763_s23  ;;  %v282_v28 = vsel %vm281_vm6, %v4869_v8, %v174_v17  ;;  %v284_v17 = vsel %vm281_vm6, %v4866_v6, %v5052_v14 }
  0xa8   :  { %451 = vrot.lane.b32.xlu0 %v4933_v56, %s4763_s23 }
  0xa9   :  { %v5064_v21 = vpop.permute.xlu1 %183 }
  0xaa   :  { %v192_v25 = vpop.permute.xlu0 %191 }
  0xab   :  { %457 = vrot.lane.b32.xlu1 %v4954_v11, %s4763_s23  ;;  %v289_v19 = vsel %vm288_vm7, %v282_v28, %v192_v25  ;;  %v740_v28 = vstv %s4571_s28  ;;  %s4595_s28 = sld [smem:[#allocation6 + $0x27]] }
  0xac   :  { %455 = vrot.lane.b32.xlu0 %v4946_v4, %s4763_s23  ;;  %s4768_s23 = smov 124  }
  0xad   :  { %v198_v27 = vpop.permute.xlu1 %197 }
  0xae   :  { %v5070_v30 = vpop.permute.xlu0 %195  ;;  %v292_v53 = vsel %vm288_vm7, %v285_v22, %v198_v27 }
  0xaf   :  { %467 = vrot.lane.b32.xlu1 %v4928_v24, %s4764_s24  ;;  %v291_v27 = vsel %vm288_vm7, %v284_v17, %v5070_v30 }
  0xb0   :  { %465 = vrot.lane.b32.xlu0 %v4919_v44, %s4764_s24 }
  0xb1   :  { %v5076_v31 = vpop.permute.xlu1 %201 }
  0xb2   :  { %v200_v1 = vpop.permute.xlu0 %199 }
  0xb3   :  { %471 = vrot.lane.b32.xlu1 %v4942_v63, %s4764_s24  ;;  %v293_v13 = vsel %vm288_vm7, %v286_v2, %v200_v1 }
  0xb4   :  { %469 = vrot.lane.b32.xlu0 %v4933_v56, %s4764_s24 }
  0xb5   :  { %v212_v32 = vpop.permute.xlu1 %211 }
  0xb6   :  { %v210_v33 = vpop.permute.xlu0 %209  ;;  %v297_v48 = vsel %vm295_vm8, %v290_v46, %v212_v32 }
  0xb7   :  { %475 = vrot.lane.b32.xlu1 %v4954_v11, %s4764_s24  ;;  %v296_v49 = vsel %vm295_vm8, %v289_v19, %v210_v33 }
  0xb8   :  { %473 = vrot.lane.b32.xlu0 %v4946_v4, %s4764_s24  ;;  %s4592_s24 = sld [smem:[#allocation6 + $0x12]] }
  0xb9   :  { %v216_v35 = vpop.permute.xlu1 %215 }
  0xba   :  { %v214_v36 = vpop.permute.xlu0 %213  ;;  %v299_v29 = vsel %vm295_vm8, %v292_v53, %v216_v35 }
  0xbb   :  { %v298_v32 = vsel %vm295_vm8, %v291_v27, %v214_v36 }
  0xbd   :  { %v5086_v37 = vpop.permute.xlu1 %219 }
  0xbe   :  { %v218_v38 = vpop.permute.xlu0 %217 }
  0xbf   :  { %v300_v25 = vsel %vm295_vm8, %v293_v13, %v218_v38  ;;  %v856_v13 = vstv %s4574_s3  ;;  %s4598_s3 = sld [smem:[#allocation6 + $0xc]] }
  0xc1   :  { %v230_v3 = vpop.permute.xlu1 %229 }
  0xc2   :  { %v228_v39 = vpop.permute.xlu0 %227  ;;  %v304_v59 = vsel %vm302_vm9, %v297_v48, %v230_v3 }
  0xc3   :  { %v303_v51 = vsel %vm302_vm9, %v296_v49, %v228_v39 }
  0xc5   :  { %v234_v40 = vpop.permute.xlu1 %233 }
  0xc6   :  { %v232_v5 = vpop.permute.xlu0 %231  ;;  %v306_v60 = vsel %vm302_vm9, %v299_v29, %v234_v40  ;;  %v287_v40 = vsel %vm281_vm6, %v4896_v34, %v5064_v21 }
  0xc7   :  { %v305_v35 = vsel %vm302_vm9, %v298_v32, %v232_v5 }
  0xc9   :  { %v5088_v10 = vpop.permute.xlu1 %237 }
  0xca   :  { %v236_v41 = vpop.permute.xlu0 %235 }
  0xcb   :  { %v307_v26 = vsel %vm302_vm9, %v300_v25, %v236_v41 }
  0xcd   :  { %v248_v42 = vpop.permute.xlu1 %247 }
  0xce   :  { %v246_v18 = vpop.permute.xlu0 %245  ;;  %v311_v8 = vsel %vm309_vm10, %v304_v59, %v248_v42  ;;  %v294_v42 = vsel %vm288_vm7, %v287_v40, %v5076_v31 }
  0xcf   :  { %v310_v54 = vsel %vm309_vm10, %v303_v51, %v246_v18  ;;  %v301_v18 = vsel %vm295_vm8, %v294_v42, %v5086_v37  ;;  %v778_v51 = vstv %s4572_s29  ;;  %s4596_s29 = sld [smem:[#allocation6 + $0x2e]] }
  0xd1   :  { %v252_v20 = vpop.permute.xlu1 %251 }
  0xd2   :  { %v250_v23 = vpop.permute.xlu0 %249  ;;  %v313_v62 = vsel %vm309_vm10, %v306_v60, %v252_v20 }
  0xd3   :  { %v312_v6 = vsel %vm309_vm10, %v305_v35, %v250_v23  ;;  %v308_v23 = vsel %vm302_vm9, %v301_v18, %v5088_v10 }
  0xd5   :  { %v5092_v45 = vpop.permute.xlu1 %255 }
  0xd6   :  { %v254_v47 = vpop.permute.xlu0 %253  ;;  %v315_v34 = vsel %vm309_vm10, %v308_v23, %v5092_v45 }
  0xd7   :  { %v314_v33 = vsel %vm309_vm10, %v307_v26, %v254_v47 }
  0xd9   :  { %v266_v52 = vpop.permute.xlu1 %265 }
  0xda   :  { %v5108_v55 = vsel %vm316_vm11, %v311_v8, %v266_v52  ;;  %v264_v57 = vpop.permute.xlu0 %263 }
  0xdb   :  { %v5112_v58 = vsel %vm316_vm11, %v310_v54, %v264_v57  ;;  %v678_v9 = vmul.f32 %v676_v50, %v5108_v55  ;;  %v704_v41 = vmul.f32 %v702_v15, %v5108_v55  ;;  %v742_v48 = vmul.f32 %v740_v28, %v5108_v55 }
  0xdc   :  { %v677_v61 = vmul.f32 %v676_v50, %v5112_v58  ;;  %v703_v30 = vmul.f32 %v702_v15, %v5112_v58  ;;  %v741_v10 = vmul.f32 %v740_v28, %v5112_v58  ;;  %v779_v52 = vmul.f32 %v778_v51, %v5112_v58 }
  0xdd   :  { %v270_v0 = vpop.permute.xlu1 %269  ;;  %687 = vrot.lane.b32.xlu1 %v678_v9, %s4765_s27  ;;  %v816_v57 = vstv %s4573_s30  ;;  %v780_v9 = vmul.f32 %v778_v51, %v5108_v55  ;;  %s4597_s30 = sld [smem:[#allocation6 + $0x5]] }
  0xde   :  { %v5123_v7 = vsel %vm316_vm11, %v313_v62, %v270_v0  ;;  %685 = vrot.lane.b32.xlu0 %v677_v61, %s4765_s27  ;;  %v268_v12 = vpop.permute.xlu0 %267  ;;  %v817_v60 = vmul.f32 %v816_v57, %v5112_v58  ;;  %v818_v61 = vmul.f32 %v816_v57, %v5108_v55 }
  0xdf   :  { %v679_v16 = vmul.f32 %v676_v50, %v5123_v7  ;;  %v5146_v39 = vsel %vm316_vm11, %v312_v6, %v268_v12  ;;  %v706_v31 = vmul.f32 %v702_v15, %v5123_v7  ;;  %v744_v22 = vmul.f32 %v740_v28, %v5123_v7 }
  0xe0   :  { %v705_v5 = vmul.f32 %v702_v15, %v5146_v39  ;;  %v743_v19 = vmul.f32 %v740_v28, %v5146_v39  ;;  %v781_v29 = vmul.f32 %v778_v51, %v5146_v39  ;;  %v782_v12 = vmul.f32 %v778_v51, %v5123_v7 }
  0xe1   :  { %v274_v14 = vpop.permute.xlu1 %273  ;;  %v830_v17 = vrot.slane %v818_v61, 4  ;;  %v819_v27 = vmul.f32 %v816_v57, %v5146_v39  ;;  %v820_v26 = vmul.f32 %v816_v57, %v5123_v7 }
  0xe2   :  { %689 = vrot.lane.b32.xlu0 %v679_v16, %s4765_s27  ;;  %v272_v1 = vpop.permute.xlu0 %271  ;;  %v5174_v37 = vsel %vm316_vm11, %v315_v34, %v274_v14  ;;  %v829_v16 = vrot.slane %v817_v60, 4  ;;  %v859_v34 = vmul.f32 %v856_v13, %v5146_v39 }
  0xe3   :  { %v5140_v3 = vsel %vm316_vm11, %v314_v33, %v272_v1  ;;  %v708_v45 = vmul.f32 %v702_v15, %v5174_v37  ;;  %v746_v53 = vmul.f32 %v740_v28, %v5174_v37  ;;  %v784_v32 = vmul.f32 %v778_v51, %v5174_v37 }
  0xe4   :  { %v680_v38 = vmul.f32 %v676_v50, %v5140_v3  ;;  %v707_v43 = vmul.f32 %v702_v15, %v5140_v3  ;;  %v745_v50 = vmul.f32 %v740_v28, %v5140_v3  ;;  %v783_v2 = vmul.f32 %v778_v51, %v5140_v3 }
  0xe5   :  { %v5161_v20 = vpop.permute.xlu1 %377  ;;  %v821_v25 = vmul.f32 %v816_v57, %v5140_v3  ;;  %v857_v33 = vmul.f32 %v856_v13, %v5112_v58  ;;  %v858_v1 = vmul.f32 %v856_v13, %v5108_v55  ;;  %v831_v35 = vsel %vm163_vm2, %v829_v16, %v830_v17 }
  0xe6   :  { %715 = vrot.lane.b32.xlu0 %v703_v30, %s4765_s27  ;;  %691 = vrot.lane.b32.xlu1 %v680_v38, %s4765_s27  ;;  %v5150_v36 = vpop.permute.xlu0 %375  ;;  %v832_v14 = vrot.slane %v819_v27, 4  ;;  %v822_v30 = vmul.f32 %v816_v57, %v5174_v37  ;;  %v834_v40 = vrot.slane %v820_v26, 4 }
  0xe7   :  { %v835_v6 = vrot.slane %v821_v25, 4 }
  0xe8   :  { %v833_v18 = vsel %vm163_vm2, %v830_v17, %v832_v14  ;;  %v837_v23 = vrot.slane %v822_v30, 4 }
  0xe9   :  { %v5178_v46 = vpop.permute.xlu1 %381  ;;  %v836_v42 = vsel %vm163_vm2, %v834_v40, %v835_v6 }
  0xea   :  { %719 = vrot.lane.b32.xlu0 %v705_v5, %s4765_s27  ;;  %717 = vrot.lane.b32.xlu1 %v704_v41, %s4765_s27  ;;  %v5169_v21 = vpop.permute.xlu0 %379  ;;  %v869_v5 = vrot.slane %v857_v33, 4  ;;  %v870_v41 = vrot.slane %v858_v1, 4 }
  0xec   :  { %v871_v28 = vsel %vm163_vm2, %v869_v5, %v870_v41 }
  0xed   :  { %v5188_v49 = vpop.permute.xlu1 %385 }
  0xee   :  { %723 = vrot.lane.b32.xlu0 %v707_v43, %s4765_s27  ;;  %721 = vrot.lane.b32.xlu1 %v706_v31, %s4765_s27  ;;  %v5182_v47 = vpop.permute.xlu0 %383 }
  0xf1   :  { %v5198_v8 = vpop.permute.xlu1 %395 }
  0xf2   :  { %753 = vrot.lane.b32.xlu0 %v741_v10, %s4765_s27  ;;  %725 = vrot.lane.b32.xlu1 %v708_v45, %s4765_s27  ;;  %v5192_v59 = vpop.permute.xlu0 %393  ;;  %v904_v10 = vstv %s4575_s4  ;;  %v838_v45 = vsel %vm163_vm2, %v835_v6, %v837_v23  ;;  %v952_v23 = vstv %s4576_s5  ;;  %s4769_s4 = smov 123   ;;  %s4599_s5 = sld [smem:[#allocation6 + $0x13]] }
  0xf3   :  { %v907_v17 = vmul.f32 %v904_v10, %v5146_v39  ;;  %v909_v33 = vmul.f32 %v904_v10, %v5140_v3  ;;  %v910_v1 = vmul.f32 %v904_v10, %v5174_v37 }
  0xf5   :  { %v5210_v62 = vpop.permute.xlu1 %399  ;;  %v923_v30 = vrot.slane %v909_v33, 4  ;;  %v925_v40 = vrot.slane %v910_v1, 4 }
  0xf6   :  { %757 = vrot.lane.b32.xlu0 %v743_v19, %s4765_s27  ;;  %755 = vrot.lane.b32.xlu1 %v742_v48, %s4765_s27  ;;  %v5202_v54 = vpop.permute.xlu0 %397  ;;  %v872_v19 = vrot.slane %v859_v34, 4  ;;  %v861_v48 = vmul.f32 %v856_v13, %v5140_v3 }
  0xf8   :  { %v875_v57 = vrot.slane %v861_v48, 4  ;;  %v954_v48 = vmul.f32 %v952_v23, %v5108_v55 }
  0xf9   :  { %v5223_v15 = vpop.permute.xlu1 %403 }
  0xfa   :  { %761 = vrot.lane.b32.xlu0 %v745_v50, %s4765_s27  ;;  %759 = vrot.lane.b32.xlu1 %v744_v22, %s4765_s27  ;;  %v5214_v0 = vpop.permute.xlu0 %401  ;;  %v862_v50 = vmul.f32 %v856_v13, %v5174_v37  ;;  %v860_v22 = vmul.f32 %v856_v13, %v5123_v7 }
  0xfc   :  { %v874_v61 = vrot.slane %v860_v22, 4 }
  0xfd   :  { %v5237_v43 = vpop.permute.xlu1 %413 }
  0xfe   :  { %791 = vrot.lane.b32.xlu0 %v779_v52, %s4765_s27  ;;  %763 = vrot.lane.b32.xlu1 %v746_v53, %s4765_s27  ;;  %v5230_v38 = vpop.permute.xlu0 %411  ;;  %v905_v52 = vmul.f32 %v904_v10, %v5112_v58  ;;  %v873_v53 = vsel %vm163_vm2, %v870_v41, %v872_v19  ;;  %v876_v13 = vsel %vm163_vm2, %v874_v61, %v875_v57 }
 0x101   :  { %v5250_v51 = vpop.permute.xlu1 %417 }
 0x102   :  { %795 = vrot.lane.b32.xlu0 %v781_v29, %s4765_s27  ;;  %793 = vrot.lane.b32.xlu1 %v780_v9, %s4765_s27  ;;  %v5241_v31 = vpop.permute.xlu0 %415  ;;  %v877_v29 = vrot.slane %v862_v50, 4  ;;  %v906_v9 = vmul.f32 %v904_v10, %v5108_v55  ;;  %v978_v50 = vstv %s4577_s6  ;;  %s4600_s6 = sld [smem:[#allocation6 + $0x1a]] }
 0x103   :  { %v980_v61 = vmul.f32 %v978_v50, %v5108_v55 }
 0x104   :  { %v918_v16 = vrot.slane %v906_v9, 4  ;;  %v981_v9 = vmul.f32 %v978_v50, %v5146_v39 }
 0x105   :  { %v5262_v25 = vpop.permute.xlu1 %421 }
 0x106   :  { %799 = vrot.lane.b32.xlu0 %v783_v2, %s4765_s27  ;;  %797 = vrot.lane.b32.xlu1 %v782_v12, %s4765_s27  ;;  %v5255_v60 = vpop.permute.xlu0 %419  ;;  %v917_v2 = vrot.slane %v905_v52, 4  ;;  %v878_v12 = vsel %vm163_vm2, %v875_v57, %v877_v29  ;;  %8858 = vst [vmem:[#allocation11_spill] sm:$0xff] %v5262_v25  ;;  %v979_v52 = vmul.f32 %v978_v50, %v5112_v58 }
 0x108   :  { %v919_v26 = vsel %vm163_vm2, %v917_v2, %v918_v16 }
 0x109   :  { %v5274_v6 = vpop.permute.xlu1 %431 }
 0x10a   :  { %839 = vrot.lane.b32.xlu0 %v831_v35, %s4765_s27  ;;  %801 = vrot.lane.b32.xlu1 %v784_v32, %s4765_s27  ;;  %v5266_v27 = vpop.permute.xlu0 %429  ;;  %v920_v32 = vrot.slane %v907_v17, 4  ;;  %v908_v35 = vmul.f32 %v904_v10, %v5123_v7  ;;  %v953_v10 = vmul.f32 %v952_v23, %v5112_v58 }
 0x10c   :  { %v921_v14 = vsel %vm163_vm2, %v918_v16, %v920_v32  ;;  %v922_v41 = vrot.slane %v908_v35, 4  ;;  %v1016_v16 = vstv %s4578_s8  ;;  %s4601_s8 = sld [smem:[#allocation6 + $0x21]] }
 0x10d   :  { %v5283_v34 = vpop.permute.xlu1 %435  ;;  %v1019_v35 = vmul.f32 %v1016_v16, %v5146_v39 }
 0x10e   :  { %843 = vrot.lane.b32.xlu0 %v836_v42, %s4765_s27  ;;  %841 = vrot.lane.b32.xlu1 %v833_v18, %s4765_s27  ;;  %v5277_v5 = vpop.permute.xlu0 %433  ;;  %v926_v42 = vsel %vm163_vm2, %v923_v30, %v925_v40  ;;  %v924_v18 = vsel %vm163_vm2, %v922_v41, %v923_v30  ;;  %v1020_v41 = vmul.f32 %v1016_v16, %v5123_v7 }
 0x112   :  { %879 = vrot.lane.b32.xlu0 %v871_v28, %s4765_s27  ;;  %845 = vrot.lane.b32.xlu1 %v838_v45, %s4765_s27  ;;  %v5287_v28 = vpop.permute.xlu0 %437  ;;  %v5292_v45 = vpop.permute.xlu1 %439 }
 0x113   :  { %8859 = vst [vmem:[#allocation12_spill] sm:$0xff] %v5292_v45 }
 0x116   :  { %883 = vrot.lane.b32.xlu0 %v872_v19, %s4765_s27  ;;  %881 = vrot.lane.b32.xlu1 %v873_v53, %s4765_s27  ;;  %v955_v19 = vmul.f32 %v952_v23, %v5123_v7  ;;  %v5296_v22 = vpop.permute.xlu0 %447  ;;  %v956_v53 = vmul.f32 %v952_v23, %v5140_v3  ;;  %v5302_v57 = vpop.permute.xlu1 %449 }
 0x11a   :  { %887 = vrot.lane.b32.xlu0 %v878_v12, %s4765_s27  ;;  %885 = vrot.lane.b32.xlu1 %v876_v13, %s4765_s27  ;;  %v5312_v2 = vpop.permute.xlu1 %453  ;;  %v983_v12 = vmul.f32 %v978_v50, %v5140_v3  ;;  %v982_v13 = vmul.f32 %v978_v50, %v5123_v7 }
 0x11e   :  { %927 = vrot.lane.b32.xlu0 %v919_v26, %s4765_s27  ;;  %889 = vrot.lane.b32.xlu1 %v877_v29, %s4765_s27  ;;  %v5306_v29 = vpop.permute.xlu0 %451  ;;  %v1017_v26 = vmul.f32 %v1016_v16, %v5112_v58  ;;  %v5322_v33 = vpop.permute.xlu1 %457 }
 0x11f   :  { %8860 = vst [vmem:[#allocation13_spill] sm:$0xff] %v5322_v33 }
 0x122   :  { %931 = vrot.lane.b32.xlu0 %v920_v32, %s4765_s27  ;;  %929 = vrot.lane.b32.xlu1 %v921_v14, %s4765_s27  ;;  %v5316_v17 = vpop.permute.xlu0 %455  ;;  %v984_v32 = vmul.f32 %v978_v50, %v5174_v37  ;;  %v1018_v14 = vmul.f32 %v1016_v16, %v5108_v55  ;;  %v5332_v30 = vpop.permute.xlu1 %467 }
 0x126   :  { %935 = vrot.lane.b32.xlu0 %v926_v42, %s4765_s27  ;;  %933 = vrot.lane.b32.xlu1 %v924_v18, %s4765_s27  ;;  %v5326_v1 = vpop.permute.xlu0 %465  ;;  %v1054_v42 = vstv %s4579_s9  ;;  %s4602_s9 = sld [smem:[#allocation6 + $0x28]] }
 0x127   :  { %v1055_v23 = vmul.f32 %v1054_v42, %v5112_v58 }
 0x12a   :  { %961 = vrot.lane.b32.xlu0 %v953_v10, %s4766_s7  ;;  %937 = vrot.lane.b32.xlu1 %v925_v40, %s4765_s27  ;;  %v1021_v40 = vmul.f32 %v1016_v16, %v5140_v3  ;;  %v5336_v18 = vpop.permute.xlu0 %469  ;;  %v1022_v10 = vmul.f32 %v1016_v16, %v5174_v37  ;;  %v1059_v16 = vmul.f32 %v1054_v42, %v5140_v3 }
 0x12e   :  { %965 = vrot.lane.b32.xlu0 %v955_v19, %s4766_s7  ;;  %963 = vrot.lane.b32.xlu1 %v954_v48, %s4766_s7  ;;  %v5342_v19 = vpop.permute.xlu1 %471  ;;  %v1092_v48 = vstv %s4580_s10  ;;  %v5346_v50 = vpop.permute.xlu0 %473  ;;  %s4603_s10 = sld [smem:[#allocation6 + $0x2f]] }
 0x132   :  { %991 = vrot.lane.b32.xlu0 %v979_v52, %s4766_s7  ;;  %967 = vrot.lane.b32.xlu1 %v956_v53, %s4766_s7  ;;  %v1057_v52 = vmul.f32 %v1054_v42, %v5146_v39  ;;  %v1056_v53 = vmul.f32 %v1054_v42, %v5108_v55 }
 0x136   :  { %995 = vrot.lane.b32.xlu0 %v981_v9, %s4766_s7  ;;  %993 = vrot.lane.b32.xlu1 %v980_v61, %s4766_s7  ;;  %v1093_v9 = vmul.f32 %v1092_v48, %v5112_v58  ;;  %v1094_v61 = vmul.f32 %v1092_v48, %v5108_v55 }
 0x13a   :  { %999 = vrot.lane.b32.xlu0 %v983_v12, %s4766_s7  ;;  %997 = vrot.lane.b32.xlu1 %v982_v13, %s4766_s7  ;;  %v5354_v12 = vpop.permute.xlu1 %475 }
 0x13b   :  { %8861 = vst [vmem:[#allocation14_spill] sm:$0xff] %v5354_v12 }
 0x13e   :  { %1029 = vrot.lane.b32.xlu0 %v1017_v26, %s4766_s7  ;;  %1001 = vrot.lane.b32.xlu1 %v984_v32, %s4766_s7  ;;  %v1058_v26 = vmul.f32 %v1054_v42, %v5123_v7  ;;  %v1095_v32 = vmul.f32 %v1092_v48, %v5146_v39 }
 0x142   :  { %1033 = vrot.lane.b32.xlu0 %v1019_v35, %s4766_s7  ;;  %1031 = vrot.lane.b32.xlu1 %v1018_v14, %s4766_s7  ;;  %v1097_v35 = vmul.f32 %v1092_v48, %v5140_v3  ;;  %v1105_v14 = vrot.slane %v1093_v9, 4  ;;  %v1098_v9 = vmul.f32 %v1092_v48, %v5174_v37 }
 0x144   :  { %v1111_v12 = vrot.slane %v1097_v35, 4  ;;  %v1113_v35 = vrot.slane %v1098_v9, 4 }
 0x146   :  { %1037 = vrot.lane.b32.xlu0 %v1021_v40, %s4766_s7  ;;  %1035 = vrot.lane.b32.xlu1 %v1020_v41, %s4766_s7  ;;  %v1106_v40 = vrot.slane %v1094_v61, 4  ;;  %v1096_v41 = vmul.f32 %v1092_v48, %v5123_v7 }
 0x148   :  { %v1107_v33 = vsel %vm163_vm2, %v1105_v14, %v1106_v40 }
 0x14a   :  { %1067 = vrot.lane.b32.xlu0 %v1055_v23, %s4766_s7  ;;  %1039 = vrot.lane.b32.xlu1 %v1022_v10, %s4766_s7  ;;  %v1132_v23 = vstv %s4581_s11  ;;  %s4604_s11 = sld [smem:[#allocation6 + $0x6]] }
 0x14b   :  { %v1133_v61 = vmul.f32 %v1132_v23, %v5112_v58  ;;  %v1135_v45 = vmul.f32 %v1132_v23, %v5146_v39  ;;  %v1138_v9 = vmul.f32 %v1132_v23, %v5174_v37 }
 0x14d   :  { %v1145_v48 = vrot.slane %v1133_v61, 4  ;;  %v1136_v61 = vmul.f32 %v1132_v23, %v5123_v7 }
 0x14e   :  { %1071 = vrot.lane.b32.xlu0 %v1057_v52, %s4766_s7  ;;  %1069 = vrot.lane.b32.xlu1 %v1056_v53, %s4766_s7  ;;  %v1060_v53 = vmul.f32 %v1054_v42, %v5174_v37 }
 0x14f   :  { %v5365_v10 = vpop.permute.xlu1 %687 }
 0x150   :  { %v5356_v13 = vpop.permute.xlu0 %685  ;;  %8863 = vst [vmem:[#allocation16_spill] sm:$0xff] %v5365_v10 }
 0x151   :  { %8862 = vst [vmem:[#allocation15_spill] sm:$0xff] %v5356_v13  ;;  %v1108_v13 = vrot.slane %v1095_v32, 4 }
 0x152   :  { %1075 = vrot.lane.b32.xlu0 %v1059_v16, %s4766_s7  ;;  %1073 = vrot.lane.b32.xlu1 %v1058_v26, %s4766_s7  ;;  %v1134_v16 = vmul.f32 %v1132_v23, %v5108_v55  ;;  %v1110_v26 = vrot.slane %v1096_v41, 4 }
 0x153   :  { %v1109_v42 = vsel %vm163_vm2, %v1106_v40, %v1108_v13  ;;  %v1148_v40 = vrot.slane %v1135_v45, 4 }
 0x154   :  { %v5367_v52 = vpop.permute.xlu0 %689  ;;  %v1112_v32 = vsel %vm163_vm2, %v1110_v26, %v1111_v12  ;;  %v1146_v14 = vrot.slane %v1134_v16, 4  ;;  %v1180_v16 = vstv %s4582_s12  ;;  %s4605_s12 = sld [smem:[#allocation6 + $0xd]] }
 0x155   :  { %8864 = vst [vmem:[#allocation17_spill] sm:$0xff] %v5367_v52  ;;  %v1182_v45 = vmul.f32 %v1180_v16, %v5108_v55 }
 0x156   :  { %1115 = vrot.lane.b32.xlu0 %v1107_v33, %s4766_s7  ;;  %1077 = vrot.lane.b32.xlu1 %v1060_v53, %s4766_s7  ;;  %v1137_v53 = vmul.f32 %v1132_v23, %v5140_v3  ;;  %v1147_v13 = vsel %vm163_vm2, %v1145_v48, %v1146_v14 }
 0x158   :  { %v5376_v10 = vpop.permute.xlu1 %691  ;;  %v5378_v52 = vpop.permute.xlu0 %715 }
 0x159   :  { %8865 = vst [vmem:[#allocation18_spill] sm:$0xff] %v5376_v10  ;;  %8866 = vst [vmem:[#allocation19_spill] sm:$0xff] %v5378_v52  ;;  %v1114_v52 = vsel %vm163_vm2, %v1111_v12, %v1113_v35  ;;  %v1153_v12 = vrot.slane %v1138_v9, 4  ;;  %v1181_v35 = vmul.f32 %v1180_v16, %v5112_v58  ;;  %v1183_v9 = vmul.f32 %v1180_v16, %v5146_v39 }
 0x15a   :  { %1117 = vrot.lane.b32.xlu1 %v1109_v42, %s4766_s7  ;;  %1119 = vrot.lane.b32.xlu0 %v1112_v32, %s4766_s7  ;;  %v1151_v32 = vrot.slane %v1137_v53, 4 }
 0x15c   :  { %v5385_v33 = vpop.permute.xlu1 %717  ;;  %v5387_v41 = vpop.permute.xlu0 %719  ;;  %v1154_v53 = vsel %vm163_vm2, %v1151_v32, %v1153_v12 }
 0x15d   :  { %8867 = vst [vmem:[#allocation20_spill] sm:$0xff] %v5385_v33  ;;  %8868 = vst [vmem:[#allocation21_spill] sm:$0xff] %v5387_v41  ;;  %v1149_v41 = vsel %vm163_vm2, %v1146_v14, %v1148_v40  ;;  %v1194_v14 = vrot.slane %v1182_v45, 4 }
 0x15e   :  { %1121 = vrot.lane.b32.xlu1 %v1114_v52, %s4766_s7  ;;  %1155 = vrot.lane.b32.xlu0 %v1147_v13, %s4766_s7  ;;  %v1150_v52 = vrot.slane %v1136_v61, 4 }
 0x160   :  { %v5396_v26 = vpop.permute.xlu1 %721  ;;  %v5398_v42 = vpop.permute.xlu0 %723  ;;  %v1152_v13 = vsel %vm163_vm2, %v1150_v52, %v1151_v32  ;;  %v1186_v52 = vmul.f32 %v1180_v16, %v5174_v37  ;;  %v1184_v32 = vmul.f32 %v1180_v16, %v5123_v7 }
 0x161   :  { %8869 = vst [vmem:[#allocation22_spill] sm:$0xff] %v5396_v26  ;;  %8870 = vst [vmem:[#allocation23_spill] sm:$0xff] %v5398_v42  ;;  %v1193_v42 = vrot.slane %v1181_v35, 4 }
 0x162   :  { %1157 = vrot.lane.b32.xlu1 %v1149_v41, %s4766_s7  ;;  %1159 = vrot.lane.b32.xlu0 %v1148_v40, %s4766_s7 }
 0x163   :  { %v1195_v61 = vsel %vm163_vm2, %v1193_v42, %v1194_v14  ;;  %v1201_v42 = vrot.slane %v1186_v52, 4 }
 0x164   :  { %v5405_v48 = vpop.permute.xlu1 %725  ;;  %v5407_v23 = vpop.permute.xlu0 %753 }
 0x165   :  { %8871 = vst [vmem:[#allocation24_spill] sm:$0xff] %v5405_v48  ;;  %8872 = vst [vmem:[#allocation25_spill] sm:$0xff] %v5407_v23  ;;  %v1196_v48 = vrot.slane %v1183_v9, 4  ;;  %v1185_v23 = vmul.f32 %v1180_v16, %v5140_v3  ;;  %v1198_v9 = vrot.slane %v1184_v32, 4 }
 0x166   :  { %1161 = vrot.lane.b32.xlu1 %v1152_v13, %s4766_s7  ;;  %1163 = vrot.lane.b32.xlu0 %v1154_v53, %s4766_s7 }
 0x167   :  { %v1197_v13 = vsel %vm163_vm2, %v1194_v14, %v1196_v48  ;;  %v1199_v53 = vrot.slane %v1185_v23, 4 }
 0x168   :  { %v5414_v41 = vpop.permute.xlu1 %755  ;;  %v5416_v40 = vpop.permute.xlu0 %757 }
 0x169   :  { %8873 = vst [vmem:[#allocation26_spill] sm:$0xff] %v5414_v41  ;;  %8874 = vst [vmem:[#allocation27_spill] sm:$0xff] %v5416_v40  ;;  %v1202_v16 = vsel %vm163_vm2, %v1199_v53, %v1201_v42 }
 0x16a   :  { %1165 = vrot.lane.b32.xlu1 %v1153_v12, %s4766_s7  ;;  %1203 = vrot.lane.b32.xlu0 %v1195_v61, %s4766_s7  ;;  %v1200_v61 = vsel %vm163_vm2, %v1198_v9, %v1199_v53  ;;  %v1254_v9 = vstv %s4584_s14  ;;  %s4606_s14 = sld [smem:[#allocation6 + $0x14]] }
 0x16c   :  { %v5424_v35 = vpop.permute.xlu1 %759  ;;  %v5426_v45 = vpop.permute.xlu0 %761 }
 0x16d   :  { %8875 = vst [vmem:[#allocation28_spill] sm:$0xff] %v5424_v35  ;;  %8876 = vst [vmem:[#allocation29_spill] sm:$0xff] %v5426_v45  ;;  %v1228_v35 = vstv %s4583_s13  ;;  %s4770_s13 = smov 122  }
 0x16e   :  { %1205 = vrot.lane.b32.xlu1 %v1197_v13, %s4766_s7  ;;  %1207 = vrot.lane.b32.xlu0 %v1196_v48, %s4766_s7  ;;  %v1229_v48 = vmul.f32 %v1228_v35, %v5112_v58  ;;  %v1230_v13 = vmul.f32 %v1228_v35, %v5108_v55  ;;  %v1231_v53 = vmul.f32 %v1228_v35, %v5123_v7 }
 0x170   :  { %v5431_v40 = vpop.permute.xlu1 %763  ;;  %v5433_v12 = vpop.permute.xlu0 %791 }
 0x171   :  { %8877 = vst [vmem:[#allocation30_spill] sm:$0xff] %v5431_v40  ;;  %8878 = vst [vmem:[#allocation31_spill] sm:$0xff] %v5433_v12 }
 0x172   :  { %1209 = vrot.lane.b32.xlu1 %v1200_v61, %s4766_s7  ;;  %1211 = vrot.lane.b32.xlu0 %v1202_v16, %s4766_s7 }
 0x174   :  { %v5439_v23 = vpop.permute.xlu1 %793  ;;  %v5441_v14 = vpop.permute.xlu0 %795 }
 0x175   :  { %8879 = vst [vmem:[#allocation32_spill] sm:$0xff] %v5439_v23  ;;  %8880 = vst [vmem:[#allocation33_spill] sm:$0xff] %v5441_v14 }
 0x176   :  { %1213 = vrot.lane.b32.xlu1 %v1201_v42, %s4766_s7  ;;  %1237 = vrot.lane.b32.xlu0 %v1229_v48, %s4767_s17  ;;  %v1232_v42 = vmul.f32 %v1228_v35, %v5140_v3  ;;  %v1255_v48 = vmul.f32 %v1254_v9, %v5112_v58 }
 0x178   :  { %v5446_v52 = vpop.permute.xlu1 %797  ;;  %v5448_v32 = vpop.permute.xlu0 %799 }
 0x179   :  { %8881 = vst [vmem:[#allocation34_spill] sm:$0xff] %v5446_v52  ;;  %8882 = vst [vmem:[#allocation35_spill] sm:$0xff] %v5448_v32 }
 0x17a   :  { %1239 = vrot.lane.b32.xlu1 %v1230_v13, %s4767_s17  ;;  %1241 = vrot.lane.b32.xlu0 %v1231_v53, %s4767_s17  ;;  %v1256_v13 = vmul.f32 %v1254_v9, %v5108_v55  ;;  %v1257_v53 = vmul.f32 %v1254_v9, %v5146_v39 }
 0x17c   :  { %v5454_v61 = vpop.permute.xlu1 %801  ;;  %v5456_v16 = vpop.permute.xlu0 %839 }
 0x17d   :  { %8883 = vst [vmem:[#allocation36_spill] sm:$0xff] %v5454_v61  ;;  %8884 = vst [vmem:[#allocation37_spill] sm:$0xff] %v5456_v16  ;;  %v1292_v61 = vstv %s4585_s18  ;;  %s4607_s18 = sld [smem:[#allocation6 + $0x1b]] }
 0x17e   :  { %1243 = vrot.lane.b32.xlu1 %v1232_v42, %s4767_s17  ;;  %1267 = vrot.lane.b32.xlu0 %v1255_v48, %s4767_s17  ;;  %v1258_v42 = vmul.f32 %v1254_v9, %v5123_v7  ;;  %v1259_v48 = vmul.f32 %v1254_v9, %v5140_v3 }
 0x180   :  { %v5462_v32 = vpop.permute.xlu1 %841  ;;  %v5464_v52 = vpop.permute.xlu0 %843 }
 0x181   :  { %8885 = vst [vmem:[#allocation38_spill] sm:$0xff] %v5462_v32  ;;  %8886 = vst [vmem:[#allocation39_spill] sm:$0xff] %v5464_v52 }
 0x182   :  { %1269 = vrot.lane.b32.xlu1 %v1256_v13, %s4767_s17  ;;  %1271 = vrot.lane.b32.xlu0 %v1257_v53, %s4767_s17  ;;  %v1260_v13 = vmul.f32 %v1254_v9, %v5174_v37  ;;  %v1293_v53 = vmul.f32 %v1292_v61, %v5112_v58 }
 0x184   :  { %v5470_v35 = vpop.permute.xlu1 %845  ;;  %v5472_v16 = vpop.permute.xlu0 %879 }
 0x185   :  { %8887 = vst [vmem:[#allocation40_spill] sm:$0xff] %v5470_v35  ;;  %8888 = vst [vmem:[#allocation41_spill] sm:$0xff] %v5472_v16 }
 0x186   :  { %1273 = vrot.lane.b32.xlu1 %v1258_v42, %s4767_s17  ;;  %1275 = vrot.lane.b32.xlu0 %v1259_v48, %s4767_s17  ;;  %v1294_v42 = vmul.f32 %v1292_v61, %v5108_v55  ;;  %v1295_v48 = vmul.f32 %v1292_v61, %v5146_v39 }
 0x188   :  { %v5478_v52 = vpop.permute.xlu1 %881  ;;  %v5480_v32 = vpop.permute.xlu0 %883 }
 0x189   :  { %8889 = vst [vmem:[#allocation42_spill] sm:$0xff] %v5478_v52  ;;  %8890 = vst [vmem:[#allocation43_spill] sm:$0xff] %v5480_v32 }
 0x18a   :  { %1277 = vrot.lane.b32.xlu1 %v1260_v13, %s4767_s17  ;;  %1305 = vrot.lane.b32.xlu0 %v1293_v53, %s4767_s17  ;;  %v1296_v13 = vmul.f32 %v1292_v61, %v5123_v7  ;;  %v1297_v53 = vmul.f32 %v1292_v61, %v5140_v3 }
 0x18c   :  { %v5486_v16 = vpop.permute.xlu1 %885  ;;  %v5488_v35 = vpop.permute.xlu0 %887 }
 0x18d   :  { %8891 = vst [vmem:[#allocation44_spill] sm:$0xff] %v5486_v16  ;;  %8892 = vst [vmem:[#allocation45_spill] sm:$0xff] %v5488_v35  ;;  %v1330_v16 = vstv %s4586_s19  ;;  %s4608_s19 = sld [smem:[#allocation6 + $0x22]] }
 0x18e   :  { %1307 = vrot.lane.b32.xlu1 %v1294_v42, %s4767_s17  ;;  %1309 = vrot.lane.b32.xlu0 %v1295_v48, %s4767_s17  ;;  %v1298_v42 = vmul.f32 %v1292_v61, %v5174_v37  ;;  %v1331_v48 = vmul.f32 %v1330_v16, %v5112_v58 }
 0x190   :  { %v5494_v9 = vpop.permute.xlu1 %889  ;;  %v5496_v32 = vpop.permute.xlu0 %927 }
 0x191   :  { %8893 = vst [vmem:[#allocation46_spill] sm:$0xff] %v5494_v9  ;;  %8894 = vst [vmem:[#allocation47_spill] sm:$0xff] %v5496_v32  ;;  %v1368_v32 = vstv %s4587_s1  ;;  %s4609_s1 = sld [smem:[#allocation6 + $0x29]] }
 0x192   :  { %1311 = vrot.lane.b32.xlu1 %v1296_v13, %s4767_s17  ;;  %1313 = vrot.lane.b32.xlu0 %v1297_v53, %s4767_s17  ;;  %v1332_v13 = vmul.f32 %v1330_v16, %v5108_v55  ;;  %v1333_v53 = vmul.f32 %v1330_v16, %v5146_v39  ;;  %v1370_v61 = vmul.f32 %v1368_v32, %v5108_v55 }
 0x193   :  { %v1371_v40 = vmul.f32 %v1368_v32, %v5146_v39  ;;  %v1373_v45 = vmul.f32 %v1368_v32, %v5140_v3  ;;  %v1374_v41 = vmul.f32 %v1368_v32, %v5174_v37 }
 0x194   :  { %v5502_v35 = vpop.permute.xlu1 %929  ;;  %v5504_v52 = vpop.permute.xlu0 %931  ;;  %v1382_v12 = vrot.slane %v1370_v61, 4 }
 0x195   :  { %8895 = vst [vmem:[#allocation48_spill] sm:$0xff] %v5502_v35  ;;  %8896 = vst [vmem:[#allocation49_spill] sm:$0xff] %v5504_v52  ;;  %v1369_v52 = vmul.f32 %v1368_v32, %v5112_v58  ;;  %v1408_v35 = vstv %s4588_s0  ;;  %v1384_v26 = vrot.slane %v1371_v40, 4  ;;  %v1387_v33 = vrot.slane %v1373_v45, 4  ;;  %s4610_s0 = sld [smem:[#allocation6 + $0x30]] }
 0x196   :  { %1315 = vrot.lane.b32.xlu1 %v1298_v42, %s4767_s17  ;;  %1343 = vrot.lane.b32.xlu0 %v1331_v48, %s4767_s17  ;;  %v1411_v40 = vmul.f32 %v1408_v35, %v5146_v39 }
 0x197   :  { %v1381_v23 = vrot.slane %v1369_v52, 4  ;;  %v1409_v52 = vmul.f32 %v1408_v35, %v5112_v58  ;;  %v1385_v10 = vsel %vm163_vm2, %v1382_v12, %v1384_v26  ;;  %v1413_v26 = vmul.f32 %v1408_v35, %v5140_v3 }
 0x198   :  { %v5510_v9 = vpop.permute.xlu1 %933  ;;  %v5512_v14 = vpop.permute.xlu0 %935 }
 0x199   :  { %8897 = vst [vmem:[#allocation50_spill] sm:$0xff] %v5510_v9  ;;  %8898 = vst [vmem:[#allocation51_spill] sm:$0xff] %v5512_v14  ;;  %v1334_v9 = vmul.f32 %v1330_v16, %v5123_v7  ;;  %v1335_v14 = vmul.f32 %v1330_v16, %v5140_v3  ;;  %v1383_v61 = vsel %vm163_vm2, %v1381_v23, %v1382_v12 }
 0x19a   :  { %1345 = vrot.lane.b32.xlu1 %v1332_v13, %s4767_s17  ;;  %1347 = vrot.lane.b32.xlu0 %v1333_v53, %s4767_s17  ;;  %v1372_v13 = vmul.f32 %v1368_v32, %v5123_v7  ;;  %v1421_v32 = vrot.slane %v1409_v52, 4  ;;  %v1424_v52 = vrot.slane %v1411_v40, 4  ;;  %v1414_v12 = vmul.f32 %v1408_v35, %v5174_v37 }
 0x19c   :  { %v5520_v42 = vpop.permute.xlu1 %937  ;;  %v5522_v48 = vpop.permute.xlu0 %961 }
 0x19d   :  { %8899 = vst [vmem:[#allocation52_spill] sm:$0xff] %v5520_v42  ;;  %8900 = vst [vmem:[#allocation53_spill] sm:$0xff] %v5522_v48  ;;  %v1336_v42 = vmul.f32 %v1330_v16, %v5174_v37  ;;  %v1389_v16 = vrot.slane %v1374_v41, 4 }
 0x19e   :  { %1349 = vrot.lane.b32.xlu1 %v1334_v9, %s4767_s17  ;;  %1351 = vrot.lane.b32.xlu0 %v1335_v14, %s4767_s17  ;;  %v1410_v9 = vmul.f32 %v1408_v35, %v5108_v55  ;;  %v1386_v14 = vrot.slane %v1372_v13, 4 }
 0x19f   :  { %v1390_v13 = vsel %vm163_vm2, %v1387_v33, %v1389_v16  ;;  %v1427_v16 = vrot.slane %v1413_v26, 4 }
 0x1a0   :  { %v5531_v53 = vpop.permute.xlu1 %963  ;;  %v5533_v48 = vpop.permute.xlu0 %965  ;;  %v1388_v25 = vsel %vm163_vm2, %v1386_v14, %v1387_v33  ;;  %v1422_v23 = vrot.slane %v1410_v9, 4 }
 0x1a1   :  { %8901 = vst [vmem:[#allocation54_spill] sm:$0xff] %v5531_v53  ;;  %8902 = vst [vmem:[#allocation55_spill] sm:$0xff] %v5533_v48 }
 0x1a2   :  { %1353 = vrot.lane.b32.xlu1 %v1336_v42, %s4767_s17  ;;  %1391 = vrot.lane.b32.xlu0 %v1383_v61, %s4767_s17  ;;  %v1456_v61 = vstv %s4589_s20  ;;  %v1423_v41 = vsel %vm163_vm2, %v1421_v32, %v1422_v23  ;;  %v1425_v14 = vsel %vm163_vm2, %v1422_v23, %v1424_v52  ;;  %v1429_v32 = vrot.slane %v1414_v12, 4  ;;  %s4618_s20 = sld [smem:[#allocation6 + $0x32]] }
 0x1a3   :  { %v1457_v33 = vmul.f32 %v1456_v61, %v5112_v58  ;;  %v1458_v40 = vmul.f32 %v1456_v61, %v5108_v55  ;;  %v1459_v23 = vmul.f32 %v1456_v61, %v5146_v39 }
 0x1a4   :  { %v5542_v53 = vpop.permute.xlu1 %967  ;;  %v5544_v48 = vpop.permute.xlu0 %991 }
 0x1a5   :  { %8903 = vst [vmem:[#allocation56_spill] sm:$0xff] %v5542_v53  ;;  %8904 = vst [vmem:[#allocation57_spill] sm:$0xff] %v5544_v48 }
 0x1a6   :  { %1393 = vrot.lane.b32.xlu1 %v1385_v10, %s4767_s17  ;;  %1395 = vrot.lane.b32.xlu0 %v1388_v25, %s4767_s17  ;;  %v1412_v25 = vmul.f32 %v1408_v35, %v5123_v7 }
 0x1a8   :  { %v5551_v45 = vpop.permute.xlu1 %993  ;;  %v5553_v42 = vpop.permute.xlu0 %995 }
 0x1a9   :  { %8905 = vst [vmem:[#allocation58_spill] sm:$0xff] %v5551_v45  ;;  %8906 = vst [vmem:[#allocation59_spill] sm:$0xff] %v5553_v42  ;;  %v1430_v42 = vsel %vm163_vm2, %v1427_v16, %v1429_v32  ;;  %v1470_v45 = vrot.slane %v1458_v40, 4 }
 0x1aa   :  { %1397 = vrot.lane.b32.xlu1 %v1390_v13, %s4767_s17  ;;  %1431 = vrot.lane.b32.xlu0 %v1423_v41, %s4767_s17  ;;  %v1426_v13 = vrot.slane %v1412_v25, 4  ;;  %v1472_v25 = vrot.slane %v1459_v23, 4 }
 0x1ac   :  { %v5562_v10 = vpop.permute.xlu1 %997  ;;  %v5564_v9 = vpop.permute.xlu0 %999  ;;  %v1473_v40 = vsel %vm163_vm2, %v1470_v45, %v1472_v25 }
 0x1ad   :  { %8907 = vst [vmem:[#allocation60_spill] sm:$0xff] %v5562_v10  ;;  %8908 = vst [vmem:[#allocation61_spill] sm:$0xff] %v5564_v9  ;;  %v1469_v10 = vrot.slane %v1457_v33, 4  ;;  %v1428_v9 = vsel %vm163_vm2, %v1426_v13, %v1427_v16  ;;  %v1461_v33 = vmul.f32 %v1456_v61, %v5140_v3 }
 0x1ae   :  { %1433 = vrot.lane.b32.xlu1 %v1425_v14, %s4767_s17  ;;  %1435 = vrot.lane.b32.xlu0 %v1424_v52, %s4767_s17  ;;  %v1462_v14 = vmul.f32 %v1456_v61, %v5174_v37 }
 0x1af   :  { %v1471_v12 = vsel %vm163_vm2, %v1469_v10, %v1470_v45  ;;  %v1475_v13 = vrot.slane %v1461_v33, 4 }
 0x1b0   :  { %v5571_v41 = vpop.permute.xlu1 %1001  ;;  %v5573_v35 = vpop.permute.xlu0 %1029  ;;  %v1477_v10 = vrot.slane %v1462_v14, 4 }
 0x1b1   :  { %8909 = vst [vmem:[#allocation62_spill] sm:$0xff] %v5571_v41  ;;  %8910 = vst [vmem:[#allocation63_spill] sm:$0xff] %v5573_v35 }
 0x1b2   :  { %1437 = vrot.lane.b32.xlu1 %v1428_v9, %s4767_s17  ;;  %1439 = vrot.lane.b32.xlu0 %v1430_v42, %s4767_s17  ;;  %v1460_v9 = vmul.f32 %v1456_v61, %v5123_v7  ;;  %v1478_v61 = vsel %vm163_vm2, %v1475_v13, %v1477_v10 }
 0x1b4   :  { %v5580_v26 = vpop.permute.xlu1 %1031  ;;  %v5582_v52 = vpop.permute.xlu0 %1033  ;;  %v1474_v23 = vrot.slane %v1460_v9, 4 }
 0x1b5   :  { %8911 = vst [vmem:[#allocation64_spill] sm:$0xff] %v5580_v26  ;;  %8912 = vst [vmem:[#allocation65_spill] sm:$0xff] %v5582_v52 }
 0x1b6   :  { %1441 = vrot.lane.b32.xlu1 %v1429_v32, %s4767_s17  ;;  %1479 = vrot.lane.b32.xlu0 %v1471_v12, %s4767_s17  ;;  %v1476_v12 = vsel %vm163_vm2, %v1474_v23, %v1475_v13  ;;  %v1530_v23 = vstv %s4591_s22  ;;  %s4620_s22 = sld [smem:[#allocation6 + $0x40]] }
 0x1b8   :  { %v5590_v16 = vpop.permute.xlu1 %1035  ;;  %v5592_v42 = vpop.permute.xlu0 %1037 }
 0x1b9   :  { %8913 = vst [vmem:[#allocation66_spill] sm:$0xff] %v5590_v16  ;;  %8914 = vst [vmem:[#allocation67_spill] sm:$0xff] %v5592_v42  ;;  %v1504_v16 = vstv %s4590_s21  ;;  %s4619_s21 = sld [smem:[#allocation6 + $0x39]] }
 0x1ba   :  { %1481 = vrot.lane.b32.xlu1 %v1473_v40, %s4767_s17  ;;  %1483 = vrot.lane.b32.xlu0 %v1472_v25, %s4767_s17  ;;  %v1505_v25 = vmul.f32 %v1504_v16, %v5112_v58  ;;  %v1506_v40 = vmul.f32 %v1504_v16, %v5108_v55  ;;  %v1507_v13 = vmul.f32 %v1504_v16, %v5123_v7 }
 0x1bc   :  { %v5597_v52 = vpop.permute.xlu1 %1039  ;;  %v5599_v32 = vpop.permute.xlu0 %1067 }
 0x1bd   :  { %8915 = vst [vmem:[#allocation68_spill] sm:$0xff] %v5597_v52  ;;  %8916 = vst [vmem:[#allocation69_spill] sm:$0xff] %v5599_v32 }
 0x1be   :  { %1485 = vrot.lane.b32.xlu1 %v1476_v12, %s4767_s17  ;;  %1487 = vrot.lane.b32.xlu0 %v1478_v61, %s4767_s17 }
 0x1c0   :  { %v5605_v45 = vpop.permute.xlu1 %1069  ;;  %v5607_v33 = vpop.permute.xlu0 %1071 }
 0x1c1   :  { %8917 = vst [vmem:[#allocation70_spill] sm:$0xff] %v5605_v45  ;;  %8918 = vst [vmem:[#allocation71_spill] sm:$0xff] %v5607_v33 }
 0x1c2   :  { %1489 = vrot.lane.b32.xlu1 %v1477_v10, %s4767_s17  ;;  %1513 = vrot.lane.b32.xlu0 %v1505_v25, %s4768_s23  ;;  %v1508_v10 = vmul.f32 %v1504_v16, %v5140_v3  ;;  %v1531_v25 = vmul.f32 %v1530_v23, %v5112_v58 }
 0x1c4   :  { %v5612_v14 = vpop.permute.xlu1 %1073  ;;  %v5614_v9 = vpop.permute.xlu0 %1075 }
 0x1c5   :  { %8919 = vst [vmem:[#allocation72_spill] sm:$0xff] %v5612_v14  ;;  %8920 = vst [vmem:[#allocation73_spill] sm:$0xff] %v5614_v9 }
 0x1c6   :  { %1515 = vrot.lane.b32.xlu1 %v1506_v40, %s4768_s23  ;;  %1517 = vrot.lane.b32.xlu0 %v1507_v13, %s4768_s23  ;;  %v1532_v40 = vmul.f32 %v1530_v23, %v5108_v55  ;;  %v1533_v13 = vmul.f32 %v1530_v23, %v5146_v39 }
 0x1c8   :  { %v5620_v12 = vpop.permute.xlu1 %1077  ;;  %v5622_v61 = vpop.permute.xlu0 %1115 }
 0x1c9   :  { %8921 = vst [vmem:[#allocation74_spill] sm:$0xff] %v5620_v12  ;;  %8922 = vst [vmem:[#allocation75_spill] sm:$0xff] %v5622_v61  ;;  %v1568_v12 = vstv %s4592_s24  ;;  %s4621_s24 = sld [smem:[#allocation6 + $0x47]] }
 0x1ca   :  { %1519 = vrot.lane.b32.xlu1 %v1508_v10, %s4768_s23  ;;  %1543 = vrot.lane.b32.xlu0 %v1531_v25, %s4768_s23  ;;  %v1534_v10 = vmul.f32 %v1530_v23, %v5123_v7  ;;  %v1535_v25 = vmul.f32 %v1530_v23, %v5140_v3 }
 0x1cc   :  { %v5628_v9 = vpop.permute.xlu1 %1117  ;;  %v5630_v14 = vpop.permute.xlu0 %1119 }
 0x1cd   :  { %8923 = vst [vmem:[#allocation76_spill] sm:$0xff] %v5628_v9  ;;  %8924 = vst [vmem:[#allocation77_spill] sm:$0xff] %v5630_v14 }
 0x1ce   :  { %1545 = vrot.lane.b32.xlu1 %v1532_v40, %s4768_s23  ;;  %1547 = vrot.lane.b32.xlu0 %v1533_v13, %s4768_s23  ;;  %v1536_v40 = vmul.f32 %v1530_v23, %v5174_v37  ;;  %v1569_v13 = vmul.f32 %v1568_v12, %v5112_v58 }
 0x1d0   :  { %v5636_v16 = vpop.permute.xlu1 %1121  ;;  %v5638_v61 = vpop.permute.xlu0 %1155 }
 0x1d1   :  { %8925 = vst [vmem:[#allocation78_spill] sm:$0xff] %v5636_v16  ;;  %8926 = vst [vmem:[#allocation79_spill] sm:$0xff] %v5638_v61 }
 0x1d2   :  { %1549 = vrot.lane.b32.xlu1 %v1534_v10, %s4768_s23  ;;  %1551 = vrot.lane.b32.xlu0 %v1535_v25, %s4768_s23  ;;  %v1570_v10 = vmul.f32 %v1568_v12, %v5108_v55  ;;  %v1571_v25 = vmul.f32 %v1568_v12, %v5146_v39 }
 0x1d4   :  { %v5644_v14 = vpop.permute.xlu1 %1157  ;;  %v5646_v9 = vpop.permute.xlu0 %1159 }
 0x1d5   :  { %8927 = vst [vmem:[#allocation80_spill] sm:$0xff] %v5644_v14  ;;  %8928 = vst [vmem:[#allocation81_spill] sm:$0xff] %v5646_v9 }
 0x1d6   :  { %1553 = vrot.lane.b32.xlu1 %v1536_v40, %s4768_s23  ;;  %1581 = vrot.lane.b32.xlu0 %v1569_v13, %s4768_s23  ;;  %v1572_v40 = vmul.f32 %v1568_v12, %v5123_v7  ;;  %v1573_v13 = vmul.f32 %v1568_v12, %v5140_v3 }
 0x1d8   :  { %v5652_v61 = vpop.permute.xlu1 %1161  ;;  %v5654_v16 = vpop.permute.xlu0 %1163 }
 0x1d9   :  { %8929 = vst [vmem:[#allocation82_spill] sm:$0xff] %v5652_v61  ;;  %8930 = vst [vmem:[#allocation83_spill] sm:$0xff] %v5654_v16  ;;  %v1606_v61 = vstv %s4593_s25  ;;  %s4622_s25 = sld [smem:[#allocation6 + $0x4e]] }
 0x1da   :  { %1583 = vrot.lane.b32.xlu1 %v1570_v10, %s4768_s23  ;;  %1585 = vrot.lane.b32.xlu0 %v1571_v25, %s4768_s23  ;;  %v1574_v10 = vmul.f32 %v1568_v12, %v5174_v37  ;;  %v1607_v25 = vmul.f32 %v1606_v61, %v5112_v58 }
 0x1dc   :  { %v5660_v23 = vpop.permute.xlu1 %1165  ;;  %v5662_v9 = vpop.permute.xlu0 %1203 }
 0x1dd   :  { %8931 = vst [vmem:[#allocation84_spill] sm:$0xff] %v5660_v23  ;;  %8932 = vst [vmem:[#allocation85_spill] sm:$0xff] %v5662_v9  ;;  %v1644_v9 = vstv %s4594_s26  ;;  %s4623_s26 = sld [smem:[#allocation6 + $0x55]] }
 0x1de   :  { %1587 = vrot.lane.b32.xlu1 %v1572_v40, %s4768_s23  ;;  %1589 = vrot.lane.b32.xlu0 %v1573_v13, %s4768_s23  ;;  %v1608_v40 = vmul.f32 %v1606_v61, %v5108_v55  ;;  %v1609_v13 = vmul.f32 %v1606_v61, %v5146_v39  ;;  %v1646_v12 = vmul.f32 %v1644_v9, %v5108_v55 }
 0x1df   :  { %v1647_v52 = vmul.f32 %v1644_v9, %v5146_v39  ;;  %v1649_v42 = vmul.f32 %v1644_v9, %v5140_v3  ;;  %v1650_v26 = vmul.f32 %v1644_v9, %v5174_v37 }
 0x1e0   :  { %v5668_v16 = vpop.permute.xlu1 %1205  ;;  %v5670_v14 = vpop.permute.xlu0 %1207  ;;  %v1658_v32 = vrot.slane %v1646_v12, 4 }
 0x1e1   :  { %8933 = vst [vmem:[#allocation86_spill] sm:$0xff] %v5668_v16  ;;  %8934 = vst [vmem:[#allocation87_spill] sm:$0xff] %v5670_v14  ;;  %v1645_v14 = vmul.f32 %v1644_v9, %v5112_v58  ;;  %v1684_v16 = vstv %s4595_s28  ;;  %v1660_v35 = vrot.slane %v1647_v52, 4  ;;  %v1663_v41 = vrot.slane %v1649_v42, 4  ;;  %s4624_s28 = sld [smem:[#allocation6 + $0x5c]] }
 0x1e2   :  { %1591 = vrot.lane.b32.xlu1 %v1574_v10, %s4768_s23  ;;  %1619 = vrot.lane.b32.xlu0 %v1607_v25, %s4768_s23  ;;  %v1687_v52 = vmul.f32 %v1684_v16, %v5146_v39 }
 0x1e3   :  { %v1657_v45 = vrot.slane %v1645_v14, 4  ;;  %v1685_v14 = vmul.f32 %v1684_v16, %v5112_v58  ;;  %v1661_v48 = vsel %vm163_vm2, %v1658_v32, %v1660_v35  ;;  %v1689_v35 = vmul.f32 %v1684_v16, %v5140_v3 }
 0x1e4   :  { %v5676_v23 = vpop.permute.xlu1 %1209  ;;  %v5678_v33 = vpop.permute.xlu0 %1211 }
 0x1e5   :  { %8935 = vst [vmem:[#allocation88_spill] sm:$0xff] %v5676_v23  ;;  %8936 = vst [vmem:[#allocation89_spill] sm:$0xff] %v5678_v33  ;;  %v1610_v23 = vmul.f32 %v1606_v61, %v5123_v7  ;;  %v1611_v33 = vmul.f32 %v1606_v61, %v5140_v3  ;;  %v1659_v12 = vsel %vm163_vm2, %v1657_v45, %v1658_v32 }
 0x1e6   :  { %1621 = vrot.lane.b32.xlu1 %v1608_v40, %s4768_s23  ;;  %1623 = vrot.lane.b32.xlu0 %v1609_v13, %s4768_s23  ;;  %v1648_v40 = vmul.f32 %v1644_v9, %v5123_v7  ;;  %v1697_v9 = vrot.slane %v1685_v14, 4  ;;  %v1700_v14 = vrot.slane %v1687_v52, 4  ;;  %v1690_v32 = vmul.f32 %v1684_v16, %v5174_v37 }
 0x1e8   :  { %v5686_v10 = vpop.permute.xlu1 %1213  ;;  %v5688_v25 = vpop.permute.xlu0 %1237 }
 0x1e9   :  { %8937 = vst [vmem:[#allocation90_spill] sm:$0xff] %v5686_v10  ;;  %8938 = vst [vmem:[#allocation91_spill] sm:$0xff] %v5688_v25  ;;  %v1612_v10 = vmul.f32 %v1606_v61, %v5174_v37  ;;  %v1665_v61 = vrot.slane %v1650_v26, 4 }
 0x1ea   :  { %1625 = vrot.lane.b32.xlu1 %v1610_v23, %s4768_s23  ;;  %1627 = vrot.lane.b32.xlu0 %v1611_v33, %s4768_s23  ;;  %v1686_v23 = vmul.f32 %v1684_v16, %v5108_v55  ;;  %v1662_v33 = vrot.slane %v1648_v40, 4 }
 0x1eb   :  { %v1666_v40 = vsel %vm163_vm2, %v1663_v41, %v1665_v61  ;;  %v1703_v61 = vrot.slane %v1689_v35, 4 }
 0x1ec   :  { %v5697_v13 = vpop.permute.xlu1 %1239  ;;  %v5699_v25 = vpop.permute.xlu0 %1241  ;;  %v1664_v53 = vsel %vm163_vm2, %v1662_v33, %v1663_v41  ;;  %v1698_v45 = vrot.slane %v1686_v23, 4 }
 0x1ed   :  { %8939 = vst [vmem:[#allocation92_spill] sm:$0xff] %v5697_v13  ;;  %8940 = vst [vmem:[#allocation93_spill] sm:$0xff] %v5699_v25 }
 0x1ee   :  { %1629 = vrot.lane.b32.xlu1 %v1612_v10, %s4768_s23  ;;  %1667 = vrot.lane.b32.xlu0 %v1659_v12, %s4768_s23  ;;  %v1732_v12 = vstv %s4596_s29  ;;  %v1699_v26 = vsel %vm163_vm2, %v1697_v9, %v1698_v45  ;;  %v1701_v33 = vsel %vm163_vm2, %v1698_v45, %v1700_v14  ;;  %v1705_v9 = vrot.slane %v1690_v32, 4  ;;  %s4625_s29 = sld [smem:[#allocation6 + $0x33]] }
 0x1ef   :  { %v1733_v41 = vmul.f32 %v1732_v12, %v5112_v58  ;;  %v1734_v52 = vmul.f32 %v1732_v12, %v5108_v55 }
 0x1f0   :  { %v5708_v13 = vpop.permute.xlu1 %1243  ;;  %v5710_v25 = vpop.permute.xlu0 %1267 }
 0x1f1   :  { %8941 = vst [vmem:[#allocation94_spill] sm:$0xff] %v5708_v13  ;;  %8942 = vst [vmem:[#allocation95_spill] sm:$0xff] %v5710_v25  ;;  %v1745_v45 = vrot.slane %v1733_v41, 4  ;;  %v1746_v35 = vrot.slane %v1734_v52, 4 }
 0x1f2   :  { %1669 = vrot.lane.b32.xlu1 %v1661_v48, %s4768_s23  ;;  %1671 = vrot.lane.b32.xlu0 %v1664_v53, %s4768_s23  ;;  %v1688_v48 = vmul.f32 %v1684_v16, %v5123_v7 }
 0x1f4   :  { %v5717_v42 = vpop.permute.xlu1 %1269  ;;  %v5719_v10 = vpop.permute.xlu0 %1271 }
 0x1f5   :  { %8943 = vst [vmem:[#allocation96_spill] sm:$0xff] %v5717_v42  ;;  %8944 = vst [vmem:[#allocation97_spill] sm:$0xff] %v5719_v10  ;;  %v1706_v10 = vsel %vm163_vm2, %v1703_v61, %v1705_v9 }
 0x1f6   :  { %1673 = vrot.lane.b32.xlu1 %v1666_v40, %s4768_s23  ;;  %1707 = vrot.lane.b32.xlu0 %v1699_v26, %s4768_s23  ;;  %v1702_v40 = vrot.slane %v1688_v48, 4  ;;  %v1747_v48 = vsel %vm163_vm2, %v1745_v45, %v1746_v35 }
 0x1f8   :  { %v5728_v53 = vpop.permute.xlu1 %1273  ;;  %v5730_v23 = vpop.permute.xlu0 %1275 }
 0x1f9   :  { %8945 = vst [vmem:[#allocation98_spill] sm:$0xff] %v5728_v53  ;;  %8946 = vst [vmem:[#allocation99_spill] sm:$0xff] %v5730_v23  ;;  %v1735_v53 = vmul.f32 %v1732_v12, %v5146_v39  ;;  %v1704_v23 = vsel %vm163_vm2, %v1702_v40, %v1703_v61 }
 0x1fa   :  { %1709 = vrot.lane.b32.xlu1 %v1701_v33, %s4768_s23  ;;  %1711 = vrot.lane.b32.xlu0 %v1700_v14, %s4768_s23 }
 0x1fb   :  { %v1748_v33 = vrot.slane %v1735_v53, 4 }
 0x1fc   :  { %v5737_v26 = vpop.permute.xlu1 %1277  ;;  %v5739_v16 = vpop.permute.xlu0 %1305 }
 0x1fd   :  { %8947 = vst [vmem:[#allocation100_spill] sm:$0xff] %v5737_v26  ;;  %8948 = vst [vmem:[#allocation101_spill] sm:$0xff] %v5739_v16  ;;  %v1737_v16 = vmul.f32 %v1732_v12, %v5140_v3  ;;  %v1738_v26 = vmul.f32 %v1732_v12, %v5174_v37  ;;  %v1749_v61 = vsel %vm163_vm2, %v1746_v35, %v1748_v33 }
 0x1fe   :  { %1713 = vrot.lane.b32.xlu1 %v1704_v23, %s4768_s23  ;;  %1715 = vrot.lane.b32.xlu0 %v1706_v10, %s4768_s23  ;;  %v1736_v23 = vmul.f32 %v1732_v12, %v5123_v7 }
 0x1ff   :  { %v1751_v52 = vrot.slane %v1737_v16, 4  ;;  %v1753_v40 = vrot.slane %v1738_v26, 4 }
 0x200   :  { %v5746_v32 = vpop.permute.xlu1 %1307  ;;  %v5748_v14 = vpop.permute.xlu0 %1309  ;;  %v1750_v53 = vrot.slane %v1736_v23, 4 }
 0x201   :  { %8949 = vst [vmem:[#allocation102_spill] sm:$0xff] %v5746_v32  ;;  %8950 = vst [vmem:[#allocation103_spill] sm:$0xff] %v5748_v14  ;;  %v1754_v12 = vsel %vm163_vm2, %v1751_v52, %v1753_v40 }
 0x202   :  { %1717 = vrot.lane.b32.xlu1 %v1705_v9, %s4768_s23  ;;  %1755 = vrot.lane.b32.xlu0 %v1747_v48, %s4768_s23  ;;  %v1752_v48 = vsel %vm163_vm2, %v1750_v53, %v1751_v52  ;;  %v1806_v53 = vstv %s4598_s3  ;;  %s4627_s3 = sld [smem:[#allocation6 + $0x41]] }
 0x204   :  { %v5756_v41 = vpop.permute.xlu1 %1311  ;;  %v5758_v10 = vpop.permute.xlu0 %1313 }
 0x205   :  { %8951 = vst [vmem:[#allocation104_spill] sm:$0xff] %v5756_v41  ;;  %8952 = vst [vmem:[#allocation105_spill] sm:$0xff] %v5758_v10  ;;  %v1780_v41 = vstv %s4597_s30  ;;  %s4626_s30 = sld [smem:[#allocation6 + $0x3a]] }
 0x206   :  { %1757 = vrot.lane.b32.xlu1 %v1749_v61, %s4768_s23  ;;  %1759 = vrot.lane.b32.xlu0 %v1748_v33, %s4768_s23  ;;  %v1781_v35 = vmul.f32 %v1780_v41, %v5112_v58  ;;  %v1782_v61 = vmul.f32 %v1780_v41, %v5108_v55  ;;  %v1783_v52 = vmul.f32 %v1780_v41, %v5123_v7 }
 0x208   :  { %v5763_v45 = vpop.permute.xlu1 %1315  ;;  %v5765_v9 = vpop.permute.xlu0 %1343 }
 0x209   :  { %8953 = vst [vmem:[#allocation106_spill] sm:$0xff] %v5763_v45  ;;  %8954 = vst [vmem:[#allocation107_spill] sm:$0xff] %v5765_v9 }
 0x20a   :  { %1761 = vrot.lane.b32.xlu1 %v1752_v48, %s4768_s23  ;;  %1763 = vrot.lane.b32.xlu0 %v1754_v12, %s4768_s23 }
 0x20c   :  { %v5771_v26 = vpop.permute.xlu1 %1345  ;;  %v5773_v16 = vpop.permute.xlu0 %1347 }
 0x20d   :  { %8955 = vst [vmem:[#allocation108_spill] sm:$0xff] %v5771_v26  ;;  %8956 = vst [vmem:[#allocation109_spill] sm:$0xff] %v5773_v16 }
 0x20e   :  { %1765 = vrot.lane.b32.xlu1 %v1753_v40, %s4768_s23  ;;  %1789 = vrot.lane.b32.xlu0 %v1781_v35, %s4769_s4  ;;  %v1784_v40 = vmul.f32 %v1780_v41, %v5140_v3  ;;  %v1807_v35 = vmul.f32 %v1806_v53, %v5112_v58 }
 0x210   :  { %v5778_v33 = vpop.permute.xlu1 %1349  ;;  %v5780_v23 = vpop.permute.xlu0 %1351 }
 0x211   :  { %8957 = vst [vmem:[#allocation110_spill] sm:$0xff] %v5778_v33  ;;  %8958 = vst [vmem:[#allocation111_spill] sm:$0xff] %v5780_v23 }
 0x212   :  { %1791 = vrot.lane.b32.xlu1 %v1782_v61, %s4769_s4  ;;  %1793 = vrot.lane.b32.xlu0 %v1783_v52, %s4769_s4  ;;  %v1808_v61 = vmul.f32 %v1806_v53, %v5108_v55  ;;  %v1809_v52 = vmul.f32 %v1806_v53, %v5146_v39 }
 0x214   :  { %v5786_v48 = vpop.permute.xlu1 %1353  ;;  %v5788_v12 = vpop.permute.xlu0 %1391 }
 0x215   :  { %8959 = vst [vmem:[#allocation112_spill] sm:$0xff] %v5786_v48  ;;  %8960 = vst [vmem:[#allocation113_spill] sm:$0xff] %v5788_v12  ;;  %v1844_v48 = vstv %s4599_s5  ;;  %s4629_s5 = sld [smem:[#allocation6 + $0x4f]] }
 0x216   :  { %1795 = vrot.lane.b32.xlu1 %v1784_v40, %s4769_s4  ;;  %1819 = vrot.lane.b32.xlu0 %v1807_v35, %s4769_s4  ;;  %v1810_v40 = vmul.f32 %v1806_v53, %v5123_v7  ;;  %v1811_v35 = vmul.f32 %v1806_v53, %v5140_v3 }
 0x218   :  { %v5794_v23 = vpop.permute.xlu1 %1393  ;;  %v5796_v33 = vpop.permute.xlu0 %1395 }
 0x219   :  { %8961 = vst [vmem:[#allocation114_spill] sm:$0xff] %v5794_v23  ;;  %8962 = vst [vmem:[#allocation115_spill] sm:$0xff] %v5796_v33 }
 0x21a   :  { %1821 = vrot.lane.b32.xlu1 %v1808_v61, %s4769_s4  ;;  %1823 = vrot.lane.b32.xlu0 %v1809_v52, %s4769_s4  ;;  %v1812_v61 = vmul.f32 %v1806_v53, %v5174_v37  ;;  %v1845_v52 = vmul.f32 %v1844_v48, %v5112_v58 }
 0x21c   :  { %v5802_v41 = vpop.permute.xlu1 %1397  ;;  %v5804_v12 = vpop.permute.xlu0 %1431 }
 0x21d   :  { %8963 = vst [vmem:[#allocation116_spill] sm:$0xff] %v5802_v41  ;;  %8964 = vst [vmem:[#allocation117_spill] sm:$0xff] %v5804_v12 }
 0x21e   :  { %1825 = vrot.lane.b32.xlu1 %v1810_v40, %s4769_s4  ;;  %1827 = vrot.lane.b32.xlu0 %v1811_v35, %s4769_s4  ;;  %v1846_v40 = vmul.f32 %v1844_v48, %v5108_v55  ;;  %v1847_v35 = vmul.f32 %v1844_v48, %v5146_v39 }
 0x220   :  { %v5810_v33 = vpop.permute.xlu1 %1433  ;;  %v5812_v23 = vpop.permute.xlu0 %1435 }
 0x221   :  { %8965 = vst [vmem:[#allocation118_spill] sm:$0xff] %v5810_v33  ;;  %8966 = vst [vmem:[#allocation119_spill] sm:$0xff] %v5812_v23 }
 0x222   :  { %1829 = vrot.lane.b32.xlu1 %v1812_v61, %s4769_s4  ;;  %1857 = vrot.lane.b32.xlu0 %v1845_v52, %s4769_s4  ;;  %v1848_v61 = vmul.f32 %v1844_v48, %v5123_v7  ;;  %v1849_v52 = vmul.f32 %v1844_v48, %v5140_v3 }
 0x224   :  { %v5818_v12 = vpop.permute.xlu1 %1437  ;;  %v5820_v41 = vpop.permute.xlu0 %1439 }
 0x225   :  { %8967 = vst [vmem:[#allocation120_spill] sm:$0xff] %v5818_v12  ;;  %8968 = vst [vmem:[#allocation121_spill] sm:$0xff] %v5820_v41  ;;  %v1882_v12 = vstv %s4600_s6  ;;  %s4630_s6 = sld [smem:[#allocation6 + $0x56]] }
 0x226   :  { %1859 = vrot.lane.b32.xlu1 %v1846_v40, %s4769_s4  ;;  %1861 = vrot.lane.b32.xlu0 %v1847_v35, %s4769_s4  ;;  %v1850_v40 = vmul.f32 %v1844_v48, %v5174_v37  ;;  %v1883_v35 = vmul.f32 %v1882_v12, %v5112_v58 }
 0x228   :  { %v5826_v53 = vpop.permute.xlu1 %1441  ;;  %v5828_v23 = vpop.permute.xlu0 %1479 }
 0x229   :  { %8969 = vst [vmem:[#allocation122_spill] sm:$0xff] %v5826_v53  ;;  %8970 = vst [vmem:[#allocation123_spill] sm:$0xff] %v5828_v23  ;;  %v1920_v23 = vstv %s4601_s8  ;;  %s4631_s8 = sld [smem:[#allocation6 + $0x5d]] }
 0x22a   :  { %1863 = vrot.lane.b32.xlu1 %v1848_v61, %s4769_s4  ;;  %1865 = vrot.lane.b32.xlu0 %v1849_v52, %s4769_s4  ;;  %v1884_v61 = vmul.f32 %v1882_v12, %v5108_v55  ;;  %v1885_v52 = vmul.f32 %v1882_v12, %v5146_v39  ;;  %v1922_v48 = vmul.f32 %v1920_v23, %v5108_v55 }
 0x22b   :  { %v1923_v45 = vmul.f32 %v1920_v23, %v5146_v39  ;;  %v1925_v10 = vmul.f32 %v1920_v23, %v5140_v3  ;;  %v1926_v14 = vmul.f32 %v1920_v23, %v5174_v37 }
 0x22c   :  { %v5834_v41 = vpop.permute.xlu1 %1481  ;;  %v5836_v33 = vpop.permute.xlu0 %1483  ;;  %v1934_v9 = vrot.slane %v1922_v48, 4 }
 0x22d   :  { %8971 = vst [vmem:[#allocation124_spill] sm:$0xff] %v5834_v41  ;;  %8972 = vst [vmem:[#allocation125_spill] sm:$0xff] %v5836_v33  ;;  %v1921_v33 = vmul.f32 %v1920_v23, %v5112_v58  ;;  %v1960_v41 = vstv %s4602_s9  ;;  %v1936_v32 = vrot.slane %v1923_v45, 4  ;;  %v1939_v42 = vrot.slane %v1925_v10, 4  ;;  %s4632_s9 = sld [smem:[#allocation6 + $0x34]] }
 0x22e   :  { %1867 = vrot.lane.b32.xlu1 %v1850_v40, %s4769_s4  ;;  %1895 = vrot.lane.b32.xlu0 %v1883_v35, %s4769_s4  ;;  %v1963_v10 = vmul.f32 %v1960_v41, %v5146_v39 }
 0x22f   :  { %v1933_v26 = vrot.slane %v1921_v33, 4  ;;  %v1961_v33 = vmul.f32 %v1960_v41, %v5112_v58  ;;  %v1937_v25 = vsel %vm163_vm2, %v1934_v9, %v1936_v32  ;;  %v1965_v32 = vmul.f32 %v1960_v41, %v5140_v3 }
 0x230   :  { %v5842_v53 = vpop.permute.xlu1 %1485  ;;  %v5844_v16 = vpop.permute.xlu0 %1487 }
 0x231   :  { %8973 = vst [vmem:[#allocation126_spill] sm:$0xff] %v5842_v53  ;;  %8974 = vst [vmem:[#allocation127_spill] sm:$0xff] %v5844_v16  ;;  %v1886_v53 = vmul.f32 %v1882_v12, %v5123_v7  ;;  %v1887_v16 = vmul.f32 %v1882_v12, %v5140_v3  ;;  %v1935_v48 = vsel %vm163_vm2, %v1933_v26, %v1934_v9 }
 0x232   :  { %1897 = vrot.lane.b32.xlu1 %v1884_v61, %s4769_s4  ;;  %1899 = vrot.lane.b32.xlu0 %v1885_v52, %s4769_s4  ;;  %v1924_v61 = vmul.f32 %v1920_v23, %v5123_v7  ;;  %v1973_v23 = vrot.slane %v1961_v33, 4  ;;  %v1976_v33 = vrot.slane %v1963_v10, 4  ;;  %v1966_v9 = vmul.f32 %v1960_v41, %v5174_v37 }
 0x234   :  { %v5852_v40 = vpop.permute.xlu1 %1489  ;;  %v5854_v35 = vpop.permute.xlu0 %1513 }
 0x235   :  { %8975 = vst [vmem:[#allocation128_spill] sm:$0xff] %v5852_v40  ;;  %8976 = vst [vmem:[#allocation129_spill] sm:$0xff] %v5854_v35  ;;  %v1888_v40 = vmul.f32 %v1882_v12, %v5174_v37  ;;  %v1941_v12 = vrot.slane %v1926_v14, 4 }
 0x236   :  { %1901 = vrot.lane.b32.xlu1 %v1886_v53, %s4769_s4  ;;  %1903 = vrot.lane.b32.xlu0 %v1887_v16, %s4769_s4  ;;  %v1962_v53 = vmul.f32 %v1960_v41, %v5108_v55  ;;  %v1938_v16 = vrot.slane %v1924_v61, 4 }
 0x237   :  { %v1942_v61 = vsel %vm163_vm2, %v1939_v42, %v1941_v12  ;;  %v1979_v12 = vrot.slane %v1965_v32, 4 }
 0x238   :  { %v5863_v52 = vpop.permute.xlu1 %1515  ;;  %v5865_v35 = vpop.permute.xlu0 %1517  ;;  %v1940_v13 = vsel %vm163_vm2, %v1938_v16, %v1939_v42  ;;  %v1974_v26 = vrot.slane %v1962_v53, 4 }
 0x239   :  { %8977 = vst [vmem:[#allocation130_spill] sm:$0xff] %v5863_v52  ;;  %8978 = vst [vmem:[#allocation131_spill] sm:$0xff] %v5865_v35 }
 0x23a   :  { %1905 = vrot.lane.b32.xlu1 %v1888_v40, %s4769_s4  ;;  %1943 = vrot.lane.b32.xlu0 %v1935_v48, %s4769_s4  ;;  %v2008_v48 = vstv %s4603_s10  ;;  %v1975_v14 = vsel %vm163_vm2, %v1973_v23, %v1974_v26  ;;  %v1977_v16 = vsel %vm163_vm2, %v1974_v26, %v1976_v33  ;;  %v1981_v23 = vrot.slane %v1966_v9, 4  ;;  %s4633_s10 = sld [smem:[#allocation6 + $0x3b]] }
 0x23b   :  { %v2009_v42 = vmul.f32 %v2008_v48, %v5112_v58  ;;  %v2010_v10 = vmul.f32 %v2008_v48, %v5108_v55 }
 0x23c   :  { %v5874_v52 = vpop.permute.xlu1 %1519  ;;  %v5876_v35 = vpop.permute.xlu0 %1543 }
 0x23d   :  { %8979 = vst [vmem:[#allocation132_spill] sm:$0xff] %v5876_v35  ;;  %v2021_v26 = vrot.slane %v2009_v42, 4  ;;  %v2022_v32 = vrot.slane %v2010_v10, 4 }
 0x23e   :  { %1945 = vrot.lane.b32.xlu1 %v1937_v25, %s4769_s4  ;;  %1947 = vrot.lane.b32.xlu0 %v1940_v13, %s4769_s4  ;;  %v1964_v25 = vmul.f32 %v1960_v41, %v5123_v7 }
 0x240   :  { %v5883_v45 = vpop.permute.xlu1 %1545  ;;  %v5885_v40 = vpop.permute.xlu0 %1547 }
 0x241   :  { %8980 = vst [vmem:[#allocation133_spill] sm:$0xff] %v5883_v45  ;;  %8981 = vst [vmem:[#allocation134_spill] sm:$0xff] %v5885_v40  ;;  %v1982_v40 = vsel %vm163_vm2, %v1979_v12, %v1981_v23 }
 0x242   :  { %1949 = vrot.lane.b32.xlu1 %v1942_v61, %s4769_s4  ;;  %1983 = vrot.lane.b32.xlu0 %v1975_v14, %s4769_s4  ;;  %v1978_v61 = vrot.slane %v1964_v25, 4  ;;  %v2023_v25 = vsel %vm163_vm2, %v2021_v26, %v2022_v32 }
 0x244   :  { %v5894_v13 = vpop.permute.xlu1 %1549  ;;  %v5896_v53 = vpop.permute.xlu0 %1551 }
 0x245   :  { %8982 = vst [vmem:[#allocation135_spill] sm:$0xff] %v5894_v13  ;;  %8983 = vst [vmem:[#allocation136_spill] sm:$0xff] %v5896_v53  ;;  %v2011_v13 = vmul.f32 %v2008_v48, %v5146_v39  ;;  %v1980_v53 = vsel %vm163_vm2, %v1978_v61, %v1979_v12 }
 0x246   :  { %1985 = vrot.lane.b32.xlu1 %v1977_v16, %s4769_s4  ;;  %1987 = vrot.lane.b32.xlu0 %v1976_v33, %s4769_s4 }
 0x247   :  { %v2024_v16 = vrot.slane %v2011_v13, 4 }
 0x248   :  { %v5903_v14 = vpop.permute.xlu1 %1553  ;;  %v5905_v41 = vpop.permute.xlu0 %1581 }
 0x249   :  { %8984 = vst [vmem:[#allocation137_spill] sm:$0xff] %v5903_v14  ;;  %8985 = vst [vmem:[#allocation138_spill] sm:$0xff] %v5905_v41  ;;  %v2013_v41 = vmul.f32 %v2008_v48, %v5140_v3  ;;  %v2014_v14 = vmul.f32 %v2008_v48, %v5174_v37  ;;  %v2025_v12 = vsel %vm163_vm2, %v2022_v32, %v2024_v16 }
 0x24a   :  { %1989 = vrot.lane.b32.xlu1 %v1980_v53, %s4769_s4  ;;  %1991 = vrot.lane.b32.xlu0 %v1982_v40, %s4769_s4  ;;  %v2012_v53 = vmul.f32 %v2008_v48, %v5123_v7 }
 0x24b   :  { %v2027_v10 = vrot.slane %v2013_v41, 4  ;;  %v2029_v61 = vrot.slane %v2014_v14, 4 }
 0x24c   :  { %v5912_v9 = vpop.permute.xlu1 %1583  ;;  %v5914_v33 = vpop.permute.xlu0 %1585  ;;  %v2026_v13 = vrot.slane %v2012_v53, 4 }
 0x24d   :  { %8986 = vst [vmem:[#allocation139_spill] sm:$0xff] %v5912_v9  ;;  %8987 = vst [vmem:[#allocation140_spill] sm:$0xff] %v5914_v33  ;;  %v2030_v48 = vsel %vm163_vm2, %v2027_v10, %v2029_v61 }
 0x24e   :  { %1993 = vrot.lane.b32.xlu1 %v1981_v23, %s4769_s4  ;;  %2031 = vrot.lane.b32.xlu0 %v2023_v25, %s4769_s4  ;;  %v2028_v25 = vsel %vm163_vm2, %v2026_v13, %v2027_v10  ;;  %v2082_v13 = vstv %s4605_s12  ;;  %s4636_s12 = sld [smem:[#allocation6 + $0x50]] }
 0x250   :  { %v5922_v42 = vpop.permute.xlu1 %1587  ;;  %v5924_v40 = vpop.permute.xlu0 %1589 }
 0x251   :  { %8988 = vst [vmem:[#allocation141_spill] sm:$0xff] %v5922_v42  ;;  %8989 = vst [vmem:[#allocation142_spill] sm:$0xff] %v5924_v40  ;;  %v2056_v42 = vstv %s4604_s11  ;;  %s4634_s11 = sld [smem:[#allocation6 + $0x42]] }
 0x252   :  { %2033 = vrot.lane.b32.xlu1 %v2025_v12, %s4769_s4  ;;  %2035 = vrot.lane.b32.xlu0 %v2024_v16, %s4769_s4  ;;  %v2057_v32 = vmul.f32 %v2056_v42, %v5112_v58  ;;  %v2058_v12 = vmul.f32 %v2056_v42, %v5108_v55  ;;  %v2059_v10 = vmul.f32 %v2056_v42, %v5123_v7 }
 0x254   :  { %v5929_v26 = vpop.permute.xlu1 %1591  ;;  %v5931_v23 = vpop.permute.xlu0 %1619 }
 0x255   :  { %8990 = vst [vmem:[#allocation143_spill] sm:$0xff] %v5929_v26  ;;  %8991 = vst [vmem:[#allocation144_spill] sm:$0xff] %v5931_v23 }
 0x256   :  { %2037 = vrot.lane.b32.xlu1 %v2028_v25, %s4769_s4  ;;  %2039 = vrot.lane.b32.xlu0 %v2030_v48, %s4769_s4 }
 0x258   :  { %v5937_v14 = vpop.permute.xlu1 %1621  ;;  %v5939_v41 = vpop.permute.xlu0 %1623 }
 0x259   :  { %8992 = vst [vmem:[#allocation145_spill] sm:$0xff] %v5937_v14  ;;  %8993 = vst [vmem:[#allocation146_spill] sm:$0xff] %v5939_v41 }
 0x25a   :  { %2041 = vrot.lane.b32.xlu1 %v2029_v61, %s4769_s4  ;;  %2065 = vrot.lane.b32.xlu0 %v2057_v32, %s4770_s13  ;;  %v2060_v61 = vmul.f32 %v2056_v42, %v5140_v3  ;;  %v2083_v32 = vmul.f32 %v2082_v13, %v5112_v58 }
 0x25c   :  { %v5944_v16 = vpop.permute.xlu1 %1625  ;;  %v5946_v53 = vpop.permute.xlu0 %1627 }
 0x25d   :  { %8994 = vst [vmem:[#allocation147_spill] sm:$0xff] %v5944_v16  ;;  %8995 = vst [vmem:[#allocation148_spill] sm:$0xff] %v5946_v53 }
 0x25e   :  { %2067 = vrot.lane.b32.xlu1 %v2058_v12, %s4770_s13  ;;  %2069 = vrot.lane.b32.xlu0 %v2059_v10, %s4770_s13  ;;  %v2084_v12 = vmul.f32 %v2082_v13, %v5108_v55  ;;  %v2085_v10 = vmul.f32 %v2082_v13, %v5146_v39 }
 0x260   :  { %v5952_v25 = vpop.permute.xlu1 %1629  ;;  %v5954_v48 = vpop.permute.xlu0 %1667 }
 0x261   :  { %8996 = vst [vmem:[#allocation149_spill] sm:$0xff] %v5952_v25  ;;  %8997 = vst [vmem:[#allocation150_spill] sm:$0xff] %v5954_v48  ;;  %v2120_v25 = vstv %s4606_s14  ;;  %s4566_s14 = sld [smem:[#allocation6 + $0x1c]] }
 0x262   :  { %2071 = vrot.lane.b32.xlu1 %v2060_v61, %s4770_s13  ;;  %2095 = vrot.lane.b32.xlu0 %v2083_v32, %s4770_s13  ;;  %v2086_v61 = vmul.f32 %v2082_v13, %v5123_v7  ;;  %v2087_v32 = vmul.f32 %v2082_v13, %v5140_v3 }
 0x264   :  { %v5960_v53 = vpop.permute.xlu1 %1669  ;;  %v5962_v16 = vpop.permute.xlu0 %1671 }
 0x265   :  { %8998 = vst [vmem:[#allocation151_spill] sm:$0xff] %v5960_v53  ;;  %8999 = vst [vmem:[#allocation152_spill] sm:$0xff] %v5962_v16 }
 0x266   :  { %2097 = vrot.lane.b32.xlu1 %v2084_v12, %s4770_s13  ;;  %2099 = vrot.lane.b32.xlu0 %v2085_v10, %s4770_s13  ;;  %v2088_v12 = vmul.f32 %v2082_v13, %v5174_v37  ;;  %v2121_v10 = vmul.f32 %v2120_v25, %v5112_v58 }
 0x268   :  { %v5968_v42 = vpop.permute.xlu1 %1673  ;;  %v5970_v48 = vpop.permute.xlu0 %1707 }
 0x269   :  { %9000 = vst [vmem:[#allocation153_spill] sm:$0xff] %v5968_v42  ;;  %9001 = vst [vmem:[#allocation154_spill] sm:$0xff] %v5970_v48 }
 0x26a   :  { %2101 = vrot.lane.b32.xlu1 %v2086_v61, %s4770_s13  ;;  %2103 = vrot.lane.b32.xlu0 %v2087_v32, %s4770_s13  ;;  %v2122_v61 = vmul.f32 %v2120_v25, %v5108_v55  ;;  %v2123_v32 = vmul.f32 %v2120_v25, %v5146_v39 }
 0x26c   :  { %v5976_v16 = vpop.permute.xlu1 %1709  ;;  %v5978_v53 = vpop.permute.xlu0 %1711 }
 0x26d   :  { %9002 = vst [vmem:[#allocation155_spill] sm:$0xff] %v5976_v16  ;;  %9003 = vst [vmem:[#allocation156_spill] sm:$0xff] %v5978_v53 }
 0x26e   :  { %2105 = vrot.lane.b32.xlu1 %v2088_v12, %s4770_s13  ;;  %2133 = vrot.lane.b32.xlu0 %v2121_v10, %s4770_s13  ;;  %v2124_v12 = vmul.f32 %v2120_v25, %v5123_v7  ;;  %v2125_v10 = vmul.f32 %v2120_v25, %v5140_v3 }
 0x270   :  { %v5984_v48 = vpop.permute.xlu1 %1713  ;;  %v5986_v42 = vpop.permute.xlu0 %1715 }
 0x271   :  { %9004 = vst [vmem:[#allocation157_spill] sm:$0xff] %v5984_v48  ;;  %9005 = vst [vmem:[#allocation158_spill] sm:$0xff] %v5986_v42  ;;  %v2158_v48 = vstv %s4607_s18  ;;  %s519_s18 = sld [smem:[#allocation6]] }
 0x272   :  { %2135 = vrot.lane.b32.xlu1 %v2122_v61, %s4770_s13  ;;  %2137 = vrot.lane.b32.xlu0 %v2123_v32, %s4770_s13  ;;  %v2126_v61 = vmul.f32 %v2120_v25, %v5174_v37  ;;  %v2159_v32 = vmul.f32 %v2158_v48, %v5112_v58  ;;  %v2164_v40 = vmul.f32 %v2158_v48, %v5174_v37 }
 0x274   :  { %v5992_v13 = vpop.permute.xlu1 %1717  ;;  %v5994_v53 = vpop.permute.xlu0 %1755 }
 0x275   :  { %9006 = vst [vmem:[#allocation159_spill] sm:$0xff] %v5992_v13  ;;  %9007 = vst [vmem:[#allocation160_spill] sm:$0xff] %v5994_v53  ;;  %v2196_v53 = vstv %s4608_s19  ;;  %s4567_s19 = sld [smem:[#allocation6 + $0x23]] }
 0x276   :  { %2139 = vrot.lane.b32.xlu1 %v2124_v12, %s4770_s13  ;;  %2141 = vrot.lane.b32.xlu0 %v2125_v10, %s4770_s13  ;;  %v2160_v12 = vmul.f32 %v2158_v48, %v5108_v55  ;;  %v2161_v10 = vmul.f32 %v2158_v48, %v5146_v39  ;;  %v2198_v25 = vmul.f32 %v2196_v53, %v5108_v55 }
 0x277   :  { %v2201_v26 = vmul.f32 %v2196_v53, %v5140_v3  ;;  %v2202_v9 = vmul.f32 %v2196_v53, %v5174_v37 }
 0x278   :  { %v6000_v42 = vpop.permute.xlu1 %1757  ;;  %v6002_v16 = vpop.permute.xlu0 %1759  ;;  %v2210_v23 = vrot.slane %v2198_v25, 4 }
 0x279   :  { %9008 = vst [vmem:[#allocation161_spill] sm:$0xff] %v6000_v42  ;;  %9009 = vst [vmem:[#allocation162_spill] sm:$0xff] %v6002_v16  ;;  %v2197_v16 = vmul.f32 %v2196_v53, %v5112_v58  ;;  %v2199_v42 = vmul.f32 %v2196_v53, %v5146_v39  ;;  %v2215_v25 = vrot.slane %v2201_v26, 4 }
 0x27a   :  { %2143 = vrot.lane.b32.xlu1 %v2126_v61, %s4770_s13  ;;  %2171 = vrot.lane.b32.xlu0 %v2159_v32, %s4770_s13 }
 0x27b   :  { %v2209_v14 = vrot.slane %v2197_v16, 4  ;;  %v2212_v33 = vrot.slane %v2199_v42, 4 }
 0x27c   :  { %v6008_v13 = vpop.permute.xlu1 %1761  ;;  %v6010_v41 = vpop.permute.xlu0 %1763 }
 0x27d   :  { %9010 = vst [vmem:[#allocation163_spill] sm:$0xff] %v6008_v13  ;;  %9011 = vst [vmem:[#allocation164_spill] sm:$0xff] %v6010_v41  ;;  %v2162_v13 = vmul.f32 %v2158_v48, %v5123_v7  ;;  %v2163_v41 = vmul.f32 %v2158_v48, %v5140_v3  ;;  %v2211_v16 = vsel %vm163_vm2, %v2209_v14, %v2210_v23  ;;  %v2217_v48 = vrot.slane %v2202_v9, 4 }
 0x27e   :  { %2173 = vrot.lane.b32.xlu1 %v2160_v12, %s4770_s13  ;;  %2175 = vrot.lane.b32.xlu0 %v2161_v10, %s4770_s13  ;;  %v2236_v12 = vstv %s4609_s1  ;;  %v2200_v10 = vmul.f32 %v2196_v53, %v5123_v7  ;;  %v2213_v42 = vsel %vm163_vm2, %v2210_v23, %v2212_v33  ;;  %s6637_s1 = sld [smem:[#allocation6 + $0x7]] }
 0x27f   :  { %v2239_v53 = vmul.f32 %v2236_v12, %v5146_v39  ;;  %v2241_v33 = vmul.f32 %v2236_v12, %v5140_v3  ;;  %v2242_v23 = vmul.f32 %v2236_v12, %v5174_v37 }
 0x280   :  { %v6018_v61 = vpop.permute.xlu1 %1765  ;;  %v6020_v32 = vpop.permute.xlu0 %1789 }
 0x281   :  { %9012 = vst [vmem:[#allocation165_spill] sm:$0xff] %v6018_v61  ;;  %9013 = vst [vmem:[#allocation166_spill] sm:$0xff] %v6020_v32 }
 0x282   :  { %2177 = vrot.lane.b32.xlu1 %v2162_v13, %s4770_s13  ;;  %2179 = vrot.lane.b32.xlu0 %v2163_v41, %s4770_s13  ;;  %v2237_v13 = vmul.f32 %v2236_v12, %v5112_v58  ;;  %v2238_v41 = vmul.f32 %v2236_v12, %v5108_v55 }
 0x284   :  { %v6029_v61 = vpop.permute.xlu1 %1791  ;;  %v6031_v32 = vpop.permute.xlu0 %1793  ;;  %v2249_v14 = vrot.slane %v2237_v13, 4  ;;  %v2250_v35 = vrot.slane %v2238_v41, 4  ;;  %v484_v13 = vsel %vm281_vm6, %v4928_v24, %v5161_v20 }
 0x285   :  { %9014 = vst [vmem:[#allocation167_spill] sm:$0xff] %v6029_v61  ;;  %9015 = vst [vmem:[#allocation168_spill] sm:$0xff] %v6031_v32  ;;  %v2214_v61 = vrot.slane %v2200_v10, 4 }
 0x286   :  { %2181 = vrot.lane.b32.xlu1 %v2164_v40, %s4770_s13  ;;  %2219 = vrot.lane.b32.xlu0 %v2211_v16, %s4770_s13  ;;  %v2218_v16 = vsel %vm163_vm2, %v2215_v25, %v2217_v48  ;;  %v2251_v9 = vsel %vm163_vm2, %v2249_v14, %v2250_v35  ;;  %v2257_v14 = vrot.slane %v2242_v23, 4 }
 0x287   :  { %v2216_v26 = vsel %vm163_vm2, %v2214_v61, %v2215_v25  ;;  %v2240_v61 = vmul.f32 %v2236_v12, %v5123_v7  ;;  %v483_v25 = vsel %vm281_vm6, %v4919_v44, %v5150_v36  ;;  %v487_v44 = vsel %vm281_vm6, %v4946_v4, %v5182_v47 }
 0x288   :  { %v6040_v45 = vpop.permute.xlu1 %1795  ;;  %v6042_v32 = vpop.permute.xlu0 %1819  ;;  %v490_v36 = vsel %vm288_vm7, %v484_v13, %v5198_v8  ;;  %v489_v20 = vsel %vm288_vm7, %v483_v25, %v5192_v59  ;;  %v486_v47 = vsel %vm281_vm6, %v4942_v63, %v5178_v46  ;;  %v493_v59 = vsel %vm288_vm7, %v487_v44, %v5214_v0 }
 0x289   :  { %9016 = vst [vmem:[#allocation169_spill] sm:$0xff] %v6040_v45  ;;  %9017 = vst [vmem:[#allocation170_spill] sm:$0xff] %v6042_v32  ;;  %v2284_v32 = vstv %s4610_s0  ;;  %v2252_v45 = vrot.slane %v2239_v53, 4  ;;  %v2254_v24 = vrot.slane %v2240_v61, 4  ;;  %v495_v4 = vsel %vm295_vm8, %v489_v20, %v5230_v38  ;;  %s6652_s0 = sld [smem:[#allocation6 + $0x57]] }
 0x28a   :  { %2221 = vrot.lane.b32.xlu1 %v2213_v42, %s4770_s13  ;;  %2223 = vrot.lane.b32.xlu0 %v2216_v26, %s4770_s13  ;;  %v2285_v53 = vmul.f32 %v2284_v32, %v5112_v58  ;;  %v2255_v26 = vrot.slane %v2241_v33, 4  ;;  %v2286_v12 = vmul.f32 %v2284_v32, %v5108_v55  ;;  %v496_v8 = vsel %vm295_vm8, %v490_v36, %v5237_v43 }
 0x28b   :  { %v2253_v42 = vsel %vm163_vm2, %v2250_v35, %v2252_v45  ;;  %v2290_v38 = vmul.f32 %v2284_v32, %v5174_v37  ;;  %v501_v63 = vsel %vm302_vm9, %v495_v4, %v5266_v27  ;;  %v502_v46 = vsel %vm302_vm9, %v496_v8, %v5274_v6 }
 0x28c   :  { %v6049_v40 = vpop.permute.xlu1 %1821  ;;  %v6051_v10 = vpop.permute.xlu0 %1823  ;;  %v2256_v33 = vsel %vm163_vm2, %v2254_v24, %v2255_v26  ;;  %v2297_v23 = vrot.slane %v2285_v53, 4  ;;  %v2298_v61 = vrot.slane %v2286_v12, 4  ;;  %v507_v0 = vsel %vm309_vm10, %v501_v63, %v5296_v22 }
 0x28d   :  { %9018 = vst [vmem:[#allocation171_spill] sm:$0xff] %v6049_v40  ;;  %9019 = vst [vmem:[#allocation172_spill] sm:$0xff] %v6051_v10  ;;  %v2288_v43 = vmul.f32 %v2284_v32, %v5123_v7  ;;  %v492_v12 = vsel %vm288_vm7, %v486_v47, %v5210_v62  ;;  %v499_v24 = vsel %vm295_vm8, %v493_v59, %v5255_v60  ;;  %v2305_v36 = vrot.slane %v2290_v38, 4 }
 0x28e   :  { %2225 = vrot.lane.b32.xlu1 %v2218_v16, %s4770_s13  ;;  %2259 = vrot.lane.b32.xlu0 %v2251_v9, %s4770_s13  ;;  %v2287_v9 = vmul.f32 %v2284_v32, %v5146_v39  ;;  %v2299_v53 = vsel %vm163_vm2, %v2297_v23, %v2298_v61  ;;  %v508_v27 = vsel %vm309_vm10, %v502_v46, %v5302_v57  ;;  %v2569_v20 = vstv %s4618_s20  ;;  %s6669_s20 = sld [smem:[#allocation6 + $0xe]] }
 0x28f   :  { %v6133_v62 = vsel %vm316_vm11, %v508_v27, %v5332_v30  ;;  %v485_v60 = vsel %vm281_vm6, %v4933_v56, %v5169_v21  ;;  %v498_v57 = vsel %vm295_vm8, %v492_v12, %v5250_v51  ;;  %v2609_v46 = vstv %s4619_s21  ;;  %s6694_s21 = sld [smem:[#allocation6 + $0x2a]] }
 0x290   :  { %v6066_v41 = vpop.permute.xlu1 %1825  ;;  %v6068_v48 = vpop.permute.xlu0 %1827  ;;  %v2571_v21 = vmul.f32 %v2569_v20, %v6133_v62  ;;  %v491_v51 = vsel %vm288_vm7, %v485_v60, %v5202_v54  ;;  %v2611_v27 = vmul.f32 %v2609_v46, %v6133_v62 }
 0x291   :  { %9020 = vst [vmem:[#allocation173_spill] sm:$0xff] %v6066_v41  ;;  %9021 = vst [vmem:[#allocation174_spill] sm:$0xff] %v6068_v48  ;;  %v497_v8 = vsel %vm295_vm8, %v491_v51, %v5241_v31  ;;  %v2657_v51 = vstv %s4620_s22  ;;  %s6722_s22 = sld [smem:[#allocation6 + $0x5e]] }
 0x292   :  { %2261 = vrot.lane.b32.xlu1 %v2253_v42, %s4770_s13  ;;  %2263 = vrot.lane.b32.xlu0 %v2252_v45, %s4770_s13  ;;  %v2258_v45 = vsel %vm163_vm2, %v2255_v26, %v2257_v14  ;;  %v2300_v42 = vrot.slane %v2287_v9, 4  ;;  %v2289_v26 = vmul.f32 %v2284_v32, %v5140_v3  ;;  %v505_v9 = vsel %vm302_vm9, %v499_v24, %v5287_v28 }
 0x293   :  { %v511_v23 = vsel %vm309_vm10, %v505_v9, %v5316_v17  ;;  %v504_v28 = vsel %vm302_vm9, %v498_v57, %v5283_v34 }
 0x294   :  { %v6082_v35 = vpop.permute.xlu1 %1829  ;;  %v6084_v16 = vpop.permute.xlu0 %1857  ;;  %v2301_v22 = vsel %vm163_vm2, %v2298_v61, %v2300_v42  ;;  %v2303_v32 = vrot.slane %v2289_v26, 4  ;;  %v6160_v4 = vsel %vm316_vm11, %v511_v23, %v5346_v50  ;;  %v510_v17 = vsel %vm309_vm10, %v504_v28, %v5312_v2  ;;  %v9041_v23 = vld [vmem:[#allocation14_spill] sm:$0xff] }
 0x295   :  { %9022 = vst [vmem:[#allocation175_spill] sm:$0xff] %v6082_v35  ;;  %9023 = vst [vmem:[#allocation176_spill] sm:$0xff] %v6084_v16  ;;  %v6168_v47 = vsel %vm316_vm11, %v510_v17, %v5342_v19  ;;  %v488_v50 = vsel %vm281_vm6, %v4954_v11, %v5188_v49  ;;  %v503_v26 = vsel %vm302_vm9, %v497_v8, %v5277_v5  ;;  %v9034_v5 = vld [vmem:[#allocation11_spill] sm:$0xff] }
 0x296   :  { %2265 = vrot.lane.b32.xlu1 %v2256_v33, %s4770_s13  ;;  %2267 = vrot.lane.b32.xlu0 %v2258_v45, %s4770_s13  ;;  %v2306_v56 = vsel %vm163_vm2, %v2303_v32, %v2305_v36  ;;  %v2572_v2 = vmul.f32 %v2569_v20, %v6168_v47  ;;  %v494_v19 = vsel %vm288_vm7, %v488_v50, %v5223_v15 }
 0x297   :  { %v509_v49 = vsel %vm309_vm10, %v503_v26, %v5306_v29  ;;  %v2613_v28 = vmul.f32 %v2609_v46, %v6168_v47 }
 0x298   :  { %v6100_v13 = vpop.permute.xlu1 %1859  ;;  %v6102_v25 = vpop.permute.xlu0 %1861  ;;  %v2581_v15 = vrot.slane %v2572_v2, 6 }
 0x299   :  { %9024 = vst [vmem:[#allocation177_spill] sm:$0xff] %v6100_v13  ;;  %9025 = vst [vmem:[#allocation178_spill] sm:$0xff] %v6102_v25  ;;  %v2627_v26 = vrot.slane %v2613_v28, 6 }
 0x29a   :  { %2269 = vrot.lane.b32.xlu1 %v2257_v14, %s4770_s13  ;;  %2307 = vrot.lane.b32.xlu0 %v2299_v53, %s4770_s13  ;;  %v6124_v14 = vsel %vm316_vm11, %v507_v0, %v5326_v1  ;;  %v2302_v1 = vrot.slane %v2288_v43, 4  ;;  %v2579_v53 = vrot.slane %v2571_v21, 6  ;;  %v6196_v0 = vsel %vm316_vm11, %v509_v49, %v5336_v18 }
 0x29b   :  { %v2570_v30 = vmul.f32 %v2569_v20, %v6124_v14  ;;  %v500_v43 = vsel %vm295_vm8, %v494_v19, %v9034_v5  ;;  %v2610_v24 = vmul.f32 %v2609_v46, %v6124_v14  ;;  %v2614_v21 = vmul.f32 %v2609_v46, %v6160_v4 }
 0x29c   :  { %v6126_v44 = vpop.permute.xlu1 %1863  ;;  %v6128_v6 = vpop.permute.xlu0 %1865  ;;  %v2304_v61 = vsel %vm163_vm2, %v2302_v1, %v2303_v32  ;;  %v9037_v32 = vld [vmem:[#allocation12_spill] sm:$0xff]  ;;  %v2658_v2 = vmul.f32 %v2657_v51, %v6124_v14  ;;  %v2659_v19 = vmul.f32 %v2657_v51, %v6133_v62 }
 0x29d   :  { %9026 = vst [vmem:[#allocation179_spill] sm:$0xff] %v6126_v44  ;;  %9027 = vst [vmem:[#allocation180_spill] sm:$0xff] %v6128_v6  ;;  %v2578_v34 = vrot.slane %v2570_v30, 6  ;;  %v2622_v9 = vrot.slane %v2610_v24, 6  ;;  %v2623_v30 = vrot.slane %v2611_v27, 6  ;;  %v2662_v24 = vmul.f32 %v2657_v51, %v6160_v4  ;;  %v9200_v6 = vld [vmem:[#allocation46_spill] sm:$0xff] }
 0x29e   :  { %2309 = vrot.lane.b32.xlu1 %v2301_v22, %s4770_s13  ;;  %2311 = vrot.lane.b32.xlu0 %v2300_v42, %s4770_s13  ;;  %v2573_v42 = vmul.f32 %v2569_v20, %v6160_v4  ;;  %v2612_v22 = vmul.f32 %v2609_v46, %v6196_v0  ;;  %v9038_v20 = vld [vmem:[#allocation13_spill] sm:$0xff]  ;;  %v2670_v5 = vrot.slane %v2658_v2, 2  ;;  %v2697_v27 = vstv %s4621_s24  ;;  %s6769_s24 = sld [smem:[#allocation6 + $0x15]] }
 0x29f   :  { %v2580_v31 = vsel %vm156_vm5, %v2578_v34, %v2579_v53  ;;  %v2624_v50 = vsel %vm156_vm5, %v2622_v9, %v2623_v30 }
 0x2a0   :  { %v6144_v33 = vpop.permute.xlu1 %1867  ;;  %v6146_v45 = vpop.permute.xlu0 %1895  ;;  %v2582_v63 = vrot.slane %v2573_v42, 6  ;;  %v2628_v42 = vrot.slane %v2614_v21, 6 }
 0x2a1   :  { %9028 = vst [vmem:[#allocation181_spill] sm:$0xff] %v6144_v33  ;;  %9029 = vst [vmem:[#allocation182_spill] sm:$0xff] %v6146_v45 }
 0x2a2   :  { %2313 = vrot.lane.b32.xlu1 %v2304_v61, %s4770_s13  ;;  %2315 = vrot.lane.b32.xlu0 %v2306_v56, %s4770_s13  ;;  %v2583_v18 = vsel %vm156_vm5, %v2581_v15, %v2582_v63  ;;  %v2625_v56 = vrot.slane %v2612_v22, 6 }
 0x2a4   :  { %v6170_v59 = vpop.permute.xlu1 %1897  ;;  %v6172_v54 = vpop.permute.xlu0 %1899 }
 0x2a5   :  { %9030 = vst [vmem:[#allocation183_spill] sm:$0xff] %v6170_v59  ;;  %9031 = vst [vmem:[#allocation184_spill] sm:$0xff] %v6172_v54 }
 0x2a6   :  { %2317 = vrot.lane.b32.xlu1 %v2305_v36, %s4770_s13  ;;  %2584 = vrot.lane.b32.xlu0 %v2578_v34, %s4765_s27  ;;  %v506_v36 = vsel %vm302_vm9, %v500_v43, %v9037_v32  ;;  %v2671_v43 = vrot.slane %v2659_v19, 2  ;;  %v2700_v19 = vmul.f32 %v2697_v27, %v6196_v0 }
 0x2a7   :  { %v512_v60 = vsel %vm309_vm10, %v506_v36, %v9038_v20 }
 0x2a8   :  { %v6187_v38 = vpop.permute.xlu1 %1901  ;;  %v6189_v11 = vpop.permute.xlu0 %1903  ;;  %v6222_v61 = vsel %vm316_vm11, %v512_v60, %v9041_v23  ;;  %v2698_v23 = vmul.f32 %v2697_v27, %v6124_v14 }
 0x2a9   :  { %9032 = vst [vmem:[#allocation185_spill] sm:$0xff] %v6187_v38  ;;  %9033 = vst [vmem:[#allocation186_spill] sm:$0xff] %v6189_v11  ;;  %v2615_v8 = vmul.f32 %v2609_v46, %v6222_v61  ;;  %v2629_v46 = vsel %vm156_vm5, %v2627_v26, %v2628_v42  ;;  %v2663_v60 = vmul.f32 %v2657_v51, %v6222_v61 }
 0x2aa   :  { %2586 = vrot.lane.b32.xlu1 %v2580_v31, %s4765_s27  ;;  %2588 = vrot.lane.b32.xlu0 %v2579_v53, %s4765_s27  ;;  %v2626_v53 = vsel %vm156_vm5, %v2623_v30, %v2625_v56  ;;  %v2676_v30 = vrot.slane %v2662_v24, 2  ;;  %v2699_v56 = vmul.f32 %v2697_v27, %v6133_v62  ;;  %v2702_v24 = vmul.f32 %v2697_v27, %v6160_v4 }
 0x2ac   :  { %v6202_v12 = vpop.permute.xlu1 %1905  ;;  %v6204_v29 = vpop.permute.xlu0 %1943  ;;  %v2711_v2 = vrot.slane %v2699_v56, 2 }
 0x2ad   :  { %9035 = vst [vmem:[#allocation11_spill] sm:$0xff] %v6202_v12  ;;  %9036 = vst [vmem:[#allocation187_spill] sm:$0xff] %v6204_v29 }
 0x2ae   :  { %2590 = vrot.lane.b32.xlu1 %v2581_v15, %s4765_s27  ;;  %2592 = vrot.lane.b32.xlu0 %v2583_v18, %s4765_s27  ;;  %v2660_v15 = vmul.f32 %v2657_v51, %v6196_v0  ;;  %v2661_v18 = vmul.f32 %v2657_v51, %v6168_v47  ;;  %v2678_v51 = vrot.slane %v2663_v60, 2 }
 0x2b0   :  { %v6216_v57 = vpop.permute.xlu1 %1945  ;;  %v6218_v1 = vpop.permute.xlu0 %1947  ;;  %v2673_v20 = vrot.slane %v2660_v15, 2  ;;  %v2675_v21 = vrot.slane %v2661_v18, 2  ;;  %v2679_v15 = vsel %vm2409_vm12, %v2676_v30, %v2678_v51  ;;  %v2703_v18 = vmul.f32 %v2697_v27, %v6222_v61 }
 0x2b1   :  { %9039 = vst [vmem:[#allocation12_spill] sm:$0xff] %v6216_v57  ;;  %9040 = vst [vmem:[#allocation13_spill] sm:$0xff] %v6218_v1  ;;  %v640_v57 = vstv %s6694_s21  ;;  %s7842_s21 = sld [smem:[#allocation6 + $0x60]] }
 0x2b2   :  { %2594 = vrot.lane.b32.xlu1 %v2582_v63, %s4765_s27  ;;  %2632 = vrot.lane.b32.xlu0 %v2622_v9, %s4765_s27  ;;  %v2630_v63 = vrot.slane %v2615_v8, 6  ;;  %v2672_v9 = vsel %vm2409_vm12, %v2670_v5, %v2671_v43  ;;  %v2674_v8 = vsel %vm2409_vm12, %v2671_v43, %v2673_v20  ;;  %v2713_v43 = vrot.slane %v2700_v19, 2 }
 0x2b3   :  { %v2718_v56 = vrot.slane %v2703_v18, 2  ;;  %v644_v11 = vmul.f32 %v640_v57, %v5123_v7 }
 0x2b4   :  { %v6228_v17 = vpop.permute.xlu1 %1949  ;;  %v6230_v34 = vpop.permute.xlu0 %1983  ;;  %v2631_v36 = vsel %vm156_vm5, %v2628_v42, %v2630_v63  ;;  %v2710_v42 = vrot.slane %v2698_v23, 2  ;;  %v2716_v23 = vrot.slane %v2702_v24, 2 }
 0x2b5   :  { %9042 = vst [vmem:[#allocation14_spill] sm:$0xff] %v6228_v17  ;;  %9043 = vst [vmem:[#allocation188_spill] sm:$0xff] %v6230_v34 }
 0x2b6   :  { %2634 = vrot.lane.b32.xlu1 %v2624_v50, %s4765_s27  ;;  %2636 = vrot.lane.b32.xlu0 %v2626_v53, %s4765_s27  ;;  %v2677_v53 = vsel %vm2409_vm12, %v2675_v21, %v2676_v30  ;;  %v2712_v5 = vsel %vm2409_vm12, %v2710_v42, %v2711_v2  ;;  %v2714_v30 = vsel %vm2409_vm12, %v2711_v2, %v2713_v43 }
 0x2b7   :  { %v2719_v19 = vsel %vm2409_vm12, %v2716_v23, %v2718_v56 }
 0x2b8   :  { %v6239_v49 = vpop.permute.xlu1 %1985  ;;  %v6241_v31 = vpop.permute.xlu0 %1987 }
 0x2b9   :  { %9044 = vst [vmem:[#allocation189_spill] sm:$0xff] %v6239_v49  ;;  %9045 = vst [vmem:[#allocation190_spill] sm:$0xff] %v6241_v31 }
 0x2ba   :  { %2638 = vrot.lane.b32.xlu1 %v2627_v26, %s4765_s27  ;;  %2640 = vrot.lane.b32.xlu0 %v2629_v46, %s4765_s27  ;;  %v2745_v46 = vstv %s4622_s25  ;;  %s6789_s25 = sld [smem:[#allocation6 + $0x35]] }
 0x2bb   :  { %v2747_v21 = vmul.f32 %v2745_v46, %v6133_v62  ;;  %v2750_v24 = vmul.f32 %v2745_v46, %v6160_v4 }
 0x2bc   :  { %v6249_v22 = vpop.permute.xlu1 %1989  ;;  %v6251_v32 = vpop.permute.xlu0 %1991 }
 0x2bd   :  { %9046 = vst [vmem:[#allocation191_spill] sm:$0xff] %v6249_v22  ;;  %9047 = vst [vmem:[#allocation192_spill] sm:$0xff] %v6251_v32  ;;  %v2759_v2 = vrot.slane %v2747_v21, 2 }
 0x2be   :  { %2642 = vrot.lane.b32.xlu1 %v2631_v36, %s4765_s27  ;;  %2680 = vrot.lane.b32.xlu0 %v2672_v9, %s4765_s27  ;;  %v2701_v36 = vmul.f32 %v2697_v27, %v6168_v47  ;;  %v2746_v9 = vmul.f32 %v2745_v46, %v6124_v14 }
 0x2c0   :  { %v6260_v28 = vpop.permute.xlu1 %1993  ;;  %v6262_v50 = vpop.permute.xlu0 %2031 }
 0x2c1   :  { %9048 = vst [vmem:[#allocation193_spill] sm:$0xff] %v6260_v28  ;;  %9049 = vst [vmem:[#allocation194_spill] sm:$0xff] %v6262_v50 }
 0x2c2   :  { %2682 = vrot.lane.b32.xlu1 %v2674_v8, %s4765_s27  ;;  %2684 = vrot.lane.b32.xlu0 %v2677_v53, %s4765_s27  ;;  %v2715_v8 = vrot.slane %v2701_v36, 2  ;;  %v2758_v53 = vrot.slane %v2746_v9, 2  ;;  %v2751_v9 = vmul.f32 %v2745_v46, %v6222_v61 }
 0x2c4   :  { %v6269_v26 = vpop.permute.xlu1 %2033  ;;  %v6271_v63 = vpop.permute.xlu0 %2035  ;;  %v2717_v42 = vsel %vm2409_vm12, %v2715_v8, %v2716_v23  ;;  %v2760_v18 = vsel %vm2409_vm12, %v2758_v53, %v2759_v2  ;;  %v2793_v23 = vstv %s4623_s26  ;;  %s6845_s26 = sld [smem:[#allocation6 + $0x38]] }
 0x2c5   :  { %9050 = vst [vmem:[#allocation195_spill] sm:$0xff] %v6269_v26  ;;  %9051 = vst [vmem:[#allocation196_spill] sm:$0xff] %v6271_v63  ;;  %v2794_v53 = vmul.f32 %v2793_v23, %v6124_v14  ;;  %v6667_v26 = vstv %s6637_s1  ;;  %s7650_s1 = sld [smem:[#allocation6 + $0x3e]] }
 0x2c6   :  { %2686 = vrot.lane.b32.xlu1 %v2679_v15, %s4765_s27  ;;  %2720 = vrot.lane.b32.xlu0 %v2712_v5, %s4765_s27  ;;  %v2748_v15 = vmul.f32 %v2745_v46, %v6196_v0  ;;  %v532_v1 = vmul.f32 %v6667_v26, %v5108_v55 }
 0x2c8   :  { %v6280_v20 = vpop.permute.xlu1 %2037  ;;  %v6282_v60 = vpop.permute.xlu0 %2039  ;;  %v2761_v36 = vrot.slane %v2748_v15, 2  ;;  %v2795_v15 = vmul.f32 %v2793_v23, %v6133_v62 }
 0x2c9   :  { %9052 = vst [vmem:[#allocation197_spill] sm:$0xff] %v6280_v20  ;;  %9053 = vst [vmem:[#allocation198_spill] sm:$0xff] %v6282_v60 }
 0x2ca   :  { %2722 = vrot.lane.b32.xlu1 %v2714_v30, %s4765_s27  ;;  %2724 = vrot.lane.b32.xlu0 %v2713_v43, %s4765_s27  ;;  %v2749_v30 = vmul.f32 %v2745_v46, %v6168_v47 }
 0x2cc   :  { %v6289_v51 = vpop.permute.xlu1 %2041  ;;  %v6291_v27 = vpop.permute.xlu0 %2065 }
 0x2cd   :  { %9054 = vst [vmem:[#allocation199_spill] sm:$0xff] %v6289_v51  ;;  %9055 = vst [vmem:[#allocation200_spill] sm:$0xff] %v6291_v27 }
 0x2ce   :  { %2726 = vrot.lane.b32.xlu1 %v2717_v42, %s4765_s27  ;;  %2728 = vrot.lane.b32.xlu0 %v2719_v19, %s4765_s27  ;;  %v2764_v42 = vrot.slane %v2750_v24, 2  ;;  %v2762_v19 = vsel %vm2409_vm12, %v2759_v2, %v2761_v36  ;;  %v2806_v2 = vrot.slane %v2794_v53, 2 }
 0x2d0   :  { %v6298_v5 = vpop.permute.xlu1 %2067  ;;  %v6300_v43 = vpop.permute.xlu0 %2069 }
 0x2d1   :  { %9056 = vst [vmem:[#allocation201_spill] sm:$0xff] %v6298_v5  ;;  %9057 = vst [vmem:[#allocation202_spill] sm:$0xff] %v6300_v43  ;;  %v2766_v43 = vrot.slane %v2751_v9, 2  ;;  %v2807_v9 = vrot.slane %v2795_v15, 2 }
 0x2d2   :  { %2730 = vrot.lane.b32.xlu1 %v2718_v56, %s4765_s27  ;;  %2768 = vrot.lane.b32.xlu0 %v2760_v18, %s4765_s27  ;;  %v2763_v56 = vrot.slane %v2749_v30, 2  ;;  %v2798_v30 = vmul.f32 %v2793_v23, %v6160_v4 }
 0x2d3   :  { %v2767_v24 = vsel %vm2409_vm12, %v2764_v42, %v2766_v43 }
 0x2d4   :  { %v6308_v21 = vpop.permute.xlu1 %2071  ;;  %v6310_v8 = vpop.permute.xlu0 %2095 }
 0x2d5   :  { %9058 = vst [vmem:[#allocation203_spill] sm:$0xff] %v6308_v21  ;;  %9059 = vst [vmem:[#allocation204_spill] sm:$0xff] %v6310_v8  ;;  %v2765_v8 = vsel %vm2409_vm12, %v2763_v56, %v2764_v42  ;;  %v2796_v21 = vmul.f32 %v2793_v23, %v6196_v0  ;;  %v2799_v56 = vmul.f32 %v2793_v23, %v6222_v61 }
 0x2d6   :  { %2770 = vrot.lane.b32.xlu1 %v2762_v19, %s4765_s27  ;;  %2772 = vrot.lane.b32.xlu0 %v2761_v36, %s4765_s27  ;;  %v2797_v42 = vmul.f32 %v2793_v23, %v6168_v47 }
 0x2d8   :  { %v6317_v46 = vpop.permute.xlu1 %2097  ;;  %v6319_v18 = vpop.permute.xlu0 %2099 }
 0x2d9   :  { %9060 = vst [vmem:[#allocation205_spill] sm:$0xff] %v6317_v46  ;;  %9061 = vst [vmem:[#allocation206_spill] sm:$0xff] %v6319_v18  ;;  %v2808_v18 = vsel %vm2409_vm12, %v2806_v2, %v2807_v9  ;;  %v2809_v46 = vrot.slane %v2796_v21, 2 }
 0x2da   :  { %2774 = vrot.lane.b32.xlu1 %v2765_v8, %s4765_s27  ;;  %2776 = vrot.lane.b32.xlu0 %v2767_v24, %s4765_s27  ;;  %v2841_v8 = vstv %s4624_s28  ;;  %v2812_v24 = vrot.slane %v2798_v30, 2  ;;  %s6855_s28 = sld [smem:[#allocation6 + $0x3c]] }
 0x2db   :  { %v2842_v2 = vmul.f32 %v2841_v8, %v6124_v14  ;;  %v2843_v21 = vmul.f32 %v2841_v8, %v6133_v62  ;;  %v2844_v30 = vmul.f32 %v2841_v8, %v6196_v0  ;;  %v2846_v5 = vmul.f32 %v2841_v8, %v6160_v4 }
 0x2dc   :  { %v6326_v19 = vpop.permute.xlu1 %2101  ;;  %v6328_v36 = vpop.permute.xlu0 %2103 }
 0x2dd   :  { %9062 = vst [vmem:[#allocation207_spill] sm:$0xff] %v6326_v19  ;;  %9063 = vst [vmem:[#allocation208_spill] sm:$0xff] %v6328_v36  ;;  %v2810_v36 = vsel %vm2409_vm12, %v2807_v9, %v2809_v46  ;;  %v2814_v19 = vrot.slane %v2799_v56, 2  ;;  %v2854_v56 = vrot.slane %v2842_v2, 6  ;;  %v2881_v2 = vstv %s4625_s29  ;;  %s6938_s29 = sld [smem:[#allocation6 + $0x3f]] }
 0x2de   :  { %2778 = vrot.lane.b32.xlu1 %v2766_v43, %s4765_s27  ;;  %2816 = vrot.lane.b32.xlu0 %v2808_v18, %s4765_s27  ;;  %v2811_v43 = vrot.slane %v2797_v42, 2 }
 0x2df   :  { %v2815_v9 = vsel %vm2409_vm12, %v2812_v24, %v2814_v19 }
 0x2e0   :  { %v6336_v53 = vpop.permute.xlu1 %2105  ;;  %v6338_v15 = vpop.permute.xlu0 %2133 }
 0x2e1   :  { %9064 = vst [vmem:[#allocation209_spill] sm:$0xff] %v6336_v53  ;;  %9065 = vst [vmem:[#allocation210_spill] sm:$0xff] %v6338_v15  ;;  %v2813_v53 = vsel %vm2409_vm12, %v2811_v43, %v2812_v24  ;;  %v2855_v15 = vrot.slane %v2843_v21, 6  ;;  %v2847_v24 = vmul.f32 %v2841_v8, %v6222_v61 }
 0x2e2   :  { %2818 = vrot.lane.b32.xlu1 %v2810_v36, %s4765_s27  ;;  %2820 = vrot.lane.b32.xlu0 %v2809_v46, %s4765_s27  ;;  %v2845_v46 = vmul.f32 %v2841_v8, %v6168_v47 }
 0x2e3   :  { %v2856_v43 = vsel %vm156_vm5, %v2854_v56, %v2855_v15  ;;  %v2862_v56 = vrot.slane %v2847_v24, 6 }
 0x2e4   :  { %v6345_v23 = vpop.permute.xlu1 %2135  ;;  %v6347_v18 = vpop.permute.xlu0 %2137 }
 0x2e5   :  { %9066 = vst [vmem:[#allocation211_spill] sm:$0xff] %v6345_v23  ;;  %9067 = vst [vmem:[#allocation212_spill] sm:$0xff] %v6347_v18  ;;  %v2857_v18 = vrot.slane %v2844_v30, 6  ;;  %v2860_v23 = vrot.slane %v2846_v5, 6  ;;  %v2883_v5 = vmul.f32 %v2881_v2, %v6133_v62 }
 0x2e6   :  { %2822 = vrot.lane.b32.xlu1 %v2813_v53, %s4765_s27  ;;  %2824 = vrot.lane.b32.xlu0 %v2815_v9, %s4765_s27  ;;  %v2859_v53 = vrot.slane %v2845_v46, 6 }
 0x2e8   :  { %v6356_v36 = vpop.permute.xlu1 %2139  ;;  %v6358_v42 = vpop.permute.xlu0 %2141  ;;  %v2861_v30 = vsel %vm156_vm5, %v2859_v53, %v2860_v23 }
 0x2e9   :  { %9068 = vst [vmem:[#allocation213_spill] sm:$0xff] %v6356_v36  ;;  %9069 = vst [vmem:[#allocation214_spill] sm:$0xff] %v6358_v42  ;;  %v2882_v36 = vmul.f32 %v2881_v2, %v6124_v14  ;;  %v2858_v42 = vsel %vm156_vm5, %v2855_v15, %v2857_v18  ;;  %v2885_v15 = vmul.f32 %v2881_v2, %v6160_v4 }
 0x2ea   :  { %2826 = vrot.lane.b32.xlu1 %v2814_v19, %s4765_s27  ;;  %2864 = vrot.lane.b32.xlu0 %v2856_v43, %s4765_s27  ;;  %v2863_v43 = vsel %vm156_vm5, %v2860_v23, %v2862_v56  ;;  %v2884_v18 = vmul.f32 %v2881_v2, %v6168_v47 }
 0x2eb   :  { %v2890_v46 = vrot.slane %v2882_v36, 6 }
 0x2ec   :  { %v6364_v21 = vpop.permute.xlu1 %2143  ;;  %v6366_v9 = vpop.permute.xlu0 %2171  ;;  %v2893_v23 = vrot.slane %v2884_v18, 6 }
 0x2ed   :  { %9070 = vst [vmem:[#allocation215_spill] sm:$0xff] %v6364_v21  ;;  %9071 = vst [vmem:[#allocation216_spill] sm:$0xff] %v6366_v9  ;;  %v2891_v21 = vrot.slane %v2883_v5, 6 }
 0x2ee   :  { %2866 = vrot.lane.b32.xlu1 %v2858_v42, %s4765_s27  ;;  %2868 = vrot.lane.b32.xlu0 %v2861_v30, %s4765_s27  ;;  %v2894_v30 = vrot.slane %v2885_v15, 6 }
 0x2ef   :  { %v2892_v53 = vsel %vm156_vm5, %v2890_v46, %v2891_v21 }
 0x2f0   :  { %v6374_v19 = vpop.permute.xlu1 %2173  ;;  %v6376_v8 = vpop.permute.xlu0 %2175  ;;  %v2895_v5 = vsel %vm156_vm5, %v2893_v23, %v2894_v30 }
 0x2f1   :  { %9072 = vst [vmem:[#allocation217_spill] sm:$0xff] %v6374_v19  ;;  %9073 = vst [vmem:[#allocation218_spill] sm:$0xff] %v6376_v8  ;;  %v2921_v8 = vstv %s4626_s30  ;;  %s6998_s30 = sld [smem:[#allocation6 + $0x4a]] }
 0x2f2   :  { %2870 = vrot.lane.b32.xlu1 %v2863_v43, %s4765_s27  ;;  %2896 = vrot.lane.b32.xlu0 %v2890_v46, %s4766_s7  ;;  %v2922_v2 = vmul.f32 %v2921_v8, %v6124_v14  ;;  %v2923_v43 = vmul.f32 %v2921_v8, %v6133_v62  ;;  %v2924_v46 = vmul.f32 %v2921_v8, %v6196_v0  ;;  %s4628_s27 = sld [smem:[#allocation6 + $0x48]] }
 0x2f4   :  { %v6383_v24 = vpop.permute.xlu1 %2177  ;;  %v6385_v42 = vpop.permute.xlu0 %2179  ;;  %v2934_v18 = vrot.slane %v2922_v2, 6 }
 0x2f5   :  { %9074 = vst [vmem:[#allocation219_spill] sm:$0xff] %v6383_v24  ;;  %9075 = vst [vmem:[#allocation220_spill] sm:$0xff] %v6385_v42  ;;  %v2969_v42 = vstv %s4627_s3  ;;  %v2925_v24 = vmul.f32 %v2921_v8, %v6168_v47  ;;  %s7010_s3 = sld [smem:[#allocation6 + $0x31]] }
 0x2f6   :  { %2898 = vrot.lane.b32.xlu1 %v2892_v53, %s4766_s7  ;;  %2900 = vrot.lane.b32.xlu0 %v2891_v21, %s4766_s7  ;;  %v2935_v53 = vrot.slane %v2923_v43, 6  ;;  %v2970_v2 = vmul.f32 %v2969_v42, %v6124_v14 }
 0x2f7   :  { %v2939_v19 = vrot.slane %v2925_v24, 6  ;;  %v2973_v24 = vmul.f32 %v2969_v42, %v6168_v47 }
 0x2f8   :  { %v6390_v36 = vpop.permute.xlu1 %2181  ;;  %v6392_v56 = vpop.permute.xlu0 %2219  ;;  %v2936_v43 = vsel %vm156_vm5, %v2934_v18, %v2935_v53 }
 0x2f9   :  { %9076 = vst [vmem:[#allocation221_spill] sm:$0xff] %v6390_v36  ;;  %9077 = vst [vmem:[#allocation222_spill] sm:$0xff] %v6392_v56  ;;  %v2937_v36 = vrot.slane %v2924_v46, 6  ;;  %v2926_v56 = vmul.f32 %v2921_v8, %v6160_v4 }
 0x2fa   :  { %2902 = vrot.lane.b32.xlu1 %v2893_v23, %s4766_s7  ;;  %2904 = vrot.lane.b32.xlu0 %v2895_v5, %s4766_s7 }
 0x2fb   :  { %v2938_v46 = vsel %vm156_vm5, %v2935_v53, %v2937_v36  ;;  %v2974_v36 = vmul.f32 %v2969_v42, %v6160_v4 }
 0x2fc   :  { %v6400_v15 = vpop.permute.xlu1 %2221  ;;  %v6402_v21 = vpop.permute.xlu0 %2223 }
 0x2fd   :  { %9078 = vst [vmem:[#allocation223_spill] sm:$0xff] %v6400_v15  ;;  %9079 = vst [vmem:[#allocation224_spill] sm:$0xff] %v6402_v21  ;;  %v2927_v15 = vmul.f32 %v2921_v8, %v6222_v61  ;;  %v2940_v21 = vrot.slane %v2926_v56, 6  ;;  %v2972_v8 = vmul.f32 %v2969_v42, %v6196_v0  ;;  %v3009_v56 = vstv %s4628_s27  ;;  %s7061_s27 = sld [smem:[#allocation6 + $0x4d]] }
 0x2fe   :  { %2906 = vrot.lane.b32.xlu1 %v2894_v30, %s4766_s7  ;;  %2944 = vrot.lane.b32.xlu0 %v2934_v18, %s4766_s7  ;;  %v2971_v30 = vmul.f32 %v2969_v42, %v6133_v62  ;;  %v2982_v18 = vrot.slane %v2970_v2, 2 }
 0x2ff   :  { %v2941_v51 = vsel %vm156_vm5, %v2939_v19, %v2940_v21 }
 0x300   :  { %v6408_v23 = vpop.permute.xlu1 %2225  ;;  %v6410_v5 = vpop.permute.xlu0 %2259  ;;  %v2983_v60 = vrot.slane %v2971_v30, 2  ;;  %v2988_v30 = vrot.slane %v2974_v36, 2  ;;  %v3012_v36 = vmul.f32 %v3009_v56, %v6196_v0 }
 0x301   :  { %9080 = vst [vmem:[#allocation225_spill] sm:$0xff] %v6408_v23  ;;  %9081 = vst [vmem:[#allocation226_spill] sm:$0xff] %v6410_v5  ;;  %v2942_v5 = vrot.slane %v2927_v15, 6 }
 0x302   :  { %2946 = vrot.lane.b32.xlu1 %v2936_v43, %s4766_s7  ;;  %2948 = vrot.lane.b32.xlu0 %v2938_v46, %s4766_s7  ;;  %v2985_v46 = vrot.slane %v2972_v8, 2  ;;  %v2984_v2 = vsel %vm2409_vm12, %v2982_v18, %v2983_v60 }
 0x303   :  { %v2943_v15 = vsel %vm156_vm5, %v2940_v21, %v2942_v5 }
 0x304   :  { %v6419_v27 = vpop.permute.xlu1 %2261  ;;  %v6421_v23 = vpop.permute.xlu0 %2263  ;;  %v2986_v21 = vsel %vm2409_vm12, %v2983_v60, %v2985_v46  ;;  %v3057_v46 = vstv %s4629_s5  ;;  %s7089_s5 = sld [smem:[#allocation6 + $0x51]] }
 0x305   :  { %9082 = vst [vmem:[#allocation227_spill] sm:$0xff] %v6419_v27  ;;  %9083 = vst [vmem:[#allocation228_spill] sm:$0xff] %v6421_v23  ;;  %v2975_v23 = vmul.f32 %v2969_v42, %v6222_v61  ;;  %v3010_v27 = vmul.f32 %v3009_v56, %v6124_v14 }
 0x306   :  { %2950 = vrot.lane.b32.xlu1 %v2939_v19, %s4766_s7  ;;  %2952 = vrot.lane.b32.xlu0 %v2941_v51, %s4766_s7  ;;  %v3011_v19 = vmul.f32 %v3009_v56, %v6133_v62  ;;  %v2987_v51 = vrot.slane %v2973_v24, 2 }
 0x307   :  { %v2990_v42 = vrot.slane %v2975_v23, 2  ;;  %v3022_v8 = vrot.slane %v3010_v27, 2  ;;  %v3025_v23 = vrot.slane %v3012_v36, 2  ;;  %v3015_v27 = vmul.f32 %v3009_v56, %v6222_v61 }
 0x308   :  { %v6429_v53 = vpop.permute.xlu1 %2265  ;;  %v6431_v43 = vpop.permute.xlu0 %2267  ;;  %v2989_v5 = vsel %vm2409_vm12, %v2987_v51, %v2988_v30  ;;  %v3023_v18 = vrot.slane %v3011_v19, 2  ;;  %v3013_v19 = vmul.f32 %v3009_v56, %v6168_v47 }
 0x309   :  { %9084 = vst [vmem:[#allocation229_spill] sm:$0xff] %v6429_v53  ;;  %9085 = vst [vmem:[#allocation230_spill] sm:$0xff] %v6431_v43  ;;  %v3030_v36 = vrot.slane %v3015_v27, 2 }
 0x30a   :  { %2954 = vrot.lane.b32.xlu1 %v2943_v15, %s4766_s7  ;;  %2992 = vrot.lane.b32.xlu0 %v2984_v2, %s4766_s7  ;;  %v2991_v2 = vsel %vm2409_vm12, %v2988_v30, %v2990_v42  ;;  %v3024_v60 = vsel %vm2409_vm12, %v3022_v8, %v3023_v18  ;;  %v3058_v30 = vmul.f32 %v3057_v46, %v6124_v14 }
 0x30b   :  { %v3059_v42 = vmul.f32 %v3057_v46, %v6133_v62 }
 0x30c   :  { %v6440_v53 = vpop.permute.xlu1 %2269  ;;  %v6442_v43 = vpop.permute.xlu0 %2307 }
 0x30d   :  { %9086 = vst [vmem:[#allocation231_spill] sm:$0xff] %v6440_v53  ;;  %9087 = vst [vmem:[#allocation232_spill] sm:$0xff] %v6442_v43  ;;  %v3014_v53 = vmul.f32 %v3009_v56, %v6160_v4 }
 0x30e   :  { %2994 = vrot.lane.b32.xlu1 %v2986_v21, %s4766_s7  ;;  %2996 = vrot.lane.b32.xlu0 %v2989_v5, %s4766_s7  ;;  %v3026_v5 = vsel %vm2409_vm12, %v3023_v18, %v3025_v23  ;;  %v3060_v18 = vmul.f32 %v3057_v46, %v6196_v0 }
 0x30f   :  { %v3028_v8 = vrot.slane %v3014_v53, 2 }
 0x310   :  { %v6449_v15 = vpop.permute.xlu1 %2309  ;;  %v6451_v24 = vpop.permute.xlu0 %2311 }
 0x311   :  { %9088 = vst [vmem:[#allocation233_spill] sm:$0xff] %v6449_v15  ;;  %9089 = vst [vmem:[#allocation234_spill] sm:$0xff] %v6451_v24  ;;  %v3031_v15 = vsel %vm2409_vm12, %v3028_v8, %v3030_v36 }
 0x312   :  { %2998 = vrot.lane.b32.xlu1 %v2991_v2, %s4766_s7  ;;  %3032 = vrot.lane.b32.xlu0 %v3024_v60, %s4766_s7  ;;  %v3027_v2 = vrot.slane %v3013_v19, 2  ;;  %v3073_v19 = vrot.slane %v3060_v18, 2 }
 0x314   :  { %v6460_v51 = vpop.permute.xlu1 %2313  ;;  %v6462_v21 = vpop.permute.xlu0 %2315  ;;  %v3029_v24 = vsel %vm2409_vm12, %v3027_v2, %v3028_v8 }
 0x315   :  { %9090 = vst [vmem:[#allocation235_spill] sm:$0xff] %v6460_v51  ;;  %9091 = vst [vmem:[#allocation236_spill] sm:$0xff] %v6462_v21  ;;  %v3070_v51 = vrot.slane %v3058_v30, 2  ;;  %v3071_v21 = vrot.slane %v3059_v42, 2  ;;  %v3062_v30 = vmul.f32 %v3057_v46, %v6160_v4  ;;  %v3063_v42 = vmul.f32 %v3057_v46, %v6222_v61 }
 0x316   :  { %3034 = vrot.lane.b32.xlu1 %v3026_v5, %s4766_s7  ;;  %3036 = vrot.lane.b32.xlu0 %v3025_v23, %s4766_s7  ;;  %v3105_v5 = vstv %s4630_s6  ;;  %s7140_s6 = sld [smem:[#allocation6 + $0x54]] }
 0x317   :  { %v3072_v27 = vsel %vm2409_vm12, %v3070_v51, %v3071_v21  ;;  %v3106_v2 = vmul.f32 %v3105_v5, %v6124_v14  ;;  %v3107_v51 = vmul.f32 %v3105_v5, %v6133_v62  ;;  %v3074_v18 = vsel %vm2409_vm12, %v3071_v21, %v3073_v19 }
 0x318   :  { %v6469_v60 = vpop.permute.xlu1 %2317  ;;  %v6471_v56 = vpop.permute.xlu0 %2584  ;;  %v3108_v21 = vmul.f32 %v3105_v5, %v6196_v0 }
 0x319   :  { %9092 = vst [vmem:[#allocation237_spill] sm:$0xff] %v6469_v60  ;;  %9093 = vst [vmem:[#allocation238_spill] sm:$0xff] %v6471_v56 }
 0x31a   :  { %3038 = vrot.lane.b32.xlu1 %v3029_v24, %s4766_s7  ;;  %3040 = vrot.lane.b32.xlu0 %v3031_v15, %s4766_s7  ;;  %v3061_v24 = vmul.f32 %v3057_v46, %v6168_v47 }
 0x31c   :  { %v6478_v53 = vpop.permute.xlu1 %2586  ;;  %v6480_v23 = vpop.permute.xlu0 %2588 }
 0x31d   :  { %9094 = vst [vmem:[#allocation239_spill] sm:$0xff] %v6478_v53  ;;  %9095 = vst [vmem:[#allocation240_spill] sm:$0xff] %v6480_v23  ;;  %v3076_v23 = vrot.slane %v3062_v30, 2  ;;  %v3078_v53 = vrot.slane %v3063_v42, 2 }
 0x31e   :  { %3042 = vrot.lane.b32.xlu1 %v3030_v36, %s4766_s7  ;;  %3080 = vrot.lane.b32.xlu0 %v3072_v27, %s4766_s7  ;;  %v3075_v36 = vrot.slane %v3061_v24, 2  ;;  %v3121_v24 = vrot.slane %v3108_v21, 2 }
 0x31f   :  { %v3079_v60 = vsel %vm2409_vm12, %v3076_v23, %v3078_v53 }
 0x320   :  { %v6488_v8 = vpop.permute.xlu1 %2590  ;;  %v6490_v15 = vpop.permute.xlu0 %2592  ;;  %v3077_v56 = vsel %vm2409_vm12, %v3075_v36, %v3076_v23 }
 0x321   :  { %9096 = vst [vmem:[#allocation241_spill] sm:$0xff] %v6488_v8  ;;  %9097 = vst [vmem:[#allocation242_spill] sm:$0xff] %v6490_v15  ;;  %v3118_v8 = vrot.slane %v3106_v2, 2  ;;  %v3119_v15 = vrot.slane %v3107_v51, 2  ;;  %v3110_v2 = vmul.f32 %v3105_v5, %v6160_v4  ;;  %v3111_v51 = vmul.f32 %v3105_v5, %v6222_v61 }
 0x322   :  { %3082 = vrot.lane.b32.xlu1 %v3074_v18, %s4766_s7  ;;  %3084 = vrot.lane.b32.xlu0 %v3073_v19, %s4766_s7  ;;  %v3153_v18 = vstv %s4631_s8  ;;  %s7204_s8 = sld [smem:[#allocation6 + $0x58]] }
 0x323   :  { %v3120_v42 = vsel %vm2409_vm12, %v3118_v8, %v3119_v15  ;;  %v3154_v36 = vmul.f32 %v3153_v18, %v6124_v14  ;;  %v3155_v8 = vmul.f32 %v3153_v18, %v6133_v62  ;;  %v3122_v21 = vsel %vm2409_vm12, %v3119_v15, %v3121_v24 }
 0x324   :  { %v6497_v27 = vpop.permute.xlu1 %2594  ;;  %v6499_v46 = vpop.permute.xlu0 %2632  ;;  %v3156_v15 = vmul.f32 %v3153_v18, %v6196_v0 }
 0x325   :  { %9098 = vst [vmem:[#allocation243_spill] sm:$0xff] %v6497_v27  ;;  %9099 = vst [vmem:[#allocation244_spill] sm:$0xff] %v6499_v46 }
 0x326   :  { %3086 = vrot.lane.b32.xlu1 %v3077_v56, %s4766_s7  ;;  %3088 = vrot.lane.b32.xlu0 %v3079_v60, %s4766_s7  ;;  %v3109_v56 = vmul.f32 %v3105_v5, %v6168_v47 }
 0x328   :  { %v6506_v30 = vpop.permute.xlu1 %2634  ;;  %v6508_v19 = vpop.permute.xlu0 %2636 }
 0x329   :  { %9100 = vst [vmem:[#allocation245_spill] sm:$0xff] %v6506_v30  ;;  %9101 = vst [vmem:[#allocation246_spill] sm:$0xff] %v6508_v19  ;;  %v3124_v19 = vrot.slane %v3110_v2, 2  ;;  %v3126_v30 = vrot.slane %v3111_v51, 2  ;;  %v3158_v2 = vmul.f32 %v3153_v18, %v6160_v4 }
 0x32a   :  { %3090 = vrot.lane.b32.xlu1 %v3078_v53, %s4766_s7  ;;  %3128 = vrot.lane.b32.xlu0 %v3120_v42, %s4766_s7  ;;  %v3123_v53 = vrot.slane %v3109_v56, 2 }
 0x32b   :  { %v3127_v27 = vsel %vm2409_vm12, %v3124_v19, %v3126_v30 }
 0x32c   :  { %v6516_v23 = vpop.permute.xlu1 %2638  ;;  %v6518_v60 = vpop.permute.xlu0 %2640  ;;  %v3125_v46 = vsel %vm2409_vm12, %v3123_v53, %v3124_v19  ;;  %v3159_v19 = vmul.f32 %v3153_v18, %v6222_v61  ;;  %v3193_v53 = vstv %s4632_s9  ;;  %s7220_s9 = sld [smem:[#allocation6 + $0x5b]] }
 0x32d   :  { %9102 = vst [vmem:[#allocation247_spill] sm:$0xff] %v6516_v23  ;;  %9103 = vst [vmem:[#allocation248_spill] sm:$0xff] %v6518_v60  ;;  %v3166_v23 = vrot.slane %v3154_v36, 6  ;;  %v3167_v60 = vrot.slane %v3155_v8, 6  ;;  %v3169_v8 = vrot.slane %v3156_v15, 6 }
 0x32e   :  { %3130 = vrot.lane.b32.xlu1 %v3122_v21, %s4766_s7  ;;  %3132 = vrot.lane.b32.xlu0 %v3121_v24, %s4766_s7  ;;  %v3157_v24 = vmul.f32 %v3153_v18, %v6168_v47  ;;  %v3172_v21 = vrot.slane %v3158_v2, 6  ;;  %v3174_v15 = vrot.slane %v3159_v19, 6  ;;  %v3195_v2 = vmul.f32 %v3193_v53, %v6133_v62 }
 0x32f   :  { %v3168_v36 = vsel %vm156_vm5, %v3166_v23, %v3167_v60 }
 0x330   :  { %v6525_v42 = vpop.permute.xlu1 %2642  ;;  %v6527_v5 = vpop.permute.xlu0 %2680 }
 0x331   :  { %9104 = vst [vmem:[#allocation249_spill] sm:$0xff] %v6525_v42  ;;  %9105 = vst [vmem:[#allocation250_spill] sm:$0xff] %v6527_v5 }
 0x332   :  { %3134 = vrot.lane.b32.xlu1 %v3125_v46, %s4766_s7  ;;  %3136 = vrot.lane.b32.xlu0 %v3127_v27, %s4766_s7  ;;  %v3171_v46 = vrot.slane %v3157_v24, 6 }
 0x334   :  { %v6536_v51 = vpop.permute.xlu1 %2682  ;;  %v6538_v56 = vpop.permute.xlu0 %2684  ;;  %v3173_v23 = vsel %vm156_vm5, %v3171_v46, %v3172_v21 }
 0x335   :  { %9106 = vst [vmem:[#allocation251_spill] sm:$0xff] %v6536_v51  ;;  %9107 = vst [vmem:[#allocation252_spill] sm:$0xff] %v6538_v56  ;;  %v3194_v51 = vmul.f32 %v3193_v53, %v6124_v14  ;;  %v3170_v56 = vsel %vm156_vm5, %v3167_v60, %v3169_v8  ;;  %v3197_v60 = vmul.f32 %v3193_v53, %v6160_v4 }
 0x336   :  { %3138 = vrot.lane.b32.xlu1 %v3126_v30, %s4766_s7  ;;  %3176 = vrot.lane.b32.xlu0 %v3168_v36, %s4766_s7  ;;  %v3175_v36 = vsel %vm156_vm5, %v3172_v21, %v3174_v15  ;;  %v3196_v8 = vmul.f32 %v3193_v53, %v6168_v47 }
 0x337   :  { %v3202_v24 = vrot.slane %v3194_v51, 6 }
 0x338   :  { %v6544_v5 = vpop.permute.xlu1 %2686  ;;  %v6546_v27 = vpop.permute.xlu0 %2720  ;;  %v3205_v51 = vrot.slane %v3196_v8, 6 }
 0x339   :  { %9108 = vst [vmem:[#allocation253_spill] sm:$0xff] %v6544_v5  ;;  %9109 = vst [vmem:[#allocation254_spill] sm:$0xff] %v6546_v27  ;;  %v3203_v27 = vrot.slane %v3195_v2, 6 }
 0x33a   :  { %3178 = vrot.lane.b32.xlu1 %v3170_v56, %s4766_s7  ;;  %3180 = vrot.lane.b32.xlu0 %v3173_v23, %s4766_s7  ;;  %v3206_v23 = vrot.slane %v3197_v60, 6 }
 0x33b   :  { %v3204_v46 = vsel %vm156_vm5, %v3202_v24, %v3203_v27 }
 0x33c   :  { %v6554_v30 = vpop.permute.xlu1 %2722  ;;  %v6556_v18 = vpop.permute.xlu0 %2724 }
 0x33d   :  { %9110 = vst [vmem:[#allocation255_spill] sm:$0xff] %v6554_v30  ;;  %9111 = vst [vmem:[#allocation256_spill] sm:$0xff] %v6556_v18  ;;  %v3233_v18 = vstv %s4633_s10  ;;  %s7313_s10 = sld [smem:[#allocation6 + $0x5f]] }
 0x33e   :  { %3182 = vrot.lane.b32.xlu1 %v3175_v36, %s4766_s7  ;;  %3208 = vrot.lane.b32.xlu0 %v3202_v24, %s4767_s17  ;;  %v3234_v53 = vmul.f32 %v3233_v18, %v6124_v14  ;;  %v3235_v2 = vmul.f32 %v3233_v18, %v6133_v62  ;;  %v3207_v36 = vsel %vm156_vm5, %v3205_v51, %v3206_v23  ;;  %s4635_s7 = sld [smem:[#allocation6 + $0x49]] }
 0x33f   :  { %v3236_v24 = vmul.f32 %v3233_v18, %v6196_v0  ;;  %v3237_v30 = vmul.f32 %v3233_v18, %v6168_v47 }
 0x340   :  { %v6563_v19 = vpop.permute.xlu1 %2726  ;;  %v6565_v56 = vpop.permute.xlu0 %2728  ;;  %v3246_v8 = vrot.slane %v3234_v53, 6  ;;  %v3239_v53 = vmul.f32 %v3233_v18, %v6222_v61 }
 0x341   :  { %9112 = vst [vmem:[#allocation257_spill] sm:$0xff] %v6563_v19  ;;  %9113 = vst [vmem:[#allocation258_spill] sm:$0xff] %v6565_v56  ;;  %v3238_v56 = vmul.f32 %v3233_v18, %v6160_v4  ;;  %v3281_v19 = vstv %s4634_s11  ;;  %s7328_s11 = sld [smem:[#allocation6 + $0x46]] }
 0x342   :  { %3210 = vrot.lane.b32.xlu1 %v3204_v46, %s4767_s17  ;;  %3212 = vrot.lane.b32.xlu0 %v3203_v27, %s4767_s17  ;;  %v3247_v46 = vrot.slane %v3235_v2, 6  ;;  %v3282_v42 = vmul.f32 %v3281_v19, %v6124_v14 }
 0x344   :  { %v6570_v21 = vpop.permute.xlu1 %2730  ;;  %v6572_v15 = vpop.permute.xlu0 %2768  ;;  %v3248_v5 = vsel %vm156_vm5, %v3246_v8, %v3247_v46 }
 0x345   :  { %9114 = vst [vmem:[#allocation259_spill] sm:$0xff] %v6570_v21  ;;  %9115 = vst [vmem:[#allocation260_spill] sm:$0xff] %v6572_v15  ;;  %v3249_v21 = vrot.slane %v3236_v24, 6  ;;  %v3252_v24 = vrot.slane %v3238_v56, 6  ;;  %v3287_v15 = vmul.f32 %v3281_v19, %v6222_v61 }
 0x346   :  { %3214 = vrot.lane.b32.xlu1 %v3205_v51, %s4767_s17  ;;  %3216 = vrot.lane.b32.xlu0 %v3207_v36, %s4767_s17 }
 0x347   :  { %v3250_v2 = vsel %vm156_vm5, %v3247_v46, %v3249_v21  ;;  %v3294_v21 = vrot.slane %v3282_v42, 2  ;;  %v3286_v46 = vmul.f32 %v3281_v19, %v6160_v4 }
 0x348   :  { %v6580_v60 = vpop.permute.xlu1 %2770  ;;  %v6582_v27 = vpop.permute.xlu0 %2772 }
 0x349   :  { %9116 = vst [vmem:[#allocation261_spill] sm:$0xff] %v6580_v60  ;;  %9117 = vst [vmem:[#allocation262_spill] sm:$0xff] %v6582_v27  ;;  %v3251_v27 = vrot.slane %v3237_v30, 6  ;;  %v3285_v30 = vmul.f32 %v3281_v19, %v6168_v47 }
 0x34a   :  { %3218 = vrot.lane.b32.xlu1 %v3206_v23, %s4767_s17  ;;  %3256 = vrot.lane.b32.xlu0 %v3246_v8, %s4767_s17  ;;  %v3283_v23 = vmul.f32 %v3281_v19, %v6133_v62  ;;  %v3284_v8 = vmul.f32 %v3281_v19, %v6196_v0 }
 0x34b   :  { %v3253_v18 = vsel %vm156_vm5, %v3251_v27, %v3252_v24 }
 0x34c   :  { %v6588_v51 = vpop.permute.xlu1 %2774  ;;  %v6590_v36 = vpop.permute.xlu0 %2776  ;;  %v3295_v56 = vrot.slane %v3283_v23, 2  ;;  %v3300_v23 = vrot.slane %v3286_v46, 2 }
 0x34d   :  { %9118 = vst [vmem:[#allocation263_spill] sm:$0xff] %v6588_v51  ;;  %9119 = vst [vmem:[#allocation264_spill] sm:$0xff] %v6590_v36  ;;  %v3254_v36 = vrot.slane %v3239_v53, 6 }
 0x34e   :  { %3258 = vrot.lane.b32.xlu1 %v3248_v5, %s4767_s17  ;;  %3260 = vrot.lane.b32.xlu0 %v3250_v2, %s4767_s17  ;;  %v3321_v5 = vstv %s4635_s7  ;;  %v3296_v42 = vsel %vm2409_vm12, %v3294_v21, %v3295_v56  ;;  %s7406_s7 = sld [smem:[#allocation6 + $0x36]] }
 0x34f   :  { %v3255_v53 = vsel %vm156_vm5, %v3252_v24, %v3254_v36  ;;  %v3322_v43 = vmul.f32 %v3321_v5, %v6124_v14  ;;  %v3302_v24 = vrot.slane %v3287_v15, 2 }
 0x350   :  { %v6599_v60 = vpop.permute.xlu1 %2778  ;;  %v6601_v51 = vpop.permute.xlu0 %2816 }
 0x351   :  { %9120 = vst [vmem:[#allocation265_spill] sm:$0xff] %v6599_v60  ;;  %9121 = vst [vmem:[#allocation266_spill] sm:$0xff] %v6601_v51  ;;  %v3297_v51 = vrot.slane %v3284_v8, 2  ;;  %v3334_v21 = vrot.slane %v3322_v43, 2  ;;  %v3303_v15 = vsel %vm2409_vm12, %v3300_v23, %v3302_v24 }
 0x352   :  { %3262 = vrot.lane.b32.xlu1 %v3251_v27, %s4767_s17  ;;  %3264 = vrot.lane.b32.xlu0 %v3253_v18, %s4767_s17  ;;  %v3323_v27 = vmul.f32 %v3321_v5, %v6133_v62  ;;  %v3299_v18 = vrot.slane %v3285_v30, 2 }
 0x353   :  { %v3298_v19 = vsel %vm2409_vm12, %v3295_v56, %v3297_v51  ;;  %v3327_v56 = vmul.f32 %v3321_v5, %v6222_v61 }
 0x354   :  { %v6609_v2 = vpop.permute.xlu1 %2818  ;;  %v6611_v60 = vpop.permute.xlu0 %2820  ;;  %v3301_v8 = vsel %vm2409_vm12, %v3299_v18, %v3300_v23  ;;  %v3335_v46 = vrot.slane %v3323_v27, 2  ;;  %v3325_v27 = vmul.f32 %v3321_v5, %v6168_v47  ;;  %v3369_v18 = vstv %s4636_s12  ;;  %s7502_s12 = sld [smem:[#allocation6 + $0x3d]] }
 0x355   :  { %9122 = vst [vmem:[#allocation267_spill] sm:$0xff] %v6609_v2  ;;  %9123 = vst [vmem:[#allocation268_spill] sm:$0xff] %v6611_v60  ;;  %v3324_v2 = vmul.f32 %v3321_v5, %v6196_v0  ;;  %v6690_v31 = vmul.f32 %v3369_v18, %v6222_v61 }
 0x356   :  { %3266 = vrot.lane.b32.xlu1 %v3255_v53, %s4767_s17  ;;  %3304 = vrot.lane.b32.xlu0 %v3296_v42, %s4767_s17  ;;  %v3326_v42 = vmul.f32 %v3321_v5, %v6160_v4  ;;  %v3336_v51 = vsel %vm2409_vm12, %v3334_v21, %v3335_v46  ;;  %v3370_v21 = vmul.f32 %v3369_v18, %v6124_v14  ;;  %v3339_v5 = vrot.slane %v3325_v27, 2 }
 0x357   :  { %v3337_v43 = vrot.slane %v3324_v2, 2  ;;  %v3342_v2 = vrot.slane %v3327_v56, 2  ;;  %v6656_v56 = vstv %s4567_s19  ;;  %v3372_v27 = vmul.f32 %v3369_v18, %v6196_v0  ;;  %s7634_s19 = sld [smem:[#allocation6 + $0x59]] }
 0x358   :  { %v6620_v60 = vpop.permute.xlu1 %2822  ;;  %v6622_v36 = vpop.permute.xlu0 %2824  ;;  %v3340_v23 = vrot.slane %v3326_v42, 2 }
 0x359   :  { %9124 = vst [vmem:[#allocation269_spill] sm:$0xff] %v6620_v60  ;;  %9125 = vst [vmem:[#allocation270_spill] sm:$0xff] %v6622_v36  ;;  %v3338_v24 = vsel %vm2409_vm12, %v3335_v46, %v3337_v43  ;;  %v3385_v22 = vrot.slane %v3372_v27, 2  ;;  %v3373_v27 = vmul.f32 %v3369_v18, %v6168_v47 }
 0x35a   :  { %3306 = vrot.lane.b32.xlu1 %v3298_v19, %s4767_s17  ;;  %3308 = vrot.lane.b32.xlu0 %v3301_v8, %s4767_s17  ;;  %v572_v19 = vstv %s4566_s14  ;;  %v3341_v36 = vsel %vm2409_vm12, %v3339_v5, %v3340_v23  ;;  %s7523_s14 = sld [smem:[#allocation6 + $0x44]] }
 0x35b   :  { %v574_v42 = vmul.f32 %v572_v19, %v5108_v55  ;;  %v573_v46 = vmul.f32 %v572_v19, %v5112_v58  ;;  %v577_v63 = vmul.f32 %v572_v19, %v5140_v3  ;;  %v578_v5 = vmul.f32 %v572_v19, %v5174_v37 }
 0x35c   :  { %v6629_v30 = vpop.permute.xlu1 %2826  ;;  %v6631_v53 = vpop.permute.xlu0 %2864 }
 0x35d   :  { %9126 = vst [vmem:[#allocation271_spill] sm:$0xff] %v6629_v30  ;;  %9127 = vst [vmem:[#allocation272_spill] sm:$0xff] %v6631_v53  ;;  %v3371_v30 = vmul.f32 %v3369_v18, %v6133_v62  ;;  %v591_v9 = vrot.slane %v577_v63, 4  ;;  %v607_v63 = vmul.f32 %v6656_v56, %v5146_v39 }
 0x35e   :  { %3310 = vrot.lane.b32.xlu1 %v3303_v15, %s4767_s17  ;;  %3344 = vrot.lane.b32.xlu0 %v3336_v51, %s4767_s17  ;;  %v575_v15 = vmul.f32 %v572_v19, %v5146_v39  ;;  %v520_v51 = vstv %s519_s18  ;;  %s7615_s18 = sld [smem:[#allocation6 + $0x52]] }
 0x35f   :  { %v3383_v60 = vrot.slane %v3371_v30, 2  ;;  %v605_v30 = vmul.f32 %v6656_v56, %v5112_v58  ;;  %v521_v28 = vmul.f32 %v520_v51, %v5112_v58 }
 0x360   :  { %v6642_v8 = vpop.permute.xlu1 %2866  ;;  %v6644_v53 = vpop.permute.xlu0 %2868  ;;  %v588_v20 = vrot.slane %v575_v15, 4  ;;  %v585_v15 = vrot.slane %v573_v46, 4  ;;  %v523_v46 = vmul.f32 %v520_v51, %v5123_v7 }
 0x361   :  { %9128 = vst [vmem:[#allocation273_spill] sm:$0xff] %v6642_v8  ;;  %9129 = vst [vmem:[#allocation274_spill] sm:$0xff] %v6644_v53 }
 0x362   :  { %3346 = vrot.lane.b32.xlu1 %v3338_v24, %s4767_s17  ;;  %3348 = vrot.lane.b32.xlu0 %v3337_v43, %s4767_s17  ;;  %v3343_v24 = vsel %vm2409_vm12, %v3340_v23, %v3342_v2  ;;  %v3382_v43 = vrot.slane %v3370_v21, 2  ;;  %v6679_v23 = vmul.f32 %v6656_v56, %v5108_v55  ;;  %v586_v21 = vrot.slane %v574_v42, 4 }
 0x364   :  { %v6658_v53 = vpop.permute.xlu1 %2870  ;;  %v6660_v8 = vpop.permute.xlu0 %2896  ;;  %v3384_v32 = vsel %vm2409_vm12, %v3382_v43, %v3383_v60  ;;  %v589_v42 = vsel %vm163_vm2, %v586_v21, %v588_v20  ;;  %v618_v43 = vrot.slane %v6679_v23, 4  ;;  %v587_v49 = vsel %vm163_vm2, %v585_v15, %v586_v21 }
 0x365   :  { %9130 = vst [vmem:[#allocation275_spill] sm:$0xff] %v6658_v53  ;;  %9131 = vst [vmem:[#allocation276_spill] sm:$0xff] %v6660_v8  ;;  %v522_v53 = vmul.f32 %v520_v51, %v5108_v55  ;;  %v576_v8 = vmul.f32 %v572_v19, %v5123_v7  ;;  %v3417_v19 = vstv %s6652_s0  ;;  %v531_v21 = vmul.f32 %v6667_v26, %v5112_v58  ;;  %s7731_s0 = sld [smem:[#allocation6 + $0x5a]] }
 0x366   :  { %3350 = vrot.lane.b32.xlu1 %v3341_v36, %s4767_s17  ;;  %3352 = vrot.lane.b32.xlu0 %v3343_v24, %s4767_s17  ;;  %v3374_v24 = vmul.f32 %v3369_v18, %v6160_v4  ;;  %v3419_v23 = vmul.f32 %v3417_v19, %v6133_v62  ;;  %v6718_v15 = vstv %s6669_s20  ;;  %s7779_s20 = sld [smem:[#allocation6 + $0x37]] }
 0x367   :  { %v590_v20 = vrot.slane %v576_v8, 4  ;;  %v6712_v18 = vadd.f32 %v589_v42, %v522_v53  ;;  %v524_v8 = vmul.f32 %v520_v51, %v5140_v3  ;;  %v620_v51 = vrot.slane %v607_v63, 4 }
 0x368   :  { %v6682_v50 = vpop.permute.xlu1 %2898  ;;  %v6684_v36 = vpop.permute.xlu0 %2900  ;;  %v608_v42 = vmul.f32 %v6656_v56, %v5123_v7  ;;  %v548_v59 = vmul.f32 %v6718_v15, %v5123_v7 }
 0x369   :  { %9132 = vst [vmem:[#allocation277_spill] sm:$0xff] %v6682_v50  ;;  %9133 = vst [vmem:[#allocation278_spill] sm:$0xff] %v6684_v36  ;;  %v593_v36 = vrot.slane %v578_v5, 4  ;;  %v617_v50 = vrot.slane %v605_v30, 4  ;;  %v3390_v5 = vrot.slane %v6690_v31, 2  ;;  %v3418_v30 = vmul.f32 %v3417_v19, %v6124_v14 }
 0x36a   :  { %3354 = vrot.lane.b32.xlu1 %v3342_v2, %s4767_s17  ;;  %3392 = vrot.lane.b32.xlu0 %v3384_v32, %s4767_s17  ;;  %v3388_v2 = vrot.slane %v3374_v24, 2  ;;  %v3386_v32 = vsel %vm2409_vm12, %v3383_v60, %v3385_v22  ;;  %v592_v31 = vsel %vm163_vm2, %v590_v20, %v591_v9  ;;  %v3387_v24 = vrot.slane %v3373_v27, 2 }
 0x36b   :  { %v594_v60 = vsel %vm163_vm2, %v591_v9, %v593_v36  ;;  %v619_v53 = vsel %vm163_vm2, %v617_v50, %v618_v43  ;;  %v3430_v36 = vrot.slane %v3418_v30, 2  ;;  %v3431_v50 = vrot.slane %v3419_v23, 2 }
 0x36c   :  { %v6704_v34 = vpop.permute.xlu1 %2902  ;;  %v6706_v17 = vpop.permute.xlu0 %2904  ;;  %v3389_v20 = vsel %vm2409_vm12, %v3387_v24, %v3388_v2  ;;  %v3391_v9 = vsel %vm2409_vm12, %v3388_v2, %v3390_v5  ;;  %v6738_v27 = vadd.f32 %v587_v49, %v521_v28  ;;  %v6740_v63 = vadd.f32 %v592_v31, %v523_v46 }
 0x36d   :  { %9134 = vst [vmem:[#allocation279_spill] sm:$0xff] %v6704_v34  ;;  %9135 = vst [vmem:[#allocation280_spill] sm:$0xff] %v6706_v17  ;;  %v609_v17 = vmul.f32 %v6656_v56, %v5140_v3  ;;  %v3420_v34 = vmul.f32 %v3417_v19, %v6196_v0  ;;  %v533_v2 = vmul.f32 %v6667_v26, %v5146_v39 }
 0x36e   :  { %3394 = vrot.lane.b32.xlu1 %v3386_v32, %s4767_s17  ;;  %3396 = vrot.lane.b32.xlu0 %v3385_v22, %s4767_s17  ;;  %v610_v49 = vmul.f32 %v6656_v56, %v5174_v37  ;;  %v621_v28 = vsel %vm163_vm2, %v618_v43, %v620_v51  ;;  %v534_v46 = vmul.f32 %v6667_v26, %v5123_v7 }
 0x36f   :  { %v623_v30 = vrot.slane %v609_v17, 4  ;;  %v6765_v24 = vmul.f32 %v3417_v19, %v6222_v61  ;;  %v641_v56 = vmul.f32 %v640_v57, %v5112_v58  ;;  %v642_v43 = vmul.f32 %v640_v57, %v5108_v55 }
 0x370   :  { %v6731_v32 = vpop.permute.xlu1 %2906  ;;  %v6733_v22 = vpop.permute.xlu0 %2944  ;;  %v3421_v17 = vmul.f32 %v3417_v19, %v6168_v47 }
 0x371   :  { %9136 = vst [vmem:[#allocation281_spill] sm:$0xff] %v6731_v32  ;;  %9137 = vst [vmem:[#allocation282_spill] sm:$0xff] %v6733_v22  ;;  %v6747_v22 = vadd.f32 %v594_v60, %v524_v8  ;;  %v6749_v32 = vadd.f32 %v619_v53, %v531_v21  ;;  %v3422_v8 = vmul.f32 %v3417_v19, %v6160_v4  ;;  %v622_v21 = vrot.slane %v608_v42, 4 }
 0x372   :  { %3398 = vrot.lane.b32.xlu1 %v3389_v20, %s4767_s17  ;;  %3400 = vrot.lane.b32.xlu0 %v3391_v9, %s4767_s17  ;;  %v3432_v60 = vsel %vm2409_vm12, %v3430_v36, %v3431_v50  ;;  %v3433_v53 = vrot.slane %v3420_v34, 2  ;;  %v3465_v20 = vstv %s6722_s22  ;;  %v6775_v42 = vadd.f32 %v621_v28, %v532_v1  ;;  %s7859_s22 = sld [smem:[#allocation6 + $0x4c]] }
 0x373   :  { %v6777_v9 = vadd.f32 %v620_v51, %v533_v2  ;;  %v625_v34 = vrot.slane %v610_v49, 4  ;;  %v643_v36 = vmul.f32 %v640_v57, %v5146_v39  ;;  %v3436_v19 = vrot.slane %v3422_v8, 2 }
 0x374   :  { %v6758_v23 = vpop.permute.xlu1 %2946  ;;  %v6760_v31 = vpop.permute.xlu0 %2948  ;;  %v3434_v1 = vsel %vm2409_vm12, %v3431_v50, %v3433_v53  ;;  %v3438_v51 = vrot.slane %v6765_v24, 2  ;;  %v3466_v2 = vmul.f32 %v3465_v20, %v6124_v14  ;;  %v3467_v49 = vmul.f32 %v3465_v20, %v6133_v62 }
 0x375   :  { %9138 = vst [vmem:[#allocation283_spill] sm:$0xff] %v6758_v23  ;;  %9139 = vst [vmem:[#allocation284_spill] sm:$0xff] %v6760_v31  ;;  %v624_v31 = vsel %vm163_vm2, %v622_v21, %v623_v30  ;;  %v535_v23 = vmul.f32 %v6667_v26, %v5140_v3  ;;  %v545_v28 = vmul.f32 %v6718_v15, %v5112_v58  ;;  %v653_v21 = vrot.slane %v641_v56, 4 }
 0x376   :  { %3402 = vrot.lane.b32.xlu1 %v3390_v5, %s4767_s17  ;;  %3440 = vrot.lane.b32.xlu0 %v3432_v60, %s4767_s17  ;;  %v536_v5 = vmul.f32 %v6667_v26, %v5174_v37  ;;  %v654_v26 = vrot.slane %v642_v43, 4  ;;  %v3435_v8 = vrot.slane %v3421_v17, 2  ;;  %v645_v50 = vmul.f32 %v640_v57, %v5140_v3 }
 0x377   :  { %v646_v24 = vmul.f32 %v640_v57, %v5174_v37  ;;  %v6802_v12 = vadd.f32 %v624_v31, %v534_v46  ;;  %v3478_v17 = vrot.slane %v3466_v2, 6  ;;  %v558_v31 = vstv %s6769_s24  ;;  %s7867_s24 = sld [smem:[#allocation6 + $0x53]] }
 0x378   :  { %v6785_v29 = vpop.permute.xlu1 %2950  ;;  %v6787_v60 = vpop.permute.xlu0 %2952  ;;  %v3437_v43 = vsel %vm2409_vm12, %v3435_v8, %v3436_v19  ;;  %v6815_v46 = vadd.f32 %v625_v34, %v536_v5  ;;  %v655_v57 = vsel %vm163_vm2, %v653_v21, %v654_v26  ;;  %v3469_v2 = vmul.f32 %v3465_v20, %v6168_v47 }
 0x379   :  { %9140 = vst [vmem:[#allocation285_spill] sm:$0xff] %v6785_v29  ;;  %9141 = vst [vmem:[#allocation286_spill] sm:$0xff] %v6787_v60  ;;  %v626_v60 = vsel %vm163_vm2, %v623_v30, %v625_v34  ;;  %v656_v29 = vrot.slane %v643_v36, 4  ;;  %v3439_v30 = vsel %vm2409_vm12, %v3436_v19, %v3438_v51  ;;  %v3479_v36 = vrot.slane %v3467_v49, 6 }
 0x37a   :  { %3442 = vrot.lane.b32.xlu1 %v3434_v1, %s4767_s17  ;;  %3444 = vrot.lane.b32.xlu0 %v3433_v53, %s4767_s17  ;;  %v3468_v53 = vmul.f32 %v3465_v20, %v6196_v0  ;;  %v3470_v1 = vmul.f32 %v3465_v20, %v6160_v4  ;;  %v6813_v54 = vadd.f32 %v626_v60, %v535_v23  ;;  %v661_v19 = vrot.slane %v646_v24, 4 }
 0x37b   :  { %v657_v8 = vsel %vm163_vm2, %v654_v26, %v656_v29  ;;  %v546_v49 = vmul.f32 %v6718_v15, %v5108_v55  ;;  %v547_v23 = vmul.f32 %v6718_v15, %v5146_v39  ;;  %v658_v34 = vrot.slane %v644_v11, 4 }
 0x37c   :  { %v6805_v38 = vpop.permute.xlu1 %2954  ;;  %v6807_v56 = vpop.permute.xlu0 %2992  ;;  %v3505_v21 = vstv %s6789_s25  ;;  %v3484_v26 = vrot.slane %v3470_v1, 6  ;;  %v669_v24 = vadd.f32 %v655_v57, %v545_v28  ;;  %v3483_v45 = vrot.slane %v3469_v2, 6  ;;  %s7985_s25 = sld [smem:[#allocation6 + $0x45]] }
 0x37d   :  { %9142 = vst [vmem:[#allocation287_spill] sm:$0xff] %v6805_v38  ;;  %9143 = vst [vmem:[#allocation288_spill] sm:$0xff] %v6807_v56  ;;  %v659_v56 = vrot.slane %v645_v50, 4  ;;  %v3471_v50 = vmul.f32 %v3465_v20, %v6222_v61  ;;  %v670_v38 = vadd.f32 %v657_v8, %v546_v49  ;;  %v671_v11 = vadd.f32 %v656_v29, %v547_v23 }
 0x37e   :  { %3446 = vrot.lane.b32.xlu1 %v3437_v43, %s4767_s17  ;;  %3448 = vrot.lane.b32.xlu0 %v3439_v30, %s4767_s17  ;;  %v3480_v43 = vsel %vm156_vm5, %v3478_v17, %v3479_v36  ;;  %v3481_v30 = vrot.slane %v3468_v53, 6  ;;  %v549_v53 = vmul.f32 %v6718_v15, %v5140_v3  ;;  %v550_v20 = vmul.f32 %v6718_v15, %v5174_v37 }
 0x37f   :  { %v559_v28 = vmul.f32 %v558_v31, %v5112_v58  ;;  %v3506_v29 = vmul.f32 %v3505_v21, %v6124_v14  ;;  %v3486_v57 = vrot.slane %v3471_v50, 6  ;;  %v3507_v8 = vmul.f32 %v3505_v21, %v6133_v62 }
 0x380   :  { %v6827_v5 = vpop.permute.xlu1 %2994  ;;  %v6829_v60 = vpop.permute.xlu0 %2996  ;;  %v3482_v1 = vsel %vm156_vm5, %v3479_v36, %v3481_v30  ;;  %v674_v58 = vadd.f32 %v661_v19, %v550_v20  ;;  %v560_v49 = vmul.f32 %v558_v31, %v5108_v55  ;;  %v561_v23 = vmul.f32 %v558_v31, %v5146_v39  ;;  %v9149_v30 = vld [vmem:[#allocation15_spill] sm:$0xff]  ;;  %v9152_v55 = vld [vmem:[#allocation17_spill] sm:$0xff]  ;;  %v9155_v20 = vld [vmem:[#allocation20_spill] sm:$0xff] }
 0x381   :  { %9144 = vst [vmem:[#allocation289_spill] sm:$0xff] %v6827_v5  ;;  %9145 = vst [vmem:[#allocation290_spill] sm:$0xff] %v6829_v60  ;;  %v660_v5 = vsel %vm163_vm2, %v658_v34, %v659_v56  ;;  %v662_v60 = vsel %vm163_vm2, %v659_v56, %v661_v19  ;;  %v3485_v56 = vsel %vm156_vm5, %v3483_v45, %v3484_v26  ;;  %v9148_v34 = vld [vmem:[#allocation16_spill] sm:$0xff]  ;;  %v3514_v50 = vrot.slane %v3506_v29, 6  ;;  %v9157_v29 = vld [vmem:[#allocation22_spill] sm:$0xff] }
 0x382   :  { %3450 = vrot.lane.b32.xlu1 %v3438_v51, %s4767_s17  ;;  %3488 = vrot.lane.b32.xlu0 %v3480_v43, %s4767_s17  ;;  %v672_v15 = vadd.f32 %v660_v5, %v548_v59  ;;  %v673_v2 = vadd.f32 %v662_v60, %v549_v53  ;;  %v562_v36 = vmul.f32 %v558_v31, %v5123_v7 }
 0x383   :  { %v563_v45 = vmul.f32 %v558_v31, %v5140_v3  ;;  %v698_v43 = vadd.f32 %v9148_v34, %v6712_v18  ;;  %v697_v59 = vadd.f32 %v9149_v30, %v6738_v27  ;;  %v564_v19 = vmul.f32 %v558_v31, %v5174_v37  ;;  %v9153_v18 = vld [vmem:[#allocation18_spill] sm:$0xff]  ;;  %v9154_v37 = vld [vmem:[#allocation19_spill] sm:$0xff]  ;;  %v9160_v34 = vld [vmem:[#allocation25_spill] sm:$0xff] }
 0x384   :  { %v6847_v17 = vpop.permute.xlu1 %2998  ;;  %v6849_v51 = vpop.permute.xlu0 %3032  ;;  %v699_v39 = vadd.f32 %v9152_v55, %v6740_v63  ;;  %v3487_v7 = vsel %vm156_vm5, %v3484_v26, %v3486_v57  ;;  %v3515_v3 = vrot.slane %v3507_v8, 6  ;;  %v6876_v53 = vmul.f32 %v3505_v21, %v6160_v4  ;;  %v9156_v63 = vld [vmem:[#allocation21_spill] sm:$0xff]  ;;  %v9161_v55 = vld [vmem:[#allocation26_spill] sm:$0xff] }
 0x385   :  { %9146 = vst [vmem:[#allocation291_spill] sm:$0xff] %v6847_v17  ;;  %9147 = vst [vmem:[#allocation292_spill] sm:$0xff] %v6849_v51  ;;  %v700_v27 = vadd.f32 %v9153_v18, %v6747_v22  ;;  %v733_v31 = vadd.f32 %v9154_v37, %v6749_v32  ;;  %v735_v26 = vadd.f32 %v9156_v63, %v6777_v9  ;;  %v9158_v22 = vld [vmem:[#allocation23_spill] sm:$0xff]  ;;  %v2360_v9 = vstv %s6845_s26  ;;  %v9165_v63 = vld [vmem:[#allocation28_spill] sm:$0xff]  ;;  %s8012_s26 = sld [smem:[#allocation6 + $0x61]] }
 0x386   :  { %3490 = vrot.lane.b32.xlu1 %v3482_v1, %s4767_s17  ;;  %3492 = vrot.lane.b32.xlu0 %v3485_v56, %s4767_s17  ;;  %v734_v1 = vadd.f32 %v9155_v20, %v6775_v42  ;;  %v6890_v56 = vadd.f32 %v9157_v29, %v6802_v12  ;;  %v6894_v57 = vadd.f32 %v9158_v22, %v6813_v54  ;;  %v9159_v42 = vld [vmem:[#allocation24_spill] sm:$0xff]  ;;  %v9164_v37 = vld [vmem:[#allocation27_spill] sm:$0xff]  ;;  %v3518_v20 = vrot.slane %v6876_v53, 6  ;;  %v9184_v51 = vld [vmem:[#allocation42_spill] sm:$0xff] }
 0x387   :  { %v3508_v32 = vmul.f32 %v3505_v21, %v6168_v47  ;;  %v6899_v8 = vadd.f32 %v9159_v42, %v6815_v46  ;;  %v6902_v30 = vadd.f32 %v9160_v34, %v669_v24  ;;  %v6913_v54 = vadd.f32 %v9164_v37, %v671_v11  ;;  %v9166_v24 = vld [vmem:[#allocation29_spill] sm:$0xff]  ;;  %v9168_v11 = vld [vmem:[#allocation31_spill] sm:$0xff]  ;;  %v9170_v34 = vld [vmem:[#allocation32_spill] sm:$0xff] }
 0x388   :  { %v6868_v5 = vpop.permute.xlu1 %3034  ;;  %v6870_v60 = vpop.permute.xlu0 %3036  ;;  %v3516_v21 = vsel %vm156_vm5, %v3514_v50, %v3515_v3  ;;  %v3545_v46 = vstv %s6855_s28  ;;  %v6919_v29 = vadd.f32 %v9165_v63, %v672_v15  ;;  %v6922_v22 = vadd.f32 %v9166_v24, %v673_v2  ;;  %v9174_v24 = vld [vmem:[#allocation34_spill] sm:$0xff] }
 0x389   :  { %9150 = vst [vmem:[#allocation16_spill] sm:$0xff] %v6868_v5  ;;  %9151 = vst [vmem:[#allocation15_spill] sm:$0xff] %v6870_v60  ;;  %v6935_v53 = vmul.f32 %v2360_v9, %v6124_v14  ;;  %v2362_v15 = vmul.f32 %v2360_v9, %v6133_v62  ;;  %v3517_v2 = vrot.slane %v3508_v32, 6  ;;  %v3547_v63 = vmul.f32 %v3545_v46, %v6133_v62 }
 0x38a   :  { %3494 = vrot.lane.b32.xlu1 %v3487_v7, %s4767_s17  ;;  %3520 = vrot.lane.b32.xlu0 %v3514_v50, %s4768_s23  ;;  %v6905_v7 = vadd.f32 %v9161_v55, %v670_v38  ;;  %v9167_v38 = vld [vmem:[#allocation30_spill] sm:$0xff]  ;;  %s6929_s17 = sld [smem:[#allocation6 + $0x43]]  ;;  %v6932_v50 = vadd.f32 %v9168_v11, %v559_v28  ;;  %v9171_v55 = vld [vmem:[#allocation33_spill] sm:$0xff]  ;;  %v3546_v28 = vmul.f32 %v3545_v46, %v6124_v14  ;;  %v9175_v11 = vld [vmem:[#allocation35_spill] sm:$0xff] }
 0x38b   :  { %v6925_v42 = vadd.f32 %v9167_v38, %v674_v58  ;;  %9169 = vst [vmem:[#allocation19_spill] sm:$0xff] %v6935_v53  ;;  %v6941_v58 = vadd.f32 %v9170_v34, %v560_v49  ;;  %v6944_v37 = vadd.f32 %v9171_v55, %v561_v23  ;;  %v6953_v38 = vadd.f32 %v9174_v24, %v562_v36  ;;  %v9176_v23 = vld [vmem:[#allocation36_spill] sm:$0xff]  ;;  %v9177_v55 = vld [vmem:[#allocation37_spill] sm:$0xff]  ;;  %v9178_v36 = vld [vmem:[#allocation38_spill] sm:$0xff] }
 0x38c   :  { %v6908_v18 = vpop.permute.xlu1 %3038  ;;  %v6910_v12 = vpop.permute.xlu0 %3040  ;;  %v3519_v49 = vsel %vm156_vm5, %v3517_v2, %v3518_v20  ;;  %v3548_v32 = vmul.f32 %v3545_v46, %v6196_v0  ;;  %v6961_v34 = vadd.f32 %v9176_v23, %v564_v19  ;;  %v6970_v24 = vadd.f32 %v9178_v36, %v698_v43  ;;  %v9182_v43 = vld [vmem:[#allocation40_spill] sm:$0xff] }
 0x38d   :  { %9162 = vst [vmem:[#allocation17_spill] sm:$0xff] %v6908_v18  ;;  %9163 = vst [vmem:[#allocation18_spill] sm:$0xff] %v6910_v12  ;;  %v6956_v12 = vadd.f32 %v9175_v11, %v563_v45  ;;  %v2363_v18 = vmul.f32 %v2360_v9, %v6196_v0  ;;  %v9179_v45 = vld [vmem:[#allocation39_spill] sm:$0xff]  ;;  %v2374_v5 = vrot.slane %v2362_v15, 6  ;;  %v2365_v19 = vmul.f32 %v2360_v9, %v6160_v4 }
 0x38e   :  { %3522 = vrot.lane.b32.xlu1 %v3516_v21, %s4768_s23  ;;  %3524 = vrot.lane.b32.xlu0 %v3515_v3, %s4768_s23  ;;  %v6973_v11 = vadd.f32 %v9179_v45, %v699_v39  ;;  %v6983_v36 = vadd.f32 %v9182_v43, %v700_v27  ;;  %v9183_v39 = vld [vmem:[#allocation41_spill] sm:$0xff]  ;;  %v3561_v60 = vrot.slane %v3548_v32, 6  ;;  %v3550_v15 = vmul.f32 %v3545_v46, %v6160_v4  ;;  %v9186_v27 = vld [vmem:[#allocation43_spill] sm:$0xff] }
 0x38f   :  { %v6986_v45 = vadd.f32 %v9183_v39, %v733_v31  ;;  %v6990_v17 = vadd.f32 %v9184_v51, %v734_v1  ;;  %v7001_v31 = vadd.f32 %v9186_v27, %v735_v26  ;;  %v2396_v51 = vstv %s6938_s29 }
 0x390   :  { %v6946_v3 = vpop.permute.xlu1 %3042  ;;  %v6948_v21 = vpop.permute.xlu0 %3080  ;;  %v3549_v1 = vmul.f32 %v3545_v46, %v6168_v47  ;;  %v3551_v26 = vmul.f32 %v3545_v46, %v6222_v61  ;;  %v7078_v44 = vadd.f32 %v9200_v6, %v6899_v8 }
 0x391   :  { %9172 = vst [vmem:[#allocation20_spill] sm:$0xff] %v6946_v3  ;;  %9173 = vst [vmem:[#allocation21_spill] sm:$0xff] %v6948_v21  ;;  %v6964_v3 = vadd.f32 %v9177_v55, %v697_v59  ;;  %v2366_v59 = vmul.f32 %v2360_v9, %v6222_v61  ;;  %v2376_v21 = vrot.slane %v2363_v18, 6 }
 0x392   :  { %3526 = vrot.lane.b32.xlu1 %v3517_v2, %s4768_s23  ;;  %3528 = vrot.lane.b32.xlu0 %v3519_v49, %s4768_s23  ;;  %v3558_v2 = vrot.slane %v3546_v28, 6  ;;  %v3559_v49 = vrot.slane %v3547_v63, 6  ;;  %v3593_v28 = vstv %s6929_s17  ;;  %v9187_v63 = vrot.slane %v6935_v53, 6 }
 0x393   :  { %v2381_v18 = vrot.slane %v2366_v59, 6 }
 0x394   :  { %v6978_v23 = vpop.permute.xlu1 %3082  ;;  %v6980_v55 = vpop.permute.xlu0 %3084  ;;  %v7006_v32 = vsel %vm156_vm5, %v9187_v63, %v2374_v5  ;;  %v3560_v39 = vsel %vm156_vm5, %v3558_v2, %v3559_v49  ;;  %v3562_v27 = vsel %vm156_vm5, %v3559_v49, %v3561_v60  ;;  %v3594_v63 = vmul.f32 %v3593_v28, %v6124_v14  ;;  %v9192_v60 = vld [vmem:[#allocation44_spill] sm:$0xff] }
 0x395   :  { %9180 = vst [vmem:[#allocation22_spill] sm:$0xff] %v6978_v23  ;;  %9181 = vst [vmem:[#allocation23_spill] sm:$0xff] %v6980_v55  ;;  %v6993_v23 = vmul.f32 %v2360_v9, %v6168_v47  ;;  %v2379_v9 = vrot.slane %v2365_v19, 6  ;;  %v3564_v55 = vrot.slane %v3550_v15, 6  ;;  %v7022_v19 = vsel %vm156_vm5, %v2374_v5, %v2376_v21 }
 0x396   :  { %3530 = vrot.lane.b32.xlu1 %v3518_v20, %s4768_s23  ;;  %3568 = vrot.lane.b32.xlu0 %v3558_v2, %s4768_s23  ;;  %9188 = vst [vmem:[#allocation25_spill] sm:$0xff] %v7006_v32  ;;  %v3595_v32 = vmul.f32 %v3593_v28, %v6133_v62  ;;  %9191 = vst [vmem:[#allocation28_spill] sm:$0xff] %v7022_v19  ;;  %v7031_v46 = vadd.f32 %v9192_v60, %v6890_v56  ;;  %v9193_v2 = vld [vmem:[#allocation45_spill] sm:$0xff]  ;;  %v3563_v21 = vrot.slane %v3549_v1, 6 }
 0x397   :  { %9185 = vst [vmem:[#allocation24_spill] sm:$0xff] %v6993_v23  ;;  %v8834_v59 = vrot.slane %v6993_v23, 6  ;;  %v7035_v49 = vadd.f32 %v9193_v2, %v6894_v57  ;;  %v2399_v5 = vmul.f32 %v2396_v51, %v6196_v0  ;;  %v3566_v60 = vrot.slane %v3551_v26, 6 }
 0x398   :  { %v7012_v20 = vpop.permute.xlu1 %3086  ;;  %v7014_v43 = vpop.permute.xlu0 %3088  ;;  %v3596_v57 = vmul.f32 %v3593_v28, %v6196_v0  ;;  %v3565_v2 = vsel %vm156_vm5, %v3563_v21, %v3564_v55  ;;  %v3606_v1 = vrot.slane %v3594_v63, 2  ;;  %v3607_v19 = vrot.slane %v3595_v32, 2 }
 0x399   :  { %9189 = vst [vmem:[#allocation26_spill] sm:$0xff] %v7012_v20  ;;  %9190 = vst [vmem:[#allocation27_spill] sm:$0xff] %v7014_v43  ;;  %v2397_v20 = vmul.f32 %v2396_v51, %v6124_v14  ;;  %v2398_v43 = vmul.f32 %v2396_v51, %v6133_v62  ;;  %v7041_v15 = vsel %vm156_vm5, %v8834_v59, %v2379_v9  ;;  %v2332_v63 = vstv %s7010_s3 }
 0x39a   :  { %3570 = vrot.lane.b32.xlu1 %v3560_v39, %s4768_s23  ;;  %3572 = vrot.lane.b32.xlu0 %v3562_v27, %s4768_s23  ;;  %9194 = vst [vmem:[#allocation29_spill] sm:$0xff] %v7041_v15  ;;  %v7044_v39 = vsel %vm156_vm5, %v2379_v9, %v2381_v18  ;;  %v3598_v23 = vmul.f32 %v3593_v28, %v6160_v4  ;;  %v7057_v9 = vstv %s6998_s30  ;;  %v2413_v18 = vrot.slane %v2399_v5, 2 }
 0x39b   :  { %9195 = vst [vmem:[#allocation30_spill] sm:$0xff] %v7044_v39  ;;  %v2410_v53 = vrot.slane %v2397_v20, 2  ;;  %v2411_v59 = vrot.slane %v2398_v43, 2  ;;  %v2401_v15 = vmul.f32 %v2396_v51, %v6160_v4  ;;  %v2400_v26 = vmul.f32 %v2396_v51, %v6168_v47 }
 0x39c   :  { %v7046_v27 = vpop.permute.xlu1 %3090  ;;  %v7048_v56 = vpop.permute.xlu0 %3128  ;;  %v3597_v32 = vmul.f32 %v3593_v28, %v6168_v47  ;;  %v3608_v5 = vsel %vm2409_vm12, %v3606_v1, %v3607_v19  ;;  %v3612_v39 = vrot.slane %v3598_v23, 2  ;;  %v3635_v33 = vmul.f32 %v7057_v9, %v6133_v62 }
 0x39d   :  { %9196 = vst [vmem:[#allocation31_spill] sm:$0xff] %v7046_v27  ;;  %9197 = vst [vmem:[#allocation32_spill] sm:$0xff] %v7048_v56  ;;  %v2402_v56 = vmul.f32 %v2396_v51, %v6222_v61  ;;  %v3609_v27 = vrot.slane %v3596_v57, 2  ;;  %v3634_v51 = vmul.f32 %v7057_v9, %v6124_v14  ;;  %v7092_v23 = vsel %vm2409_vm12, %v2411_v59, %v2413_v18  ;;  %v9204_v57 = vld [vmem:[#allocation48_spill] sm:$0xff] }
 0x39e   :  { %3574 = vrot.lane.b32.xlu1 %v3563_v21, %s4768_s23  ;;  %3576 = vrot.lane.b32.xlu0 %v3565_v2, %s4768_s23  ;;  %v3567_v21 = vsel %vm156_vm5, %v3564_v55, %v3566_v60  ;;  %v3599_v2 = vmul.f32 %v3593_v28, %v6222_v61  ;;  %v7085_v55 = vsel %vm2409_vm12, %v2410_v53, %v2411_v59  ;;  %v2416_v28 = vrot.slane %v2401_v15, 2 }
 0x39f   :  { %9202 = vst [vmem:[#allocation35_spill] sm:$0xff] %v7085_v55  ;;  %9203 = vst [vmem:[#allocation36_spill] sm:$0xff] %v7092_v23  ;;  %v2415_v60 = vrot.slane %v2400_v26, 2  ;;  %v2418_v6 = vrot.slane %v2402_v56, 2  ;;  %v3611_v8 = vrot.slane %v3597_v32, 2  ;;  %v7099_v53 = vmul.f32 %v2332_v63, %v6124_v14 }
 0x3a0   :  { %v7065_v20 = vpop.permute.xlu1 %3130  ;;  %v7067_v43 = vpop.permute.xlu0 %3132  ;;  %v3646_v18 = vrot.slane %v3634_v51, 2  ;;  %v3647_v56 = vrot.slane %v3635_v33, 2  ;;  %v3636_v26 = vmul.f32 %v7057_v9, %v6196_v0  ;;  %v9214_v51 = vld [vmem:[#allocation51_spill] sm:$0xff] }
 0x3a1   :  { %9198 = vst [vmem:[#allocation33_spill] sm:$0xff] %v7065_v20  ;;  %9199 = vst [vmem:[#allocation34_spill] sm:$0xff] %v7067_v43  ;;  %v9201_v43 = vld [vmem:[#allocation47_spill] sm:$0xff]  ;;  %v3613_v59 = vsel %vm2409_vm12, %v3611_v8, %v3612_v39 }
 0x3a2   :  { %v7082_v20 = vadd.f32 %v9201_v43, %v6902_v30  ;;  %3578 = vrot.lane.b32.xlu1 %v3567_v21, %s4768_s23  ;;  %3616 = vrot.lane.b32.xlu0 %v3608_v5, %s4768_s23  ;;  %v7096_v30 = vadd.f32 %v9204_v57, %v6905_v7  ;;  %9205 = vst [vmem:[#allocation37_spill] sm:$0xff] %v7099_v53  ;;  %v3614_v21 = vrot.slane %v3599_v2, 2  ;;  %v9208_v7 = vld [vmem:[#allocation49_spill] sm:$0xff]  ;;  %v2465_v2 = vstv %s7061_s27 }
 0x3a3   :  { %v3610_v43 = vsel %vm2409_vm12, %v3607_v19, %v3609_v27  ;;  %v7111_v32 = vadd.f32 %v9208_v7, %v6913_v54  ;;  %v7114_v5 = vsel %vm2409_vm12, %v2415_v60, %v2416_v28  ;;  %v7117_v57 = vmul.f32 %v2332_v63, %v6133_v62  ;;  %v9211_v19 = vld [vmem:[#allocation50_spill] sm:$0xff] }
 0x3a4   :  { %v7101_v15 = vpop.permute.xlu1 %3134  ;;  %v7103_v1 = vpop.permute.xlu0 %3136  ;;  %9209 = vst [vmem:[#allocation40_spill] sm:$0xff] %v7114_v5  ;;  %v7123_v33 = vadd.f32 %v9211_v19, %v6919_v29  ;;  %v7126_v27 = vsel %vm2409_vm12, %v2416_v28, %v2418_v6  ;;  %v7129_v54 = vmul.f32 %v2332_v63, %v6160_v4  ;;  %v7134_v60 = vadd.f32 %v9214_v51, %v6922_v22 }
 0x3a5   :  { %9206 = vst [vmem:[#allocation38_spill] sm:$0xff] %v7101_v15  ;;  %9207 = vst [vmem:[#allocation39_spill] sm:$0xff] %v7103_v1  ;;  %v3638_v6 = vmul.f32 %v7057_v9, %v6160_v4  ;;  %v3648_v22 = vsel %vm2409_vm12, %v3646_v18, %v3647_v56  ;;  %v3649_v7 = vrot.slane %v3636_v26, 2  ;;  %v7152_v19 = vmul.f32 %v7057_v9, %v6222_v61  ;;  %v9219_v18 = vld [vmem:[#allocation53_spill] sm:$0xff]  ;;  %v9220_v1 = vld [vmem:[#allocation54_spill] sm:$0xff] }
 0x3a6   :  { %9210 = vst [vmem:[#allocation41_spill] sm:$0xff] %v7117_v57  ;;  %3618 = vrot.lane.b32.xlu1 %v3610_v43, %s4768_s23  ;;  %3620 = vrot.lane.b32.xlu0 %v3613_v59, %s4768_s23  ;;  %9212 = vst [vmem:[#allocation42_spill] sm:$0xff] %v7126_v27  ;;  %v7138_v43 = vmul.f32 %v2332_v63, %v6168_v47  ;;  %v3615_v59 = vsel %vm2409_vm12, %v3612_v39, %v3614_v21  ;;  %v9218_v39 = vld [vmem:[#allocation52_spill] sm:$0xff] }
 0x3a7   :  { %9213 = vst [vmem:[#allocation43_spill] sm:$0xff] %v7129_v54  ;;  %v2466_v51 = vmul.f32 %v2465_v2, %v6124_v14  ;;  %v2467_v8 = vmul.f32 %v2465_v2, %v6133_v62  ;;  %v7164_v21 = vadd.f32 %v9218_v39, %v6925_v42  ;;  %v7168_v26 = vadd.f32 %v9219_v18, %v6964_v3  ;;  %v9228_v27 = vld [vmem:[#allocation56_spill] sm:$0xff] }
 0x3a8   :  { %9215 = vst [vmem:[#allocation44_spill] sm:$0xff] %v7138_v43  ;;  %v7142_v29 = vpop.permute.xlu1 %3138  ;;  %v7144_v28 = vpop.permute.xlu0 %3176  ;;  %v7179_v15 = vmul.f32 %v2465_v2, %v6196_v0  ;;  %v3652_v3 = vrot.slane %v3638_v6, 2  ;;  %v3650_v18 = vsel %vm2409_vm12, %v3647_v56, %v3649_v7  ;;  %v3654_v63 = vrot.slane %v7152_v19, 2 }
 0x3a9   :  { %9216 = vst [vmem:[#allocation45_spill] sm:$0xff] %v7142_v29  ;;  %9217 = vst [vmem:[#allocation46_spill] sm:$0xff] %v7144_v28  ;;  %v7160_v28 = vstv %s7089_s5  ;;  %v3637_v29 = vmul.f32 %v7057_v9, %v6168_v47  ;;  %v2478_v56 = vrot.slane %v2466_v51, 2  ;;  %v2479_v19 = vrot.slane %v2467_v8, 2 }
 0x3aa   :  { %3622 = vrot.lane.b32.xlu1 %v3615_v59, %s4768_s23  ;;  %3656 = vrot.lane.b32.xlu0 %v3648_v22, %s4768_s23  ;;  %v7175_v59 = vadd.f32 %v9220_v1, %v6970_v24  ;;  %9221 = vst [vmem:[#allocation47_spill] sm:$0xff] %v7179_v15  ;;  %v3682_v9 = vmul.f32 %v7160_v28, %v6124_v14  ;;  %v9224_v1 = vld [vmem:[#allocation55_spill] sm:$0xff] }
 0x3ab   :  { %v3683_v24 = vmul.f32 %v7160_v28, %v6133_v62  ;;  %v7193_v22 = vadd.f32 %v9224_v1, %v6973_v11  ;;  %v7208_v5 = vadd.f32 %v9228_v27, %v6983_v36  ;;  %v9229_v11 = vrot.slane %v7129_v54, 6 }
 0x3ac   :  { %v7181_v42 = vpop.permute.xlu1 %3178  ;;  %v7183_v39 = vpop.permute.xlu0 %3180  ;;  %v9230_v1 = vrot.slane %v7138_v43, 6  ;;  %v7218_v51 = vmul.f32 %v2465_v2, %v6160_v4  ;;  %v3651_v8 = vrot.slane %v3637_v29, 2  ;;  %v3694_v54 = vrot.slane %v3682_v9, 2  ;;  %v9234_v29 = vld [vmem:[#allocation57_spill] sm:$0xff] }
 0x3ad   :  { %9222 = vst [vmem:[#allocation48_spill] sm:$0xff] %v7181_v42  ;;  %9223 = vst [vmem:[#allocation49_spill] sm:$0xff] %v7183_v39  ;;  %v9225_v42 = vrot.slane %v7117_v57, 6  ;;  %v9226_v39 = vrot.slane %v7099_v53, 6  ;;  %v7235_v43 = vadd.f32 %v9234_v29, %v6986_v45 }
 0x3ae   :  { %3658 = vrot.lane.b32.xlu1 %v3650_v18, %s4768_s23  ;;  %3660 = vrot.lane.b32.xlu0 %v3649_v7, %s4768_s23  ;;  %v7215_v57 = vsel %vm156_vm5, %v9230_v1, %v9229_v11  ;;  %v3684_v18 = vmul.f32 %v7160_v28, %v6196_v0  ;;  %v3653_v11 = vsel %vm2409_vm12, %v3651_v8, %v3652_v3  ;;  %v9237_v8 = vld [vmem:[#allocation58_spill] sm:$0xff]  ;;  %v2484_v45 = vrot.slane %v7218_v51, 2  ;;  %v9243_v51 = vld [vmem:[#allocation60_spill] sm:$0xff] }
 0x3af   :  { %v7200_v6 = vsel %vm156_vm5, %v9226_v39, %v9225_v42  ;;  %9231 = vst [vmem:[#allocation51_spill] sm:$0xff] %v7215_v57  ;;  %v2469_v42 = vmul.f32 %v2465_v2, %v6168_v47  ;;  %v2501_v39 = vstv %s7140_s6  ;;  %v3655_v1 = vsel %vm2409_vm12, %v3652_v3, %v3654_v63  ;;  %v9238_v3 = vld [vmem:[#allocation59_spill] sm:$0xff] }
 0x3b0   :  { %9227 = vst [vmem:[#allocation50_spill] sm:$0xff] %v7200_v6  ;;  %v7225_v36 = vpop.permute.xlu1 %3182  ;;  %v7227_v27 = vpop.permute.xlu0 %3208  ;;  %v3695_v57 = vrot.slane %v3683_v24, 2  ;;  %v7238_v7 = vsel %vm2409_vm12, %v2478_v56, %v2479_v19  ;;  %v7251_v9 = vadd.f32 %v9238_v3, %v7001_v31  ;;  %v2502_v24 = vmul.f32 %v2501_v39, %v6124_v14 }
 0x3b1   :  { %9232 = vst [vmem:[#allocation52_spill] sm:$0xff] %v7225_v36  ;;  %9233 = vst [vmem:[#allocation53_spill] sm:$0xff] %v7227_v27  ;;  %v7241_v36 = vmul.f32 %v2465_v2, %v6222_v61  ;;  %v7247_v27 = vadd.f32 %v9237_v8, %v6990_v17  ;;  %v9239_v56 = vrot.slane %v7179_v15, 2  ;;  %v3686_v31 = vmul.f32 %v7160_v28, %v6160_v4 }
 0x3b2   :  { %9235 = vst [vmem:[#allocation54_spill] sm:$0xff] %v7238_v7  ;;  %3662 = vrot.lane.b32.xlu1 %v3653_v11, %s4768_s23  ;;  %3664 = vrot.lane.b32.xlu0 %v3655_v1, %s4768_s23  ;;  %v2483_v11 = vrot.slane %v2469_v42, 2  ;;  %v2503_v1 = vmul.f32 %v2501_v39, %v6133_v62  ;;  %v7269_v8 = vadd.f32 %v9243_v51, %v7031_v46  ;;  %v3697_v15 = vrot.slane %v3684_v18, 2  ;;  %v9244_v42 = vld [vmem:[#allocation61_spill] sm:$0xff] }
 0x3b3   :  { %9236 = vst [vmem:[#allocation55_spill] sm:$0xff] %v7241_v36  ;;  %v7258_v2 = vsel %vm2409_vm12, %v2479_v19, %v9239_v56  ;;  %v3696_v3 = vsel %vm2409_vm12, %v3694_v54, %v3695_v57  ;;  %v7274_v19 = vmul.f32 %v7160_v28, %v6222_v61  ;;  %v7278_v56 = vadd.f32 %v9244_v42, %v7035_v49 }
 0x3b4   :  { %9240 = vst [vmem:[#allocation56_spill] sm:$0xff] %v7258_v2  ;;  %v7261_v17 = vpop.permute.xlu1 %3210  ;;  %v7263_v29 = vpop.permute.xlu0 %3212  ;;  %v3729_v46 = vstv %s7204_s8  ;;  %v7288_v54 = vsel %vm2409_vm12, %v2483_v11, %v2484_v45  ;;  %v2514_v18 = vrot.slane %v2502_v24, 2  ;;  %v2537_v51 = vstv %s7220_s9 }
 0x3b5   :  { %9241 = vst [vmem:[#allocation57_spill] sm:$0xff] %v7261_v17  ;;  %9242 = vst [vmem:[#allocation58_spill] sm:$0xff] %v7263_v29  ;;  %v7282_v17 = vmul.f32 %v2501_v39, %v6196_v0  ;;  %v3685_v2 = vmul.f32 %v7160_v28, %v6168_v47  ;;  %v2515_v49 = vrot.slane %v2503_v1, 2  ;;  %v2506_v42 = vmul.f32 %v2501_v39, %v6160_v4 }
 0x3b6   :  { %3666 = vrot.lane.b32.xlu1 %v3654_v63, %s4768_s23  ;;  %3704 = vrot.lane.b32.xlu0 %v3696_v3, %s4768_s23  ;;  %9246 = vst [vmem:[#allocation60_spill] sm:$0xff] %v7288_v54  ;;  %v7295_v29 = vmul.f32 %v2501_v39, %v6222_v61  ;;  %v3700_v3 = vrot.slane %v3686_v31, 2  ;;  %v3698_v6 = vsel %vm2409_vm12, %v3695_v57, %v3697_v15  ;;  %v3702_v11 = vrot.slane %v7274_v19, 2  ;;  %v9250_v57 = vld [vmem:[#allocation62_spill] sm:$0xff]  ;;  %v9251_v19 = vld [vmem:[#allocation63_spill] sm:$0xff] }
 0x3b7   :  { %9245 = vst [vmem:[#allocation59_spill] sm:$0xff] %v7282_v17  ;;  %v3730_v24 = vmul.f32 %v3729_v46, %v6124_v14  ;;  %v3731_v54 = vmul.f32 %v3729_v46, %v6133_v62  ;;  %v2505_v1 = vmul.f32 %v2501_v39, %v6168_v47  ;;  %v2538_v23 = vmul.f32 %v2537_v51, %v6124_v14 }
 0x3b8   :  { %9247 = vst [vmem:[#allocation61_spill] sm:$0xff] %v7295_v29  ;;  %v7297_v7 = vpop.permute.xlu1 %3214  ;;  %v7299_v63 = vpop.permute.xlu0 %3216  ;;  %v7309_v55 = vmul.f32 %v2537_v51, %v6133_v62  ;;  %v7317_v31 = vadd.f32 %v9250_v57, %v7078_v44  ;;  %v7321_v28 = vadd.f32 %v9251_v19, %v7082_v20  ;;  %v9252_v39 = vrot.slane %v7241_v36, 2 }
 0x3b9   :  { %9248 = vst [vmem:[#allocation293_spill] sm:$0xff] %v7297_v7  ;;  %9249 = vst [vmem:[#allocation294_spill] sm:$0xff] %v7299_v63  ;;  %v2520_v7 = vrot.slane %v2506_v42, 2  ;;  %v3732_v20 = vmul.f32 %v3729_v46, %v6196_v0  ;;  %v3743_v36 = vrot.slane %v3731_v54, 2  ;;  %v2519_v42 = vrot.slane %v2505_v1, 2 }
 0x3ba   :  { %3706 = vrot.lane.b32.xlu1 %v3698_v6, %s4768_s23  ;;  %3708 = vrot.lane.b32.xlu0 %v3697_v15, %s4768_s23  ;;  %v7326_v63 = vsel %vm2409_vm12, %v2484_v45, %v9252_v39  ;;  %v3699_v6 = vrot.slane %v3685_v2, 2  ;;  %v7331_v15 = vsel %vm2409_vm12, %v2514_v18, %v2515_v49  ;;  %v3703_v45 = vsel %vm2409_vm12, %v3700_v3, %v3702_v11 }
 0x3bb   :  { %9253 = vst [vmem:[#allocation62_spill] sm:$0xff] %v7326_v63  ;;  %9254 = vst [vmem:[#allocation63_spill] sm:$0xff] %v7331_v15  ;;  %v3742_v39 = vrot.slane %v3730_v24, 2  ;;  %v9257_v2 = vrot.slane %v7282_v17, 2  ;;  %v2550_v63 = vrot.slane %v2538_v23, 6  ;;  %v2551_v53 = vrot.slane %v7309_v55, 6 }
 0x3bc   :  { %v7334_v44 = vpop.permute.xlu1 %3218  ;;  %v7336_v57 = vpop.permute.xlu0 %3256  ;;  %v3701_v19 = vsel %vm2409_vm12, %v3699_v6, %v3700_v3  ;;  %v9260_v3 = vld [vmem:[#allocation65_spill] sm:$0xff]  ;;  %v2540_v24 = vmul.f32 %v2537_v51, %v6196_v0  ;;  %v7360_v23 = vsel %vm2409_vm12, %v2519_v42, %v2520_v7  ;;  %v9262_v55 = vrot.slane %v7295_v29, 2 }
 0x3bd   :  { %9255 = vst [vmem:[#allocation295_spill] sm:$0xff] %v7334_v44  ;;  %9256 = vst [vmem:[#allocation296_spill] sm:$0xff] %v7336_v57  ;;  %v7344_v18 = vsel %vm2409_vm12, %v2515_v49, %v9257_v2  ;;  %v9259_v57 = vld [vmem:[#allocation64_spill] sm:$0xff]  ;;  %v7355_v54 = vadd.f32 %v9260_v3, %v7111_v32  ;;  %v2542_v49 = vmul.f32 %v2537_v51, %v6160_v4  ;;  %v3745_v3 = vrot.slane %v3732_v20, 2 }
 0x3be   :  { %9258 = vst [vmem:[#allocation297_spill] sm:$0xff] %v7344_v18  ;;  %3710 = vrot.lane.b32.xlu1 %v3701_v19, %s4768_s23  ;;  %3712 = vrot.lane.b32.xlu0 %v3703_v45, %s4768_s23  ;;  %v7351_v6 = vadd.f32 %v9259_v57, %v7096_v30  ;;  %9261 = vst [vmem:[#allocation64_spill] sm:$0xff] %v7360_v23  ;;  %v7365_v1 = vsel %vm2409_vm12, %v2520_v7, %v9262_v55  ;;  %v9266_v45 = vld [vmem:[#allocation66_spill] sm:$0xff]  ;;  %v9267_v7 = vld [vmem:[#allocation67_spill] sm:$0xff]  ;;  %v2429_v29 = vstv %s7328_s11 }
 0x3bf   :  { %9263 = vst [vmem:[#allocation65_spill] sm:$0xff] %v7365_v1  ;;  %v2541_v30 = vmul.f32 %v2537_v51, %v6168_v47  ;;  %v3734_v19 = vmul.f32 %v3729_v46, %v6160_v4  ;;  %v7375_v2 = vadd.f32 %v9266_v45, %v7123_v33  ;;  %v3744_v42 = vsel %vm2409_vm12, %v3742_v39, %v3743_v36  ;;  %v9269_v1 = vld [vmem:[#allocation68_spill] sm:$0xff] }
 0x3c0   :  { %v7368_v57 = vpop.permute.xlu1 %3258  ;;  %v7370_v32 = vpop.permute.xlu0 %3260  ;;  %v7379_v44 = vmul.f32 %v3729_v46, %v6222_v61  ;;  %v7383_v55 = vadd.f32 %v9267_v7, %v7134_v60  ;;  %v3733_v33 = vmul.f32 %v3729_v46, %v6168_v47  ;;  %v3777_v45 = vstv %s7313_s10  ;;  %v9270_v60 = vld [vmem:[#allocation69_spill] sm:$0xff] }
 0x3c1   :  { %9264 = vst [vmem:[#allocation298_spill] sm:$0xff] %v7368_v57  ;;  %9265 = vst [vmem:[#allocation299_spill] sm:$0xff] %v7370_v32  ;;  %v7386_v57 = vsel %vm156_vm5, %v2550_v63, %v2551_v53  ;;  %v2553_v32 = vrot.slane %v2540_v24, 6  ;;  %v2556_v39 = vrot.slane %v2542_v49, 6  ;;  %v2543_v20 = vmul.f32 %v2537_v51, %v6222_v61 }
 0x3c2   :  { %9268 = vst [vmem:[#allocation66_spill] sm:$0xff] %v7386_v57  ;;  %3714 = vrot.lane.b32.xlu1 %v3702_v11, %s4768_s23  ;;  %3752 = vrot.lane.b32.xlu0 %v3744_v42, %s4768_s23  ;;  %v7396_v23 = vadd.f32 %v9269_v1, %v7164_v21  ;;  %v7400_v63 = vadd.f32 %v9270_v60, %v6932_v50  ;;  %v2555_v7 = vrot.slane %v2541_v30, 6  ;;  %v3748_v46 = vrot.slane %v3734_v19, 2 }
 0x3c3   :  { %v3746_v24 = vsel %vm2409_vm12, %v3743_v36, %v3745_v3  ;;  %v3750_v51 = vrot.slane %v7379_v44, 2  ;;  %v3778_v49 = vmul.f32 %v3777_v45, %v6124_v14  ;;  %v3779_v21 = vmul.f32 %v3777_v45, %v6133_v62 }
 0x3c4   :  { %v7402_v11 = vpop.permute.xlu1 %3262  ;;  %v7404_v42 = vpop.permute.xlu0 %3264  ;;  %v2430_v1 = vmul.f32 %v2429_v29, %v6124_v14  ;;  %v2431_v50 = vmul.f32 %v2429_v29, %v6133_v62  ;;  %v7415_v30 = vmul.f32 %v2429_v29, %v6196_v0  ;;  %v3747_v19 = vrot.slane %v3733_v33, 2 }
 0x3c5   :  { %9271 = vst [vmem:[#allocation67_spill] sm:$0xff] %v7402_v11  ;;  %9272 = vst [vmem:[#allocation68_spill] sm:$0xff] %v7404_v42  ;;  %v7420_v36 = vsel %vm156_vm5, %v2551_v53, %v2553_v32  ;;  %v7423_v44 = vsel %vm156_vm5, %v2555_v7, %v2556_v39  ;;  %v2558_v60 = vrot.slane %v2543_v20, 6  ;;  %v2434_v42 = vmul.f32 %v2429_v29, %v6160_v4 }
 0x3c6   :  { %9273 = vst [vmem:[#allocation69_spill] sm:$0xff] %v7415_v30  ;;  %3754 = vrot.lane.b32.xlu1 %v3746_v24, %s4768_s23  ;;  %3756 = vrot.lane.b32.xlu0 %v3745_v3, %s4768_s23  ;;  %9274 = vst [vmem:[#allocation300_spill] sm:$0xff] %v7420_v36  ;;  %v2433_v11 = vmul.f32 %v2429_v29, %v6168_v47  ;;  %v7428_v57 = vmul.f32 %v2429_v29, %v6222_v61  ;;  %v3790_v33 = vrot.slane %v3778_v49, 6 }
 0x3c7   :  { %9275 = vst [vmem:[#allocation301_spill] sm:$0xff] %v7423_v44  ;;  %v3749_v3 = vsel %vm2409_vm12, %v3747_v19, %v3748_v46  ;;  %v3780_v53 = vmul.f32 %v3777_v45, %v6196_v0  ;;  %v3751_v32 = vsel %vm2409_vm12, %v3748_v46, %v3750_v51  ;;  %v3791_v7 = vrot.slane %v3779_v21, 6  ;;  %v9279_v44 = vld [vmem:[#allocation70_spill] sm:$0xff]  ;;  %v9280_v19 = vld [vmem:[#allocation71_spill] sm:$0xff] }
 0x3c8   :  { %9276 = vst [vmem:[#allocation302_spill] sm:$0xff] %v7428_v57  ;;  %v7430_v17 = vpop.permute.xlu1 %3266  ;;  %v7432_v24 = vpop.permute.xlu0 %3304  ;;  %v3782_v20 = vmul.f32 %v3777_v45, %v6160_v4  ;;  %v7440_v36 = vadd.f32 %v9279_v44, %v6941_v58  ;;  %v2442_v29 = vrot.slane %v2430_v1, 2  ;;  %v2443_v18 = vrot.slane %v2431_v50, 2  ;;  %v9282_v58 = vld [vmem:[#allocation72_spill] sm:$0xff] }
 0x3c9   :  { %9277 = vst [vmem:[#allocation303_spill] sm:$0xff] %v7430_v17  ;;  %9278 = vst [vmem:[#allocation304_spill] sm:$0xff] %v7432_v24  ;;  %v7447_v46 = vadd.f32 %v9280_v19, %v6944_v37  ;;  %v7450_v49 = vsel %vm156_vm5, %v2556_v39, %v2558_v60  ;;  %v2448_v21 = vrot.slane %v2434_v42, 2  ;;  %v3781_v24 = vmul.f32 %v3777_v45, %v6168_v47  ;;  %v9285_v60 = vld [vmem:[#allocation73_spill] sm:$0xff] }
 0x3ca   :  { %3758 = vrot.lane.b32.xlu1 %v3749_v3, %s4768_s23  ;;  %3760 = vrot.lane.b32.xlu0 %v3751_v32, %s4768_s23  ;;  %9281 = vst [vmem:[#allocation70_spill] sm:$0xff] %v7450_v49  ;;  %v7455_v1 = vadd.f32 %v9282_v58, %v6953_v38  ;;  %v2447_v50 = vrot.slane %v2433_v11, 2  ;;  %v3817_v17 = vstv %s7406_s7  ;;  %v3792_v37 = vsel %vm156_vm5, %v3790_v33, %v3791_v7 }
 0x3cb   :  { %v3793_v19 = vrot.slane %v3780_v53, 6  ;;  %v3796_v39 = vrot.slane %v3782_v20, 6  ;;  %v3783_v42 = vmul.f32 %v3777_v45, %v6222_v61  ;;  %v7467_v49 = vadd.f32 %v9285_v60, %v6956_v12  ;;  %v9289_v53 = vld [vmem:[#allocation74_spill] sm:$0xff]  ;;  %v9290_v45 = vld [vmem:[#allocation75_spill] sm:$0xff]  ;;  %v9292_v60 = vld [vmem:[#allocation76_spill] sm:$0xff] }
 0x3cc   :  { %v7458_v3 = vpop.permute.xlu1 %3306  ;;  %v7460_v32 = vpop.permute.xlu0 %3308  ;;  %v7470_v38 = vsel %vm2409_vm12, %v2442_v29, %v2443_v18  ;;  %v9287_v11 = vrot.slane %v7415_v30, 2  ;;  %v7481_v33 = vadd.f32 %v9289_v53, %v6961_v34  ;;  %v1127_v12 = vadd.f32 %v9290_v45, %v7168_v26  ;;  %v9298_v45 = vld [vmem:[#allocation78_spill] sm:$0xff] }
 0x3cd   :  { %9283 = vst [vmem:[#allocation71_spill] sm:$0xff] %v7458_v3  ;;  %9284 = vst [vmem:[#allocation72_spill] sm:$0xff] %v7460_v32  ;;  %v7486_v20 = vsel %vm2409_vm12, %v2447_v50, %v2448_v21  ;;  %v3795_v29 = vrot.slane %v3781_v24, 6  ;;  %v1128_v44 = vadd.f32 %v9292_v60, %v7175_v59  ;;  %v3818_v26 = vmul.f32 %v3817_v17, %v6124_v14 }
 0x3ce   :  { %9286 = vst [vmem:[#allocation73_spill] sm:$0xff] %v7470_v38  ;;  %v7475_v58 = vsel %vm2409_vm12, %v2443_v18, %v9287_v11  ;;  %3762 = vrot.lane.b32.xlu1 %v3750_v51, %s4768_s23  ;;  %3800 = vrot.lane.b32.xlu0 %v3792_v37, %s4768_s23  ;;  %9291 = vst [vmem:[#allocation74_spill] sm:$0xff] %v7486_v20  ;;  %v9293_v18 = vld [vmem:[#allocation77_spill] sm:$0xff]  ;;  %v9294_v51 = vrot.slane %v7428_v57, 2  ;;  %v3794_v24 = vsel %vm156_vm5, %v3791_v7, %v3793_v19 }
 0x3cf   :  { %9288 = vst [vmem:[#allocation305_spill] sm:$0xff] %v7475_v58  ;;  %v1129_v11 = vadd.f32 %v9293_v18, %v7193_v22  ;;  %v3797_v59 = vsel %vm156_vm5, %v3795_v29, %v3796_v39  ;;  %v3798_v50 = vrot.slane %v3783_v42, 6  ;;  %v3819_v22 = vmul.f32 %v3817_v17, %v6133_v62  ;;  %v9301_v7 = vld [vmem:[#allocation81_spill] sm:$0xff]  ;;  %v9302_v42 = vld [vmem:[#allocation82_spill] sm:$0xff]  ;;  %v9336_v58 = vld [vmem:[#allocation108_spill] sm:$0xff] }
 0x3d0   :  { %v7495_v37 = vsel %vm2409_vm12, %v2448_v21, %v9294_v51  ;;  %v7497_v34 = vpop.permute.xlu1 %3310  ;;  %v7499_v53 = vpop.permute.xlu0 %3344  ;;  %v1130_v60 = vadd.f32 %v9298_v45, %v7208_v5  ;;  %v9299_v21 = vld [vmem:[#allocation79_spill] sm:$0xff]  ;;  %v9300_v51 = vld [vmem:[#allocation80_spill] sm:$0xff]  ;;  %v1175_v19 = vadd.f32 %v9301_v7, %v7251_v9  ;;  %v1176_v29 = vadd.f32 %v9302_v42, %v7269_v8 }
 0x3d1   :  { %9295 = vst [vmem:[#allocation75_spill] sm:$0xff] %v7495_v37  ;;  %9296 = vst [vmem:[#allocation76_spill] sm:$0xff] %v7497_v34  ;;  %v1173_v18 = vadd.f32 %v9299_v21, %v7235_v43  ;;  %v1174_v57 = vadd.f32 %v9300_v51, %v7247_v27  ;;  %v9303_v37 = vld [vmem:[#allocation83_spill] sm:$0xff]  ;;  %v9304_v5 = vld [vmem:[#allocation84_spill] sm:$0xff]  ;;  %v3826_v7 = vrot.slane %v3818_v26, 6  ;;  %v3827_v42 = vrot.slane %v3819_v22, 6 }
 0x3d2   :  { %9297 = vst [vmem:[#allocation77_spill] sm:$0xff] %v7499_v53  ;;  %3802 = vrot.lane.b32.xlu1 %v3794_v24, %s4768_s23  ;;  %3804 = vrot.lane.b32.xlu0 %v3797_v59, %s4768_s23  ;;  %v1177_v20 = vadd.f32 %v9303_v37, %v7278_v56  ;;  %v1178_v45 = vadd.f32 %v9304_v5, %v7317_v31  ;;  %v9305_v43 = vld [vmem:[#allocation85_spill] sm:$0xff]  ;;  %v9306_v24 = vld [vmem:[#allocation86_spill] sm:$0xff]  ;;  %v9307_v21 = vld [vmem:[#allocation87_spill] sm:$0xff] }
 0x3d3   :  { %v1221_v27 = vadd.f32 %v9305_v43, %v7321_v28  ;;  %v1222_v59 = vadd.f32 %v9306_v24, %v7351_v6  ;;  %v1223_v9 = vadd.f32 %v9307_v21, %v7355_v54  ;;  %v9310_v56 = vld [vmem:[#allocation88_spill] sm:$0xff]  ;;  %v3799_v31 = vsel %vm156_vm5, %v3796_v39, %v3798_v50  ;;  %v9311_v5 = vld [vmem:[#allocation89_spill] sm:$0xff]  ;;  %v9312_v43 = vld [vmem:[#allocation90_spill] sm:$0xff] }
 0x3d4   :  { %v7531_v51 = vpop.permute.xlu1 %3346  ;;  %v7533_v8 = vpop.permute.xlu0 %3348  ;;  %v1224_v37 = vadd.f32 %v9310_v56, %v7375_v2  ;;  %v3821_v28 = vmul.f32 %v3817_v17, %v6160_v4  ;;  %v1225_v6 = vadd.f32 %v9311_v5, %v7383_v55  ;;  %v1226_v54 = vadd.f32 %v9312_v43, %v7396_v23  ;;  %v9313_v24 = vld [vmem:[#allocation91_spill] sm:$0xff]  ;;  %v9314_v2 = vld [vmem:[#allocation92_spill] sm:$0xff]  ;;  %v9315_v39 = vld [vmem:[#allocation93_spill] sm:$0xff] }
 0x3d5   :  { %9308 = vst [vmem:[#allocation78_spill] sm:$0xff] %v7531_v51  ;;  %9309 = vst [vmem:[#allocation79_spill] sm:$0xff] %v7533_v8  ;;  %v7544_v21 = vadd.f32 %v9313_v24, %v1127_v12  ;;  %v7549_v26 = vadd.f32 %v9314_v2, %v1128_v44  ;;  %v7552_v50 = vadd.f32 %v9315_v39, %v1129_v11  ;;  %v9316_v22 = vld [vmem:[#allocation94_spill] sm:$0xff]  ;;  %v9317_v5 = vld [vmem:[#allocation95_spill] sm:$0xff]  ;;  %v3857_v11 = vstv %s7502_s12 }
 0x3d6   :  { %3806 = vrot.lane.b32.xlu1 %v3799_v31, %s4768_s23  ;;  %3832 = vrot.lane.b32.xlu0 %v3826_v7, %s4769_s4  ;;  %v7555_v56 = vadd.f32 %v9316_v22, %v1130_v60  ;;  %v3820_v55 = vmul.f32 %v3817_v17, %v6168_v47  ;;  %v7559_v23 = vadd.f32 %v9317_v5, %v1173_v18  ;;  %v9318_v12 = vld [vmem:[#allocation96_spill] sm:$0xff]  ;;  %v9319_v31 = vld [vmem:[#allocation97_spill] sm:$0xff]  ;;  %v9322_v2 = vld [vmem:[#allocation98_spill] sm:$0xff]  ;;  %v3830_v22 = vrot.slane %v3821_v28, 6  ;;  %s7590_s23 = sld [smem:[#allocation6 + $0x4b]] }
 0x3d7   :  { %v7562_v43 = vadd.f32 %v9318_v12, %v1174_v57  ;;  %v7565_v24 = vadd.f32 %v9319_v31, %v1175_v19  ;;  %v7573_v60 = vadd.f32 %v9322_v2, %v1176_v29  ;;  %v9323_v39 = vld [vmem:[#allocation99_spill] sm:$0xff]  ;;  %v3828_v18 = vsel %vm156_vm5, %v3826_v7, %v3827_v42  ;;  %v9324_v57 = vld [vmem:[#allocation100_spill] sm:$0xff]  ;;  %v9325_v19 = vld [vmem:[#allocation101_spill] sm:$0xff] }
 0x3d8   :  { %v7567_v8 = vpop.permute.xlu1 %3350  ;;  %v7569_v44 = vpop.permute.xlu0 %3352  ;;  %v7576_v17 = vadd.f32 %v9323_v39, %v1177_v20  ;;  %v7580_v5 = vadd.f32 %v9324_v57, %v1178_v45  ;;  %v7583_v12 = vadd.f32 %v9325_v19, %v1221_v27  ;;  %v9326_v31 = vld [vmem:[#allocation102_spill] sm:$0xff]  ;;  %v3829_v20 = vrot.slane %v3820_v55, 6  ;;  %v9327_v45 = vld [vmem:[#allocation103_spill] sm:$0xff]  ;;  %v9330_v57 = vld [vmem:[#allocation104_spill] sm:$0xff] }
 0x3d9   :  { %9320 = vst [vmem:[#allocation80_spill] sm:$0xff] %v7567_v8  ;;  %9321 = vst [vmem:[#allocation81_spill] sm:$0xff] %v7569_v44  ;;  %v7586_v8 = vadd.f32 %v9326_v31, %v1222_v59  ;;  %v3858_v29 = vmul.f32 %v3857_v11, %v6124_v14  ;;  %v3859_v7 = vmul.f32 %v3857_v11, %v6133_v62  ;;  %v3905_v28 = vstv %s7523_s14  ;;  %v9331_v19 = vld [vmem:[#allocation105_spill] sm:$0xff] }
 0x3da   :  { %3834 = vrot.lane.b32.xlu1 %v3828_v18, %s4769_s4  ;;  %3836 = vrot.lane.b32.xlu0 %v3827_v42, %s4769_s4  ;;  %v7596_v2 = vadd.f32 %v9327_v45, %v1223_v9  ;;  %v3860_v59 = vmul.f32 %v3857_v11, %v6196_v0  ;;  %v3862_v18 = vmul.f32 %v3857_v11, %v6160_v4  ;;  %v9332_v45 = vld [vmem:[#allocation106_spill] sm:$0xff] }
 0x3db   :  { %v3863_v42 = vmul.f32 %v3857_v11, %v6222_v61  ;;  %v7606_v55 = vadd.f32 %v9330_v57, %v1224_v37  ;;  %v7609_v31 = vadd.f32 %v9331_v19, %v1225_v6  ;;  %v3831_v44 = vsel %vm156_vm5, %v3829_v20, %v3830_v22  ;;  %v9333_v6 = vld [vmem:[#allocation107_spill] sm:$0xff] }
 0x3dc   :  { %v7598_v27 = vpop.permute.xlu1 %3354  ;;  %v7600_v39 = vpop.permute.xlu0 %3392  ;;  %v7613_v9 = vmul.f32 %v3857_v11, %v6168_v47  ;;  %v3906_v37 = vmul.f32 %v3905_v28, %v6124_v14  ;;  %v3907_v57 = vmul.f32 %v3905_v28, %v6133_v62  ;;  %v7626_v19 = vadd.f32 %v9333_v6, %v7400_v63 }
 0x3dd   :  { %9328 = vst [vmem:[#allocation82_spill] sm:$0xff] %v7598_v27  ;;  %9329 = vst [vmem:[#allocation83_spill] sm:$0xff] %v7600_v39  ;;  %v7618_v27 = vadd.f32 %v9332_v45, %v1226_v54  ;;  %v3870_v51 = vrot.slane %v3858_v29, 6  ;;  %v3871_v11 = vrot.slane %v3859_v7, 6  ;;  %v3908_v53 = vmul.f32 %v3905_v28, %v6196_v0  ;;  %v9337_v29 = vld [vmem:[#allocation109_spill] sm:$0xff] }
 0x3de   :  { %3838 = vrot.lane.b32.xlu1 %v3829_v20, %s4769_s4  ;;  %3840 = vrot.lane.b32.xlu0 %v3831_v44, %s4769_s4  ;;  %v3873_v20 = vrot.slane %v3860_v59, 6  ;;  %v3876_v45 = vrot.slane %v3862_v18, 6  ;;  %v3878_v44 = vrot.slane %v3863_v42, 6  ;;  %v3910_v34 = vmul.f32 %v3905_v28, %v6160_v4 }
 0x3df   :  { %v7638_v63 = vadd.f32 %v9336_v58, %v7440_v36  ;;  %v7642_v7 = vadd.f32 %v9337_v29, %v7447_v46  ;;  %v3875_v6 = vrot.slane %v7613_v9, 6  ;;  %v3911_v38 = vmul.f32 %v3905_v28, %v6222_v61  ;;  %v9339_v36 = vld [vmem:[#allocation110_spill] sm:$0xff]  ;;  %v9341_v58 = vld [vmem:[#allocation111_spill] sm:$0xff] }
 0x3e0   :  { %v7629_v30 = vpop.permute.xlu1 %3394  ;;  %v7631_v54 = vpop.permute.xlu0 %3396  ;;  %v3918_v59 = vrot.slane %v3906_v37, 2  ;;  %v3919_v18 = vrot.slane %v3907_v57, 2  ;;  %v3909_v42 = vmul.f32 %v3905_v28, %v6168_v47  ;;  %v3945_v32 = vstv %s7590_s23 }
 0x3e1   :  { %9334 = vst [vmem:[#allocation84_spill] sm:$0xff] %v7629_v30  ;;  %9335 = vst [vmem:[#allocation85_spill] sm:$0xff] %v7631_v54  ;;  %v7654_v46 = vadd.f32 %v9339_v36, %v7455_v1  ;;  %v7658_v9 = vadd.f32 %v9341_v58, %v7467_v49  ;;  %v3921_v29 = vrot.slane %v3908_v53, 2  ;;  %v3874_v28 = vsel %vm156_vm5, %v3871_v11, %v3873_v20  ;;  %v9345_v53 = vld [vmem:[#allocation112_spill] sm:$0xff] }
 0x3e2   :  { %9338 = vst [vmem:[#allocation86_spill] sm:$0xff] %v7642_v7  ;;  %3842 = vrot.lane.b32.xlu1 %v3830_v22, %s4769_s4  ;;  %3880 = vrot.lane.b32.xlu0 %v3870_v51, %s4769_s4  ;;  %v3872_v22 = vsel %vm156_vm5, %v3870_v51, %v3871_v11  ;;  %v3877_v57 = vsel %vm156_vm5, %v3875_v6, %v3876_v45  ;;  %v3924_v30 = vrot.slane %v3910_v34, 2  ;;  %v3926_v1 = vrot.slane %v3911_v38, 2  ;;  %v9347_v34 = vld [vmem:[#allocation113_spill] sm:$0xff] }
 0x3e3   :  { %9340 = vst [vmem:[#allocation87_spill] sm:$0xff] %v7654_v46  ;;  %9342 = vst [vmem:[#allocation88_spill] sm:$0xff] %v7658_v9  ;;  %v3879_v54 = vsel %vm156_vm5, %v3876_v45, %v3878_v44  ;;  %v3946_v36 = vmul.f32 %v3945_v32, %v6124_v14  ;;  %v3947_v49 = vmul.f32 %v3945_v32, %v6133_v62  ;;  %v7671_v58 = vstv %s7615_s18 }
 0x3e4   :  { %v7661_v3 = vpop.permute.xlu1 %3398  ;;  %v7663_v37 = vpop.permute.xlu0 %3400  ;;  %v7675_v51 = vadd.f32 %v9345_v53, %v7481_v33  ;;  %v3920_v11 = vsel %vm2409_vm12, %v3918_v59, %v3919_v18  ;;  %v3923_v20 = vrot.slane %v3909_v42, 2  ;;  %v7681_v38 = vmul.f32 %v3945_v32, %v6196_v0 }
 0x3e5   :  { %9343 = vst [vmem:[#allocation89_spill] sm:$0xff] %v7661_v3  ;;  %9344 = vst [vmem:[#allocation90_spill] sm:$0xff] %v7663_v37  ;;  %v7685_v45 = vadd.f32 %v9347_v34, %v7544_v21  ;;  %v3922_v44 = vsel %vm2409_vm12, %v3919_v18, %v3921_v29  ;;  %v3950_v37 = vmul.f32 %v3945_v32, %v6160_v4  ;;  %v4041_v53 = vstv %s7634_s19 }
 0x3e6   :  { %9346 = vst [vmem:[#allocation91_spill] sm:$0xff] %v7675_v51  ;;  %3882 = vrot.lane.b32.xlu1 %v3872_v22, %s4769_s4  ;;  %3884 = vrot.lane.b32.xlu0 %v3874_v28, %s4769_s4  ;;  %v7690_v33 = vmul.f32 %v3945_v32, %v6222_v61  ;;  %v3925_v59 = vsel %vm2409_vm12, %v3923_v20, %v3924_v30  ;;  %v3958_v29 = vrot.slane %v3946_v36, 2  ;;  %v3959_v34 = vrot.slane %v3947_v49, 2  ;;  %v9351_v20 = vld [vmem:[#allocation115_spill] sm:$0xff] }
 0x3e7   :  { %v3949_v42 = vmul.f32 %v3945_v32, %v6168_v47  ;;  %v3994_v21 = vmul.f32 %v7671_v58, %v6124_v14  ;;  %v7702_v18 = vsel %vm2409_vm12, %v3924_v30, %v3926_v1  ;;  %v7706_v3 = vmul.f32 %v7671_v58, %v6133_v62 }
 0x3e8   :  { %v7692_v22 = vpop.permute.xlu1 %3402  ;;  %v7694_v28 = vpop.permute.xlu0 %3440  ;;  %v7714_v32 = vadd.f32 %v9351_v20, %v7552_v50  ;;  %v4169_v1 = vstv %s7650_s1  ;;  %v3964_v36 = vrot.slane %v3950_v37, 2  ;;  %v4042_v39 = vmul.f32 %v4041_v53, %v6124_v14 }
 0x3e9   :  { %9348 = vst [vmem:[#allocation92_spill] sm:$0xff] %v7692_v22  ;;  %9349 = vst [vmem:[#allocation93_spill] sm:$0xff] %v7694_v28  ;;  %v9350_v22 = vld [vmem:[#allocation114_spill] sm:$0xff]  ;;  %v4043_v15 = vmul.f32 %v4041_v53, %v6133_v62  ;;  %v3963_v50 = vrot.slane %v3949_v42, 2  ;;  %v4006_v20 = vrot.slane %v3994_v21, 2  ;;  %v7735_v49 = vmul.f32 %v4041_v53, %v6222_v61 }
 0x3ea   :  { %v7710_v28 = vadd.f32 %v9350_v22, %v7549_v26  ;;  %3886 = vrot.lane.b32.xlu1 %v3875_v6, %s4769_s4  ;;  %3888 = vrot.lane.b32.xlu0 %v3877_v57, %s4769_s4  ;;  %v7728_v6 = vmul.f32 %v4041_v53, %v6196_v0  ;;  %v4046_v57 = vmul.f32 %v4041_v53, %v6160_v4  ;;  %v9354_v21 = vrot.slane %v7681_v38, 2 }
 0x3eb   :  { %v7738_v30 = vmul.f32 %v4169_v1, %v6124_v14  ;;  %v3960_v42 = vsel %vm2409_vm12, %v3958_v29, %v3959_v34  ;;  %v4045_v37 = vmul.f32 %v4041_v53, %v6168_v47  ;;  %v7751_v25 = vsel %vm2409_vm12, %v3963_v50, %v3964_v36  ;;  %v9357_v29 = vld [vmem:[#allocation117_spill] sm:$0xff] }
 0x3ec   :  { %v7723_v26 = vpop.permute.xlu1 %3442  ;;  %v7725_v22 = vpop.permute.xlu0 %3444  ;;  %v9355_v13 = vrot.slane %v7690_v33, 2  ;;  %v4054_v35 = vrot.slane %v4042_v39, 2  ;;  %v7764_v41 = vadd.f32 %v9357_v29, %v7559_v23  ;;  %v8845_v50 = vrot.slane %v7728_v6, 2  ;;  %v9361_v23 = vld [vmem:[#allocation118_spill] sm:$0xff] }
 0x3ed   :  { %9352 = vst [vmem:[#allocation94_spill] sm:$0xff] %v7723_v26  ;;  %9353 = vst [vmem:[#allocation95_spill] sm:$0xff] %v7725_v22  ;;  %v7741_v26 = vmul.f32 %v4169_v1, %v6133_v62  ;;  %v3962_v22 = vsel %vm2409_vm12, %v3959_v34, %v9354_v21  ;;  %v4060_v21 = vrot.slane %v4046_v57, 2  ;;  %v4059_v57 = vrot.slane %v4045_v37, 2 }
 0x3ee   :  { %3890 = vrot.lane.b32.xlu1 %v3879_v54, %s4769_s4  ;;  %3928 = vrot.lane.b32.xlu0 %v3920_v11, %s4769_s4  ;;  %v7756_v16 = vsel %vm2409_vm12, %v3964_v36, %v9355_v13  ;;  %v4055_v54 = vrot.slane %v4043_v15, 2  ;;  %v9356_v11 = vld [vmem:[#allocation116_spill] sm:$0xff]  ;;  %v9360_v13 = vrot.slane %v7706_v3, 2  ;;  %v4174_v29 = vmul.f32 %v4169_v1, %v6160_v4 }
 0x3ef   :  { %v7760_v48 = vadd.f32 %v9356_v11, %v7555_v56  ;;  %v4183_v36 = vrot.slane %v7741_v26, 6  ;;  %v7783_v11 = vadd.f32 %v9361_v23, %v7562_v43  ;;  %v4175_v15 = vmul.f32 %v4169_v1, %v6222_v61 }
 0x3f0   :  { %v7766_v34 = vpop.permute.xlu1 %3446  ;;  %v7768_v53 = vpop.permute.xlu0 %3448  ;;  %v7774_v39 = vsel %vm2409_vm12, %v4006_v20, %v9360_v13  ;;  %v4172_v20 = vmul.f32 %v4169_v1, %v6196_v0  ;;  %v9362_v13 = vld [vmem:[#allocation119_spill] sm:$0xff]  ;;  %v7794_v26 = vsel %vm2409_vm12, %v4054_v35, %v4055_v54  ;;  %v7799_v43 = vmul.f32 %v7671_v58, %v6196_v0 }
 0x3f1   :  { %9358 = vst [vmem:[#allocation96_spill] sm:$0xff] %v7766_v34  ;;  %9359 = vst [vmem:[#allocation97_spill] sm:$0xff] %v7768_v53  ;;  %v7791_v56 = vadd.f32 %v9362_v13, %v7565_v24  ;;  %v7808_v37 = vsel %vm2409_vm12, %v4055_v54, %v8845_v50  ;;  %v7811_v24 = vsel %vm2409_vm12, %v4059_v57, %v4060_v21  ;;  %v4353_v23 = vstv %s7731_s0 }
 0x3f2   :  { %3930 = vrot.lane.b32.xlu1 %v3922_v44, %s4769_s4  ;;  %3932 = vrot.lane.b32.xlu0 %v3925_v59, %s4769_s4  ;;  %9363 = vst [vmem:[#allocation98_spill] sm:$0xff] %v7799_v43  ;;  %v7814_v35 = vmul.f32 %v4169_v1, %v6168_v47  ;;  %v9366_v13 = vrot.slane %v7735_v49, 2  ;;  %v3998_v54 = vmul.f32 %v7671_v58, %v6160_v4  ;;  %v9369_v1 = vld [vmem:[#allocation120_spill] sm:$0xff]  ;;  %v4190_v34 = vrot.slane %v4175_v15, 6  ;;  %v9374_v15 = vld [vmem:[#allocation121_spill] sm:$0xff] }
 0x3f3   :  { %v7831_v57 = vmul.f32 %v7671_v58, %v6222_v61  ;;  %v7835_v50 = vadd.f32 %v9369_v1, %v7573_v60  ;;  %v4354_v40 = vmul.f32 %v4353_v23, %v6124_v14  ;;  %v4355_v60 = vmul.f32 %v4353_v23, %v6133_v62 }
 0x3f4   :  { %v7801_v44 = vpop.permute.xlu1 %3450  ;;  %v7803_v59 = vpop.permute.xlu0 %3488  ;;  %v7820_v53 = vsel %vm2409_vm12, %v4060_v21, %v9366_v13  ;;  %v4185_v21 = vrot.slane %v4172_v20, 6  ;;  %v4188_v13 = vrot.slane %v4174_v29, 6  ;;  %v7853_v20 = vmul.f32 %v4353_v23, %v6196_v0 }
 0x3f5   :  { %9364 = vst [vmem:[#allocation99_spill] sm:$0xff] %v7801_v44  ;;  %9365 = vst [vmem:[#allocation100_spill] sm:$0xff] %v7803_v59  ;;  %v9367_v44 = vrot.slane %v7738_v30, 6  ;;  %v7857_v29 = vmul.f32 %v4353_v23, %v6222_v61  ;;  %v7863_v10 = vadd.f32 %v9374_v15, %v7576_v17  ;;  %v4012_v51 = vrot.slane %v3998_v54, 2 }
 0x3f6   :  { %9368 = vst [vmem:[#allocation101_spill] sm:$0xff] %v7831_v57  ;;  %3934 = vrot.lane.b32.xlu1 %v7702_v18, %s4769_s4  ;;  %3968 = vrot.lane.b32.xlu0 %v3960_v42, %s4769_s4  ;;  %9372 = vst [vmem:[#allocation104_spill] sm:$0xff] %v7853_v20  ;;  %v9375_v42 = vrot.slane %v7681_v38, 2  ;;  %v7874_v9 = vsel %vm156_vm5, %v4183_v36, %v4185_v21  ;;  %v9376_v46 = vrot.slane %v7814_v35, 6  ;;  %v9378_v7 = vrot.slane %v7706_v3, 2  ;;  %v9381_v3 = vld [vmem:[#allocation122_spill] sm:$0xff] }
 0x3f7   :  { %v7825_v59 = vsel %vm156_vm5, %v9367_v44, %v4183_v36  ;;  %v3997_v44 = vmul.f32 %v7671_v58, %v6168_v47  ;;  %v4358_v58 = vmul.f32 %v4353_v23, %v6160_v4  ;;  %9373 = vst [vmem:[#allocation105_spill] sm:$0xff] %v7857_v29  ;;  %v4357_v15 = vmul.f32 %v4353_v23, %v6168_v47 }
 0x3f8   :  { %v7847_v1 = vpop.permute.xlu1 %3490  ;;  %v7849_v18 = vpop.permute.xlu0 %3492  ;;  %v7879_v17 = vsel %vm156_vm5, %v9376_v46, %v4188_v13  ;;  %v4366_v36 = vrot.slane %v4354_v40, 2  ;;  %v4367_v21 = vrot.slane %v4355_v60, 2  ;;  %v9382_v40 = vld [vmem:[#allocation123_spill] sm:$0xff] }
 0x3f9   :  { %9370 = vst [vmem:[#allocation102_spill] sm:$0xff] %v7847_v1  ;;  %9371 = vst [vmem:[#allocation103_spill] sm:$0xff] %v7849_v18  ;;  %v4129_v18 = vstv %s7779_s20  ;;  %v4011_v54 = vrot.slane %v3997_v44, 2  ;;  %v7883_v1 = vsel %vm156_vm5, %v4188_v13, %v4190_v34  ;;  %v4372_v23 = vrot.slane %v4358_v58, 2  ;;  %v9386_v34 = vld [vmem:[#allocation124_spill] sm:$0xff] }
 0x3fa   :  { %3970 = vrot.lane.b32.xlu1 %v3962_v22, %s4769_s4  ;;  %3972 = vrot.lane.b32.xlu0 %v9375_v42, %s4769_s4  ;;  %v9377_v22 = vrot.slane %v7799_v43, 2  ;;  %v7899_v13 = vmul.f32 %v4129_v18, %v6124_v14  ;;  %v7903_v43 = vadd.f32 %v9381_v3, %v7580_v5  ;;  %v7919_v44 = vadd.f32 %v9386_v34, %v7586_v8 }
 0x3fb   :  { %v7910_v60 = vsel %vm2409_vm12, %v4011_v54, %v4012_v51  ;;  %v4371_v5 = vrot.slane %v4357_v15, 2  ;;  %v4089_v54 = vstv %s7842_s21  ;;  %v7934_v8 = vsel %vm2409_vm12, %v4366_v36, %v4367_v21 }
 0x3fc   :  { %v7890_v38 = vsel %vm2409_vm12, %v9378_v7, %v9377_v22  ;;  %v7892_v42 = vpop.permute.xlu1 %3494  ;;  %v7894_v46 = vpop.permute.xlu0 %3520  ;;  %v7907_v7 = vadd.f32 %v9382_v40, %v7583_v12  ;;  %9383 = vst [vmem:[#allocation108_spill] sm:$0xff] %v7910_v60  ;;  %v9384_v22 = vrot.slane %v7831_v57, 2  ;;  %v7926_v12 = vmul.f32 %v4129_v18, %v6133_v62  ;;  %9389 = vst [vmem:[#allocation111_spill] sm:$0xff] %v7934_v8  ;;  %v9408_v57 = vld [vmem:[#allocation128_spill] sm:$0xff] }
 0x3fd   :  { %9379 = vst [vmem:[#allocation106_spill] sm:$0xff] %v7892_v42  ;;  %9380 = vst [vmem:[#allocation107_spill] sm:$0xff] %v7894_v46  ;;  %v7937_v34 = vmul.f32 %v4129_v18, %v6168_v47  ;;  %v9394_v40 = vrot.slane %v7853_v20, 2  ;;  %v9397_v36 = vrot.slane %v7857_v29, 2  ;;  %v4090_v42 = vmul.f32 %v4089_v54, %v6124_v14 }
 0x3fe   :  { %v7915_v58 = vsel %vm2409_vm12, %v4012_v51, %v9384_v22  ;;  %3974 = vrot.lane.b32.xlu1 %v7751_v25, %s4769_s4  ;;  %3976 = vrot.lane.b32.xlu0 %v7756_v16, %s4769_s4  ;;  %9387 = vst [vmem:[#allocation110_spill] sm:$0xff] %v7926_v12  ;;  %v9388_v51 = vld [vmem:[#allocation125_spill] sm:$0xff]  ;;  %v7940_v25 = vmul.f32 %v4129_v18, %v6160_v4  ;;  %v7964_v46 = vstv %s7867_s24  ;;  %v9400_v18 = vld [vmem:[#allocation126_spill] sm:$0xff] }
 0x3ff   :  { %9385 = vst [vmem:[#allocation109_spill] sm:$0xff] %v7915_v58  ;;  %v7931_v3 = vadd.f32 %v9388_v51, %v7596_v2  ;;  %9390 = vst [vmem:[#allocation112_spill] sm:$0xff] %v7937_v34  ;;  %v7949_v22 = vsel %vm2409_vm12, %v4367_v21, %v9394_v40  ;;  %v7952_v2 = vsel %vm2409_vm12, %v4371_v5, %v4372_v23  ;;  %v9399_v21 = vrot.slane %v7690_v33, 2 }
 0x400   :  { %9391 = vst [vmem:[#allocation113_spill] sm:$0xff] %v7940_v25  ;;  %v7942_v16 = vpop.permute.xlu1 %3522  ;;  %v7944_v15 = vpop.permute.xlu0 %3524  ;;  %9395 = vst [vmem:[#allocation116_spill] sm:$0xff] %v7949_v22  ;;  %v7957_v51 = vsel %vm2409_vm12, %v4372_v23, %v9397_v36  ;;  %v4092_v23 = vmul.f32 %v4089_v54, %v6196_v0  ;;  %v4094_v40 = vmul.f32 %v4089_v54, %v6160_v4 }
 0x401   :  { %9392 = vst [vmem:[#allocation114_spill] sm:$0xff] %v7942_v16  ;;  %9393 = vst [vmem:[#allocation115_spill] sm:$0xff] %v7944_v15  ;;  %v4091_v16 = vmul.f32 %v4089_v54, %v6133_v62  ;;  %v4257_v15 = vstv %s7859_s22  ;;  %v4095_v36 = vmul.f32 %v4089_v54, %v6222_v61  ;;  %v7977_v29 = vadd.f32 %v9400_v18, %v7606_v55 }
 0x402   :  { %9396 = vst [vmem:[#allocation117_spill] sm:$0xff] %v7952_v2  ;;  %9398 = vst [vmem:[#allocation118_spill] sm:$0xff] %v7957_v51  ;;  %3978 = vrot.lane.b32.xlu1 %v9399_v21, %s4769_s4  ;;  %4016 = vrot.lane.b32.xlu0 %v7774_v39, %s4769_s4  ;;  %v9401_v51 = vld [vmem:[#allocation127_spill] sm:$0xff]  ;;  %v4093_v20 = vmul.f32 %v4089_v54, %v6168_v47  ;;  %v4258_v22 = vmul.f32 %v4257_v15, %v6124_v14  ;;  %v9406_v54 = vrot.slane %v7926_v12, 6 }
 0x403   :  { %v7981_v2 = vadd.f32 %v9401_v51, %v7609_v31  ;;  %v4259_v55 = vmul.f32 %v4257_v15, %v6133_v62  ;;  %v7995_v18 = vmul.f32 %v4257_v15, %v6196_v0  ;;  %v4102_v31 = vrot.slane %v4090_v42, 6 }
 0x404   :  { %v7987_v21 = vpop.permute.xlu1 %3526  ;;  %v7989_v5 = vpop.permute.xlu0 %3528  ;;  %v4103_v51 = vrot.slane %v4091_v16, 6  ;;  %v4262_v33 = vmul.f32 %v4257_v15, %v6160_v4  ;;  %v7999_v39 = vmul.f32 %v4257_v15, %v6222_v61  ;;  %v4105_v42 = vrot.slane %v4092_v23, 6 }
 0x405   :  { %9402 = vst [vmem:[#allocation119_spill] sm:$0xff] %v7987_v21  ;;  %9403 = vst [vmem:[#allocation120_spill] sm:$0xff] %v7989_v5  ;;  %v9407_v5 = vrot.slane %v7899_v13, 6  ;;  %v4108_v16 = vrot.slane %v4094_v40, 6  ;;  %v4110_v8 = vrot.slane %v4095_v36, 6  ;;  %v8016_v58 = vadd.f32 %v9408_v57, %v7618_v27 }
 0x406   :  { %9404 = vst [vmem:[#allocation121_spill] sm:$0xff] %v7995_v18  ;;  %9405 = vst [vmem:[#allocation122_spill] sm:$0xff] %v7999_v39  ;;  %4064 = vrot.lane.b32.xlu1 %v7794_v26, %s4769_s4  ;;  %4066 = vrot.lane.b32.xlu0 %v7808_v37, %s4769_s4  ;;  %v9409_v26 = vld [vmem:[#allocation129_spill] sm:$0xff]  ;;  %v9410_v37 = vrot.slane %v7940_v25, 6  ;;  %v9411_v12 = vrot.slane %v7937_v34, 6  ;;  %v4261_v23 = vmul.f32 %v4257_v15, %v6168_v47  ;;  %v4270_v27 = vrot.slane %v4258_v22, 2 }
 0x407   :  { %v8010_v21 = vsel %vm156_vm5, %v9407_v5, %v9406_v54  ;;  %v8020_v60 = vadd.f32 %v9409_v26, %v7685_v45  ;;  %v4107_v54 = vrot.slane %v4093_v20, 6  ;;  %v4271_v57 = vrot.slane %v4259_v55, 2  ;;  %v9415_v55 = vld [vmem:[#allocation130_spill] sm:$0xff] }
 0x408   :  { %v8027_v5 = vsel %vm156_vm5, %v9411_v12, %v9410_v37  ;;  %v8030_v40 = vpop.permute.xlu1 %3530  ;;  %v8032_v36 = vpop.permute.xlu0 %3568  ;;  %v8854_v45 = vrot.slane %v7995_v18, 2  ;;  %v8036_v26 = vsel %vm156_vm5, %v4102_v31, %v4103_v51  ;;  %v4276_v25 = vrot.slane %v4262_v33, 2 }
 0x409   :  { %9412 = vst [vmem:[#allocation123_spill] sm:$0xff] %v8030_v40  ;;  %9413 = vst [vmem:[#allocation124_spill] sm:$0xff] %v8032_v36  ;;  %v8853_v34 = vrot.slane %v7999_v39, 2  ;;  %v4306_v12 = vmul.f32 %v7964_v46, %v6124_v14  ;;  %v9414_v15 = vrot.slane %v7728_v6, 2  ;;  %v8047_v20 = vsel %vm156_vm5, %v4103_v51, %v4105_v42 }
 0x40a   :  { %4070 = vrot.lane.b32.xlu0 %v7811_v24, %s4769_s4  ;;  %v8050_v22 = vsel %vm156_vm5, %v4107_v54, %v4108_v16  ;;  %v8053_v33 = vsel %vm156_vm5, %v4108_v16, %v4110_v8  ;;  %v8057_v31 = vadd.f32 %v9415_v55, %v7710_v28  ;;  %v4275_v37 = vrot.slane %v4261_v23, 2  ;;  %v9416_v24 = vld [vmem:[#allocation131_spill] sm:$0xff] }
 0x40b   :  { %4068 = vrot.lane.b32.xlu1 %v9414_v15, %s4769_s4  ;;  %v4307_v6 = vmul.f32 %v7964_v46, %v6133_v62  ;;  %v4217_v15 = vstv %s7985_s25  ;;  %v8064_v51 = vadd.f32 %v9416_v24, %v7714_v32  ;;  %v8071_v8 = vsel %vm2409_vm12, %v4270_v27, %v4271_v57 }
 0x40c   :  { %v8066_v42 = vpop.permute.xlu1 %3570  ;;  %v8068_v54 = vpop.permute.xlu0 %3572  ;;  %v8076_v28 = vsel %vm2409_vm12, %v4271_v57, %v8854_v45  ;;  %v8080_v16 = vmul.f32 %v7964_v46, %v6196_v0  ;;  %v8083_v23 = vsel %vm2409_vm12, %v4275_v37, %v4276_v25  ;;  %v8088_v32 = vsel %vm2409_vm12, %v4276_v25, %v8853_v34 }
 0x40d   :  { %9417 = vst [vmem:[#allocation125_spill] sm:$0xff] %v8066_v42  ;;  %9418 = vst [vmem:[#allocation126_spill] sm:$0xff] %v8068_v54  ;;  %v4318_v55 = vrot.slane %v4306_v12, 2  ;;  %v4310_v27 = vmul.f32 %v7964_v46, %v6160_v4  ;;  %v9422_v57 = vrot.slane %v7735_v49, 2  ;;  %v8099_v37 = vmul.f32 %v7964_v46, %v6222_v61 }
 0x40e   :  { %9419 = vst [vmem:[#allocation127_spill] sm:$0xff] %v8076_v28  ;;  %9420 = vst [vmem:[#allocation128_spill] sm:$0xff] %v8083_v23  ;;  %v4218_v24 = vmul.f32 %v4217_v15, %v6124_v14  ;;  %v4219_v25 = vmul.f32 %v4217_v15, %v6133_v62  ;;  %v4401_v34 = vstv %s8012_s26  ;;  %v4319_v12 = vrot.slane %v4307_v6, 2 }
 0x40f   :  { %9421 = vst [vmem:[#allocation129_spill] sm:$0xff] %v8088_v32  ;;  %4072 = vrot.lane.b32.xlu1 %v7820_v53, %s4769_s4  ;;  %4074 = vrot.lane.b32.xlu0 %v9422_v57, %s4769_s4  ;;  %v4309_v45 = vmul.f32 %v7964_v46, %v6168_v47  ;;  %v4220_v54 = vmul.f32 %v4217_v15, %v6196_v0  ;;  %v9423_v57 = vld [vmem:[#allocation132_spill] sm:$0xff] }
 0x410   :  { %v4222_v53 = vmul.f32 %v4217_v15, %v6160_v4  ;;  %v8110_v49 = vadd.f32 %v5874_v52, %v7760_v48  ;;  %v8114_v42 = vadd.f32 %v9423_v57, %v7764_v41  ;;  %v8116_v39 = vpop.permute.xlu1 %3574  ;;  %v8118_v36 = vpop.permute.xlu0 %3576  ;;  %v4223_v46 = vmul.f32 %v4217_v15, %v6222_v61 }
 0x411   :  { %9424 = vst [vmem:[#allocation130_spill] sm:$0xff] %v8116_v39  ;;  %9425 = vst [vmem:[#allocation131_spill] sm:$0xff] %v8118_v36  ;;  %v4221_v40 = vmul.f32 %v4217_v15, %v6168_v47  ;;  %v4402_v32 = vmul.f32 %v4401_v34, %v6124_v14  ;;  %v4403_v23 = vmul.f32 %v4401_v34, %v6133_v62  ;;  %v9426_v41 = vrot.slane %v7738_v30, 6  ;;  %v9428_v30 = vld [vmem:[#allocation134_spill] sm:$0xff] }
 0x412   :  { %v4404_v52 = vmul.f32 %v4401_v34, %v6196_v0  ;;  %v4324_v48 = vrot.slane %v4310_v27, 2  ;;  %v8857_v57 = vrot.slane %v8099_v37, 2  ;;  %v4230_v6 = vrot.slane %v4218_v24, 2  ;;  %v9427_v0 = vld [vmem:[#allocation133_spill] sm:$0xff] }
 0x413   :  { %4192 = vrot.lane.b32.xlu1 %v9426_v41, %s4770_s13  ;;  %4194 = vrot.lane.b32.xlu0 %v7825_v59, %s4770_s13  ;;  %v4231_v36 = vrot.slane %v4219_v25, 2  ;;  %v8133_v15 = vsel %vm2409_vm12, %v4318_v55, %v4319_v12  ;;  %v4323_v14 = vrot.slane %v4309_v45, 2  ;;  %v4233_v39 = vrot.slane %v4220_v54, 2 }
 0x414   :  { %v4236_v62 = vrot.slane %v4222_v53, 2  ;;  %v1562_v18 = vadd.f32 %v9427_v0, %v7783_v11  ;;  %v1563_v41 = vadd.f32 %v9428_v30, %v7791_v56  ;;  %v8139_v28 = vpop.permute.xlu1 %3578  ;;  %v8141_v59 = vpop.permute.xlu0 %3616  ;;  %v9429_v27 = vrot.slane %v8080_v16, 2  ;;  %v9441_v30 = vld [vmem:[#allocation138_spill] sm:$0xff] }
 0x415   :  { %v4238_v55 = vrot.slane %v4223_v46, 2  ;;  %v4235_v25 = vrot.slane %v4221_v40, 2  ;;  %v4414_v45 = vrot.slane %v4402_v32, 6  ;;  %v4415_v54 = vrot.slane %v4403_v23, 6  ;;  %v9431_v23 = vld [vmem:[#allocation135_spill] sm:$0xff] }
 0x416   :  { %v8146_v24 = vsel %vm2409_vm12, %v4319_v12, %v9429_v27  ;;  %v4417_v53 = vrot.slane %v4404_v52, 6  ;;  %v9430_v56 = vrot.slane %v7814_v35, 6  ;;  %v8154_v11 = vsel %vm2409_vm12, %v4323_v14, %v4324_v48 }
 0x417   :  { %4196 = vrot.lane.b32.xlu1 %v7874_v9, %s4770_s13  ;;  %v8159_v12 = vsel %vm2409_vm12, %v4324_v48, %v8857_v57  ;;  %v8162_v40 = vsel %vm2409_vm12, %v4230_v6, %v4231_v36  ;;  %v1564_v32 = vadd.f32 %v9431_v23, %v7835_v50  ;;  %v9432_v9 = vld [vmem:[#allocation136_spill] sm:$0xff]  ;;  %v8169_v35 = vsel %vm2409_vm12, %v4231_v36, %v4233_v39  ;;  %v9440_v39 = vld [vmem:[#allocation137_spill] sm:$0xff]  ;;  %v9457_v57 = vld [vmem:[#allocation91_spill] sm:$0xff] }
 0x418   :  { %4198 = vrot.lane.b32.xlu0 %v9430_v56, %s4770_s13  ;;  %v1565_v46 = vadd.f32 %v9432_v9, %v7863_v10  ;;  %9433 = vst [vmem:[#allocation132_spill] sm:$0xff] %v8169_v35  ;;  %v8172_v52 = vsel %vm2409_vm12, %v4235_v25, %v4236_v62  ;;  %v8174_v14 = vpop.permute.xlu1 %3618  ;;  %v8176_v0 = vpop.permute.xlu0 %3620  ;;  %v8179_v48 = vsel %vm2409_vm12, %v4236_v62, %v4238_v55  ;;  %v9451_v9 = vld [vmem:[#allocation86_spill] sm:$0xff] }
 0x419   :  { %9434 = vst [vmem:[#allocation133_spill] sm:$0xff] %v8172_v52  ;;  %9435 = vst [vmem:[#allocation134_spill] sm:$0xff] %v8176_v0  ;;  %v8182_v6 = vmul.f32 %v4401_v34, %v6168_v47  ;;  %v8185_v50 = vmul.f32 %v4401_v34, %v6160_v4  ;;  %v8188_v10 = vmul.f32 %v4401_v34, %v6222_v61  ;;  %v9444_v47 = vld [vmem:[#allocation139_spill] sm:$0xff]  ;;  %v9445_v4 = vld [vmem:[#allocation140_spill] sm:$0xff] }
 0x41a   :  { %9436 = vst [vmem:[#allocation135_spill] sm:$0xff] %v8179_v48  ;;  %v1566_v36 = vadd.f32 %v9440_v39, %v7903_v43  ;;  %v1599_v27 = vadd.f32 %v9441_v30, %v7907_v7  ;;  %v8195_v25 = vsel %vm156_vm5, %v4414_v45, %v4415_v54  ;;  %v8198_v62 = vsel %vm156_vm5, %v4415_v54, %v4417_v53  ;;  %v9446_v61 = vld [vmem:[#allocation141_spill] sm:$0xff]  ;;  %v9447_v43 = vld [vmem:[#allocation142_spill] sm:$0xff]  ;;  %v9448_v45 = vld [vmem:[#allocation143_spill] sm:$0xff] }
 0x41b   :  { %9437 = vst [vmem:[#allocation136_spill] sm:$0xff] %v8182_v6  ;;  %9438 = vst [vmem:[#allocation306_spill] sm:$0xff] %v8185_v50  ;;  %v1600_v55 = vadd.f32 %v9444_v47, %v7919_v44  ;;  %v1601_v56 = vadd.f32 %v9445_v4, %v7931_v3  ;;  %v1602_v34 = vadd.f32 %v9446_v61, %v7977_v29  ;;  %4200 = vrot.lane.b32.xlu1 %v7879_v17, %s4770_s13  ;;  %v9449_v44 = vld [vmem:[#allocation144_spill] sm:$0xff]  ;;  %v9450_v3 = vld [vmem:[#allocation145_spill] sm:$0xff] }
 0x41c   :  { %9439 = vst [vmem:[#allocation307_spill] sm:$0xff] %v8188_v10  ;;  %9442 = vst [vmem:[#allocation137_spill] sm:$0xff] %v8195_v25  ;;  %4202 = vrot.lane.b32.xlu0 %v7883_v1, %s4770_s13  ;;  %v1603_v7 = vadd.f32 %v9447_v43, %v7981_v2  ;;  %v1604_v54 = vadd.f32 %v9448_v45, %v8016_v58  ;;  %v1637_v53 = vadd.f32 %v9449_v44, %v7626_v19  ;;  %v9452_v29 = vld [vmem:[#allocation146_spill] sm:$0xff]  ;;  %v9453_v30 = vld [vmem:[#allocation87_spill] sm:$0xff]  ;;  %v8228_v58 = vpop.permute.xlu0 %3656 }
 0x41d   :  { %9443 = vst [vmem:[#allocation138_spill] sm:$0xff] %v8198_v62  ;;  %v1638_v23 = vadd.f32 %v9450_v3, %v7638_v63  ;;  %v1639_v39 = vadd.f32 %v9452_v29, %v9451_v9  ;;  %v9454_v17 = vld [vmem:[#allocation147_spill] sm:$0xff]  ;;  %v9455_v4 = vld [vmem:[#allocation88_spill] sm:$0xff]  ;;  %v9458_v2 = vld [vmem:[#allocation149_spill] sm:$0xff]  ;;  %v8226_v62 = vpop.permute.xlu1 %3622 }
 0x41e   :  { %v1640_v47 = vadd.f32 %v9454_v17, %v9453_v30  ;;  %v9456_v1 = vld [vmem:[#allocation148_spill] sm:$0xff]  ;;  %v1642_v43 = vadd.f32 %v9458_v2, %v9457_v57  ;;  %9459 = vst [vmem:[#allocation139_spill] sm:$0xff] %v8226_v62  ;;  %9460 = vst [vmem:[#allocation140_spill] sm:$0xff] %v8228_v58  ;;  %v9461_v19 = vld [vmem:[#allocation150_spill] sm:$0xff] }
 0x41f   :  { %v1641_v61 = vadd.f32 %v9456_v1, %v9455_v4  ;;  %v1679_v45 = vadd.f32 %v9461_v19, %v8020_v60  ;;  %v9462_v63 = vld [vmem:[#allocation151_spill] sm:$0xff]  ;;  %v9463_v3 = vld [vmem:[#allocation152_spill] sm:$0xff]  ;;  %v9464_v29 = vld [vmem:[#allocation153_spill] sm:$0xff]  ;;  %4018 = vrot.lane.b32.xlu1 %v7890_v38, %s4769_s4 }
 0x420   :  { %v1680_v44 = vadd.f32 %v9462_v63, %v8057_v31  ;;  %v1681_v9 = vadd.f32 %v9463_v3, %v8064_v51  ;;  %v1682_v30 = vadd.f32 %v9464_v29, %v8110_v49  ;;  %v9465_v17 = vld [vmem:[#allocation154_spill] sm:$0xff]  ;;  %v9466_v57 = vld [vmem:[#allocation155_spill] sm:$0xff]  ;;  %v9467_v2 = vld [vmem:[#allocation156_spill] sm:$0xff] }
 0x421   :  { %v1725_v4 = vadd.f32 %v9465_v17, %v8114_v42  ;;  %v1726_v1 = vadd.f32 %v9466_v57, %v1562_v18  ;;  %v1727_v10 = vadd.f32 %v9467_v2, %v1563_v41  ;;  %v9468_v60 = vld [vmem:[#allocation98_spill] sm:$0xff]  ;;  %v9470_v31 = vld [vmem:[#allocation157_spill] sm:$0xff]  ;;  %v9472_v58 = vld [vmem:[#allocation159_spill] sm:$0xff]  ;;  %v8255_v48 = vpop.permute.xlu1 %3658 }
 0x422   :  { %v9469_v19 = vrot.slane %v9468_v60, 2  ;;  %v1728_v63 = vadd.f32 %v9470_v31, %v1564_v32  ;;  %v9471_v51 = vld [vmem:[#allocation158_spill] sm:$0xff]  ;;  %v1730_v49 = vadd.f32 %v9472_v58, %v1566_v36  ;;  %v9473_v29 = vld [vmem:[#allocation160_spill] sm:$0xff]  ;;  %v9474_v42 = vld [vmem:[#allocation161_spill] sm:$0xff]  ;;  %9478 = vst [vmem:[#allocation141_spill] sm:$0xff] %v8255_v48  ;;  %v8257_v60 = vpop.permute.xlu0 %3660 }
 0x423   :  { %v1729_v3 = vadd.f32 %v9471_v51, %v1565_v46  ;;  %v1773_v6 = vadd.f32 %v9473_v29, %v1599_v27  ;;  %v1774_v17 = vadd.f32 %v9474_v42, %v1600_v55  ;;  %v9475_v18 = vld [vmem:[#allocation162_spill] sm:$0xff]  ;;  %v9476_v41 = vld [vmem:[#allocation163_spill] sm:$0xff]  ;;  %v9477_v25 = vld [vmem:[#allocation164_spill] sm:$0xff]  ;;  %9479 = vst [vmem:[#allocation142_spill] sm:$0xff] %v8257_v60 }
 0x424   :  { %4020 = vrot.lane.b32.xlu0 %v9469_v19, %s4769_s4  ;;  %v1775_v57 = vadd.f32 %v9475_v18, %v1601_v56  ;;  %v1776_v2 = vadd.f32 %v9476_v41, %v1602_v34  ;;  %v1777_v38 = vadd.f32 %v9477_v25, %v1603_v7  ;;  %v9480_v19 = vld [vmem:[#allocation165_spill] sm:$0xff]  ;;  %v9481_v31 = vld [vmem:[#allocation166_spill] sm:$0xff]  ;;  %v9482_v51 = vld [vmem:[#allocation167_spill] sm:$0xff] }
 0x425   :  { %v1778_v32 = vadd.f32 %v9480_v19, %v1604_v54  ;;  %v1801_v46 = vadd.f32 %v9481_v31, %v1679_v45  ;;  %v1802_v36 = vadd.f32 %v9482_v51, %v1680_v44  ;;  %v9483_v58 = vld [vmem:[#allocation168_spill] sm:$0xff]  ;;  %v9484_v29 = vld [vmem:[#allocation169_spill] sm:$0xff]  ;;  %v9485_v42 = vld [vmem:[#allocation170_spill] sm:$0xff] }
 0x426   :  { %v1803_v27 = vadd.f32 %v9483_v58, %v1681_v9  ;;  %v1804_v55 = vadd.f32 %v9484_v29, %v1682_v30  ;;  %v1837_v56 = vadd.f32 %v9485_v42, %v1725_v4  ;;  %v9486_v18 = vld [vmem:[#allocation171_spill] sm:$0xff]  ;;  %v9487_v25 = vld [vmem:[#allocation108_spill] sm:$0xff]  ;;  %v9488_v7 = vld [vmem:[#allocation109_spill] sm:$0xff]  ;;  %v8280_v48 = vpop.permute.xlu0 %3664 }
 0x427   :  { %v1838_v34 = vadd.f32 %v9486_v18, %v1726_v1  ;;  %4022 = vrot.lane.b32.xlu1 %v9487_v25, %s4769_s4  ;;  %v9489_v41 = vld [vmem:[#allocation172_spill] sm:$0xff]  ;;  %v9490_v19 = vld [vmem:[#allocation173_spill] sm:$0xff]  ;;  %v9491_v31 = vld [vmem:[#allocation174_spill] sm:$0xff]  ;;  %v8278_v25 = vpop.permute.xlu1 %3662  ;;  %9498 = vst [vmem:[#allocation144_spill] sm:$0xff] %v8280_v48 }
 0x428   :  { %4024 = vrot.lane.b32.xlu0 %v9488_v7, %s4769_s4  ;;  %v1839_v54 = vadd.f32 %v9489_v41, %v1727_v10  ;;  %v1840_v45 = vadd.f32 %v9490_v19, %v1728_v63  ;;  %v1841_v44 = vadd.f32 %v9491_v31, %v1729_v3  ;;  %v9492_v51 = vld [vmem:[#allocation175_spill] sm:$0xff]  ;;  %v9493_v58 = vld [vmem:[#allocation176_spill] sm:$0xff]  ;;  %v9494_v29 = vld [vmem:[#allocation177_spill] sm:$0xff]  ;;  %9497 = vst [vmem:[#allocation143_spill] sm:$0xff] %v8278_v25 }
 0x429   :  { %v1842_v9 = vadd.f32 %v9492_v51, %v1730_v49  ;;  %v1875_v30 = vadd.f32 %v9493_v58, %v1773_v6  ;;  %v1876_v4 = vadd.f32 %v9494_v29, %v1774_v17  ;;  %v9495_v42 = vld [vmem:[#allocation178_spill] sm:$0xff]  ;;  %v9496_v18 = vld [vmem:[#allocation179_spill] sm:$0xff]  ;;  %v9499_v7 = vld [vmem:[#allocation180_spill] sm:$0xff] }
 0x42a   :  { %v1877_v1 = vadd.f32 %v9495_v42, %v1775_v57  ;;  %v1878_v60 = vadd.f32 %v9496_v18, %v1776_v2  ;;  %v1879_v10 = vadd.f32 %v9499_v7, %v1777_v38  ;;  %v9500_v41 = vld [vmem:[#allocation181_spill] sm:$0xff]  ;;  %v9501_v19 = vld [vmem:[#allocation182_spill] sm:$0xff]  ;;  %v9502_v31 = vld [vmem:[#allocation183_spill] sm:$0xff]  ;;  %v8304_v25 = vpop.permute.xlu0 %3704 }
 0x42b   :  { %v1880_v63 = vadd.f32 %v9500_v41, %v1778_v32  ;;  %v1913_v3 = vadd.f32 %v9501_v19, %v1637_v53  ;;  %v1914_v49 = vadd.f32 %v9502_v31, %v1638_v23  ;;  %v9503_v51 = vld [vmem:[#allocation184_spill] sm:$0xff]  ;;  %v9504_v58 = vld [vmem:[#allocation185_spill] sm:$0xff]  ;;  %v9505_v29 = vld [vmem:[#allocation186_spill] sm:$0xff] }
 0x42c   :  { %v1915_v6 = vadd.f32 %v9503_v51, %v1639_v39  ;;  %v1916_v17 = vadd.f32 %v9504_v58, %v1640_v47  ;;  %v1917_v57 = vadd.f32 %v9505_v29, %v1641_v61  ;;  %v9506_v2 = vld [vmem:[#allocation101_spill] sm:$0xff]  ;;  %v9508_v18 = vld [vmem:[#allocation111_spill] sm:$0xff]  ;;  %v9511_v53 = vld [vmem:[#allocation12_spill] sm:$0xff] }
 0x42d   :  { %v9507_v42 = vrot.slane %v9506_v2, 2  ;;  %4376 = vrot.lane.b32.xlu0 %v9508_v18, %s4770_s13  ;;  %v9509_v38 = vld [vmem:[#allocation11_spill] sm:$0xff]  ;;  %v1956_v19 = vadd.f32 %v9511_v53, %v1802_v36  ;;  %v9512_v23 = vld [vmem:[#allocation13_spill] sm:$0xff]  ;;  %v9513_v39 = vld [vmem:[#allocation14_spill] sm:$0xff] }
 0x42e   :  { %v1918_v7 = vadd.f32 %v9509_v38, %v1642_v43  ;;  %v9510_v32 = vld [vmem:[#allocation187_spill] sm:$0xff]  ;;  %v1957_v31 = vadd.f32 %v9512_v23, %v1803_v27  ;;  %v1958_v51 = vadd.f32 %v9513_v39, %v1804_v55  ;;  %v9514_v47 = vld [vmem:[#allocation188_spill] sm:$0xff]  ;;  %v9515_v61 = vld [vmem:[#allocation189_spill] sm:$0xff] }
 0x42f   :  { %4026 = vrot.lane.b32.xlu1 %v9507_v42, %s4769_s4  ;;  %v1955_v41 = vadd.f32 %v9510_v32, %v1801_v46  ;;  %v2001_v58 = vadd.f32 %v9514_v47, %v1837_v56  ;;  %v2002_v29 = vadd.f32 %v9515_v61, %v1838_v34  ;;  %v9516_v48 = vld [vmem:[#allocation216_spill] sm:$0xff]  ;;  %v8302_v42 = vpop.permute.xlu1 %3666  ;;  %v9518_v18 = vld [vmem:[#allocation190_spill] sm:$0xff]  ;;  %v9519_v38 = vld [vmem:[#allocation191_spill] sm:$0xff] }
 0x430   :  { %v2189_v2 = vadd.f32 %v9516_v48, %v1913_v3  ;;  %9517 = vst [vmem:[#allocation145_spill] sm:$0xff] %v8302_v42  ;;  %v2003_v43 = vadd.f32 %v9518_v18, %v1839_v54  ;;  %v2004_v46 = vadd.f32 %v9519_v38, %v1840_v45  ;;  %v9520_v32 = vld [vmem:[#allocation192_spill] sm:$0xff]  ;;  %v9521_v27 = vld [vmem:[#allocation193_spill] sm:$0xff]  ;;  %v9523_v55 = vld [vmem:[#allocation194_spill] sm:$0xff] }
 0x431   :  { %v8309_v36 = vadd.f32 %v9520_v32, %v1841_v44  ;;  %v8312_v53 = vadd.f32 %v9521_v27, %v1842_v9  ;;  %v2049_v56 = vadd.f32 %v9523_v55, %v1875_v30  ;;  %v9524_v23 = vld [vmem:[#allocation195_spill] sm:$0xff]  ;;  %v9525_v39 = vld [vmem:[#allocation196_spill] sm:$0xff]  ;;  %v9529_v45 = vld [vmem:[#allocation197_spill] sm:$0xff] }
 0x432   :  { %v2050_v34 = vadd.f32 %v9524_v23, %v1876_v4  ;;  %v2051_v48 = vadd.f32 %v9525_v39, %v1877_v1  ;;  %v9526_v3 = vld [vmem:[#allocation116_spill] sm:$0xff]  ;;  %v2052_v61 = vadd.f32 %v9529_v45, %v1878_v60  ;;  %v9530_v44 = vld [vmem:[#allocation198_spill] sm:$0xff]  ;;  %v9531_v38 = vld [vmem:[#allocation199_spill] sm:$0xff] }
 0x433   :  { %9522 = vst [vmem:[#allocation86_spill] sm:$0xff] %v8312_v53  ;;  %4378 = vrot.lane.b32.xlu1 %v9526_v3, %s4770_s13  ;;  %v9527_v47 = vld [vmem:[#allocation104_spill] sm:$0xff]  ;;  %v2053_v18 = vadd.f32 %v9530_v44, %v1879_v10  ;;  %v2054_v9 = vadd.f32 %v9531_v38, %v1880_v63  ;;  %v9533_v30 = vld [vmem:[#allocation201_spill] sm:$0xff]  ;;  %v9534_v4 = vld [vmem:[#allocation202_spill] sm:$0xff]  ;;  %v8331_v50 = vpop.permute.xlu1 %3706  ;;  %v9565_v53 = vrot.slane %v7899_v13, 6 }
 0x434   :  { %v9528_v54 = vrot.slane %v9527_v47, 2  ;;  %v9532_v32 = vld [vmem:[#allocation200_spill] sm:$0xff]  ;;  %v2078_v55 = vadd.f32 %v9533_v30, %v1956_v19  ;;  %v2079_v23 = vadd.f32 %v9534_v4, %v1957_v31  ;;  %v9535_v1 = vld [vmem:[#allocation203_spill] sm:$0xff]  ;;  %v8333_v47 = vpop.permute.xlu0 %3708  ;;  %v9539_v10 = vld [vmem:[#allocation205_spill] sm:$0xff] }
 0x435   :  { %v2077_v27 = vadd.f32 %v9532_v32, %v1955_v41  ;;  %v2080_v39 = vadd.f32 %v9535_v1, %v1958_v51  ;;  %v9536_v42 = vld [vmem:[#allocation19_spill] sm:$0xff]  ;;  %v9538_v60 = vld [vmem:[#allocation204_spill] sm:$0xff]  ;;  %v8337_v45 = vadd.f32 %v9539_v10, %v2002_v29  ;;  %v9540_v63 = vld [vmem:[#allocation210_spill] sm:$0xff] }
 0x436   :  { %4380 = vrot.lane.b32.xlu0 %v9528_v54, %s4770_s13  ;;  %v9537_v3 = vrot.slane %v9536_v42, 6  ;;  %v2113_v54 = vadd.f32 %v9538_v60, %v2001_v58  ;;  %v2151_v41 = vadd.f32 %v9540_v63, %v2049_v56  ;;  %v9541_v44 = vld [vmem:[#allocation217_spill] sm:$0xff]  ;;  %v9542_v38 = vld [vmem:[#allocation206_spill] sm:$0xff]  ;;  %v9543_v51 = vld [vmem:[#allocation207_spill] sm:$0xff] }
 0x437   :  { %v2190_v19 = vadd.f32 %v9541_v44, %v1914_v49  ;;  %v8342_v31 = vadd.f32 %v9542_v38, %v2003_v43  ;;  %v8345_v32 = vadd.f32 %v9543_v51, %v2004_v46  ;;  %v9546_v30 = vld [vmem:[#allocation117_spill] sm:$0xff]  ;;  %v9547_v58 = vld [vmem:[#allocation118_spill] sm:$0xff]  ;;  %v9548_v29 = vld [vmem:[#allocation211_spill] sm:$0xff] }
 0x438   :  { %v2389_v62 = vadd.f32 %v9537_v3, %v2189_v2  ;;  %v9545_v2 = vld [vmem:[#allocation218_spill] sm:$0xff]  ;;  %4382 = vrot.lane.b32.xlu1 %v9546_v30, %s4770_s13  ;;  %v2152_v4 = vadd.f32 %v9548_v29, %v2050_v34  ;;  %v9549_v1 = vld [vmem:[#allocation212_spill] sm:$0xff]  ;;  %v9550_v3 = vld [vmem:[#allocation213_spill] sm:$0xff]  ;;  %v8362_v30 = vpop.permute.xlu1 %3710 }
 0x439   :  { %9544 = vst [vmem:[#allocation146_spill] sm:$0xff] %v8345_v32  ;;  %v2191_v42 = vadd.f32 %v9545_v2, %v1915_v6  ;;  %v2153_v56 = vadd.f32 %v9549_v1, %v2051_v48  ;;  %v2154_v49 = vadd.f32 %v9550_v3, %v2052_v61  ;;  %v9551_v60 = vld [vmem:[#allocation232_spill] sm:$0xff]  ;;  %v9552_v10 = vld [vmem:[#allocation214_spill] sm:$0xff]  ;;  %v9553_v46 = vld [vmem:[#allocation215_spill] sm:$0xff] }
 0x43a   :  { %4384 = vrot.lane.b32.xlu0 %v9547_v58, %s4770_s13  ;;  %v2325_v43 = vadd.f32 %v9551_v60, %v2151_v41  ;;  %v2155_v63 = vadd.f32 %v9552_v10, %v2053_v18  ;;  %v2156_v44 = vadd.f32 %v9553_v46, %v2054_v9  ;;  %v9554_v38 = vld [vmem:[#allocation219_spill] sm:$0xff]  ;;  %v8364_v58 = vpop.permute.xlu0 %3712  ;;  %v9556_v34 = vld [vmem:[#allocation25_spill] sm:$0xff]  ;;  %v9557_v48 = vld [vmem:[#allocation220_spill] sm:$0xff] }
 0x43b   :  { %v2192_v6 = vadd.f32 %v9554_v38, %v1916_v17  ;;  %v9555_v51 = vld [vmem:[#allocation63_spill] sm:$0xff]  ;;  %v2390_v29 = vadd.f32 %v9556_v34, %v2190_v19  ;;  %v2193_v1 = vadd.f32 %v9557_v48, %v1917_v57  ;;  %v9558_v61 = vld [vmem:[#allocation221_spill] sm:$0xff]  ;;  %v9559_v41 = vld [vmem:[#allocation222_spill] sm:$0xff] }
 0x43c   :  { %v8360_v2 = vadd.f32 %v9555_v51, %v2389_v62  ;;  %v2194_v3 = vadd.f32 %v9558_v61, %v1918_v7  ;;  %v2231_v60 = vadd.f32 %v9559_v41, %v2077_v27  ;;  %v9560_v18 = vld [vmem:[#allocation28_spill] sm:$0xff]  ;;  %v9561_v9 = vld [vmem:[#allocation223_spill] sm:$0xff]  ;;  %v9562_v17 = vld [vmem:[#allocation233_spill] sm:$0xff]  ;;  %v8389_v13 = vpop.permute.xlu1 %3714 }
 0x43d   :  { %v2391_v10 = vadd.f32 %v9560_v18, %v2191_v42  ;;  %v2232_v46 = vadd.f32 %v9561_v9, %v2078_v55  ;;  %v2326_v38 = vadd.f32 %v9562_v17, %v2152_v4  ;;  %v9563_v62 = vld [vmem:[#allocation105_spill] sm:$0xff]  ;;  %v9568_v7 = vld [vmem:[#allocation234_spill] sm:$0xff]  ;;  %v9569_v27 = vld [vmem:[#allocation235_spill] sm:$0xff] }
 0x43e   :  { %v9564_v51 = vrot.slane %v9563_v62, 2  ;;  %4144 = vrot.lane.b32.xlu0 %v9565_v53, %s4770_s13  ;;  %v9566_v19 = vld [vmem:[#allocation37_spill] sm:$0xff]  ;;  %v2327_v48 = vadd.f32 %v9568_v7, %v2153_v56  ;;  %v2328_v61 = vadd.f32 %v9569_v27, %v2154_v49  ;;  %v9570_v42 = vld [vmem:[#allocation236_spill] sm:$0xff]  ;;  %v8391_v53 = vpop.permute.xlu0 %3752  ;;  %v9577_v56 = vld [vmem:[#allocation30_spill] sm:$0xff] }
 0x43f   :  { %v9567_v57 = vrot.slane %v9566_v19, 6  ;;  %v2329_v41 = vadd.f32 %v9570_v42, %v2155_v63  ;;  %v9571_v55 = vld [vmem:[#allocation24_spill] sm:$0xff]  ;;  %v9574_v62 = vld [vmem:[#allocation225_spill] sm:$0xff]  ;;  %v9578_v49 = vld [vmem:[#allocation35_spill] sm:$0xff] }
 0x440   :  { %4386 = vrot.lane.b32.xlu1 %v9564_v51, %s4770_s13  ;;  %v9572_v18 = vrot.slane %v9571_v55, 6  ;;  %v9573_v9 = vld [vmem:[#allocation224_spill] sm:$0xff]  ;;  %v2234_v51 = vadd.f32 %v9574_v62, %v2080_v39  ;;  %v9575_v52 = vld [vmem:[#allocation237_spill] sm:$0xff]  ;;  %v2424_v7 = vadd.f32 %v9578_v49, %v2231_v60  ;;  %v9581_v55 = vld [vmem:[#allocation50_spill] sm:$0xff] }
 0x441   :  { %v2353_v34 = vadd.f32 %v9567_v57, %v2325_v43  ;;  %v2233_v17 = vadd.f32 %v9573_v9, %v2079_v23  ;;  %v2330_v35 = vadd.f32 %v9575_v52, %v2156_v44  ;;  %v9576_v43 = vld [vmem:[#allocation29_spill] sm:$0xff]  ;;  %v2394_v57 = vadd.f32 %v9577_v56, %v2194_v3  ;;  %v9580_v42 = vld [vmem:[#allocation36_spill] sm:$0xff]  ;;  %v9584_v52 = vld [vmem:[#allocation110_spill] sm:$0xff] }
 0x442   :  { %v2392_v4 = vadd.f32 %v9572_v18, %v2192_v6  ;;  %v2393_v19 = vadd.f32 %v9576_v43, %v2193_v1  ;;  %v9579_v63 = vld [vmem:[#allocation297_spill] sm:$0xff]  ;;  %v2425_v6 = vadd.f32 %v9580_v42, %v2232_v46  ;;  %v2354_v23 = vadd.f32 %v9581_v55, %v2326_v38  ;;  %v9582_v18 = vld [vmem:[#allocation59_spill] sm:$0xff]  ;;  %v9588_v60 = vld [vmem:[#allocation44_spill] sm:$0xff] }
 0x443   :  { %v2531_v27 = vadd.f32 %v9579_v63, %v2390_v29  ;;  %v9583_v39 = vrot.slane %v9582_v18, 2  ;;  %v9585_v44 = vrot.slane %v9584_v52, 6  ;;  %v9586_v1 = vld [vmem:[#allocation41_spill] sm:$0xff]  ;;  %v9589_v43 = vrot.slane %v9588_v60, 6  ;;  %v9590_v56 = vld [vmem:[#allocation51_spill] sm:$0xff]  ;;  %v9591_v49 = vld [vmem:[#allocation54_spill] sm:$0xff] }
 0x444   :  { %4146 = vrot.lane.b32.xlu1 %v8010_v21, %s4770_s13  ;;  %v9587_v3 = vrot.slane %v9586_v1, 6  ;;  %v2357_v46 = vadd.f32 %v9590_v56, %v2329_v41  ;;  %v2494_v38 = vadd.f32 %v9591_v49, %v2353_v34  ;;  %v9592_v63 = vld [vmem:[#allocation40_spill] sm:$0xff]  ;;  %v9594_v18 = vld [vmem:[#allocation43_spill] sm:$0xff]  ;;  %v8419_v1 = vpop.permute.xlu0 %3756  ;;  %v9599_v41 = vld [vmem:[#allocation61_spill] sm:$0xff] }
 0x445   :  { %v2532_v9 = vadd.f32 %v9583_v39, %v2391_v10  ;;  %4148 = vrot.lane.b32.xlu0 %v9585_v44, %s4770_s13  ;;  %v2356_v29 = vadd.f32 %v9589_v43, %v2328_v61  ;;  %v2426_v42 = vadd.f32 %v9592_v63, %v2233_v17  ;;  %v9593_v10 = vld [vmem:[#allocation42_spill] sm:$0xff]  ;;  %v9595_v21 = vrot.slane %v9594_v18, 6  ;;  %v9596_v32 = vld [vmem:[#allocation64_spill] sm:$0xff]  ;;  %v8417_v44 = vpop.permute.xlu1 %3754  ;;  %v9598_v61 = vld [vmem:[#allocation65_spill] sm:$0xff] }
 0x446   :  { %v2355_v62 = vadd.f32 %v9587_v3, %v2327_v48  ;;  %v2427_v55 = vadd.f32 %v9593_v10, %v2234_v51  ;;  %v2533_v52 = vadd.f32 %v9596_v32, %v2392_v4  ;;  %v9597_v48 = vld [vmem:[#allocation238_spill] sm:$0xff]  ;;  %v2534_v60 = vadd.f32 %v9598_v61, %v2393_v19  ;;  %v9603_v63 = vld [vmem:[#allocation56_spill] sm:$0xff]  ;;  %v9607_v19 = vld [vmem:[#allocation47_spill] sm:$0xff] }
 0x447   :  { %v2358_v39 = vadd.f32 %v9595_v21, %v2330_v35  ;;  %v2602_v3 = vadd.f32 %v9597_v48, %v2494_v38  ;;  %v9600_v43 = vrot.slane %v9599_v41, 2  ;;  %v9601_v56 = vld [vmem:[#allocation66_spill] sm:$0xff]  ;;  %v2495_v35 = vadd.f32 %v9603_v63, %v2354_v23  ;;  %v9604_v10 = vld [vmem:[#allocation300_spill] sm:$0xff]  ;;  %v9615_v63 = vld [vmem:[#allocation301_spill] sm:$0xff] }
 0x448   :  { %v2564_v17 = vadd.f32 %v9601_v56, %v2424_v7  ;;  %v9602_v49 = vld [vmem:[#allocation226_spill] sm:$0xff]  ;;  %v2565_v32 = vadd.f32 %v9604_v10, %v2425_v6  ;;  %v9605_v4 = vld [vmem:[#allocation112_spill] sm:$0xff]  ;;  %v9608_v38 = vrot.slane %v9607_v19, 2  ;;  %v9613_v56 = vld [vmem:[#allocation55_spill] sm:$0xff]  ;;  %v2566_v10 = vadd.f32 %v9615_v63, %v2426_v42 }
 0x449   :  { %v2535_v34 = vadd.f32 %v9600_v43, %v2394_v57  ;;  %v8427_v51 = vadd.f32 %v9602_v49, %v2113_v54  ;;  %v9606_v18 = vrot.slane %v9605_v4, 6  ;;  %4152 = vrot.lane.b32.xlu0 %v8027_v5, %s4770_s13  ;;  %v9609_v57 = vld [vmem:[#allocation60_spill] sm:$0xff]  ;;  %v9610_v7 = vld [vmem:[#allocation62_spill] sm:$0xff]  ;;  %v9612_v43 = vld [vmem:[#allocation239_spill] sm:$0xff]  ;;  %v9614_v6 = vrot.slane %v9613_v56, 2  ;;  %v8446_v0 = vpop.permute.xlu1 %3758  ;;  %v8448_v5 = vpop.permute.xlu0 %3760 }
 0x44a   :  { %v2496_v21 = vadd.f32 %v9608_v38, %v2355_v62  ;;  %v2497_v48 = vadd.f32 %v9609_v57, %v2356_v29  ;;  %v2498_v61 = vadd.f32 %v9610_v7, %v2357_v46  ;;  %v9611_v54 = vld [vmem:[#allocation260_spill] sm:$0xff]  ;;  %v2603_v23 = vadd.f32 %v9612_v43, %v2495_v35  ;;  %v9616_v4 = vld [vmem:[#allocation70_spill] sm:$0xff]  ;;  %v9618_v29 = vld [vmem:[#allocation241_spill] sm:$0xff] }
 0x44b   :  { %4150 = vrot.lane.b32.xlu1 %v9606_v18, %s4770_s13  ;;  %v2786_v41 = vadd.f32 %v9611_v54, %v2602_v3  ;;  %v2499_v49 = vadd.f32 %v9614_v6, %v2358_v39  ;;  %v2567_v18 = vadd.f32 %v9616_v4, %v2427_v55  ;;  %v9617_v62 = vld [vmem:[#allocation240_spill] sm:$0xff]  ;;  %v9619_v46 = vld [vmem:[#allocation242_spill] sm:$0xff]  ;;  %v9621_v35 = vld [vmem:[#allocation243_spill] sm:$0xff] }
 0x44c   :  { %v2604_v19 = vadd.f32 %v9617_v62, %v2496_v21  ;;  %v2605_v38 = vadd.f32 %v9618_v29, %v2497_v48  ;;  %v2606_v57 = vadd.f32 %v9619_v46, %v2498_v61  ;;  %v9620_v3 = vld [vmem:[#allocation276_spill] sm:$0xff]  ;;  %v9623_v42 = vld [vmem:[#allocation245_spill] sm:$0xff]  ;;  %v9626_v21 = vld [vmem:[#allocation246_spill] sm:$0xff] }
 0x44d   :  { %v2914_v7 = vadd.f32 %v9620_v3, %v2786_v41  ;;  %v2607_v54 = vadd.f32 %v9621_v35, %v2499_v49  ;;  %v9622_v39 = vld [vmem:[#allocation244_spill] sm:$0xff]  ;;  %v2651_v56 = vadd.f32 %v9623_v42, %v2531_v27  ;;  %v9624_v55 = vld [vmem:[#allocation113_spill] sm:$0xff]  ;;  %4112 = vrot.lane.b32.xlu0 %v8036_v26, %s4769_s4  ;;  %v2652_v48 = vadd.f32 %v9626_v21, %v2532_v9  ;;  %v9628_v4 = vld [vmem:[#allocation262_spill] sm:$0xff]  ;;  %v8475_v26 = vpop.permute.xlu0 %3800 }
 0x44e   :  { %v2650_v43 = vadd.f32 %v9622_v39, %v8360_v2  ;;  %v9625_v6 = vrot.slane %v9624_v55, 6  ;;  %v9627_v63 = vld [vmem:[#allocation261_spill] sm:$0xff]  ;;  %v2788_v41 = vadd.f32 %v9628_v4, %v2604_v19  ;;  %v9630_v29 = vld [vmem:[#allocation247_spill] sm:$0xff]  ;;  %v9631_v2 = vld [vmem:[#allocation248_spill] sm:$0xff]  ;;  %v8473_v55 = vpop.permute.xlu1 %3762 }
 0x44f   :  { %v2787_v61 = vadd.f32 %v9627_v63, %v2603_v23  ;;  %v9629_v62 = vld [vmem:[#allocation21_spill] sm:$0xff]  ;;  %v2653_v46 = vadd.f32 %v9630_v29, %v2533_v52  ;;  %v2654_v3 = vadd.f32 %v9631_v2, %v2534_v60  ;;  %v9633_v39 = vld [vmem:[#allocation250_spill] sm:$0xff]  ;;  %v9634_v9 = vld [vmem:[#allocation251_spill] sm:$0xff] }
 0x450   :  { %4154 = vrot.lane.b32.xlu1 %v9625_v6, %s4770_s13  ;;  %v3098_v49 = vadd.f32 %v9629_v62, %v2914_v7  ;;  %v9632_v27 = vld [vmem:[#allocation249_spill] sm:$0xff]  ;;  %v8471_v42 = vadd.f32 %v9633_v39, %v2564_v17  ;;  %v8478_v6 = vadd.f32 %v9634_v9, %v2565_v32  ;;  %v9636_v21 = vld [vmem:[#allocation278_spill] sm:$0xff]  ;;  %v9638_v4 = vld [vmem:[#allocation252_spill] sm:$0xff] }
 0x451   :  { %v2655_v35 = vadd.f32 %v9632_v27, %v2535_v34  ;;  %v9635_v23 = vld [vmem:[#allocation277_spill] sm:$0xff]  ;;  %v2916_v7 = vadd.f32 %v9636_v21, %v2788_v41  ;;  %v8484_v60 = vadd.f32 %v9638_v4, %v2566_v10  ;;  %v9640_v17 = vld [vmem:[#allocation263_spill] sm:$0xff]  ;;  %4116 = vrot.lane.b32.xlu0 %v8050_v22, %s4769_s4  ;;  %v9641_v32 = vld [vmem:[#allocation264_spill] sm:$0xff] }
 0x452   :  { %v2915_v19 = vadd.f32 %v9635_v23, %v2787_v61  ;;  %v9637_v63 = vld [vmem:[#allocation53_spill] sm:$0xff]  ;;  %v2789_v29 = vadd.f32 %v9640_v17, %v2605_v38  ;;  %v2790_v61 = vadd.f32 %v9641_v32, %v2606_v57  ;;  %v9642_v2 = vld [vmem:[#allocation22_spill] sm:$0xff]  ;;  %v9643_v27 = vld [vmem:[#allocation23_spill] sm:$0xff]  ;;  %v8504_v17 = vpop.permute.xlu0 %3804 }
 0x453   :  { %v3226_v52 = vadd.f32 %v9637_v63, %v3098_v49  ;;  %v9639_v34 = vld [vmem:[#allocation253_spill] sm:$0xff]  ;;  %v3100_v49 = vadd.f32 %v9643_v27, %v2916_v7  ;;  %v9644_v39 = vld [vmem:[#allocation83_spill] sm:$0xff]  ;;  %v9649_v22 = vld [vmem:[#allocation280_spill] sm:$0xff] }
 0x454   :  { %v8487_v62 = vadd.f32 %v9639_v34, %v2567_v18  ;;  %4114 = vrot.lane.b32.xlu1 %v8047_v20, %s4769_s4  ;;  %v3099_v41 = vadd.f32 %v9642_v2, %v2915_v19  ;;  %v9645_v9 = vld [vmem:[#allocation265_spill] sm:$0xff]  ;;  %v9646_v18 = vld [vmem:[#allocation266_spill] sm:$0xff]  ;;  %v9647_v63 = vld [vmem:[#allocation267_spill] sm:$0xff]  ;;  %v8502_v20 = vpop.permute.xlu1 %3802  ;;  %v2918_v57 = vadd.f32 %v9649_v22, %v2790_v61 }
 0x455   :  { %v3410_v10 = vadd.f32 %v9644_v39, %v3226_v52  ;;  %v2791_v23 = vadd.f32 %v9645_v9, %v2607_v54  ;;  %v2834_v21 = vadd.f32 %v9646_v18, %v2650_v43  ;;  %v2835_v38 = vadd.f32 %v9647_v63, %v2651_v56  ;;  %v9648_v4 = vld [vmem:[#allocation279_spill] sm:$0xff]  ;;  %v9650_v32 = vld [vmem:[#allocation57_spill] sm:$0xff]  ;;  %v9651_v2 = vld [vmem:[#allocation58_spill] sm:$0xff]  ;;  %4280 = vrot.lane.b32.xlu0 %v8071_v8, %s4770_s13 }
 0x456   :  { %v2917_v34 = vadd.f32 %v9648_v4, %v2789_v29  ;;  %v3227_v19 = vadd.f32 %v9650_v32, %v3099_v41  ;;  %v3228_v7 = vadd.f32 %v9651_v2, %v3100_v49  ;;  %v9652_v27 = vld [vmem:[#allocation107_spill] sm:$0xff]  ;;  %v9653_v39 = vld [vmem:[#allocation268_spill] sm:$0xff]  ;;  %v9654_v9 = vld [vmem:[#allocation269_spill] sm:$0xff] }
 0x457   :  { %v3538_v52 = vadd.f32 %v9652_v27, %v3410_v10  ;;  %v2836_v54 = vadd.f32 %v9653_v39, %v2652_v48  ;;  %v2837_v43 = vadd.f32 %v9654_v9, %v2653_v46  ;;  %v9655_v18 = vld [vmem:[#allocation26_spill] sm:$0xff]  ;;  %v9656_v29 = vld [vmem:[#allocation27_spill] sm:$0xff]  ;;  %v9657_v63 = vld [vmem:[#allocation84_spill] sm:$0xff]  ;;  %v3833_v9 = vpop.permute.xlu0 %3832 }
 0x458   :  { %v3101_v56 = vadd.f32 %v9655_v18, %v2917_v34  ;;  %4118 = vrot.lane.b32.xlu1 %v8053_v33, %s4769_s4  ;;  %v3102_v61 = vadd.f32 %v9656_v29, %v2918_v57  ;;  %v3411_v41 = vadd.f32 %v9657_v63, %v3227_v19  ;;  %v9658_v4 = vld [vmem:[#allocation85_spill] sm:$0xff]  ;;  %v9659_v22 = vld [vmem:[#allocation270_spill] sm:$0xff]  ;;  %v8525_v33 = vpop.permute.xlu1 %3806  ;;  %v9665_v19 = vld [vmem:[#allocation115_spill] sm:$0xff]  ;;  %s4771_s4 = smov [#allocation7]  }
 0x459   :  { %v3412_v49 = vadd.f32 %v9658_v4, %v3228_v7  ;;  %v3722_v10 = vadd.f32 %v8304_v25, %v3538_v52  ;;  %v2838_v48 = vadd.f32 %v9659_v22, %v2654_v3  ;;  %v9660_v32 = vld [vmem:[#allocation281_spill] sm:$0xff]  ;;  %v9661_v2 = vld [vmem:[#allocation282_spill] sm:$0xff]  ;;  %v9666_v25 = vld [vmem:[#allocation271_spill] sm:$0xff] }
 0x45a   :  { %v2919_v46 = vadd.f32 %v9660_v32, %v2791_v23  ;;  %v2962_v34 = vadd.f32 %v9661_v2, %v2834_v21  ;;  %v9662_v27 = vld [vmem:[#allocation293_spill] sm:$0xff]  ;;  %v9663_v8 = vld [vmem:[#allocation294_spill] sm:$0xff]  ;;  %v2839_v52 = vadd.f32 %v9666_v25, %v2655_v35  ;;  %v9667_v3 = vld [vmem:[#allocation31_spill] sm:$0xff] }
 0x45b   :  { %v3229_v39 = vadd.f32 %v9662_v27, %v3101_v56  ;;  %v3230_v18 = vadd.f32 %v9663_v8, %v3102_v61  ;;  %v9664_v57 = vld [vmem:[#allocation114_spill] sm:$0xff]  ;;  %v3540_v63 = vadd.f32 %v9665_v19, %v3412_v49  ;;  %v8530_v7 = vadd.f32 %v3833_v9, %v3722_v10  ;;  %v9668_v23 = vld [vmem:[#allocation32_spill] sm:$0xff]  ;;  %v9669_v21 = vld [vmem:[#allocation127_spill] sm:$0xff] }
 0x45c   :  { %v3539_v29 = vadd.f32 %v9664_v57, %v3411_v41  ;;  %v3103_v4 = vadd.f32 %v9667_v3, %v2919_v46  ;;  %v3146_v22 = vadd.f32 %v9668_v23, %v2962_v34  ;;  %4282 = vrot.lane.b32.xlu1 %v9669_v21, %s4770_s13  ;;  %v9670_v56 = vld [vmem:[#allocation121_spill] sm:$0xff]  ;;  %v9673_v41 = vld [vmem:[#allocation90_spill] sm:$0xff]  ;;  %v9674_v35 = vld [vmem:[#allocation283_spill] sm:$0xff]  ;;  %v3835_v3 = vpop.permute.xlu1 %3834  ;;  %v3837_v23 = vpop.permute.xlu0 %3836 }
 0x45d   :  { %v9671_v32 = vrot.slane %v9670_v56, 2  ;;  %v9672_v61 = vld [vmem:[#allocation89_spill] sm:$0xff]  ;;  %v3414_v27 = vadd.f32 %v9673_v41, %v3230_v18  ;;  %v3724_v10 = vadd.f32 %v8333_v47, %v3540_v63  ;;  %v2963_v9 = vadd.f32 %v9674_v35, %v2835_v38  ;;  %v9675_v46 = vld [vmem:[#allocation284_spill] sm:$0xff]  ;;  %v9676_v34 = vld [vmem:[#allocation295_spill] sm:$0xff] }
 0x45e   :  { %v3413_v2 = vadd.f32 %v9672_v61, %v3229_v39  ;;  %v3723_v49 = vadd.f32 %v8331_v50, %v3539_v29  ;;  %v2964_v8 = vadd.f32 %v9675_v46, %v2836_v54  ;;  %v3231_v57 = vadd.f32 %v9676_v34, %v3103_v4  ;;  %v9677_v19 = vld [vmem:[#allocation296_spill] sm:$0xff]  ;;  %v9678_v21 = vld [vmem:[#allocation119_spill] sm:$0xff]  ;;  %v9681_v38 = vld [vmem:[#allocation33_spill] sm:$0xff] }
 0x45f   :  { %4284 = vrot.lane.b32.xlu0 %v9671_v32, %s4770_s13  ;;  %v3274_v25 = vadd.f32 %v9677_v19, %v3146_v22  ;;  %v9679_v32 = vld [vmem:[#allocation120_spill] sm:$0xff]  ;;  %v8552_v18 = vadd.f32 %v3837_v23, %v3724_v10  ;;  %v3147_v29 = vadd.f32 %v9681_v38, %v2963_v9  ;;  %v9682_v54 = vld [vmem:[#allocation34_spill] sm:$0xff]  ;;  %v9684_v22 = vld [vmem:[#allocation129_spill] sm:$0xff] }
 0x460   :  { %v3541_v56 = vadd.f32 %v9678_v21, %v3413_v2  ;;  %v3542_v39 = vadd.f32 %v9679_v32, %v3414_v27  ;;  %v8550_v61 = vadd.f32 %v3835_v3, %v3723_v49  ;;  %v9680_v50 = vld [vmem:[#allocation272_spill] sm:$0xff]  ;;  %v3148_v63 = vadd.f32 %v9682_v54, %v2964_v8  ;;  %v9686_v27 = vld [vmem:[#allocation93_spill] sm:$0xff]  ;;  %v9688_v34 = vld [vmem:[#allocation286_spill] sm:$0xff]  ;;  %v3839_v21 = vpop.permute.xlu1 %3838  ;;  %v3841_v32 = vpop.permute.xlu0 %3840 }
 0x461   :  { %v2876_v47 = vadd.f32 %v9680_v50, %v8471_v42  ;;  %v9683_v4 = vld [vmem:[#allocation128_spill] sm:$0xff]  ;;  %v3458_v49 = vadd.f32 %v9686_v27, %v3274_v25  ;;  %v9687_v46 = vld [vmem:[#allocation285_spill] sm:$0xff]  ;;  %v2966_v9 = vadd.f32 %v9688_v34, %v2838_v48  ;;  %v9689_v19 = vld [vmem:[#allocation298_spill] sm:$0xff] }
 0x462   :  { %4286 = vrot.lane.b32.xlu1 %v9683_v4, %s4770_s13  ;;  %v9685_v2 = vld [vmem:[#allocation92_spill] sm:$0xff]  ;;  %v3725_v10 = vadd.f32 %v8362_v30, %v3541_v56  ;;  %v3726_v35 = vadd.f32 %v8364_v58, %v3542_v39  ;;  %v2965_v42 = vadd.f32 %v9687_v46, %v2837_v43  ;;  %v3275_v8 = vadd.f32 %v9689_v19, %v3147_v29  ;;  %v9690_v3 = vld [vmem:[#allocation299_spill] sm:$0xff]  ;;  %v9693_v30 = vld [vmem:[#allocation273_spill] sm:$0xff] }
 0x463   :  { %4288 = vrot.lane.b32.xlu0 %v9684_v22, %s4770_s13  ;;  %v3415_v41 = vadd.f32 %v9685_v2, %v3231_v57  ;;  %v3276_v23 = vadd.f32 %v9690_v3, %v3148_v63  ;;  %v9691_v50 = vld [vmem:[#allocation123_spill] sm:$0xff]  ;;  %v9692_v54 = vld [vmem:[#allocation124_spill] sm:$0xff]  ;;  %v2877_v58 = vadd.f32 %v9693_v30, %v8478_v6  ;;  %v9694_v43 = vld [vmem:[#allocation38_spill] sm:$0xff] }
 0x464   :  { %v3586_v57 = vadd.f32 %v9692_v54, %v3458_v49  ;;  %v8572_v4 = vadd.f32 %v3839_v21, %v3725_v10  ;;  %v8574_v25 = vadd.f32 %v3841_v32, %v3726_v35  ;;  %v3149_v56 = vadd.f32 %v9694_v43, %v2965_v42  ;;  %v9695_v48 = vld [vmem:[#allocation39_spill] sm:$0xff]  ;;  %v9696_v29 = vld [vmem:[#allocation122_spill] sm:$0xff]  ;;  %v9701_v46 = vld [vmem:[#allocation288_spill] sm:$0xff]  ;;  %v3843_v21 = vpop.permute.xlu1 %3842  ;;  %v3881_v32 = vpop.permute.xlu0 %3880 }
 0x465   :  { %v3543_v38 = vadd.f32 %v9691_v50, %v3415_v41  ;;  %v3150_v39 = vadd.f32 %v9695_v48, %v2966_v9  ;;  %v9697_v63 = vrot.slane %v9696_v29, 2  ;;  %v9698_v22 = vld [vmem:[#allocation94_spill] sm:$0xff]  ;;  %v9699_v41 = vld [vmem:[#allocation95_spill] sm:$0xff]  ;;  %v3004_v42 = vadd.f32 %v9701_v46, %v2876_v47  ;;  %v9703_v19 = vld [vmem:[#allocation68_spill] sm:$0xff] }
 0x466   :  { %v3459_v2 = vadd.f32 %v9698_v22, %v3275_v8  ;;  %v3460_v27 = vadd.f32 %v9699_v41, %v3276_v23  ;;  %v3770_v10 = vadd.f32 %v8391_v53, %v3586_v57  ;;  %v9700_v6 = vld [vmem:[#allocation287_spill] sm:$0xff]  ;;  %v9704_v50 = vld [vmem:[#allocation125_spill] sm:$0xff]  ;;  %v9705_v54 = vld [vmem:[#allocation126_spill] sm:$0xff]  ;;  %v9709_v43 = vrot.slane %v8080_v16, 2 }
 0x467   :  { %4290 = vrot.lane.b32.xlu1 %v9697_v63, %s4770_s13  ;;  %4328 = vrot.lane.b32.xlu0 %v8133_v15, %s4770_s13  ;;  %v3727_v49 = vadd.f32 %v8389_v13, %v3543_v38  ;;  %v2967_v35 = vadd.f32 %v9700_v6, %v2839_v52  ;;  %v9702_v34 = vld [vmem:[#allocation67_spill] sm:$0xff]  ;;  %v3278_v3 = vadd.f32 %v9703_v19, %v3150_v39  ;;  %v9706_v13 = vld [vmem:[#allocation274_spill] sm:$0xff]  ;;  %v9707_v52 = vld [vmem:[#allocation45_spill] sm:$0xff] }
 0x468   :  { %v3277_v9 = vadd.f32 %v9702_v34, %v3149_v56  ;;  %v3587_v15 = vadd.f32 %v9704_v50, %v3459_v2  ;;  %v3588_v8 = vadd.f32 %v9705_v54, %v3460_v27  ;;  %v8597_v23 = vadd.f32 %v3881_v32, %v3770_v10  ;;  %v9708_v47 = vld [vmem:[#allocation46_spill] sm:$0xff]  ;;  %v9710_v56 = vld [vmem:[#allocation96_spill] sm:$0xff]  ;;  %v9711_v39 = vld [vmem:[#allocation97_spill] sm:$0xff]  ;;  %v3885_v46 = vpop.permute.xlu0 %3884 }
 0x469   :  { %v8595_v30 = vadd.f32 %v3843_v21, %v3727_v49  ;;  %v2878_v53 = vadd.f32 %v9706_v13, %v8484_v60  ;;  %v3151_v38 = vadd.f32 %v9707_v52, %v2967_v35  ;;  %v3188_v57 = vadd.f32 %v9708_v47, %v3004_v42  ;;  %v9712_v60 = vld [vmem:[#allocation289_spill] sm:$0xff]  ;;  %v9713_v41 = vld [vmem:[#allocation290_spill] sm:$0xff]  ;;  %v9714_v49 = vld [vmem:[#allocation303_spill] sm:$0xff]  ;;  %v3883_v35 = vpop.permute.xlu1 %3882 }
 0x46a   :  { %v3461_v48 = vadd.f32 %v9710_v56, %v3277_v9  ;;  %v3462_v29 = vadd.f32 %v9711_v39, %v3278_v3  ;;  %v3771_v63 = vadd.f32 %v8417_v44, %v3587_v15  ;;  %v3772_v22 = vadd.f32 %v8419_v1, %v3588_v8  ;;  %v9715_v6 = vld [vmem:[#allocation304_spill] sm:$0xff]  ;;  %v9716_v16 = vld [vmem:[#allocation130_spill] sm:$0xff]  ;;  %v9717_v34 = vld [vmem:[#allocation131_spill] sm:$0xff] }
 0x46b   :  { %4330 = vrot.lane.b32.xlu1 %v8146_v24, %s4770_s13  ;;  %4332 = vrot.lane.b32.xlu0 %v9709_v43, %s4770_s13  ;;  %v3005_v2 = vadd.f32 %v9712_v60, %v2877_v58  ;;  %v3006_v27 = vadd.f32 %v9713_v41, %v2878_v53  ;;  %v3279_v10 = vadd.f32 %v9714_v49, %v3151_v38  ;;  %v9718_v44 = vld [vmem:[#allocation275_spill] sm:$0xff]  ;;  %v9719_v58 = vld [vmem:[#allocation48_spill] sm:$0xff]  ;;  %v9720_v32 = vld [vmem:[#allocation49_spill] sm:$0xff]  ;;  %v9730_v49 = vrot.slane %v8099_v37, 2 }
 0x46c   :  { %v3316_v24 = vadd.f32 %v9715_v6, %v3188_v57  ;;  %v3589_v42 = vadd.f32 %v9716_v16, %v3461_v48  ;;  %v3590_v9 = vadd.f32 %v9717_v34, %v3462_v29  ;;  %v8618_v19 = vadd.f32 %v3883_v35, %v3771_v63  ;;  %v9721_v15 = vld [vmem:[#allocation99_spill] sm:$0xff]  ;;  %v9722_v8 = vld [vmem:[#allocation100_spill] sm:$0xff]  ;;  %v3889_v29 = vpop.permute.xlu0 %3888 }
 0x46d   :  { %v8620_v3 = vadd.f32 %v3885_v46, %v3772_v22  ;;  %v2879_v1 = vadd.f32 %v9718_v44, %v8487_v62  ;;  %v3189_v21 = vadd.f32 %v9719_v58, %v3005_v2  ;;  %v3190_v50 = vadd.f32 %v9720_v32, %v3006_v27  ;;  %v9723_v62 = vld [vmem:[#allocation227_spill] sm:$0xff]  ;;  %v9726_v48 = vld [vmem:[#allocation72_spill] sm:$0xff]  ;;  %v3887_v39 = vpop.permute.xlu1 %3886  ;;  %v9734_v46 = vld [vmem:[#allocation254_spill] sm:$0xff] }
 0x46e   :  { %v3463_v54 = vadd.f32 %v9721_v15, %v3279_v10  ;;  %v3500_v13 = vadd.f32 %v9722_v8, %v3316_v24  ;;  %v3773_v53 = vadd.f32 %v8446_v0, %v3589_v42  ;;  %v3774_v52 = vadd.f32 %v8448_v5, %v3590_v9  ;;  %v9724_v47 = vld [vmem:[#allocation291_spill] sm:$0xff]  ;;  %v9727_v5 = vld [vmem:[#allocation228_spill] sm:$0xff]  ;;  %v9735_v42 = vld [vmem:[#allocation305_spill] sm:$0xff] }
 0x46f   :  { %4334 = vrot.lane.b32.xlu1 %v8154_v11, %s4770_s13  ;;  %4336 = vrot.lane.b32.xlu0 %v8159_v12, %s4770_s13  ;;  %v2278_v38 = vadd.f32 %v9723_v62, %v8337_v45  ;;  %v3007_v57 = vadd.f32 %v9724_v47, %v2879_v1  ;;  %v9725_v43 = vld [vmem:[#allocation71_spill] sm:$0xff]  ;;  %v3318_v11 = vadd.f32 %v9726_v48, %v3190_v50  ;;  %v9728_v45 = vld [vmem:[#allocation73_spill] sm:$0xff]  ;;  %v9729_v41 = vld [vmem:[#allocation52_spill] sm:$0xff] }
 0x470   :  { %v3317_v56 = vadd.f32 %v9725_v43, %v3189_v21  ;;  %v3591_v12 = vadd.f32 %v8139_v28, %v3463_v54  ;;  %v3628_v63 = vadd.f32 %v8141_v59, %v3500_v13  ;;  %v8641_v22 = vadd.f32 %v3887_v39, %v3773_v53  ;;  %v9731_v28 = vld [vmem:[#allocation102_spill] sm:$0xff]  ;;  %v9732_v10 = vld [vmem:[#allocation103_spill] sm:$0xff]  ;;  %v9733_v35 = vld [vmem:[#allocation208_spill] sm:$0xff]  ;;  %v3929_v1 = vpop.permute.xlu0 %3928 }
 0x471   :  { %v8643_v0 = vadd.f32 %v3889_v29, %v3774_v52  ;;  %v2279_v60 = vadd.f32 %v9727_v5, %v8342_v31  ;;  %v2458_v2 = vadd.f32 %v9728_v45, %v8427_v51  ;;  %v3191_v27 = vadd.f32 %v9729_v41, %v3007_v57  ;;  %v9736_v37 = vld [vmem:[#allocation76_spill] sm:$0xff]  ;;  %v3891_v44 = vpop.permute.xlu1 %3890  ;;  %v9737_v58 = vld [vmem:[#allocation134_spill] sm:$0xff]  ;;  %v9739_v50 = vld [vmem:[#allocation229_spill] sm:$0xff] }
 0x472   :  { %v3501_v59 = vadd.f32 %v9731_v28, %v3317_v56  ;;  %v3502_v6 = vadd.f32 %v9732_v10, %v3318_v11  ;;  %v3775_v24 = vadd.f32 %v8473_v55, %v3591_v12  ;;  %v3812_v31 = vadd.f32 %v8475_v26, %v3628_v63  ;;  %v9738_v26 = vld [vmem:[#allocation146_spill] sm:$0xff]  ;;  %v9741_v8 = vld [vmem:[#allocation69_spill] sm:$0xff]  ;;  %v9743_v52 = vld [vmem:[#allocation132_spill] sm:$0xff] }
 0x473   :  { %4338 = vrot.lane.b32.xlu1 %v9730_v49, %s4770_s13  ;;  %4240 = vrot.lane.b32.xlu0 %v8162_v40, %s4770_s13  ;;  %v2117_v51 = vadd.f32 %v9733_v35, %v8309_v36  ;;  %v2738_v16 = vadd.f32 %v9734_v46, %v2458_v2  ;;  %v2459_v34 = vadd.f32 %v9735_v42, %v2278_v38  ;;  %v9740_v36 = vld [vmem:[#allocation230_spill] sm:$0xff]  ;;  %v9742_v13 = vrot.slane %v9741_v8, 2  ;;  %v9744_v62 = vld [vmem:[#allocation133_spill] sm:$0xff]  ;;  %v9749_v29 = vld [vmem:[#allocation255_spill] sm:$0xff] }
 0x474   :  { %v3319_v9 = vadd.f32 %v9736_v37, %v3191_v27  ;;  %v3629_v40 = vadd.f32 %v8174_v14, %v3501_v59  ;;  %v3630_v21 = vadd.f32 %v9737_v58, %v3502_v6  ;;  %v8666_v32 = vadd.f32 %v3891_v44, %v3775_v24  ;;  %v9745_v14 = vld [vmem:[#allocation292_spill] sm:$0xff]  ;;  %v9746_v47 = vld [vmem:[#allocation106_spill] sm:$0xff]  ;;  %v9748_v11 = vld [vmem:[#allocation209_spill] sm:$0xff]  ;;  %v3933_v45 = vpop.permute.xlu0 %3932 }
 0x475   :  { %v8668_v55 = vadd.f32 %v3929_v1, %v3812_v31  ;;  %v2280_v15 = vadd.f32 %v9739_v50, %v9738_v26  ;;  %v2281_v54 = vadd.f32 %v9740_v36, %v2117_v51  ;;  %v2460_v53 = vadd.f32 %v9742_v13, %v2279_v60  ;;  %v9747_v48 = vld [vmem:[#allocation86_spill] sm:$0xff]  ;;  %v9750_v63 = vld [vmem:[#allocation256_spill] sm:$0xff]  ;;  %v3931_v60 = vpop.permute.xlu1 %3930  ;;  %v9752_v27 = vld [vmem:[#allocation77_spill] sm:$0xff] }
 0x476   :  { %v3050_v38 = vadd.f32 %v9745_v14, %v2738_v16  ;;  %v3503_v57 = vadd.f32 %v9746_v47, %v3319_v9  ;;  %v3813_v43 = vadd.f32 %v8502_v20, %v3629_v40  ;;  %v3814_v56 = vadd.f32 %v8504_v17, %v3630_v21  ;;  %v9751_v2 = vld [vmem:[#allocation306_spill] sm:$0xff]  ;;  %v9753_v28 = vld [vmem:[#allocation139_spill] sm:$0xff]  ;;  %v9758_v16 = vld [vmem:[#allocation137_spill] sm:$0xff] }
 0x477   :  { %4242 = vrot.lane.b32.xlu1 %v9743_v52, %s4770_s13  ;;  %4244 = vrot.lane.b32.xlu0 %v9744_v62, %s4770_s13  ;;  %v2118_v39 = vadd.f32 %v9748_v11, %v9747_v48  ;;  %v2739_v12 = vadd.f32 %v9749_v29, %v2459_v34  ;;  %v2740_v5 = vadd.f32 %v9750_v63, %v2460_v53  ;;  %v4420_v41 = vrot.slane %v9751_v2, 6  ;;  %v9754_v17 = vld [vmem:[#allocation231_spill] sm:$0xff]  ;;  %v9755_v24 = vld [vmem:[#allocation74_spill] sm:$0xff]  ;;  %v9759_v42 = vld [vmem:[#allocation136_spill] sm:$0xff] }
 0x478   :  { %v3362_v49 = vadd.f32 %v9752_v27, %v3050_v38  ;;  %v3631_v59 = vadd.f32 %v9753_v28, %v3503_v57  ;;  %v8690_v10 = vadd.f32 %v3931_v60, %v3813_v43  ;;  %v8692_v20 = vadd.f32 %v3933_v45, %v3814_v56  ;;  %v9756_v35 = vld [vmem:[#allocation75_spill] sm:$0xff]  ;;  %v9760_v37 = vld [vmem:[#allocation16_spill] sm:$0xff]  ;;  %v9763_v26 = vld [vmem:[#allocation257_spill] sm:$0xff]  ;;  %v3969_v8 = vpop.permute.xlu0 %3968 }
 0x479   :  { %v2282_v6 = vadd.f32 %v9754_v17, %v2118_v39  ;;  %v2461_v31 = vadd.f32 %v9755_v24, %v2280_v15  ;;  %v2462_v51 = vadd.f32 %v9756_v35, %v2281_v54  ;;  %v9757_v46 = vld [vmem:[#allocation135_spill] sm:$0xff]  ;;  %v4419_v34 = vrot.slane %v9759_v42, 6  ;;  %v9762_v40 = vld [vmem:[#allocation140_spill] sm:$0xff]  ;;  %v9764_v15 = vld [vmem:[#allocation258_spill] sm:$0xff]  ;;  %v3935_v54 = vpop.permute.xlu1 %3934 }
 0x47a   :  { %v3051_v9 = vadd.f32 %v9760_v37, %v2739_v12  ;;  %v9761_v44 = vld [vmem:[#allocation15_spill] sm:$0xff]  ;;  %v3674_v58 = vadd.f32 %v9762_v40, %v3362_v49  ;;  %v3815_v21 = vadd.f32 %v8525_v33, %v3631_v59  ;;  %v9766_v62 = vld [vmem:[#allocation78_spill] sm:$0xff]  ;;  %v9771_v39 = vld [vmem:[#allocation17_spill] sm:$0xff] }
 0x47b   :  { %4246 = vrot.lane.b32.xlu1 %v9757_v46, %s4770_s13  ;;  %4424 = vrot.lane.b32.xlu0 %v9758_v16, %s4770_s13  ;;  %v3052_v1 = vadd.f32 %v9761_v44, %v2740_v5  ;;  %v2741_v50 = vadd.f32 %v9763_v26, %v2461_v31  ;;  %v2742_v36 = vadd.f32 %v9764_v15, %v2462_v51  ;;  %v9765_v53 = vld [vmem:[#allocation307_spill] sm:$0xff]  ;;  %v9768_v56 = vld [vmem:[#allocation302_spill] sm:$0xff]  ;;  %v9773_v5 = vld [vmem:[#allocation141_spill] sm:$0xff] }
 0x47c   :  { %v4421_v13 = vsel %vm156_vm5, %v4419_v34, %v4420_v41  ;;  %v4422_v52 = vrot.slane %v9765_v53, 6  ;;  %v3363_v14 = vadd.f32 %v9766_v62, %v3051_v9  ;;  %v9767_v38 = vld [vmem:[#allocation79_spill] sm:$0xff]  ;;  %v8712_v57 = vadd.f32 %v3935_v54, %v3815_v21  ;;  %v9770_v11 = vld [vmem:[#allocation138_spill] sm:$0xff]  ;;  %v3973_v59 = vpop.permute.xlu0 %3972  ;;  %v9777_v31 = vld [vmem:[#allocation81_spill] sm:$0xff] }
 0x47d   :  { %v3364_v47 = vadd.f32 %v9767_v38, %v3052_v1  ;;  %v8714_v43 = vadd.f32 %v3969_v8, %v3674_v58  ;;  %v9769_v33 = vrot.slane %v9768_v56, 2  ;;  %v3053_v29 = vadd.f32 %v9771_v39, %v2741_v50  ;;  %v9772_v12 = vld [vmem:[#allocation18_spill] sm:$0xff]  ;;  %v9775_v27 = vld [vmem:[#allocation259_spill] sm:$0xff]  ;;  %v3971_v28 = vpop.permute.xlu1 %3970  ;;  %v9778_v16 = vld [vmem:[#allocation20_spill] sm:$0xff] }
 0x47e   :  { %v3054_v63 = vadd.f32 %v9772_v12, %v2742_v36  ;;  %v3675_v60 = vadd.f32 %v9773_v5, %v3363_v14  ;;  %v9774_v45 = vld [vmem:[#allocation142_spill] sm:$0xff]  ;;  %v4423_v17 = vsel %vm156_vm5, %v4420_v41, %v4422_v52  ;;  %v9779_v34 = vld [vmem:[#allocation143_spill] sm:$0xff]  ;;  %v9780_v9 = vld [vmem:[#allocation144_spill] sm:$0xff] }
 0x47f   :  { %v2463_v48 = vadd.f32 %v9769_v33, %v2282_v6  ;;  %4426 = vrot.lane.b32.xlu1 %v9770_v11, %s4770_s13  ;;  %4428 = vrot.lane.b32.xlu0 %v4421_v13, %s4770_s13  ;;  %v3676_v2 = vadd.f32 %v9774_v45, %v3364_v47  ;;  %v9776_v6 = vld [vmem:[#allocation80_spill] sm:$0xff]  ;;  %v9781_v58 = vld [vmem:[#allocation82_spill] sm:$0xff]  ;;  %v9782_v50 = vld [vmem:[#allocation145_spill] sm:$0xff] }
 0x480   :  { %v3365_v24 = vadd.f32 %v9776_v6, %v3053_v29  ;;  %v3366_v35 = vadd.f32 %v9777_v31, %v3054_v63  ;;  %v8729_v51 = vadd.f32 %v3971_v28, %v3675_v60  ;;  %v3977_v40 = vpop.permute.xlu0 %3976 }
 0x481   :  { %v2743_v49 = vadd.f32 %v9775_v27, %v2463_v48  ;;  %v8731_v46 = vadd.f32 %v3973_v59, %v3676_v2  ;;  %v3975_v1 = vpop.permute.xlu1 %3974 }
 0x482   :  { %v3677_v37 = vadd.f32 %v9779_v34, %v3365_v24  ;;  %v3678_v44 = vadd.f32 %v9780_v9, %v3366_v35 }
 0x483   :  { %4430 = vrot.lane.b32.xlu1 %v4423_v17, %s4770_s13  ;;  %v3055_v42 = vadd.f32 %v9778_v16, %v2743_v49  ;;  %s4550_s13 = sshll.u32 %s4771_s4, 4  ;;  %s4551_s13 = int_to_ptr.vmem [resolvable:$true] %s4550_s13 }
 0x484   :  { %v8738_v21 = vadd.f32 %v3975_v1, %v3677_v37  ;;  %v8740_v26 = vadd.f32 %v3977_v40, %v3678_v44  ;;  %v4017_v54 = vpop.permute.xlu0 %4016  ;;  %s4729_s28 = scalar_lea.vmem %s4551_s13, 512  ;;  %p4734_p11 = scmp.lt.s32.totalorder %s4551_s13, %s4551_s13 }
 0x485   :  { %v3367_v41 = vadd.f32 %v9781_v58, %v3055_v42  ;;  %v3979_v36 = vpop.permute.xlu1 %3978  ;;  %v8746_v13 = vadd.f32 %v4017_v54, %v8530_v7  ;;  %p4730_p10 = scmp.ne.s32.totalorder %s4551_s13, %s4729_s28  ;;  %p4735_p12 = scmp.lt.s32.totalorder %s4729_s28, %s4729_s28 }
 0x487   :  { %v3679_v15 = vadd.f32 %v9782_v50, %v3367_v41  ;;  %p4736_p13 = por %p4735_p12, %p4734_p11 }
 0x488   :  { %v4067_v52 = vpop.permute.xlu0 %4066 }
 0x489   :  { %v8743_v8 = vadd.f32 %v3979_v36, %v3679_v15  ;;  %v4065_v53 = vpop.permute.xlu1 %4064  ;;  %v4083_v14 = vadd.f32 %v4067_v52, %v8618_v19  ;;  %p4737_p0 = pnand %p4736_p13, %p4730_p10 }
 0x48a   :  { %v4082_v62 = vadd.f32 %v4065_v53, %v8597_v23 }
 0x48c   :  { %v4071_v47 = vpop.permute.xlu0 %4070 }
 0x48d   :  { %v4069_v38 = vpop.permute.xlu1 %4068  ;;  %v4085_v33 = vadd.f32 %v4071_v47, %v8641_v22 }
 0x48e   :  { %v4084_v56 = vadd.f32 %v4069_v38, %v8620_v3 }
 0x490   :  { %v4075_v11 = vpop.permute.xlu0 %4074 }
 0x491   :  { %v4073_v48 = vpop.permute.xlu1 %4072  ;;  %v4087_v29 = vadd.f32 %v4075_v11, %v8666_v32 }
 0x492   :  { %v4086_v39 = vadd.f32 %v4073_v48, %v8643_v0 }
 0x494   :  { %v4195_v12 = vpop.permute.xlu0 %4194 }
 0x495   :  { %v4193_v7 = vpop.permute.xlu1 %4192  ;;  %v4211_v5 = vadd.f32 %v4195_v12, %v4083_v14 }
 0x496   :  { %v4210_v63 = vadd.f32 %v4193_v7, %v4082_v62 }
 0x498   :  { %v4199_v23 = vpop.permute.xlu0 %4198 }
 0x499   :  { %v4197_v60 = vpop.permute.xlu1 %4196  ;;  %v4213_v19 = vadd.f32 %v4199_v23, %v4085_v33 }
 0x49a   :  { %v4212_v45 = vadd.f32 %v4197_v60, %v4084_v56 }
 0x49c   :  { %v4203_v27 = vpop.permute.xlu0 %4202 }
 0x49d   :  { %v4201_v2 = vpop.permute.xlu1 %4200  ;;  %v4215_v3 = vadd.f32 %v4203_v27, %v4087_v29 }
 0x49e   :  { %v4214_v49 = vadd.f32 %v4201_v2, %v4086_v39 }
 0x4a0   :  { %v4021_v22 = vpop.permute.xlu0 %4020 }
 0x4a1   :  { %v4019_v28 = vpop.permute.xlu1 %4018  ;;  %v8758_v0 = vadd.f32 %v4021_v22, %v8552_v18 }
 0x4a2   :  { %v8755_v59 = vadd.f32 %v4019_v28, %v8550_v61 }
 0x4a4   :  { %v4025_v17 = vpop.permute.xlu0 %4024 }
 0x4a5   :  { %v4023_v32 = vpop.permute.xlu1 %4022  ;;  %v8764_v24 = vadd.f32 %v4025_v17, %v8574_v25 }
 0x4a6   :  { %v8761_v6 = vadd.f32 %v4023_v32, %v8572_v4 }
 0x4a8   :  { %v4377_v35 = vpop.permute.xlu0 %4376 }
 0x4a9   :  { %v4027_v31 = vpop.permute.xlu1 %4026  ;;  %v4394_v42 = vadd.f32 %v4377_v35, %v4210_v63 }
 0x4aa   :  { %v8767_v16 = vadd.f32 %v4027_v31, %v8595_v30 }
 0x4ab   :  { %v4471_v18 = vrot.slane %v4394_v42, 1 }
 0x4ac   :  { %v4381_v61 = vpop.permute.xlu0 %4380 }
 0x4ad   :  { %v4379_v34 = vpop.permute.xlu1 %4378  ;;  %v8769_v9 = vadd.f32 %v4381_v61, %v4212_v45 }
 0x4ae   :  { %v4395_v37 = vadd.f32 %v4379_v34, %v4211_v5 }
 0x4af   :  { %v4474_v4 = vrot.slane %v8769_v9, 1 }
 0x4b0   :  { %v4472_v44 = vrot.slane %v4395_v37, 1  ;;  %v4385_v40 = vpop.permute.xlu0 %4384 }
 0x4b1   :  { %v4383_v1 = vpop.permute.xlu1 %4382  ;;  %v4398_v58 = vadd.f32 %v4385_v40, %v4214_v49 }
 0x4b2   :  { %v4397_v25 = vadd.f32 %v4383_v1, %v4213_v19  ;;  %v4473_v41 = vsel %vm4446_vm13, %v4471_v18, %v4472_v44  ;;  %v4475_v30 = vsel %vm4446_vm13, %v4472_v44, %v4474_v4 }
 0x4b3   :  { %v4477_v15 = vrot.slane %v4398_v58, 1 }
 0x4b4   :  { %v4476_v50 = vrot.slane %v4397_v25, 1  ;;  %v4145_v54 = vpop.permute.xlu0 %4144 }
 0x4b5   :  { %v4387_v36 = vpop.permute.xlu1 %4386 }
 0x4b6   :  { %v8774_v53 = vadd.f32 %v4387_v36, %v4215_v3  ;;  %v4478_v52 = vsel %vm4446_vm13, %v4476_v50, %v4477_v15 }
 0x4b8   :  { %v4479_v62 = vrot.slane %v8774_v53, 1  ;;  %v4149_v38 = vpop.permute.xlu0 %4148 }
 0x4b9   :  { %v4147_v14 = vpop.permute.xlu1 %4146 }
 0x4ba   :  { %v4480_v47 = vsel %vm4446_vm13, %v4477_v15, %v4479_v62 }
 0x4bc   :  { %v4153_v33 = vpop.permute.xlu0 %4152 }
 0x4bd   :  { %v4151_v56 = vpop.permute.xlu1 %4150  ;;  %v4166_v58 = vadd.f32 %v4153_v33, %v8764_v24 }
 0x4be   :  { %v4165_v25 = vadd.f32 %v4151_v56, %v8761_v6 }
 0x4c0   :  { %v4113_v11 = vpop.permute.xlu0 %4112 }
 0x4c2   :  { %v4155_v48 = vpop.permute.xlu1 %4154 }
 0x4c4   :  { %v8783_v29 = vpop.permute.xlu0 %4116 }
 0x4c6   :  { %v8781_v39 = vpop.permute.xlu1 %4114 }
 0x4c8   :  { %v4281_v12 = vpop.permute.xlu0 %4280 }
 0x4c9   :  { %v4298_v63 = vadd.f32 %v4281_v12, %v8714_v43  ;;  %v4162_v43 = vadd.f32 %v4145_v54, %v8746_v13 }
 0x4ca   :  { %v8785_v7 = vpop.permute.xlu1 %4118 }
 0x4cb   :  { %v4447_v19 = vrot.slane %v4298_v63, 1 }
 0x4ce   :  { %v4283_v5 = vpop.permute.xlu1 %4282 }
 0x4cf   :  { %v4299_v23 = vadd.f32 %v4283_v5, %v8729_v51 }
 0x4d1   :  { %v4285_v60 = vpop.permute.xlu0 %4284  ;;  %v4448_v2 = vrot.slane %v4299_v23, 1 }
 0x4d2   :  { %v4300_v45 = vadd.f32 %v4285_v60, %v8731_v46 }
 0x4d3   :  { %v4449_v32 = vsel %vm4446_vm13, %v4447_v19, %v4448_v2 }
 0x4d4   :  { %v4450_v27 = vrot.slane %v4300_v45, 1  ;;  %v4287_v49 = vpop.permute.xlu1 %4286 }
 0x4d5   :  { %v4289_v3 = vpop.permute.xlu0 %4288  ;;  %v4301_v28 = vadd.f32 %v4287_v49, %v8738_v21  ;;  %v4163_v21 = vadd.f32 %v4147_v14, %v8755_v59  ;;  %v4125_v49 = vadd.f32 %v8781_v39, %v8690_v10 }
 0x4d6   :  { %v4302_v22 = vadd.f32 %v4289_v3, %v8740_v26  ;;  %v8794_v17 = vsel %vm4446_vm13, %v4448_v2, %v4450_v27  ;;  %v4164_v26 = vadd.f32 %v4149_v38, %v8758_v0  ;;  %v4126_v3 = vadd.f32 %v8783_v29, %v8692_v20 }
 0x4d7   :  { %v4452_v31 = vrot.slane %v4301_v28, 1 }
 0x4d8   :  { %v4453_v51 = vrot.slane %v4302_v22, 1 }
 0x4d9   :  { %v4291_v35 = vpop.permute.xlu1 %4290  ;;  %v4329_v46 = vpop.permute.xlu0 %4328 }
 0x4da   :  { %v4303_v42 = vadd.f32 %v4291_v35, %v8743_v8  ;;  %v4346_v34 = vadd.f32 %v4329_v46, %v4162_v43  ;;  %v4454_v61 = vsel %vm4446_vm13, %v4452_v31, %v4453_v51 }
 0x4dc   :  { %v4455_v37 = vrot.slane %v4303_v42, 1  ;;  %v4487_v9 = vadd.f32 %v4473_v41, %v4346_v34  ;;  %v4167_v41 = vadd.f32 %v4155_v48, %v8767_v16  ;;  %v4124_v16 = vadd.f32 %v4113_v11, %v8668_v55 }
 0x4dd   :  { %v4331_v18 = vpop.permute.xlu1 %4330  ;;  %v4333_v44 = vpop.permute.xlu0 %4332  ;;  %v4127_v55 = vadd.f32 %v8785_v7, %v8712_v57 }
 0x4de   :  { %v4347_v1 = vadd.f32 %v4331_v18, %v4163_v21  ;;  %v4348_v40 = vadd.f32 %v4333_v44, %v4164_v26  ;;  %v4456_v13 = vsel %vm4446_vm13, %v4453_v51, %v4455_v37  ;;  %v4499_v15 = vrot.slane %v4487_v9, 2 }
 0x4e0   :  { %v4488_v8 = vadd.f32 %v4475_v30, %v4347_v1  ;;  %v4489_v50 = vadd.f32 %v4474_v4, %v4348_v40 }
 0x4e1   :  { %v4335_v36 = vpop.permute.xlu1 %4334  ;;  %v4337_v54 = vpop.permute.xlu0 %4336 }
 0x4e2   :  { %v4500_v59 = vrot.slane %v4488_v8, 2  ;;  %v4502_v14 = vrot.slane %v4489_v50, 2  ;;  %v4349_v0 = vadd.f32 %v4335_v36, %v4165_v25  ;;  %v4350_v38 = vadd.f32 %v4337_v54, %v4166_v58 }
 0x4e4   :  { %v4490_v12 = vadd.f32 %v4478_v52, %v4349_v0  ;;  %v4491_v63 = vadd.f32 %v4480_v47, %v4350_v38  ;;  %v4501_v5 = vsel %vm2409_vm12, %v4499_v15, %v4500_v59  ;;  %v4503_v60 = vsel %vm2409_vm12, %v4500_v59, %v4502_v14 }
 0x4e5   :  { %v4339_v6 = vpop.permute.xlu1 %4338  ;;  %v4241_v56 = vpop.permute.xlu0 %4240 }
 0x4e6   :  { %v4504_v24 = vrot.slane %v4490_v12, 2  ;;  %v4505_v30 = vrot.slane %v4491_v63, 2  ;;  %v4351_v4 = vadd.f32 %v4339_v6, %v4167_v41  ;;  %v4252_v47 = vadd.f32 %v4241_v56, %v4124_v16 }
 0x4e8   :  { %v4492_v33 = vadd.f32 %v4479_v62, %v4351_v4  ;;  %v4506_v23 = vsel %vm2409_vm12, %v4504_v24, %v4505_v30 }
 0x4e9   :  { %v4243_v45 = vpop.permute.xlu1 %4242  ;;  %v4245_v19 = vpop.permute.xlu0 %4244 }
 0x4ea   :  { %v4507_v52 = vrot.slane %v4492_v33, 2  ;;  %v4253_v62 = vadd.f32 %v4243_v45, %v4125_v49  ;;  %v4254_v28 = vadd.f32 %v4245_v19, %v4126_v3 }
 0x4ec   :  { %v4508_v48 = vsel %vm2409_vm12, %v4505_v30, %v4507_v52 }
 0x4ed   :  { %v4247_v2 = vpop.permute.xlu1 %4246  ;;  %v4425_v27 = vpop.permute.xlu0 %4424 }
 0x4ee   :  { %v4436_v53 = vadd.f32 %v4425_v27, %v4252_v47  ;;  %v4255_v46 = vadd.f32 %v4247_v2, %v4127_v55 }
 0x4f0   :  { %v4461_v22 = vadd.f32 %v4449_v32, %v4436_v53 }
 0x4f1   :  { %v4427_v43 = vpop.permute.xlu1 %4426  ;;  %v4429_v31 = vpop.permute.xlu0 %4428 }
 0x4f2   :  { %v4513_v11 = vadd.f32 %v4501_v5, %v4461_v22  ;;  %v4437_v51 = vadd.f32 %v4427_v43, %v4253_v62  ;;  %v4438_v35 = vadd.f32 %v4429_v31, %v4254_v28 }
 0x4f4   :  { %v4660_v42 = vmul.f32 -1.442695, %v4513_v11  ;;  %v4462_v34 = vadd.f32 %v8794_v17, %v4437_v51  ;;  %v4463_v10 = vadd.f32 %v4454_v61, %v4438_v35 }
 0x4f5   :  { %v4431_v39 = vpop.permute.xlu1 %4430 }
 0x4f6   :  { %4681 = vpow2.f32 %v4660_v42  ;;  %v4514_v20 = vadd.f32 %v4503_v60, %v4462_v34  ;;  %v4515_v29 = vadd.f32 %v4506_v23, %v4463_v10  ;;  %v4439_v21 = vadd.f32 %v4431_v39, %v4255_v46 }
 0x4f8   :  { %v4661_v26 = vmul.f32 -1.442695, %v4514_v20  ;;  %v4662_v32 = vmul.f32 -1.442695, %v4515_v29  ;;  %v4464_v37 = vadd.f32 %v4456_v13, %v4439_v21 }
 0x4fa   :  { %4683 = vpow2.f32 %v4661_v26  ;;  %v4516_v9 = vadd.f32 %v4508_v48, %v4464_v37 }
 0x4fb   :  { %4685 = vpow2.f32 %v4662_v32 }
 0x4fc   :  { %v4663_v57 = vmul.f32 -1.442695, %v4516_v9 }
 0x4fe   :  { %4687 = vpow2.f32 %v4663_v57 }
 0x503   :  { %v4682_v7 = vpop.eup %4681 }
 0x504   :  { %v4529_v18 = vadd.f32 1.0, %v4682_v7 }
 0x506   :  { %4689 = vrcp.f32 %v4529_v18 }
 0x507   :  { %v4684_v44 = vpop.eup %4683 }
 0x508   :  { %v4686_v1 = vpop.eup %4685  ;;  %v4530_v17 = vadd.f32 1.0, %v4684_v44 }
 0x509   :  { %v4531_v61 = vadd.f32 1.0, %v4686_v1 }
 0x50a   :  { %4691 = vrcp.f32 %v4530_v17 }
 0x50b   :  { %v4688_v40 = vpop.eup %4687  ;;  %4693 = vrcp.f32 %v4531_v61 }
 0x50c   :  { %v4532_v25 = vadd.f32 1.0, %v4688_v40 }
 0x50e   :  { %4695 = vrcp.f32 %v4532_v25 }
 0x513   :  { %v4690_v58 = vpop.eup %4689 }
 0x514   :  { %4541 = vst.msk [vmem:[#allocation7] sm:$0xff] %vm55_vm0, %v4690_v58 }
 0x517   :  { %v4692_v13 = vpop.eup %4691 }
 0x518   :  { %v4694_v8 = vpop.eup %4693  ;;  %4542 = vst.msk [vmem:[#allocation7 + $0x8] sm:$0xff] %vm55_vm0, %v4692_v13 }
 0x519   :  { %4543 = vst.msk [vmem:[#allocation7 + $0x10] sm:$0xff] %vm55_vm0, %v4694_v8 }
 0x51b   :  { %v4696_v50 = vpop.eup %4695 }
 0x51c   :  { %4544 = vst.msk [vmem:[#allocation7 + $0x18] sm:$0xff] %vm55_vm0, %v4696_v50 }
 0x51d   :  { %4740 = shalt.err (!%p4737_p0)
}
 0x51e   :  { %4556 = dma.vmem_to_hbm [thread:$0]  %s4551_s13, 512, %s8831_s2, [#allocation4], %s4756_s15, %s4756_s15, %s4757_s16  }
 0x51f   :  { %4753 = dma.done.wait [#allocation4], 512  }
 0x520   :  { %4754 = vsyncadd [#allocation4], 4294966784 }
 0x521   :  { %4560 = vsyncpa [#allocation3], 1 }
 0x522   :  { %4561 = vsyncpa [#allocation4], 1 }
 0x523   :  { %4562 = vsyncpa [#allocation5], 1 }

</bundles_post_ra>
